<compile_context>
chip_gen: v5e
topology: v5e:2x2
jax: 0.10.0
libtpu: 0.0.40
codegen_flags: <defaults>
</compile_context>

<pallas_src>
import functools

import jax
import jax.numpy as jnp
from jax.experimental import pallas as pl
from jax.experimental.pallas import tpu as pltpu

NHEAD = 4
LN_EPS = 1e-5


def _layer_norm(x, gamma, beta):
    mu = jnp.mean(x, axis=-1, keepdims=True)
    xc = x - mu
    var = jnp.mean(xc * xc, axis=-1, keepdims=True)
    return xc * jax.lax.rsqrt(var + LN_EPS) * gamma + beta


def fused_decoder_kernel(
    tgt_ref, mem_ref,
    sa_wqkv_ref, sa_bqkv_ref, sa_wo_ref,
    ca_wq_ref, ca_bq_ref, ca_wkv_ref, ca_bkv_ref, ca_wo_ref,
    ff_w1_ref, ff_b1_ref, ff_w2_ref, vecs_ref,
    out_ref,
    *, num_layers, nhead,
):
    f32 = jnp.float32
    bf16 = jnp.bfloat16

    q_len, d = tgt_ref.shape
    dim_ff = ff_w1_ref.shape[1]
    hd = d // nhead
    scale = 1.0 / float(hd) ** 0.5

    tgt0 = tgt_ref[...].astype(f32)

    # ---------- hoisted, layer-invariant work (runs once, outside the loop) ----------
    # Pre-broadcast every bias / LN vector to activation shape once: JAX does not CSE
    # broadcast_in_dim, so implicit [1,D]->[Q,D] broadcasts inside the 8x-unrolled body
    # would replay ~30 sublane broadcasts per layer.
    def bvec(i):
        return jnp.broadcast_to(vecs_ref[i:i + 1, :], (q_len, d))

    sa_bo, ca_bo, ff_b2 = bvec(0), bvec(1), bvec(2)
    ln1_g, ln1_b = bvec(3), bvec(4)
    ln2_g, ln2_b = bvec(5), bvec(6)
    ln3_g, ln3_b = bvec(7), bvec(8)
    sa_bqkv = jnp.broadcast_to(sa_bqkv_ref[...], (q_len, 3 * d))
    ca_bq = jnp.broadcast_to(ca_bq_ref[...], (q_len, d))
    ff_b1 = jnp.broadcast_to(ff_b1_ref[...], (q_len, dim_ff))

    # Cross-attention K/V depend only on q_feat and the (shared) layer weights:
    # one fused [K,D]@[D,2D] projection, kept live as bf16 (only used as MXU operands).
    mem16 = mem_ref[...].astype(bf16)
    ca_kv = jnp.dot(mem16, ca_wkv_ref[...], preferred_element_type=f32) + ca_bkv_ref[...]
    ca_kv16 = ca_kv.astype(bf16)
    ca_k = ca_kv16[:, :d]
    ca_v = ca_kv16[:, d:]

    def attention(q16, k16, v16, wo16, bo):
        # q16: [Q, D] bf16 (heads along lanes); k16/v16: [L, D] bf16; wo16: [D, D] bf16.
        # Per-head score and p@v matmuls stay tiny; the softmax is batched by stacking
        # the nhead score blocks along sublanes -> ONE max/exp/sum/reciprocal.
        s_parts = [
            jax.lax.dot_general(                       # q_h @ k_h.T without a transpose
                q16[:, h * hd:(h + 1) * hd], k16[:, h * hd:(h + 1) * hd],
                (((1,), (1,)), ((), ())), preferred_element_type=f32)
            for h in range(nhead)]
        s = jnp.concatenate(s_parts, axis=0) * scale   # [nhead*Q, L]
        s = s - jnp.max(s, axis=-1, keepdims=True)
        p = jnp.exp(s)
        p = p * pl.reciprocal(jnp.sum(p, axis=-1, keepdims=True))   # exact reciprocal
        p16 = p.astype(bf16)
        o_parts = [
            jnp.dot(p16[h * q_len:(h + 1) * q_len, :],  # sublane-tile-aligned slices
                    v16[:, h * hd:(h + 1) * hd],
                    preferred_element_type=f32)
            for h in range(nhead)]
        o16 = jnp.concatenate(o_parts, axis=-1).astype(bf16)  # concat heads -> one Wo
        return jnp.dot(o16, wo16, preferred_element_type=f32) + bo

    def one_layer(x):
        # Weights are re-read from VMEM refs at point of use (vld slots are cheap and
        # easily hidden) rather than hoisted into long-lived vregs around the loop.
        # --- self-attention: one fused x@[D,3D] QKV projection ---
        qkv = jnp.dot(x.astype(bf16), sa_wqkv_ref[...],
                      preferred_element_type=f32) + sa_bqkv
        qkv16 = qkv.astype(bf16)
        sa = attention(qkv16[:, :d], qkv16[:, d:2 * d], qkv16[:, 2 * d:],
                       sa_wo_ref[...], sa_bo)
        x = _layer_norm(x + sa, ln1_g, ln1_b)
        # --- cross-attention (memory = q_feat; K/V hoisted outside the loop) ---
        cq = jnp.dot(x.astype(bf16), ca_wq_ref[...],
                     preferred_element_type=f32) + ca_bq
        ca = attention(cq.astype(bf16), ca_k, ca_v, ca_wo_ref[...], ca_bo)
        x = _layer_norm(x + ca, ln2_g, ln2_b)
        # --- feed-forward (ReLU) ---
        hidden = jnp.maximum(
            jnp.dot(x.astype(bf16), ff_w1_ref[...], preferred_element_type=f32) + ff_b1,
            0.0)
        ff = jnp.dot(hidden.astype(bf16), ff_w2_ref[...],
                     preferred_element_type=f32) + ff_b2
        return _layer_norm(x + ff, ln3_g, ln3_b)

    # Fully unrolled (num_layers is static): gives the LLO scheduler cross-layer
    # visibility so MXU pushes, EUP exp/rsqrt and XLU reductions can co-issue.
    out = jax.lax.fori_loop(0, num_layers, lambda i, x: one_layer(x), tgt0, unroll=True)
    out_ref[...] = out.astype(out_ref.dtype)


@functools.partial(jax.jit, static_argnames=("num_layers", "nhead"))
def tmatcher_decoder(grouping_region, q_feat, packed_params, num_layers=8, nhead=NHEAD):
    """Full num_layers decoder stack in a single Pallas kernel (weights resident in VMEM)."""
    assert grouping_region.shape[-1] % nhead == 0
    inputs = (grouping_region, q_feat) + tuple(packed_params)
    kernel = functools.partial(fused_decoder_kernel, num_layers=num_layers, nhead=nhead)
    return pl.pallas_call(
        kernel,
        out_shape=jax.ShapeDtypeStruct(grouping_region.shape, grouping_region.dtype),
        in_specs=[pl.BlockSpec(memory_space=pltpu.MemorySpace.VMEM)] * len(inputs),
        out_specs=pl.BlockSpec(memory_space=pltpu.MemorySpace.VMEM),
        compiler_params=pltpu.CompilerParams(vmem_limit_bytes=8 << 20),
    )(*inputs)


# ----------------------------- parameters ----------------------------------


def init_raw_params(key, d_model, dim_ff):
    """Deterministic synthetic parameters for ONE decoder layer (shared by all layers)."""
    keys = jax.random.split(key, 24)
    s = 1.0 / d_model ** 0.5

    def n(k, shape, sc):
        return jax.random.normal(k, shape, jnp.float32) * sc

    return dict(
        sa_wq=n(keys[0], (d_model, d_model), s),
        sa_wk=n(keys[1], (d_model, d_model), s),
        sa_wv=n(keys[2], (d_model, d_model), s),
        sa_wo=n(keys[3], (d_model, d_model), s),
        sa_bq=n(keys[4], (d_model,), 0.05),
        sa_bk=n(keys[5], (d_model,), 0.05),
        sa_bv=n(keys[6], (d_model,), 0.05),
        sa_bo=n(keys[7], (d_model,), 0.05),
        ca_wq=n(keys[8], (d_model, d_model), s),
        ca_wk=n(keys[9], (d_model, d_model), s),
        ca_wv=n(keys[10], (d_model, d_model), s),
        ca_wo=n(keys[11], (d_model, d_model), s),
        ca_bq=n(keys[12], (d_model,), 0.05),
        ca_bk=n(keys[13], (d_model,), 0.05),
        ca_bv=n(keys[14], (d_model,), 0.05),
        ca_bo=n(keys[15], (d_model,), 0.05),
        ff_w1=n(keys[16], (d_model, dim_ff), s),
        ff_b1=n(keys[17], (dim_ff,), 0.05),
        ff_w2=n(keys[18], (dim_ff, d_model), 1.0 / dim_ff ** 0.5),
        ff_b2=n(keys[19], (d_model,), 0.05),
        ln1_g=1.0 + n(keys[20], (d_model,), 0.05),
        ln1_b=n(keys[21], (d_model,), 0.05),
        ln2_g=1.0 + n(keys[22], (d_model,), 0.05),
        ln2_b=n(keys[23], (d_model,), 0.05),
        ln3_g=jnp.ones((d_model,), jnp.float32),
        ln3_b=jnp.zeros((d_model,), jnp.float32),
    )


def pack_params(raw):
    """Host-side packing: fused full-width bf16 matmul weights + one [9, D] f32 vector table."""
    d = raw["sa_wq"].shape[0]
    bf16 = jnp.bfloat16
    sa_wqkv = jnp.concatenate([raw["sa_wq"], raw["sa_wk"], raw["sa_wv"]], axis=1).astype(bf16)
    sa_bqkv = jnp.concatenate([raw["sa_bq"], raw["sa_bk"], raw["sa_bv"]]).reshape(1, 3 * d)
    ca_wkv = jnp.concatenate([raw["ca_wk"], raw["ca_wv"]], axis=1).astype(bf16)
    ca_bkv = jnp.concatenate([raw["ca_bk"], raw["ca_bv"]]).reshape(1, 2 * d)
    vecs = jnp.stack([raw["sa_bo"], raw["ca_bo"], raw["ff_b2"],
                      raw["ln1_g"], raw["ln1_b"],
                      raw["ln2_g"], raw["ln2_b"],
                      raw["ln3_g"], raw["ln3_b"]])
    return (sa_wqkv, sa_bqkv, raw["sa_wo"].astype(bf16),
            raw["ca_wq"].astype(bf16), raw["ca_bq"].reshape(1, d),
            ca_wkv, ca_bkv, raw["ca_wo"].astype(bf16),
            raw["ff_w1"].astype(bf16), raw["ff_b1"].reshape(1, -1),
            raw["ff_w2"].astype(bf16), vecs)


# ------------------------- pure-JAX f32 reference ---------------------------


def _ref_mha(q_in, kv_in, wq, wk, wv, wo, bq, bk, bv, bo, nhead):
    d = q_in.shape[-1]
    hd = d // nhead
    q = q_in @ wq + bq
    k = kv_in @ wk + bk
    v = kv_in @ wv + bv
    heads = []
    for h in range(nhead):
        qh = q[:, h * hd:(h + 1) * hd]
        kh = k[:, h * hd:(h + 1) * hd]
        vh = v[:, h * hd:(h + 1) * hd]
        p = jax.nn.softmax((qh @ kh.T) / (hd ** 0.5), axis=-1)
        heads.append(p @ vh)
    return jnp.concatenate(heads, axis=-1) @ wo + bo


def reference_decoder(tgt, mem, raw, num_layers, nhead):
    for _ in range(num_layers):
        sa = _ref_mha(tgt, tgt, raw["sa_wq"], raw["sa_wk"], raw["sa_wv"], raw["sa_wo"],
                      raw["sa_bq"], raw["sa_bk"], raw["sa_bv"], raw["sa_bo"], nhead)
        tgt = _layer_norm(tgt + sa, raw["ln1_g"], raw["ln1_b"])
        ca = _ref_mha(tgt, mem, raw["ca_wq"], raw["ca_wk"], raw["ca_wv"], raw["ca_wo"],
                      raw["ca_bq"], raw["ca_bk"], raw["ca_bv"], raw["ca_bo"], nhead)
        tgt = _layer_norm(tgt + ca, raw["ln2_g"], raw["ln2_b"])
        hidden = jax.nn.relu(tgt @ raw["ff_w1"] + raw["ff_b1"])
        ff = hidden @ raw["ff_w2"] + raw["ff_b2"]
        tgt = _layer_norm(tgt + ff, raw["ln3_g"], raw["ln3_b"])
    return tgt


if __name__ == "__main__":
    Q, K, D, DIM_FF, NUM_LAYERS = 8, 16, 32, 64, 8

    root = jax.random.PRNGKey(0)
    k_tgt, k_mem, k_par = jax.random.split(root, 3)

    grouping_region = jax.random.normal(k_tgt, (Q, D), jnp.float32)
    q_feat = jax.random.normal(k_mem, (K, D), jnp.float32)
    raw_params = init_raw_params(k_par, D, DIM_FF)      # shared by all layers (deepcopy)
    packed_params = pack_params(raw_params)

    out = tmatcher_decoder(grouping_region, q_feat, packed_params,
                           num_layers=NUM_LAYERS, nhead=NHEAD)
    out = jax.block_until_ready(out)

    assert out.shape == (Q, D) and out.dtype == jnp.float32
    assert bool(jnp.all(jnp.isfinite(out)))

    # Tolerance reflects bf16 MXU operands compounded over 8 layers (reference is f32).
    ref = reference_decoder(grouping_region, q_feat, raw_params, NUM_LAYERS, NHEAD)
    max_err = float(jnp.max(jnp.abs(out - ref)))
    assert max_err < 2.5e-1, f"max abs error vs pure-JAX reference: {max_err}"

    print("KERNEL_OK")
</pallas_src>

<mosaic_0001>
module attributes {stable_mosaic.version = 11 : i64} {
  func.func @fused_decoder_kernel(%arg0: memref<8x32xf32, #tpu.memory_space<vmem>>, %arg1: memref<16x32xf32, #tpu.memory_space<vmem>>, %arg2: memref<32x96xbf16, #tpu.memory_space<vmem>>, %arg3: memref<1x96xf32, #tpu.memory_space<vmem>>, %arg4: memref<32x32xbf16, #tpu.memory_space<vmem>>, %arg5: memref<32x32xbf16, #tpu.memory_space<vmem>>, %arg6: memref<1x32xf32, #tpu.memory_space<vmem>>, %arg7: memref<32x64xbf16, #tpu.memory_space<vmem>>, %arg8: memref<1x64xf32, #tpu.memory_space<vmem>>, %arg9: memref<32x32xbf16, #tpu.memory_space<vmem>>, %arg10: memref<32x64xbf16, #tpu.memory_space<vmem>>, %arg11: memref<1x64xf32, #tpu.memory_space<vmem>>, %arg12: memref<64x32xbf16, #tpu.memory_space<vmem>>, %arg13: memref<9x32xf32, #tpu.memory_space<vmem>>, %arg14: memref<8x32xf32, #tpu.memory_space<vmem>>) attributes {dimension_semantics = [], scalar_prefetch = 0 : i64, scratch_operands = 0 : i64, tpu.core_type = #tpu.core_type<tc>} {
    %c0 = arith.constant 0 : index
    %c0_0 = arith.constant 0 : index
    %0 = vector.load %arg0[%c0, %c0_0] : memref<8x32xf32, #tpu.memory_space<vmem>>, vector<8x32xf32>
    %c0_1 = arith.constant 0 : index
    %c0_2 = arith.constant 0 : index
    %1 = vector.load %arg13[%c0_1, %c0_2] : memref<9x32xf32, #tpu.memory_space<vmem>>, vector<1x32xf32>
    %2 = vector.shape_cast %1 : vector<1x32xf32> to vector<1x32xf32>
    %3 = vector.broadcast %2 : vector<1x32xf32> to vector<8x32xf32>
    %c1 = arith.constant 1 : index
    %c0_3 = arith.constant 0 : index
    %4 = vector.load %arg13[%c1, %c0_3] : memref<9x32xf32, #tpu.memory_space<vmem>>, vector<1x32xf32>
    %5 = vector.shape_cast %4 : vector<1x32xf32> to vector<1x32xf32>
    %6 = vector.broadcast %5 : vector<1x32xf32> to vector<8x32xf32>
    %c2 = arith.constant 2 : index
    %c0_4 = arith.constant 0 : index
    %7 = vector.load %arg13[%c2, %c0_4] : memref<9x32xf32, #tpu.memory_space<vmem>>, vector<1x32xf32>
    %8 = vector.shape_cast %7 : vector<1x32xf32> to vector<1x32xf32>
    %9 = vector.broadcast %8 : vector<1x32xf32> to vector<8x32xf32>
    %c3 = arith.constant 3 : index
    %c0_5 = arith.constant 0 : index
    %10 = vector.load %arg13[%c3, %c0_5] : memref<9x32xf32, #tpu.memory_space<vmem>>, vector<1x32xf32>
    %11 = vector.shape_cast %10 : vector<1x32xf32> to vector<1x32xf32>
    %12 = vector.broadcast %11 : vector<1x32xf32> to vector<8x32xf32>
    %c4 = arith.constant 4 : index
    %c0_6 = arith.constant 0 : index
    %13 = vector.load %arg13[%c4, %c0_6] : memref<9x32xf32, #tpu.memory_space<vmem>>, vector<1x32xf32>
    %14 = vector.shape_cast %13 : vector<1x32xf32> to vector<1x32xf32>
    %15 = vector.broadcast %14 : vector<1x32xf32> to vector<8x32xf32>
    %c5 = arith.constant 5 : index
    %c0_7 = arith.constant 0 : index
    %16 = vector.load %arg13[%c5, %c0_7] : memref<9x32xf32, #tpu.memory_space<vmem>>, vector<1x32xf32>
    %17 = vector.shape_cast %16 : vector<1x32xf32> to vector<1x32xf32>
    %18 = vector.broadcast %17 : vector<1x32xf32> to vector<8x32xf32>
    %c6 = arith.constant 6 : index
    %c0_8 = arith.constant 0 : index
    %19 = vector.load %arg13[%c6, %c0_8] : memref<9x32xf32, #tpu.memory_space<vmem>>, vector<1x32xf32>
    %20 = vector.shape_cast %19 : vector<1x32xf32> to vector<1x32xf32>
    %21 = vector.broadcast %20 : vector<1x32xf32> to vector<8x32xf32>
    %c7 = arith.constant 7 : index
    %c0_9 = arith.constant 0 : index
    %22 = vector.load %arg13[%c7, %c0_9] : memref<9x32xf32, #tpu.memory_space<vmem>>, vector<1x32xf32>
    %23 = vector.shape_cast %22 : vector<1x32xf32> to vector<1x32xf32>
    %24 = vector.broadcast %23 : vector<1x32xf32> to vector<8x32xf32>
    %c8 = arith.constant 8 : index
    %c0_10 = arith.constant 0 : index
    %25 = vector.load %arg13[%c8, %c0_10] : memref<9x32xf32, #tpu.memory_space<vmem>>, vector<1x32xf32>
    %26 = vector.shape_cast %25 : vector<1x32xf32> to vector<1x32xf32>
    %27 = vector.broadcast %26 : vector<1x32xf32> to vector<8x32xf32>
    %c0_11 = arith.constant 0 : index
    %c0_12 = arith.constant 0 : index
    %28 = vector.load %arg3[%c0_11, %c0_12] : memref<1x96xf32, #tpu.memory_space<vmem>>, vector<1x96xf32>
    %29 = vector.shape_cast %28 : vector<1x96xf32> to vector<1x96xf32>
    %30 = vector.broadcast %29 : vector<1x96xf32> to vector<8x96xf32>
    %c0_13 = arith.constant 0 : index
    %c0_14 = arith.constant 0 : index
    %31 = vector.load %arg6[%c0_13, %c0_14] : memref<1x32xf32, #tpu.memory_space<vmem>>, vector<1x32xf32>
    %32 = vector.shape_cast %31 : vector<1x32xf32> to vector<1x32xf32>
    %33 = vector.broadcast %32 : vector<1x32xf32> to vector<8x32xf32>
    %c0_15 = arith.constant 0 : index
    %c0_16 = arith.constant 0 : index
    %34 = vector.load %arg11[%c0_15, %c0_16] : memref<1x64xf32, #tpu.memory_space<vmem>>, vector<1x64xf32>
    %35 = vector.shape_cast %34 : vector<1x64xf32> to vector<1x64xf32>
    %36 = vector.broadcast %35 : vector<1x64xf32> to vector<8x64xf32>
    %c0_17 = arith.constant 0 : index
    %c0_18 = arith.constant 0 : index
    %37 = vector.load %arg1[%c0_17, %c0_18] : memref<16x32xf32, #tpu.memory_space<vmem>>, vector<16x32xf32>
    %38 = arith.truncf %37 : vector<16x32xf32> to vector<16x32xbf16>
    %c0_19 = arith.constant 0 : index
    %c0_20 = arith.constant 0 : index
    %39 = vector.load %arg7[%c0_19, %c0_20] : memref<32x64xbf16, #tpu.memory_space<vmem>>, vector<32x64xbf16>
    %cst = arith.constant dense<0.000000e+00> : vector<16x64xf32>
    %40 = tpu.matmul %38, %39, %cst {dimension_numbers = #tpu.dot_dimension_numbers<[1], [0], [0], [1], [0, 0, 1, 1], [], []>} : vector<16x32xbf16>, vector<32x64xbf16>, vector<16x64xf32> -> vector<16x64xf32>
    %c0_21 = arith.constant 0 : index
    %c0_22 = arith.constant 0 : index
    %41 = vector.load %arg8[%c0_21, %c0_22] : memref<1x64xf32, #tpu.memory_space<vmem>>, vector<1x64xf32>
    %42 = vector.broadcast %41 : vector<1x64xf32> to vector<16x64xf32>
    %43 = arith.addf %40, %42 : vector<16x64xf32>
    %44 = arith.truncf %43 : vector<16x64xf32> to vector<16x64xbf16>
    %45 = vector.extract_strided_slice %44 {offsets = [0, 0], sizes = [16, 32], strides = [1, 1]} : vector<16x64xbf16> to vector<16x32xbf16>
    %46 = vector.extract_strided_slice %44 {offsets = [0, 32], sizes = [16, 32], strides = [1, 1]} : vector<16x64xbf16> to vector<16x32xbf16>
    %c0_i32 = arith.constant 0 : i32
    %47 = arith.truncf %0 : vector<8x32xf32> to vector<8x32xbf16>
    %c0_23 = arith.constant 0 : index
    %c0_24 = arith.constant 0 : index
    %48 = vector.load %arg2[%c0_23, %c0_24] : memref<32x96xbf16, #tpu.memory_space<vmem>>, vector<32x96xbf16>
    %cst_25 = arith.constant dense<0.000000e+00> : vector<8x96xf32>
    %49 = tpu.matmul %47, %48, %cst_25 {dimension_numbers = #tpu.dot_dimension_numbers<[1], [0], [0], [1], [0, 0, 1, 1], [], []>} : vector<8x32xbf16>, vector<32x96xbf16>, vector<8x96xf32> -> vector<8x96xf32>
    %50 = arith.addf %49, %30 : vector<8x96xf32>
    %51 = arith.truncf %50 : vector<8x96xf32> to vector<8x96xbf16>
    %52 = vector.extract_strided_slice %51 {offsets = [0, 0], sizes = [8, 32], strides = [1, 1]} : vector<8x96xbf16> to vector<8x32xbf16>
    %53 = vector.extract_strided_slice %51 {offsets = [0, 32], sizes = [8, 32], strides = [1, 1]} : vector<8x96xbf16> to vector<8x32xbf16>
    %54 = vector.extract_strided_slice %51 {offsets = [0, 64], sizes = [8, 32], strides = [1, 1]} : vector<8x96xbf16> to vector<8x32xbf16>
    %c0_26 = arith.constant 0 : index
    %c0_27 = arith.constant 0 : index
    %55 = vector.load %arg4[%c0_26, %c0_27] : memref<32x32xbf16, #tpu.memory_space<vmem>>, vector<32x32xbf16>
    %56 = vector.extract_strided_slice %52 {offsets = [0, 0], sizes = [8, 8], strides = [1, 1]} : vector<8x32xbf16> to vector<8x8xbf16>
    %57 = vector.extract_strided_slice %53 {offsets = [0, 0], sizes = [8, 8], strides = [1, 1]} : vector<8x32xbf16> to vector<8x8xbf16>
    %cst_28 = arith.constant dense<0.000000e+00> : vector<8x8xf32>
    %58 = tpu.matmul %56, %57, %cst_28 {dimension_numbers = #tpu.dot_dimension_numbers<[1], [1], [0], [0], [0, 0, 1, 0], [], []>} : vector<8x8xbf16>, vector<8x8xbf16>, vector<8x8xf32> -> vector<8x8xf32>
    %59 = vector.extract_strided_slice %52 {offsets = [0, 8], sizes = [8, 8], strides = [1, 1]} : vector<8x32xbf16> to vector<8x8xbf16>
    %60 = vector.extract_strided_slice %53 {offsets = [0, 8], sizes = [8, 8], strides = [1, 1]} : vector<8x32xbf16> to vector<8x8xbf16>
    %cst_29 = arith.constant dense<0.000000e+00> : vector<8x8xf32>
    %61 = tpu.matmul %59, %60, %cst_29 {dimension_numbers = #tpu.dot_dimension_numbers<[1], [1], [0], [0], [0, 0, 1, 0], [], []>} : vector<8x8xbf16>, vector<8x8xbf16>, vector<8x8xf32> -> vector<8x8xf32>
    %62 = vector.extract_strided_slice %52 {offsets = [0, 16], sizes = [8, 8], strides = [1, 1]} : vector<8x32xbf16> to vector<8x8xbf16>
    %63 = vector.extract_strided_slice %53 {offsets = [0, 16], sizes = [8, 8], strides = [1, 1]} : vector<8x32xbf16> to vector<8x8xbf16>
    %cst_30 = arith.constant dense<0.000000e+00> : vector<8x8xf32>
    %64 = tpu.matmul %62, %63, %cst_30 {dimension_numbers = #tpu.dot_dimension_numbers<[1], [1], [0], [0], [0, 0, 1, 0], [], []>} : vector<8x8xbf16>, vector<8x8xbf16>, vector<8x8xf32> -> vector<8x8xf32>
    %65 = vector.extract_strided_slice %52 {offsets = [0, 24], sizes = [8, 8], strides = [1, 1]} : vector<8x32xbf16> to vector<8x8xbf16>
    %66 = vector.extract_strided_slice %53 {offsets = [0, 24], sizes = [8, 8], strides = [1, 1]} : vector<8x32xbf16> to vector<8x8xbf16>
    %cst_31 = arith.constant dense<0.000000e+00> : vector<8x8xf32>
    %67 = tpu.matmul %65, %66, %cst_31 {dimension_numbers = #tpu.dot_dimension_numbers<[1], [1], [0], [0], [0, 0, 1, 0], [], []>} : vector<8x8xbf16>, vector<8x8xbf16>, vector<8x8xf32> -> vector<8x8xf32>
    %68 = tpu.concatenate %58, %61, %64, %67 in 0 : vector<8x8xf32>, vector<8x8xf32>, vector<8x8xf32>, vector<8x8xf32> -> vector<32x8xf32>
    %cst_32 = arith.constant 0.353553385 : f32
    %69 = vector.broadcast %cst_32 : f32 to vector<32x8xf32>
    %70 = arith.mulf %68, %69 : vector<32x8xf32>
    %cst_33 = arith.constant dense<0xFF800000> : vector<32xf32>
    %71 = vector.multi_reduction <maximumf>, %70, %cst_33 [1] : vector<32x8xf32> to vector<32xf32>
    %72 = vector.shape_cast %71 : vector<32xf32> to vector<32x1xf32>
    %73 = vector.broadcast %72 : vector<32x1xf32> to vector<32x8xf32>
    %74 = arith.subf %70, %73 : vector<32x8xf32>
    %75 = math.exp %74 : vector<32x8xf32>
    %cst_34 = arith.constant dense<0.000000e+00> : vector<32xf32>
    %76 = vector.multi_reduction <add>, %75, %cst_34 [1] : vector<32x8xf32> to vector<32xf32>
    %77 = vector.shape_cast %76 : vector<32xf32> to vector<32x1xf32>
    %78 = tpu.reciprocal %77 : vector<32x1xf32> -> vector<32x1xf32>
    %79 = vector.broadcast %78 : vector<32x1xf32> to vector<32x8xf32>
    %80 = arith.mulf %75, %79 : vector<32x8xf32>
    %81 = arith.truncf %80 : vector<32x8xf32> to vector<32x8xbf16>
    %82 = vector.extract_strided_slice %81 {offsets = [0, 0], sizes = [8, 8], strides = [1, 1]} : vector<32x8xbf16> to vector<8x8xbf16>
    %83 = vector.extract_strided_slice %54 {offsets = [0, 0], sizes = [8, 8], strides = [1, 1]} : vector<8x32xbf16> to vector<8x8xbf16>
    %cst_35 = arith.constant dense<0.000000e+00> : vector<8x8xf32>
    %84 = tpu.matmul %82, %83, %cst_35 {dimension_numbers = #tpu.dot_dimension_numbers<[1], [0], [0], [1], [0, 0, 1, 1], [], []>} : vector<8x8xbf16>, vector<8x8xbf16>, vector<8x8xf32> -> vector<8x8xf32>
    %85 = vector.extract_strided_slice %81 {offsets = [8, 0], sizes = [8, 8], strides = [1, 1]} : vector<32x8xbf16> to vector<8x8xbf16>
    %86 = vector.extract_strided_slice %54 {offsets = [0, 8], sizes = [8, 8], strides = [1, 1]} : vector<8x32xbf16> to vector<8x8xbf16>
    %cst_36 = arith.constant dense<0.000000e+00> : vector<8x8xf32>
    %87 = tpu.matmul %85, %86, %cst_36 {dimension_numbers = #tpu.dot_dimension_numbers<[1], [0], [0], [1], [0, 0, 1, 1], [], []>} : vector<8x8xbf16>, vector<8x8xbf16>, vector<8x8xf32> -> vector<8x8xf32>
    %88 = vector.extract_strided_slice %81 {offsets = [16, 0], sizes = [8, 8], strides = [1, 1]} : vector<32x8xbf16> to vector<8x8xbf16>
    %89 = vector.extract_strided_slice %54 {offsets = [0, 16], sizes = [8, 8], strides = [1, 1]} : vector<8x32xbf16> to vector<8x8xbf16>
    %cst_37 = arith.constant dense<0.000000e+00> : vector<8x8xf32>
    %90 = tpu.matmul %88, %89, %cst_37 {dimension_numbers = #tpu.dot_dimension_numbers<[1], [0], [0], [1], [0, 0, 1, 1], [], []>} : vector<8x8xbf16>, vector<8x8xbf16>, vector<8x8xf32> -> vector<8x8xf32>
    %91 = vector.extract_strided_slice %81 {offsets = [24, 0], sizes = [8, 8], strides = [1, 1]} : vector<32x8xbf16> to vector<8x8xbf16>
    %92 = vector.extract_strided_slice %54 {offsets = [0, 24], sizes = [8, 8], strides = [1, 1]} : vector<8x32xbf16> to vector<8x8xbf16>
    %cst_38 = arith.constant dense<0.000000e+00> : vector<8x8xf32>
    %93 = tpu.matmul %91, %92, %cst_38 {dimension_numbers = #tpu.dot_dimension_numbers<[1], [0], [0], [1], [0, 0, 1, 1], [], []>} : vector<8x8xbf16>, vector<8x8xbf16>, vector<8x8xf32> -> vector<8x8xf32>
    %94 = tpu.concatenate %84, %87, %90, %93 in 1 : vector<8x8xf32>, vector<8x8xf32>, vector<8x8xf32>, vector<8x8xf32> -> vector<8x32xf32>
    %95 = arith.truncf %94 : vector<8x32xf32> to vector<8x32xbf16>
    %cst_39 = arith.constant dense<0.000000e+00> : vector<8x32xf32>
    %96 = tpu.matmul %95, %55, %cst_39 {dimension_numbers = #tpu.dot_dimension_numbers<[1], [0], [0], [1], [0, 0, 1, 1], [], []>} : vector<8x32xbf16>, vector<32x32xbf16>, vector<8x32xf32> -> vector<8x32xf32>
    %97 = arith.addf %96, %3 : vector<8x32xf32>
    %98 = arith.addf %0, %97 : vector<8x32xf32>
    %cst_40 = arith.constant dense<0.000000e+00> : vector<8xf32>
    %99 = vector.multi_reduction <add>, %98, %cst_40 [1] : vector<8x32xf32> to vector<8xf32>
    %100 = vector.shape_cast %99 : vector<8xf32> to vector<8x1xf32>
    %cst_41 = arith.constant 3.200000e+01 : f32
    %101 = vector.broadcast %cst_41 : f32 to vector<8x1xf32>
    %102 = arith.divf %100, %101 : vector<8x1xf32>
    %103 = vector.broadcast %102 : vector<8x1xf32> to vector<8x32xf32>
    %104 = arith.subf %98, %103 : vector<8x32xf32>
    %105 = arith.mulf %104, %104 : vector<8x32xf32>
    %cst_42 = arith.constant dense<0.000000e+00> : vector<8xf32>
    %106 = vector.multi_reduction <add>, %105, %cst_42 [1] : vector<8x32xf32> to vector<8xf32>
    %107 = vector.shape_cast %106 : vector<8xf32> to vector<8x1xf32>
    %cst_43 = arith.constant 3.200000e+01 : f32
    %108 = vector.broadcast %cst_43 : f32 to vector<8x1xf32>
    %109 = arith.divf %107, %108 : vector<8x1xf32>
    %cst_44 = arith.constant 9.99999974E-6 : f32
    %110 = vector.broadcast %cst_44 : f32 to vector<8x1xf32>
    %111 = arith.addf %109, %110 : vector<8x1xf32>
    %112 = math.rsqrt %111 : vector<8x1xf32>
    %113 = vector.broadcast %112 : vector<8x1xf32> to vector<8x32xf32>
    %114 = arith.mulf %104, %113 : vector<8x32xf32>
    %115 = arith.mulf %114, %12 : vector<8x32xf32>
    %116 = arith.addf %115, %15 : vector<8x32xf32>
    %117 = arith.truncf %116 : vector<8x32xf32> to vector<8x32xbf16>
    %c0_45 = arith.constant 0 : index
    %c0_46 = arith.constant 0 : index
    %118 = vector.load %arg5[%c0_45, %c0_46] : memref<32x32xbf16, #tpu.memory_space<vmem>>, vector<32x32xbf16>
    %cst_47 = arith.constant dense<0.000000e+00> : vector<8x32xf32>
    %119 = tpu.matmul %117, %118, %cst_47 {dimension_numbers = #tpu.dot_dimension_numbers<[1], [0], [0], [1], [0, 0, 1, 1], [], []>} : vector<8x32xbf16>, vector<32x32xbf16>, vector<8x32xf32> -> vector<8x32xf32>
    %120 = arith.addf %119, %33 : vector<8x32xf32>
    %121 = arith.truncf %120 : vector<8x32xf32> to vector<8x32xbf16>
    %c0_48 = arith.constant 0 : index
    %c0_49 = arith.constant 0 : index
    %122 = vector.load %arg9[%c0_48, %c0_49] : memref<32x32xbf16, #tpu.memory_space<vmem>>, vector<32x32xbf16>
    %123 = vector.extract_strided_slice %121 {offsets = [0, 0], sizes = [8, 8], strides = [1, 1]} : vector<8x32xbf16> to vector<8x8xbf16>
    %124 = vector.extract_strided_slice %45 {offsets = [0, 0], sizes = [16, 8], strides = [1, 1]} : vector<16x32xbf16> to vector<16x8xbf16>
    %cst_50 = arith.constant dense<0.000000e+00> : vector<8x16xf32>
    %125 = tpu.matmul %123, %124, %cst_50 {dimension_numbers = #tpu.dot_dimension_numbers<[1], [1], [0], [0], [0, 0, 1, 0], [], []>} : vector<8x8xbf16>, vector<16x8xbf16>, vector<8x16xf32> -> vector<8x16xf32>
    %126 = vector.extract_strided_slice %121 {offsets = [0, 8], sizes = [8, 8], strides = [1, 1]} : vector<8x32xbf16> to vector<8x8xbf16>
    %127 = vector.extract_strided_slice %45 {offsets = [0, 8], sizes = [16, 8], strides = [1, 1]} : vector<16x32xbf16> to vector<16x8xbf16>
    %cst_51 = arith.constant dense<0.000000e+00> : vector<8x16xf32>
    %128 = tpu.matmul %126, %127, %cst_51 {dimension_numbers = #tpu.dot_dimension_numbers<[1], [1], [0], [0], [0, 0, 1, 0], [], []>} : vector<8x8xbf16>, vector<16x8xbf16>, vector<8x16xf32> -> vector<8x16xf32>
    %129 = vector.extract_strided_slice %121 {offsets = [0, 16], sizes = [8, 8], strides = [1, 1]} : vector<8x32xbf16> to vector<8x8xbf16>
    %130 = vector.extract_strided_slice %45 {offsets = [0, 16], sizes = [16, 8], strides = [1, 1]} : vector<16x32xbf16> to vector<16x8xbf16>
    %cst_52 = arith.constant dense<0.000000e+00> : vector<8x16xf32>
    %131 = tpu.matmul %129, %130, %cst_52 {dimension_numbers = #tpu.dot_dimension_numbers<[1], [1], [0], [0], [0, 0, 1, 0], [], []>} : vector<8x8xbf16>, vector<16x8xbf16>, vector<8x16xf32> -> vector<8x16xf32>
    %132 = vector.extract_strided_slice %121 {offsets = [0, 24], sizes = [8, 8], strides = [1, 1]} : vector<8x32xbf16> to vector<8x8xbf16>
    %133 = vector.extract_strided_slice %45 {offsets = [0, 24], sizes = [16, 8], strides = [1, 1]} : vector<16x32xbf16> to vector<16x8xbf16>
    %cst_53 = arith.constant dense<0.000000e+00> : vector<8x16xf32>
    %134 = tpu.matmul %132, %133, %cst_53 {dimension_numbers = #tpu.dot_dimension_numbers<[1], [1], [0], [0], [0, 0, 1, 0], [], []>} : vector<8x8xbf16>, vector<16x8xbf16>, vector<8x16xf32> -> vector<8x16xf32>
    %135 = tpu.concatenate %125, %128, %131, %134 in 0 : vector<8x16xf32>, vector<8x16xf32>, vector<8x16xf32>, vector<8x16xf32> -> vector<32x16xf32>
    %cst_54 = arith.constant 0.353553385 : f32
    %136 = vector.broadcast %cst_54 : f32 to vector<32x16xf32>
    %137 = arith.mulf %135, %136 : vector<32x16xf32>
    %cst_55 = arith.constant dense<0xFF800000> : vector<32xf32>
    %138 = vector.multi_reduction <maximumf>, %137, %cst_55 [1] : vector<32x16xf32> to vector<32xf32>
    %139 = vector.shape_cast %138 : vector<32xf32> to vector<32x1xf32>
    %140 = vector.broadcast %139 : vector<32x1xf32> to vector<32x16xf32>
    %141 = arith.subf %137, %140 : vector<32x16xf32>
    %142 = math.exp %141 : vector<32x16xf32>
    %cst_56 = arith.constant dense<0.000000e+00> : vector<32xf32>
    %143 = vector.multi_reduction <add>, %142, %cst_56 [1] : vector<32x16xf32> to vector<32xf32>
    %144 = vector.shape_cast %143 : vector<32xf32> to vector<32x1xf32>
    %145 = tpu.reciprocal %144 : vector<32x1xf32> -> vector<32x1xf32>
    %146 = vector.broadcast %145 : vector<32x1xf32> to vector<32x16xf32>
    %147 = arith.mulf %142, %146 : vector<32x16xf32>
    %148 = arith.truncf %147 : vector<32x16xf32> to vector<32x16xbf16>
    %149 = vector.extract_strided_slice %148 {offsets = [0, 0], sizes = [8, 16], strides = [1, 1]} : vector<32x16xbf16> to vector<8x16xbf16>
    %150 = vector.extract_strided_slice %46 {offsets = [0, 0], sizes = [16, 8], strides = [1, 1]} : vector<16x32xbf16> to vector<16x8xbf16>
    %cst_57 = arith.constant dense<0.000000e+00> : vector<8x8xf32>
    %151 = tpu.matmul %149, %150, %cst_57 {dimension_numbers = #tpu.dot_dimension_numbers<[1], [0], [0], [1], [0, 0, 1, 1], [], []>} : vector<8x16xbf16>, vector<16x8xbf16>, vector<8x8xf32> -> vector<8x8xf32>
    %152 = vector.extract_strided_slice %148 {offsets = [8, 0], sizes = [8, 16], strides = [1, 1]} : vector<32x16xbf16> to vector<8x16xbf16>
    %153 = vector.extract_strided_slice %46 {offsets = [0, 8], sizes = [16, 8], strides = [1, 1]} : vector<16x32xbf16> to vector<16x8xbf16>
    %cst_58 = arith.constant dense<0.000000e+00> : vector<8x8xf32>
    %154 = tpu.matmul %152, %153, %cst_58 {dimension_numbers = #tpu.dot_dimension_numbers<[1], [0], [0], [1], [0, 0, 1, 1], [], []>} : vector<8x16xbf16>, vector<16x8xbf16>, vector<8x8xf32> -> vector<8x8xf32>
    %155 = vector.extract_strided_slice %148 {offsets = [16, 0], sizes = [8, 16], strides = [1, 1]} : vector<32x16xbf16> to vector<8x16xbf16>
    %156 = vector.extract_strided_slice %46 {offsets = [0, 16], sizes = [16, 8], strides = [1, 1]} : vector<16x32xbf16> to vector<16x8xbf16>
    %cst_59 = arith.constant dense<0.000000e+00> : vector<8x8xf32>
    %157 = tpu.matmul %155, %156, %cst_59 {dimension_numbers = #tpu.dot_dimension_numbers<[1], [0], [0], [1], [0, 0, 1, 1], [], []>} : vector<8x16xbf16>, vector<16x8xbf16>, vector<8x8xf32> -> vector<8x8xf32>
    %158 = vector.extract_strided_slice %148 {offsets = [24, 0], sizes = [8, 16], strides = [1, 1]} : vector<32x16xbf16> to vector<8x16xbf16>
    %159 = vector.extract_strided_slice %46 {offsets = [0, 24], sizes = [16, 8], strides = [1, 1]} : vector<16x32xbf16> to vector<16x8xbf16>
    %cst_60 = arith.constant dense<0.000000e+00> : vector<8x8xf32>
    %160 = tpu.matmul %158, %159, %cst_60 {dimension_numbers = #tpu.dot_dimension_numbers<[1], [0], [0], [1], [0, 0, 1, 1], [], []>} : vector<8x16xbf16>, vector<16x8xbf16>, vector<8x8xf32> -> vector<8x8xf32>
    %161 = tpu.concatenate %151, %154, %157, %160 in 1 : vector<8x8xf32>, vector<8x8xf32>, vector<8x8xf32>, vector<8x8xf32> -> vector<8x32xf32>
    %162 = arith.truncf %161 : vector<8x32xf32> to vector<8x32xbf16>
    %cst_61 = arith.constant dense<0.000000e+00> : vector<8x32xf32>
    %163 = tpu.matmul %162, %122, %cst_61 {dimension_numbers = #tpu.dot_dimension_numbers<[1], [0], [0], [1], [0, 0, 1, 1], [], []>} : vector<8x32xbf16>, vector<32x32xbf16>, vector<8x32xf32> -> vector<8x32xf32>
    %164 = arith.addf %163, %6 : vector<8x32xf32>
    %165 = arith.addf %116, %164 : vector<8x32xf32>
    %cst_62 = arith.constant dense<0.000000e+00> : vector<8xf32>
    %166 = vector.multi_reduction <add>, %165, %cst_62 [1] : vector<8x32xf32> to vector<8xf32>
    %167 = vector.shape_cast %166 : vector<8xf32> to vector<8x1xf32>
    %cst_63 = arith.constant 3.200000e+01 : f32
    %168 = vector.broadcast %cst_63 : f32 to vector<8x1xf32>
    %169 = arith.divf %167, %168 : vector<8x1xf32>
    %170 = vector.broadcast %169 : vector<8x1xf32> to vector<8x32xf32>
    %171 = arith.subf %165, %170 : vector<8x32xf32>
    %172 = arith.mulf %171, %171 : vector<8x32xf32>
    %cst_64 = arith.constant dense<0.000000e+00> : vector<8xf32>
    %173 = vector.multi_reduction <add>, %172, %cst_64 [1] : vector<8x32xf32> to vector<8xf32>
    %174 = vector.shape_cast %173 : vector<8xf32> to vector<8x1xf32>
    %cst_65 = arith.constant 3.200000e+01 : f32
    %175 = vector.broadcast %cst_65 : f32 to vector<8x1xf32>
    %176 = arith.divf %174, %175 : vector<8x1xf32>
    %cst_66 = arith.constant 9.99999974E-6 : f32
    %177 = vector.broadcast %cst_66 : f32 to vector<8x1xf32>
    %178 = arith.addf %176, %177 : vector<8x1xf32>
    %179 = math.rsqrt %178 : vector<8x1xf32>
    %180 = vector.broadcast %179 : vector<8x1xf32> to vector<8x32xf32>
    %181 = arith.mulf %171, %180 : vector<8x32xf32>
    %182 = arith.mulf %181, %18 : vector<8x32xf32>
    %183 = arith.addf %182, %21 : vector<8x32xf32>
    %184 = arith.truncf %183 : vector<8x32xf32> to vector<8x32xbf16>
    %c0_67 = arith.constant 0 : index
    %c0_68 = arith.constant 0 : index
    %185 = vector.load %arg10[%c0_67, %c0_68] : memref<32x64xbf16, #tpu.memory_space<vmem>>, vector<32x64xbf16>
    %cst_69 = arith.constant dense<0.000000e+00> : vector<8x64xf32>
    %186 = tpu.matmul %184, %185, %cst_69 {dimension_numbers = #tpu.dot_dimension_numbers<[1], [0], [0], [1], [0, 0, 1, 1], [], []>} : vector<8x32xbf16>, vector<32x64xbf16>, vector<8x64xf32> -> vector<8x64xf32>
    %187 = arith.addf %186, %36 : vector<8x64xf32>
    %cst_70 = arith.constant 0.000000e+00 : f32
    %188 = vector.broadcast %cst_70 : f32 to vector<8x64xf32>
    %189 = arith.maximumf %187, %188 : vector<8x64xf32>
    %190 = arith.truncf %189 : vector<8x64xf32> to vector<8x64xbf16>
    %c0_71 = arith.constant 0 : index
    %c0_72 = arith.constant 0 : index
    %191 = vector.load %arg12[%c0_71, %c0_72] : memref<64x32xbf16, #tpu.memory_space<vmem>>, vector<64x32xbf16>
    %cst_73 = arith.constant dense<0.000000e+00> : vector<8x32xf32>
    %192 = tpu.matmul %190, %191, %cst_73 {dimension_numbers = #tpu.dot_dimension_numbers<[1], [0], [0], [1], [0, 0, 1, 1], [], []>} : vector<8x64xbf16>, vector<64x32xbf16>, vector<8x32xf32> -> vector<8x32xf32>
    %193 = arith.addf %192, %9 : vector<8x32xf32>
    %194 = arith.addf %183, %193 : vector<8x32xf32>
    %cst_74 = arith.constant dense<0.000000e+00> : vector<8xf32>
    %195 = vector.multi_reduction <add>, %194, %cst_74 [1] : vector<8x32xf32> to vector<8xf32>
    %196 = vector.shape_cast %195 : vector<8xf32> to vector<8x1xf32>
    %cst_75 = arith.constant 3.200000e+01 : f32
    %197 = vector.broadcast %cst_75 : f32 to vector<8x1xf32>
    %198 = arith.divf %196, %197 : vector<8x1xf32>
    %199 = vector.broadcast %198 : vector<8x1xf32> to vector<8x32xf32>
    %200 = arith.subf %194, %199 : vector<8x32xf32>
    %201 = arith.mulf %200, %200 : vector<8x32xf32>
    %cst_76 = arith.constant dense<0.000000e+00> : vector<8xf32>
    %202 = vector.multi_reduction <add>, %201, %cst_76 [1] : vector<8x32xf32> to vector<8xf32>
    %203 = vector.shape_cast %202 : vector<8xf32> to vector<8x1xf32>
    %cst_77 = arith.constant 3.200000e+01 : f32
    %204 = vector.broadcast %cst_77 : f32 to vector<8x1xf32>
    %205 = arith.divf %203, %204 : vector<8x1xf32>
    %cst_78 = arith.constant 9.99999974E-6 : f32
    %206 = vector.broadcast %cst_78 : f32 to vector<8x1xf32>
    %207 = arith.addf %205, %206 : vector<8x1xf32>
    %208 = math.rsqrt %207 : vector<8x1xf32>
    %209 = vector.broadcast %208 : vector<8x1xf32> to vector<8x32xf32>
    %210 = arith.mulf %200, %209 : vector<8x32xf32>
    %211 = arith.mulf %210, %24 : vector<8x32xf32>
    %212 = arith.addf %211, %27 : vector<8x32xf32>
    %c1_i32 = arith.constant 1 : i32
    %213 = arith.truncf %212 : vector<8x32xf32> to vector<8x32xbf16>
    %c0_79 = arith.constant 0 : index
    %c0_80 = arith.constant 0 : index
    %214 = vector.load %arg2[%c0_79, %c0_80] : memref<32x96xbf16, #tpu.memory_space<vmem>>, vector<32x96xbf16>
    %cst_81 = arith.constant dense<0.000000e+00> : vector<8x96xf32>
    %215 = tpu.matmul %213, %214, %cst_81 {dimension_numbers = #tpu.dot_dimension_numbers<[1], [0], [0], [1], [0, 0, 1, 1], [], []>} : vector<8x32xbf16>, vector<32x96xbf16>, vector<8x96xf32> -> vector<8x96xf32>
    %216 = arith.addf %215, %30 : vector<8x96xf32>
    %217 = arith.truncf %216 : vector<8x96xf32> to vector<8x96xbf16>
    %218 = vector.extract_strided_slice %217 {offsets = [0, 0], sizes = [8, 32], strides = [1, 1]} : vector<8x96xbf16> to vector<8x32xbf16>
    %219 = vector.extract_strided_slice %217 {offsets = [0, 32], sizes = [8, 32], strides = [1, 1]} : vector<8x96xbf16> to vector<8x32xbf16>
    %220 = vector.extract_strided_slice %217 {offsets = [0, 64], sizes = [8, 32], strides = [1, 1]} : vector<8x96xbf16> to vector<8x32xbf16>
    %c0_82 = arith.constant 0 : index
    %c0_83 = arith.constant 0 : index
    %221 = vector.load %arg4[%c0_82, %c0_83] : memref<32x32xbf16, #tpu.memory_space<vmem>>, vector<32x32xbf16>
    %222 = vector.extract_strided_slice %218 {offsets = [0, 0], sizes = [8, 8], strides = [1, 1]} : vector<8x32xbf16> to vector<8x8xbf16>
    %223 = vector.extract_strided_slice %219 {offsets = [0, 0], sizes = [8, 8], strides = [1, 1]} : vector<8x32xbf16> to vector<8x8xbf16>
    %cst_84 = arith.constant dense<0.000000e+00> : vector<8x8xf32>
    %224 = tpu.matmul %222, %223, %cst_84 {dimension_numbers = #tpu.dot_dimension_numbers<[1], [1], [0], [0], [0, 0, 1, 0], [], []>} : vector<8x8xbf16>, vector<8x8xbf16>, vector<8x8xf32> -> vector<8x8xf32>
    %225 = vector.extract_strided_slice %218 {offsets = [0, 8], sizes = [8, 8], strides = [1, 1]} : vector<8x32xbf16> to vector<8x8xbf16>
    %226 = vector.extract_strided_slice %219 {offsets = [0, 8], sizes = [8, 8], strides = [1, 1]} : vector<8x32xbf16> to vector<8x8xbf16>
    %cst_85 = arith.constant dense<0.000000e+00> : vector<8x8xf32>
    %227 = tpu.matmul %225, %226, %cst_85 {dimension_numbers = #tpu.dot_dimension_numbers<[1], [1], [0], [0], [0, 0, 1, 0], [], []>} : vector<8x8xbf16>, vector<8x8xbf16>, vector<8x8xf32> -> vector<8x8xf32>
    %228 = vector.extract_strided_slice %218 {offsets = [0, 16], sizes = [8, 8], strides = [1, 1]} : vector<8x32xbf16> to vector<8x8xbf16>
    %229 = vector.extract_strided_slice %219 {offsets = [0, 16], sizes = [8, 8], strides = [1, 1]} : vector<8x32xbf16> to vector<8x8xbf16>
    %cst_86 = arith.constant dense<0.000000e+00> : vector<8x8xf32>
    %230 = tpu.matmul %228, %229, %cst_86 {dimension_numbers = #tpu.dot_dimension_numbers<[1], [1], [0], [0], [0, 0, 1, 0], [], []>} : vector<8x8xbf16>, vector<8x8xbf16>, vector<8x8xf32> -> vector<8x8xf32>
    %231 = vector.extract_strided_slice %218 {offsets = [0, 24], sizes = [8, 8], strides = [1, 1]} : vector<8x32xbf16> to vector<8x8xbf16>
    %232 = vector.extract_strided_slice %219 {offsets = [0, 24], sizes = [8, 8], strides = [1, 1]} : vector<8x32xbf16> to vector<8x8xbf16>
    %cst_87 = arith.constant dense<0.000000e+00> : vector<8x8xf32>
    %233 = tpu.matmul %231, %232, %cst_87 {dimension_numbers = #tpu.dot_dimension_numbers<[1], [1], [0], [0], [0, 0, 1, 0], [], []>} : vector<8x8xbf16>, vector<8x8xbf16>, vector<8x8xf32> -> vector<8x8xf32>
    %234 = tpu.concatenate %224, %227, %230, %233 in 0 : vector<8x8xf32>, vector<8x8xf32>, vector<8x8xf32>, vector<8x8xf32> -> vector<32x8xf32>
    %cst_88 = arith.constant 0.353553385 : f32
    %235 = vector.broadcast %cst_88 : f32 to vector<32x8xf32>
    %236 = arith.mulf %234, %235 : vector<32x8xf32>
    %cst_89 = arith.constant dense<0xFF800000> : vector<32xf32>
    %237 = vector.multi_reduction <maximumf>, %236, %cst_89 [1] : vector<32x8xf32> to vector<32xf32>
    %238 = vector.shape_cast %237 : vector<32xf32> to vector<32x1xf32>
    %239 = vector.broadcast %238 : vector<32x1xf32> to vector<32x8xf32>
    %240 = arith.subf %236, %239 : vector<32x8xf32>
    %241 = math.exp %240 : vector<32x8xf32>
    %cst_90 = arith.constant dense<0.000000e+00> : vector<32xf32>
    %242 = vector.multi_reduction <add>, %241, %cst_90 [1] : vector<32x8xf32> to vector<32xf32>
    %243 = vector.shape_cast %242 : vector<32xf32> to vector<32x1xf32>
    %244 = tpu.reciprocal %243 : vector<32x1xf32> -> vector<32x1xf32>
    %245 = vector.broadcast %244 : vector<32x1xf32> to vector<32x8xf32>
    %246 = arith.mulf %241, %245 : vector<32x8xf32>
    %247 = arith.truncf %246 : vector<32x8xf32> to vector<32x8xbf16>
    %248 = vector.extract_strided_slice %247 {offsets = [0, 0], sizes = [8, 8], strides = [1, 1]} : vector<32x8xbf16> to vector<8x8xbf16>
    %249 = vector.extract_strided_slice %220 {offsets = [0, 0], sizes = [8, 8], strides = [1, 1]} : vector<8x32xbf16> to vector<8x8xbf16>
    %cst_91 = arith.constant dense<0.000000e+00> : vector<8x8xf32>
    %250 = tpu.matmul %248, %249, %cst_91 {dimension_numbers = #tpu.dot_dimension_numbers<[1], [0], [0], [1], [0, 0, 1, 1], [], []>} : vector<8x8xbf16>, vector<8x8xbf16>, vector<8x8xf32> -> vector<8x8xf32>
    %251 = vector.extract_strided_slice %247 {offsets = [8, 0], sizes = [8, 8], strides = [1, 1]} : vector<32x8xbf16> to vector<8x8xbf16>
    %252 = vector.extract_strided_slice %220 {offsets = [0, 8], sizes = [8, 8], strides = [1, 1]} : vector<8x32xbf16> to vector<8x8xbf16>
    %cst_92 = arith.constant dense<0.000000e+00> : vector<8x8xf32>
    %253 = tpu.matmul %251, %252, %cst_92 {dimension_numbers = #tpu.dot_dimension_numbers<[1], [0], [0], [1], [0, 0, 1, 1], [], []>} : vector<8x8xbf16>, vector<8x8xbf16>, vector<8x8xf32> -> vector<8x8xf32>
    %254 = vector.extract_strided_slice %247 {offsets = [16, 0], sizes = [8, 8], strides = [1, 1]} : vector<32x8xbf16> to vector<8x8xbf16>
    %255 = vector.extract_strided_slice %220 {offsets = [0, 16], sizes = [8, 8], strides = [1, 1]} : vector<8x32xbf16> to vector<8x8xbf16>
    %cst_93 = arith.constant dense<0.000000e+00> : vector<8x8xf32>
    %256 = tpu.matmul %254, %255, %cst_93 {dimension_numbers = #tpu.dot_dimension_numbers<[1], [0], [0], [1], [0, 0, 1, 1], [], []>} : vector<8x8xbf16>, vector<8x8xbf16>, vector<8x8xf32> -> vector<8x8xf32>
    %257 = vector.extract_strided_slice %247 {offsets = [24, 0], sizes = [8, 8], strides = [1, 1]} : vector<32x8xbf16> to vector<8x8xbf16>
    %258 = vector.extract_strided_slice %220 {offsets = [0, 24], sizes = [8, 8], strides = [1, 1]} : vector<8x32xbf16> to vector<8x8xbf16>
    %cst_94 = arith.constant dense<0.000000e+00> : vector<8x8xf32>
    %259 = tpu.matmul %257, %258, %cst_94 {dimension_numbers = #tpu.dot_dimension_numbers<[1], [0], [0], [1], [0, 0, 1, 1], [], []>} : vector<8x8xbf16>, vector<8x8xbf16>, vector<8x8xf32> -> vector<8x8xf32>
    %260 = tpu.concatenate %250, %253, %256, %259 in 1 : vector<8x8xf32>, vector<8x8xf32>, vector<8x8xf32>, vector<8x8xf32> -> vector<8x32xf32>
    %261 = arith.truncf %260 : vector<8x32xf32> to vector<8x32xbf16>
    %cst_95 = arith.constant dense<0.000000e+00> : vector<8x32xf32>
    %262 = tpu.matmul %261, %221, %cst_95 {dimension_numbers = #tpu.dot_dimension_numbers<[1], [0], [0], [1], [0, 0, 1, 1], [], []>} : vector<8x32xbf16>, vector<32x32xbf16>, vector<8x32xf32> -> vector<8x32xf32>
    %263 = arith.addf %262, %3 : vector<8x32xf32>
    %264 = arith.addf %212, %263 : vector<8x32xf32>
    %cst_96 = arith.constant dense<0.000000e+00> : vector<8xf32>
    %265 = vector.multi_reduction <add>, %264, %cst_96 [1] : vector<8x32xf32> to vector<8xf32>
    %266 = vector.shape_cast %265 : vector<8xf32> to vector<8x1xf32>
    %cst_97 = arith.constant 3.200000e+01 : f32
    %267 = vector.broadcast %cst_97 : f32 to vector<8x1xf32>
    %268 = arith.divf %266, %267 : vector<8x1xf32>
    %269 = vector.broadcast %268 : vector<8x1xf32> to vector<8x32xf32>
    %270 = arith.subf %264, %269 : vector<8x32xf32>
    %271 = arith.mulf %270, %270 : vector<8x32xf32>
    %cst_98 = arith.constant dense<0.000000e+00> : vector<8xf32>
    %272 = vector.multi_reduction <add>, %271, %cst_98 [1] : vector<8x32xf32> to vector<8xf32>
    %273 = vector.shape_cast %272 : vector<8xf32> to vector<8x1xf32>
    %cst_99 = arith.constant 3.200000e+01 : f32
    %274 = vector.broadcast %cst_99 : f32 to vector<8x1xf32>
    %275 = arith.divf %273, %274 : vector<8x1xf32>
    %cst_100 = arith.constant 9.99999974E-6 : f32
    %276 = vector.broadcast %cst_100 : f32 to vector<8x1xf32>
    %277 = arith.addf %275, %276 : vector<8x1xf32>
    %278 = math.rsqrt %277 : vector<8x1xf32>
    %279 = vector.broadcast %278 : vector<8x1xf32> to vector<8x32xf32>
    %280 = arith.mulf %270, %279 : vector<8x32xf32>
    %281 = arith.mulf %280, %12 : vector<8x32xf32>
    %282 = arith.addf %281, %15 : vector<8x32xf32>
    %283 = arith.truncf %282 : vector<8x32xf32> to vector<8x32xbf16>
    %c0_101 = arith.constant 0 : index
    %c0_102 = arith.constant 0 : index
    %284 = vector.load %arg5[%c0_101, %c0_102] : memref<32x32xbf16, #tpu.memory_space<vmem>>, vector<32x32xbf16>
    %cst_103 = arith.constant dense<0.000000e+00> : vector<8x32xf32>
    %285 = tpu.matmul %283, %284, %cst_103 {dimension_numbers = #tpu.dot_dimension_numbers<[1], [0], [0], [1], [0, 0, 1, 1], [], []>} : vector<8x32xbf16>, vector<32x32xbf16>, vector<8x32xf32> -> vector<8x32xf32>
    %286 = arith.addf %285, %33 : vector<8x32xf32>
    %287 = arith.truncf %286 : vector<8x32xf32> to vector<8x32xbf16>
    %c0_104 = arith.constant 0 : index
    %c0_105 = arith.constant 0 : index
    %288 = vector.load %arg9[%c0_104, %c0_105] : memref<32x32xbf16, #tpu.memory_space<vmem>>, vector<32x32xbf16>
    %289 = vector.extract_strided_slice %287 {offsets = [0, 0], sizes = [8, 8], strides = [1, 1]} : vector<8x32xbf16> to vector<8x8xbf16>
    %290 = vector.extract_strided_slice %45 {offsets = [0, 0], sizes = [16, 8], strides = [1, 1]} : vector<16x32xbf16> to vector<16x8xbf16>
    %cst_106 = arith.constant dense<0.000000e+00> : vector<8x16xf32>
    %291 = tpu.matmul %289, %290, %cst_106 {dimension_numbers = #tpu.dot_dimension_numbers<[1], [1], [0], [0], [0, 0, 1, 0], [], []>} : vector<8x8xbf16>, vector<16x8xbf16>, vector<8x16xf32> -> vector<8x16xf32>
    %292 = vector.extract_strided_slice %287 {offsets = [0, 8], sizes = [8, 8], strides = [1, 1]} : vector<8x32xbf16> to vector<8x8xbf16>
    %293 = vector.extract_strided_slice %45 {offsets = [0, 8], sizes = [16, 8], strides = [1, 1]} : vector<16x32xbf16> to vector<16x8xbf16>
    %cst_107 = arith.constant dense<0.000000e+00> : vector<8x16xf32>
    %294 = tpu.matmul %292, %293, %cst_107 {dimension_numbers = #tpu.dot_dimension_numbers<[1], [1], [0], [0], [0, 0, 1, 0], [], []>} : vector<8x8xbf16>, vector<16x8xbf16>, vector<8x16xf32> -> vector<8x16xf32>
    %295 = vector.extract_strided_slice %287 {offsets = [0, 16], sizes = [8, 8], strides = [1, 1]} : vector<8x32xbf16> to vector<8x8xbf16>
    %296 = vector.extract_strided_slice %45 {offsets = [0, 16], sizes = [16, 8], strides = [1, 1]} : vector<16x32xbf16> to vector<16x8xbf16>
    %cst_108 = arith.constant dense<0.000000e+00> : vector<8x16xf32>
    %297 = tpu.matmul %295, %296, %cst_108 {dimension_numbers = #tpu.dot_dimension_numbers<[1], [1], [0], [0], [0, 0, 1, 0], [], []>} : vector<8x8xbf16>, vector<16x8xbf16>, vector<8x16xf32> -> vector<8x16xf32>
    %298 = vector.extract_strided_slice %287 {offsets = [0, 24], sizes = [8, 8], strides = [1, 1]} : vector<8x32xbf16> to vector<8x8xbf16>
    %299 = vector.extract_strided_slice %45 {offsets = [0, 24], sizes = [16, 8], strides = [1, 1]} : vector<16x32xbf16> to vector<16x8xbf16>
    %cst_109 = arith.constant dense<0.000000e+00> : vector<8x16xf32>
    %300 = tpu.matmul %298, %299, %cst_109 {dimension_numbers = #tpu.dot_dimension_numbers<[1], [1], [0], [0], [0, 0, 1, 0], [], []>} : vector<8x8xbf16>, vector<16x8xbf16>, vector<8x16xf32> -> vector<8x16xf32>
    %301 = tpu.concatenate %291, %294, %297, %300 in 0 : vector<8x16xf32>, vector<8x16xf32>, vector<8x16xf32>, vector<8x16xf32> -> vector<32x16xf32>
    %cst_110 = arith.constant 0.353553385 : f32
    %302 = vector.broadcast %cst_110 : f32 to vector<32x16xf32>
    %303 = arith.mulf %301, %302 : vector<32x16xf32>
    %cst_111 = arith.constant dense<0xFF800000> : vector<32xf32>
    %304 = vector.multi_reduction <maximumf>, %303, %cst_111 [1] : vector<32x16xf32> to vector<32xf32>
    %305 = vector.shape_cast %304 : vector<32xf32> to vector<32x1xf32>
    %306 = vector.broadcast %305 : vector<32x1xf32> to vector<32x16xf32>
    %307 = arith.subf %303, %306 : vector<32x16xf32>
    %308 = math.exp %307 : vector<32x16xf32>
    %cst_112 = arith.constant dense<0.000000e+00> : vector<32xf32>
    %309 = vector.multi_reduction <add>, %308, %cst_112 [1] : vector<32x16xf32> to vector<32xf32>
    %310 = vector.shape_cast %309 : vector<32xf32> to vector<32x1xf32>
    %311 = tpu.reciprocal %310 : vector<32x1xf32> -> vector<32x1xf32>
    %312 = vector.broadcast %311 : vector<32x1xf32> to vector<32x16xf32>
    %313 = arith.mulf %308, %312 : vector<32x16xf32>
    %314 = arith.truncf %313 : vector<32x16xf32> to vector<32x16xbf16>
    %315 = vector.extract_strided_slice %314 {offsets = [0, 0], sizes = [8, 16], strides = [1, 1]} : vector<32x16xbf16> to vector<8x16xbf16>
    %316 = vector.extract_strided_slice %46 {offsets = [0, 0], sizes = [16, 8], strides = [1, 1]} : vector<16x32xbf16> to vector<16x8xbf16>
    %cst_113 = arith.constant dense<0.000000e+00> : vector<8x8xf32>
    %317 = tpu.matmul %315, %316, %cst_113 {dimension_numbers = #tpu.dot_dimension_numbers<[1], [0], [0], [1], [0, 0, 1, 1], [], []>} : vector<8x16xbf16>, vector<16x8xbf16>, vector<8x8xf32> -> vector<8x8xf32>
    %318 = vector.extract_strided_slice %314 {offsets = [8, 0], sizes = [8, 16], strides = [1, 1]} : vector<32x16xbf16> to vector<8x16xbf16>
    %319 = vector.extract_strided_slice %46 {offsets = [0, 8], sizes = [16, 8], strides = [1, 1]} : vector<16x32xbf16> to vector<16x8xbf16>
    %cst_114 = arith.constant dense<0.000000e+00> : vector<8x8xf32>
    %320 = tpu.matmul %318, %319, %cst_114 {dimension_numbers = #tpu.dot_dimension_numbers<[1], [0], [0], [1], [0, 0, 1, 1], [], []>} : vector<8x16xbf16>, vector<16x8xbf16>, vector<8x8xf32> -> vector<8x8xf32>
    %321 = vector.extract_strided_slice %314 {offsets = [16, 0], sizes = [8, 16], strides = [1, 1]} : vector<32x16xbf16> to vector<8x16xbf16>
    %322 = vector.extract_strided_slice %46 {offsets = [0, 16], sizes = [16, 8], strides = [1, 1]} : vector<16x32xbf16> to vector<16x8xbf16>
    %cst_115 = arith.constant dense<0.000000e+00> : vector<8x8xf32>
    %323 = tpu.matmul %321, %322, %cst_115 {dimension_numbers = #tpu.dot_dimension_numbers<[1], [0], [0], [1], [0, 0, 1, 1], [], []>} : vector<8x16xbf16>, vector<16x8xbf16>, vector<8x8xf32> -> vector<8x8xf32>
    %324 = vector.extract_strided_slice %314 {offsets = [24, 0], sizes = [8, 16], strides = [1, 1]} : vector<32x16xbf16> to vector<8x16xbf16>
    %325 = vector.extract_strided_slice %46 {offsets = [0, 24], sizes = [16, 8], strides = [1, 1]} : vector<16x32xbf16> to vector<16x8xbf16>
    %cst_116 = arith.constant dense<0.000000e+00> : vector<8x8xf32>
    %326 = tpu.matmul %324, %325, %cst_116 {dimension_numbers = #tpu.dot_dimension_numbers<[1], [0], [0], [1], [0, 0, 1, 1], [], []>} : vector<8x16xbf16>, vector<16x8xbf16>, vector<8x8xf32> -> vector<8x8xf32>
    %327 = tpu.concatenate %317, %320, %323, %326 in 1 : vector<8x8xf32>, vector<8x8xf32>, vector<8x8xf32>, vector<8x8xf32> -> vector<8x32xf32>
    %328 = arith.truncf %327 : vector<8x32xf32> to vector<8x32xbf16>
    %cst_117 = arith.constant dense<0.000000e+00> : vector<8x32xf32>
    %329 = tpu.matmul %328, %288, %cst_117 {dimension_numbers = #tpu.dot_dimension_numbers<[1], [0], [0], [1], [0, 0, 1, 1], [], []>} : vector<8x32xbf16>, vector<32x32xbf16>, vector<8x32xf32> -> vector<8x32xf32>
    %330 = arith.addf %329, %6 : vector<8x32xf32>
    %331 = arith.addf %282, %330 : vector<8x32xf32>
    %cst_118 = arith.constant dense<0.000000e+00> : vector<8xf32>
    %332 = vector.multi_reduction <add>, %331, %cst_118 [1] : vector<8x32xf32> to vector<8xf32>
    %333 = vector.shape_cast %332 : vector<8xf32> to vector<8x1xf32>
    %cst_119 = arith.constant 3.200000e+01 : f32
    %334 = vector.broadcast %cst_119 : f32 to vector<8x1xf32>
    %335 = arith.divf %333, %334 : vector<8x1xf32>
    %336 = vector.broadcast %335 : vector<8x1xf32> to vector<8x32xf32>
    %337 = arith.subf %331, %336 : vector<8x32xf32>
    %338 = arith.mulf %337, %337 : vector<8x32xf32>
    %cst_120 = arith.constant dense<0.000000e+00> : vector<8xf32>
    %339 = vector.multi_reduction <add>, %338, %cst_120 [1] : vector<8x32xf32> to vector<8xf32>
    %340 = vector.shape_cast %339 : vector<8xf32> to vector<8x1xf32>
    %cst_121 = arith.constant 3.200000e+01 : f32
    %341 = vector.broadcast %cst_121 : f32 to vector<8x1xf32>
    %342 = arith.divf %340, %341 : vector<8x1xf32>
    %cst_122 = arith.constant 9.99999974E-6 : f32
    %343 = vector.broadcast %cst_122 : f32 to vector<8x1xf32>
    %344 = arith.addf %342, %343 : vector<8x1xf32>
    %345 = math.rsqrt %344 : vector<8x1xf32>
    %346 = vector.broadcast %345 : vector<8x1xf32> to vector<8x32xf32>
    %347 = arith.mulf %337, %346 : vector<8x32xf32>
    %348 = arith.mulf %347, %18 : vector<8x32xf32>
    %349 = arith.addf %348, %21 : vector<8x32xf32>
    %350 = arith.truncf %349 : vector<8x32xf32> to vector<8x32xbf16>
    %c0_123 = arith.constant 0 : index
    %c0_124 = arith.constant 0 : index
    %351 = vector.load %arg10[%c0_123, %c0_124] : memref<32x64xbf16, #tpu.memory_space<vmem>>, vector<32x64xbf16>
    %cst_125 = arith.constant dense<0.000000e+00> : vector<8x64xf32>
    %352 = tpu.matmul %350, %351, %cst_125 {dimension_numbers = #tpu.dot_dimension_numbers<[1], [0], [0], [1], [0, 0, 1, 1], [], []>} : vector<8x32xbf16>, vector<32x64xbf16>, vector<8x64xf32> -> vector<8x64xf32>
    %353 = arith.addf %352, %36 : vector<8x64xf32>
    %cst_126 = arith.constant 0.000000e+00 : f32
    %354 = vector.broadcast %cst_126 : f32 to vector<8x64xf32>
    %355 = arith.maximumf %353, %354 : vector<8x64xf32>
    %356 = arith.truncf %355 : vector<8x64xf32> to vector<8x64xbf16>
    %c0_127 = arith.constant 0 : index
    %c0_128 = arith.constant 0 : index
    %357 = vector.load %arg12[%c0_127, %c0_128] : memref<64x32xbf16, #tpu.memory_space<vmem>>, vector<64x32xbf16>
    %cst_129 = arith.constant dense<0.000000e+00> : vector<8x32xf32>
    %358 = tpu.matmul %356, %357, %cst_129 {dimension_numbers = #tpu.dot_dimension_numbers<[1], [0], [0], [1], [0, 0, 1, 1], [], []>} : vector<8x64xbf16>, vector<64x32xbf16>, vector<8x32xf32> -> vector<8x32xf32>
    %359 = arith.addf %358, %9 : vector<8x32xf32>
    %360 = arith.addf %349, %359 : vector<8x32xf32>
    %cst_130 = arith.constant dense<0.000000e+00> : vector<8xf32>
    %361 = vector.multi_reduction <add>, %360, %cst_130 [1] : vector<8x32xf32> to vector<8xf32>
    %362 = vector.shape_cast %361 : vector<8xf32> to vector<8x1xf32>
    %cst_131 = arith.constant 3.200000e+01 : f32
    %363 = vector.broadcast %cst_131 : f32 to vector<8x1xf32>
    %364 = arith.divf %362, %363 : vector<8x1xf32>
    %365 = vector.broadcast %364 : vector<8x1xf32> to vector<8x32xf32>
    %366 = arith.subf %360, %365 : vector<8x32xf32>
    %367 = arith.mulf %366, %366 : vector<8x32xf32>
    %cst_132 = arith.constant dense<0.000000e+00> : vector<8xf32>
    %368 = vector.multi_reduction <add>, %367, %cst_132 [1] : vector<8x32xf32> to vector<8xf32>
    %369 = vector.shape_cast %368 : vector<8xf32> to vector<8x1xf32>
    %cst_133 = arith.constant 3.200000e+01 : f32
    %370 = vector.broadcast %cst_133 : f32 to vector<8x1xf32>
    %371 = arith.divf %369, %370 : vector<8x1xf32>
    %cst_134 = arith.constant 9.99999974E-6 : f32
    %372 = vector.broadcast %cst_134 : f32 to vector<8x1xf32>
    %373 = arith.addf %371, %372 : vector<8x1xf32>
    %374 = math.rsqrt %373 : vector<8x1xf32>
    %375 = vector.broadcast %374 : vector<8x1xf32> to vector<8x32xf32>
    %376 = arith.mulf %366, %375 : vector<8x32xf32>
    %377 = arith.mulf %376, %24 : vector<8x32xf32>
    %378 = arith.addf %377, %27 : vector<8x32xf32>
    %c2_i32 = arith.constant 2 : i32
    %379 = arith.truncf %378 : vector<8x32xf32> to vector<8x32xbf16>
    %c0_135 = arith.constant 0 : index
    %c0_136 = arith.constant 0 : index
    %380 = vector.load %arg2[%c0_135, %c0_136] : memref<32x96xbf16, #tpu.memory_space<vmem>>, vector<32x96xbf16>
    %cst_137 = arith.constant dense<0.000000e+00> : vector<8x96xf32>
    %381 = tpu.matmul %379, %380, %cst_137 {dimension_numbers = #tpu.dot_dimension_numbers<[1], [0], [0], [1], [0, 0, 1, 1], [], []>} : vector<8x32xbf16>, vector<32x96xbf16>, vector<8x96xf32> -> vector<8x96xf32>
    %382 = arith.addf %381, %30 : vector<8x96xf32>
    %383 = arith.truncf %382 : vector<8x96xf32> to vector<8x96xbf16>
    %384 = vector.extract_strided_slice %383 {offsets = [0, 0], sizes = [8, 32], strides = [1, 1]} : vector<8x96xbf16> to vector<8x32xbf16>
    %385 = vector.extract_strided_slice %383 {offsets = [0, 32], sizes = [8, 32], strides = [1, 1]} : vector<8x96xbf16> to vector<8x32xbf16>
    %386 = vector.extract_strided_slice %383 {offsets = [0, 64], sizes = [8, 32], strides = [1, 1]} : vector<8x96xbf16> to vector<8x32xbf16>
    %c0_138 = arith.constant 0 : index
    %c0_139 = arith.constant 0 : index
    %387 = vector.load %arg4[%c0_138, %c0_139] : memref<32x32xbf16, #tpu.memory_space<vmem>>, vector<32x32xbf16>
    %388 = vector.extract_strided_slice %384 {offsets = [0, 0], sizes = [8, 8], strides = [1, 1]} : vector<8x32xbf16> to vector<8x8xbf16>
    %389 = vector.extract_strided_slice %385 {offsets = [0, 0], sizes = [8, 8], strides = [1, 1]} : vector<8x32xbf16> to vector<8x8xbf16>
    %cst_140 = arith.constant dense<0.000000e+00> : vector<8x8xf32>
    %390 = tpu.matmul %388, %389, %cst_140 {dimension_numbers = #tpu.dot_dimension_numbers<[1], [1], [0], [0], [0, 0, 1, 0], [], []>} : vector<8x8xbf16>, vector<8x8xbf16>, vector<8x8xf32> -> vector<8x8xf32>
    %391 = vector.extract_strided_slice %384 {offsets = [0, 8], sizes = [8, 8], strides = [1, 1]} : vector<8x32xbf16> to vector<8x8xbf16>
    %392 = vector.extract_strided_slice %385 {offsets = [0, 8], sizes = [8, 8], strides = [1, 1]} : vector<8x32xbf16> to vector<8x8xbf16>
    %cst_141 = arith.constant dense<0.000000e+00> : vector<8x8xf32>
    %393 = tpu.matmul %391, %392, %cst_141 {dimension_numbers = #tpu.dot_dimension_numbers<[1], [1], [0], [0], [0, 0, 1, 0], [], []>} : vector<8x8xbf16>, vector<8x8xbf16>, vector<8x8xf32> -> vector<8x8xf32>
    %394 = vector.extract_strided_slice %384 {offsets = [0, 16], sizes = [8, 8], strides = [1, 1]} : vector<8x32xbf16> to vector<8x8xbf16>
    %395 = vector.extract_strided_slice %385 {offsets = [0, 16], sizes = [8, 8], strides = [1, 1]} : vector<8x32xbf16> to vector<8x8xbf16>
    %cst_142 = arith.constant dense<0.000000e+00> : vector<8x8xf32>
    %396 = tpu.matmul %394, %395, %cst_142 {dimension_numbers = #tpu.dot_dimension_numbers<[1], [1], [0], [0], [0, 0, 1, 0], [], []>} : vector<8x8xbf16>, vector<8x8xbf16>, vector<8x8xf32> -> vector<8x8xf32>
    %397 = vector.extract_strided_slice %384 {offsets = [0, 24], sizes = [8, 8], strides = [1, 1]} : vector<8x32xbf16> to vector<8x8xbf16>
    %398 = vector.extract_strided_slice %385 {offsets = [0, 24], sizes = [8, 8], strides = [1, 1]} : vector<8x32xbf16> to vector<8x8xbf16>
    %cst_143 = arith.constant dense<0.000000e+00> : vector<8x8xf32>
    %399 = tpu.matmul %397, %398, %cst_143 {dimension_numbers = #tpu.dot_dimension_numbers<[1], [1], [0], [0], [0, 0, 1, 0], [], []>} : vector<8x8xbf16>, vector<8x8xbf16>, vector<8x8xf32> -> vector<8x8xf32>
    %400 = tpu.concatenate %390, %393, %396, %399 in 0 : vector<8x8xf32>, vector<8x8xf32>, vector<8x8xf32>, vector<8x8xf32> -> vector<32x8xf32>
    %cst_144 = arith.constant 0.353553385 : f32
    %401 = vector.broadcast %cst_144 : f32 to vector<32x8xf32>
    %402 = arith.mulf %400, %401 : vector<32x8xf32>
    %cst_145 = arith.constant dense<0xFF800000> : vector<32xf32>
    %403 = vector.multi_reduction <maximumf>, %402, %cst_145 [1] : vector<32x8xf32> to vector<32xf32>
    %404 = vector.shape_cast %403 : vector<32xf32> to vector<32x1xf32>
    %405 = vector.broadcast %404 : vector<32x1xf32> to vector<32x8xf32>
    %406 = arith.subf %402, %405 : vector<32x8xf32>
    %407 = math.exp %406 : vector<32x8xf32>
    %cst_146 = arith.constant dense<0.000000e+00> : vector<32xf32>
    %408 = vector.multi_reduction <add>, %407, %cst_146 [1] : vector<32x8xf32> to vector<32xf32>
    %409 = vector.shape_cast %408 : vector<32xf32> to vector<32x1xf32>
    %410 = tpu.reciprocal %409 : vector<32x1xf32> -> vector<32x1xf32>
    %411 = vector.broadcast %410 : vector<32x1xf32> to vector<32x8xf32>
    %412 = arith.mulf %407, %411 : vector<32x8xf32>
    %413 = arith.truncf %412 : vector<32x8xf32> to vector<32x8xbf16>
    %414 = vector.extract_strided_slice %413 {offsets = [0, 0], sizes = [8, 8], strides = [1, 1]} : vector<32x8xbf16> to vector<8x8xbf16>
    %415 = vector.extract_strided_slice %386 {offsets = [0, 0], sizes = [8, 8], strides = [1, 1]} : vector<8x32xbf16> to vector<8x8xbf16>
    %cst_147 = arith.constant dense<0.000000e+00> : vector<8x8xf32>
    %416 = tpu.matmul %414, %415, %cst_147 {dimension_numbers = #tpu.dot_dimension_numbers<[1], [0], [0], [1], [0, 0, 1, 1], [], []>} : vector<8x8xbf16>, vector<8x8xbf16>, vector<8x8xf32> -> vector<8x8xf32>
    %417 = vector.extract_strided_slice %413 {offsets = [8, 0], sizes = [8, 8], strides = [1, 1]} : vector<32x8xbf16> to vector<8x8xbf16>
    %418 = vector.extract_strided_slice %386 {offsets = [0, 8], sizes = [8, 8], strides = [1, 1]} : vector<8x32xbf16> to vector<8x8xbf16>
    %cst_148 = arith.constant dense<0.000000e+00> : vector<8x8xf32>
    %419 = tpu.matmul %417, %418, %cst_148 {dimension_numbers = #tpu.dot_dimension_numbers<[1], [0], [0], [1], [0, 0, 1, 1], [], []>} : vector<8x8xbf16>, vector<8x8xbf16>, vector<8x8xf32> -> vector<8x8xf32>
    %420 = vector.extract_strided_slice %413 {offsets = [16, 0], sizes = [8, 8], strides = [1, 1]} : vector<32x8xbf16> to vector<8x8xbf16>
    %421 = vector.extract_strided_slice %386 {offsets = [0, 16], sizes = [8, 8], strides = [1, 1]} : vector<8x32xbf16> to vector<8x8xbf16>
    %cst_149 = arith.constant dense<0.000000e+00> : vector<8x8xf32>
    %422 = tpu.matmul %420, %421, %cst_149 {dimension_numbers = #tpu.dot_dimension_numbers<[1], [0], [0], [1], [0, 0, 1, 1], [], []>} : vector<8x8xbf16>, vector<8x8xbf16>, vector<8x8xf32> -> vector<8x8xf32>
    %423 = vector.extract_strided_slice %413 {offsets = [24, 0], sizes = [8, 8], strides = [1, 1]} : vector<32x8xbf16> to vector<8x8xbf16>
    %424 = vector.extract_strided_slice %386 {offsets = [0, 24], sizes = [8, 8], strides = [1, 1]} : vector<8x32xbf16> to vector<8x8xbf16>
    %cst_150 = arith.constant dense<0.000000e+00> : vector<8x8xf32>
    %425 = tpu.matmul %423, %424, %cst_150 {dimension_numbers = #tpu.dot_dimension_numbers<[1], [0], [0], [1], [0, 0, 1, 1], [], []>} : vector<8x8xbf16>, vector<8x8xbf16>, vector<8x8xf32> -> vector<8x8xf32>
    %426 = tpu.concatenate %416, %419, %422, %425 in 1 : vector<8x8xf32>, vector<8x8xf32>, vector<8x8xf32>, vector<8x8xf32> -> vector<8x32xf32>
    %427 = arith.truncf %426 : vector<8x32xf32> to vector<8x32xbf16>
    %cst_151 = arith.constant dense<0.000000e+00> : vector<8x32xf32>
    %428 = tpu.matmul %427, %387, %cst_151 {dimension_numbers = #tpu.dot_dimension_numbers<[1], [0], [0], [1], [0, 0, 1, 1], [], []>} : vector<8x32xbf16>, vector<32x32xbf16>, vector<8x32xf32> -> vector<8x32xf32>
    %429 = arith.addf %428, %3 : vector<8x32xf32>
    %430 = arith.addf %378, %429 : vector<8x32xf32>
    %cst_152 = arith.constant dense<0.000000e+00> : vector<8xf32>
    %431 = vector.multi_reduction <add>, %430, %cst_152 [1] : vector<8x32xf32> to vector<8xf32>
    %432 = vector.shape_cast %431 : vector<8xf32> to vector<8x1xf32>
    %cst_153 = arith.constant 3.200000e+01 : f32
    %433 = vector.broadcast %cst_153 : f32 to vector<8x1xf32>
    %434 = arith.divf %432, %433 : vector<8x1xf32>
    %435 = vector.broadcast %434 : vector<8x1xf32> to vector<8x32xf32>
    %436 = arith.subf %430, %435 : vector<8x32xf32>
    %437 = arith.mulf %436, %436 : vector<8x32xf32>
    %cst_154 = arith.constant dense<0.000000e+00> : vector<8xf32>
    %438 = vector.multi_reduction <add>, %437, %cst_154 [1] : vector<8x32xf32> to vector<8xf32>
    %439 = vector.shape_cast %438 : vector<8xf32> to vector<8x1xf32>
    %cst_155 = arith.constant 3.200000e+01 : f32
    %440 = vector.broadcast %cst_155 : f32 to vector<8x1xf32>
    %441 = arith.divf %439, %440 : vector<8x1xf32>
    %cst_156 = arith.constant 9.99999974E-6 : f32
    %442 = vector.broadcast %cst_156 : f32 to vector<8x1xf32>
    %443 = arith.addf %441, %442 : vector<8x1xf32>
    %444 = math.rsqrt %443 : vector<8x1xf32>
    %445 = vector.broadcast %444 : vector<8x1xf32> to vector<8x32xf32>
    %446 = arith.mulf %436, %445 : vector<8x32xf32>
    %447 = arith.mulf %446, %12 : vector<8x32xf32>
    %448 = arith.addf %447, %15 : vector<8x32xf32>
    %449 = arith.truncf %448 : vector<8x32xf32> to vector<8x32xbf16>
    %c0_157 = arith.constant 0 : index
    %c0_158 = arith.constant 0 : index
    %450 = vector.load %arg5[%c0_157, %c0_158] : memref<32x32xbf16, #tpu.memory_space<vmem>>, vector<32x32xbf16>
    %cst_159 = arith.constant dense<0.000000e+00> : vector<8x32xf32>
    %451 = tpu.matmul %449, %450, %cst_159 {dimension_numbers = #tpu.dot_dimension_numbers<[1], [0], [0], [1], [0, 0, 1, 1], [], []>} : vector<8x32xbf16>, vector<32x32xbf16>, vector<8x32xf32> -> vector<8x32xf32>
    %452 = arith.addf %451, %33 : vector<8x32xf32>
    %453 = arith.truncf %452 : vector<8x32xf32> to vector<8x32xbf16>
    %c0_160 = arith.constant 0 : index
    %c0_161 = arith.constant 0 : index
    %454 = vector.load %arg9[%c0_160, %c0_161] : memref<32x32xbf16, #tpu.memory_space<vmem>>, vector<32x32xbf16>
    %455 = vector.extract_strided_slice %453 {offsets = [0, 0], sizes = [8, 8], strides = [1, 1]} : vector<8x32xbf16> to vector<8x8xbf16>
    %456 = vector.extract_strided_slice %45 {offsets = [0, 0], sizes = [16, 8], strides = [1, 1]} : vector<16x32xbf16> to vector<16x8xbf16>
    %cst_162 = arith.constant dense<0.000000e+00> : vector<8x16xf32>
    %457 = tpu.matmul %455, %456, %cst_162 {dimension_numbers = #tpu.dot_dimension_numbers<[1], [1], [0], [0], [0, 0, 1, 0], [], []>} : vector<8x8xbf16>, vector<16x8xbf16>, vector<8x16xf32> -> vector<8x16xf32>
    %458 = vector.extract_strided_slice %453 {offsets = [0, 8], sizes = [8, 8], strides = [1, 1]} : vector<8x32xbf16> to vector<8x8xbf16>
    %459 = vector.extract_strided_slice %45 {offsets = [0, 8], sizes = [16, 8], strides = [1, 1]} : vector<16x32xbf16> to vector<16x8xbf16>
    %cst_163 = arith.constant dense<0.000000e+00> : vector<8x16xf32>
    %460 = tpu.matmul %458, %459, %cst_163 {dimension_numbers = #tpu.dot_dimension_numbers<[1], [1], [0], [0], [0, 0, 1, 0], [], []>} : vector<8x8xbf16>, vector<16x8xbf16>, vector<8x16xf32> -> vector<8x16xf32>
    %461 = vector.extract_strided_slice %453 {offsets = [0, 16], sizes = [8, 8], strides = [1, 1]} : vector<8x32xbf16> to vector<8x8xbf16>
    %462 = vector.extract_strided_slice %45 {offsets = [0, 16], sizes = [16, 8], strides = [1, 1]} : vector<16x32xbf16> to vector<16x8xbf16>
    %cst_164 = arith.constant dense<0.000000e+00> : vector<8x16xf32>
    %463 = tpu.matmul %461, %462, %cst_164 {dimension_numbers = #tpu.dot_dimension_numbers<[1], [1], [0], [0], [0, 0, 1, 0], [], []>} : vector<8x8xbf16>, vector<16x8xbf16>, vector<8x16xf32> -> vector<8x16xf32>
    %464 = vector.extract_strided_slice %453 {offsets = [0, 24], sizes = [8, 8], strides = [1, 1]} : vector<8x32xbf16> to vector<8x8xbf16>
    %465 = vector.extract_strided_slice %45 {offsets = [0, 24], sizes = [16, 8], strides = [1, 1]} : vector<16x32xbf16> to vector<16x8xbf16>
    %cst_165 = arith.constant dense<0.000000e+00> : vector<8x16xf32>
    %466 = tpu.matmul %464, %465, %cst_165 {dimension_numbers = #tpu.dot_dimension_numbers<[1], [1], [0], [0], [0, 0, 1, 0], [], []>} : vector<8x8xbf16>, vector<16x8xbf16>, vector<8x16xf32> -> vector<8x16xf32>
    %467 = tpu.concatenate %457, %460, %463, %466 in 0 : vector<8x16xf32>, vector<8x16xf32>, vector<8x16xf32>, vector<8x16xf32> -> vector<32x16xf32>
    %cst_166 = arith.constant 0.353553385 : f32
    %468 = vector.broadcast %cst_166 : f32 to vector<32x16xf32>
    %469 = arith.mulf %467, %468 : vector<32x16xf32>
    %cst_167 = arith.constant dense<0xFF800000> : vector<32xf32>
    %470 = vector.multi_reduction <maximumf>, %469, %cst_167 [1] : vector<32x16xf32> to vector<32xf32>
    %471 = vector.shape_cast %470 : vector<32xf32> to vector<32x1xf32>
    %472 = vector.broadcast %471 : vector<32x1xf32> to vector<32x16xf32>
    %473 = arith.subf %469, %472 : vector<32x16xf32>
    %474 = math.exp %473 : vector<32x16xf32>
    %cst_168 = arith.constant dense<0.000000e+00> : vector<32xf32>
    %475 = vector.multi_reduction <add>, %474, %cst_168 [1] : vector<32x16xf32> to vector<32xf32>
    %476 = vector.shape_cast %475 : vector<32xf32> to vector<32x1xf32>
    %477 = tpu.reciprocal %476 : vector<32x1xf32> -> vector<32x1xf32>
    %478 = vector.broadcast %477 : vector<32x1xf32> to vector<32x16xf32>
    %479 = arith.mulf %474, %478 : vector<32x16xf32>
    %480 = arith.truncf %479 : vector<32x16xf32> to vector<32x16xbf16>
    %481 = vector.extract_strided_slice %480 {offsets = [0, 0], sizes = [8, 16], strides = [1, 1]} : vector<32x16xbf16> to vector<8x16xbf16>
    %482 = vector.extract_strided_slice %46 {offsets = [0, 0], sizes = [16, 8], strides = [1, 1]} : vector<16x32xbf16> to vector<16x8xbf16>
    %cst_169 = arith.constant dense<0.000000e+00> : vector<8x8xf32>
    %483 = tpu.matmul %481, %482, %cst_169 {dimension_numbers = #tpu.dot_dimension_numbers<[1], [0], [0], [1], [0, 0, 1, 1], [], []>} : vector<8x16xbf16>, vector<16x8xbf16>, vector<8x8xf32> -> vector<8x8xf32>
    %484 = vector.extract_strided_slice %480 {offsets = [8, 0], sizes = [8, 16], strides = [1, 1]} : vector<32x16xbf16> to vector<8x16xbf16>
    %485 = vector.extract_strided_slice %46 {offsets = [0, 8], sizes = [16, 8], strides = [1, 1]} : vector<16x32xbf16> to vector<16x8xbf16>
    %cst_170 = arith.constant dense<0.000000e+00> : vector<8x8xf32>
    %486 = tpu.matmul %484, %485, %cst_170 {dimension_numbers = #tpu.dot_dimension_numbers<[1], [0], [0], [1], [0, 0, 1, 1], [], []>} : vector<8x16xbf16>, vector<16x8xbf16>, vector<8x8xf32> -> vector<8x8xf32>
    %487 = vector.extract_strided_slice %480 {offsets = [16, 0], sizes = [8, 16], strides = [1, 1]} : vector<32x16xbf16> to vector<8x16xbf16>
    %488 = vector.extract_strided_slice %46 {offsets = [0, 16], sizes = [16, 8], strides = [1, 1]} : vector<16x32xbf16> to vector<16x8xbf16>
    %cst_171 = arith.constant dense<0.000000e+00> : vector<8x8xf32>
    %489 = tpu.matmul %487, %488, %cst_171 {dimension_numbers = #tpu.dot_dimension_numbers<[1], [0], [0], [1], [0, 0, 1, 1], [], []>} : vector<8x16xbf16>, vector<16x8xbf16>, vector<8x8xf32> -> vector<8x8xf32>
    %490 = vector.extract_strided_slice %480 {offsets = [24, 0], sizes = [8, 16], strides = [1, 1]} : vector<32x16xbf16> to vector<8x16xbf16>
    %491 = vector.extract_strided_slice %46 {offsets = [0, 24], sizes = [16, 8], strides = [1, 1]} : vector<16x32xbf16> to vector<16x8xbf16>
    %cst_172 = arith.constant dense<0.000000e+00> : vector<8x8xf32>
    %492 = tpu.matmul %490, %491, %cst_172 {dimension_numbers = #tpu.dot_dimension_numbers<[1], [0], [0], [1], [0, 0, 1, 1], [], []>} : vector<8x16xbf16>, vector<16x8xbf16>, vector<8x8xf32> -> vector<8x8xf32>
    %493 = tpu.concatenate %483, %486, %489, %492 in 1 : vector<8x8xf32>, vector<8x8xf32>, vector<8x8xf32>, vector<8x8xf32> -> vector<8x32xf32>
    %494 = arith.truncf %493 : vector<8x32xf32> to vector<8x32xbf16>
    %cst_173 = arith.constant dense<0.000000e+00> : vector<8x32xf32>
    %495 = tpu.matmul %494, %454, %cst_173 {dimension_numbers = #tpu.dot_dimension_numbers<[1], [0], [0], [1], [0, 0, 1, 1], [], []>} : vector<8x32xbf16>, vector<32x32xbf16>, vector<8x32xf32> -> vector<8x32xf32>
    %496 = arith.addf %495, %6 : vector<8x32xf32>
    %497 = arith.addf %448, %496 : vector<8x32xf32>
    %cst_174 = arith.constant dense<0.000000e+00> : vector<8xf32>
    %498 = vector.multi_reduction <add>, %497, %cst_174 [1] : vector<8x32xf32> to vector<8xf32>
    %499 = vector.shape_cast %498 : vector<8xf32> to vector<8x1xf32>
    %cst_175 = arith.constant 3.200000e+01 : f32
    %500 = vector.broadcast %cst_175 : f32 to vector<8x1xf32>
    %501 = arith.divf %499, %500 : vector<8x1xf32>
    %502 = vector.broadcast %501 : vector<8x1xf32> to vector<8x32xf32>
    %503 = arith.subf %497, %502 : vector<8x32xf32>
    %504 = arith.mulf %503, %503 : vector<8x32xf32>
    %cst_176 = arith.constant dense<0.000000e+00> : vector<8xf32>
    %505 = vector.multi_reduction <add>, %504, %cst_176 [1] : vector<8x32xf32> to vector<8xf32>
    %506 = vector.shape_cast %505 : vector<8xf32> to vector<8x1xf32>
    %cst_177 = arith.constant 3.200000e+01 : f32
    %507 = vector.broadcast %cst_177 : f32 to vector<8x1xf32>
    %508 = arith.divf %506, %507 : vector<8x1xf32>
    %cst_178 = arith.constant 9.99999974E-6 : f32
    %509 = vector.broadcast %cst_178 : f32 to vector<8x1xf32>
    %510 = arith.addf %508, %509 : vector<8x1xf32>
    %511 = math.rsqrt %510 : vector<8x1xf32>
    %512 = vector.broadcast %511 : vector<8x1xf32> to vector<8x32xf32>
    %513 = arith.mulf %503, %512 : vector<8x32xf32>
    %514 = arith.mulf %513, %18 : vector<8x32xf32>
    %515 = arith.addf %514, %21 : vector<8x32xf32>
    %516 = arith.truncf %515 : vector<8x32xf32> to vector<8x32xbf16>
    %c0_179 = arith.constant 0 : index
    %c0_180 = arith.constant 0 : index
    %517 = vector.load %arg10[%c0_179, %c0_180] : memref<32x64xbf16, #tpu.memory_space<vmem>>, vector<32x64xbf16>
    %cst_181 = arith.constant dense<0.000000e+00> : vector<8x64xf32>
    %518 = tpu.matmul %516, %517, %cst_181 {dimension_numbers = #tpu.dot_dimension_numbers<[1], [0], [0], [1], [0, 0, 1, 1], [], []>} : vector<8x32xbf16>, vector<32x64xbf16>, vector<8x64xf32> -> vector<8x64xf32>
    %519 = arith.addf %518, %36 : vector<8x64xf32>
    %cst_182 = arith.constant 0.000000e+00 : f32
    %520 = vector.broadcast %cst_182 : f32 to vector<8x64xf32>
    %521 = arith.maximumf %519, %520 : vector<8x64xf32>
    %522 = arith.truncf %521 : vector<8x64xf32> to vector<8x64xbf16>
    %c0_183 = arith.constant 0 : index
    %c0_184 = arith.constant 0 : index
    %523 = vector.load %arg12[%c0_183, %c0_184] : memref<64x32xbf16, #tpu.memory_space<vmem>>, vector<64x32xbf16>
    %cst_185 = arith.constant dense<0.000000e+00> : vector<8x32xf32>
    %524 = tpu.matmul %522, %523, %cst_185 {dimension_numbers = #tpu.dot_dimension_numbers<[1], [0], [0], [1], [0, 0, 1, 1], [], []>} : vector<8x64xbf16>, vector<64x32xbf16>, vector<8x32xf32> -> vector<8x32xf32>
    %525 = arith.addf %524, %9 : vector<8x32xf32>
    %526 = arith.addf %515, %525 : vector<8x32xf32>
    %cst_186 = arith.constant dense<0.000000e+00> : vector<8xf32>
    %527 = vector.multi_reduction <add>, %526, %cst_186 [1] : vector<8x32xf32> to vector<8xf32>
    %528 = vector.shape_cast %527 : vector<8xf32> to vector<8x1xf32>
    %cst_187 = arith.constant 3.200000e+01 : f32
    %529 = vector.broadcast %cst_187 : f32 to vector<8x1xf32>
    %530 = arith.divf %528, %529 : vector<8x1xf32>
    %531 = vector.broadcast %530 : vector<8x1xf32> to vector<8x32xf32>
    %532 = arith.subf %526, %531 : vector<8x32xf32>
    %533 = arith.mulf %532, %532 : vector<8x32xf32>
    %cst_188 = arith.constant dense<0.000000e+00> : vector<8xf32>
    %534 = vector.multi_reduction <add>, %533, %cst_188 [1] : vector<8x32xf32> to vector<8xf32>
    %535 = vector.shape_cast %534 : vector<8xf32> to vector<8x1xf32>
    %cst_189 = arith.constant 3.200000e+01 : f32
    %536 = vector.broadcast %cst_189 : f32 to vector<8x1xf32>
    %537 = arith.divf %535, %536 : vector<8x1xf32>
    %cst_190 = arith.constant 9.99999974E-6 : f32
    %538 = vector.broadcast %cst_190 : f32 to vector<8x1xf32>
    %539 = arith.addf %537, %538 : vector<8x1xf32>
    %540 = math.rsqrt %539 : vector<8x1xf32>
    %541 = vector.broadcast %540 : vector<8x1xf32> to vector<8x32xf32>
    %542 = arith.mulf %532, %541 : vector<8x32xf32>
    %543 = arith.mulf %542, %24 : vector<8x32xf32>
    %544 = arith.addf %543, %27 : vector<8x32xf32>
    %c3_i32 = arith.constant 3 : i32
    %545 = arith.truncf %544 : vector<8x32xf32> to vector<8x32xbf16>
    %c0_191 = arith.constant 0 : index
    %c0_192 = arith.constant 0 : index
    %546 = vector.load %arg2[%c0_191, %c0_192] : memref<32x96xbf16, #tpu.memory_space<vmem>>, vector<32x96xbf16>
    %cst_193 = arith.constant dense<0.000000e+00> : vector<8x96xf32>
    %547 = tpu.matmul %545, %546, %cst_193 {dimension_numbers = #tpu.dot_dimension_numbers<[1], [0], [0], [1], [0, 0, 1, 1], [], []>} : vector<8x32xbf16>, vector<32x96xbf16>, vector<8x96xf32> -> vector<8x96xf32>
    %548 = arith.addf %547, %30 : vector<8x96xf32>
    %549 = arith.truncf %548 : vector<8x96xf32> to vector<8x96xbf16>
    %550 = vector.extract_strided_slice %549 {offsets = [0, 0], sizes = [8, 32], strides = [1, 1]} : vector<8x96xbf16> to vector<8x32xbf16>
    %551 = vector.extract_strided_slice %549 {offsets = [0, 32], sizes = [8, 32], strides = [1, 1]} : vector<8x96xbf16> to vector<8x32xbf16>
    %552 = vector.extract_strided_slice %549 {offsets = [0, 64], sizes = [8, 32], strides = [1, 1]} : vector<8x96xbf16> to vector<8x32xbf16>
    %c0_194 = arith.constant 0 : index
    %c0_195 = arith.constant 0 : index
    %553 = vector.load %arg4[%c0_194, %c0_195] : memref<32x32xbf16, #tpu.memory_space<vmem>>, vector<32x32xbf16>
    %554 = vector.extract_strided_slice %550 {offsets = [0, 0], sizes = [8, 8], strides = [1, 1]} : vector<8x32xbf16> to vector<8x8xbf16>
    %555 = vector.extract_strided_slice %551 {offsets = [0, 0], sizes = [8, 8], strides = [1, 1]} : vector<8x32xbf16> to vector<8x8xbf16>
    %cst_196 = arith.constant dense<0.000000e+00> : vector<8x8xf32>
    %556 = tpu.matmul %554, %555, %cst_196 {dimension_numbers = #tpu.dot_dimension_numbers<[1], [1], [0], [0], [0, 0, 1, 0], [], []>} : vector<8x8xbf16>, vector<8x8xbf16>, vector<8x8xf32> -> vector<8x8xf32>
    %557 = vector.extract_strided_slice %550 {offsets = [0, 8], sizes = [8, 8], strides = [1, 1]} : vector<8x32xbf16> to vector<8x8xbf16>
    %558 = vector.extract_strided_slice %551 {offsets = [0, 8], sizes = [8, 8], strides = [1, 1]} : vector<8x32xbf16> to vector<8x8xbf16>
    %cst_197 = arith.constant dense<0.000000e+00> : vector<8x8xf32>
    %559 = tpu.matmul %557, %558, %cst_197 {dimension_numbers = #tpu.dot_dimension_numbers<[1], [1], [0], [0], [0, 0, 1, 0], [], []>} : vector<8x8xbf16>, vector<8x8xbf16>, vector<8x8xf32> -> vector<8x8xf32>
    %560 = vector.extract_strided_slice %550 {offsets = [0, 16], sizes = [8, 8], strides = [1, 1]} : vector<8x32xbf16> to vector<8x8xbf16>
    %561 = vector.extract_strided_slice %551 {offsets = [0, 16], sizes = [8, 8], strides = [1, 1]} : vector<8x32xbf16> to vector<8x8xbf16>
    %cst_198 = arith.constant dense<0.000000e+00> : vector<8x8xf32>
    %562 = tpu.matmul %560, %561, %cst_198 {dimension_numbers = #tpu.dot_dimension_numbers<[1], [1], [0], [0], [0, 0, 1, 0], [], []>} : vector<8x8xbf16>, vector<8x8xbf16>, vector<8x8xf32> -> vector<8x8xf32>
    %563 = vector.extract_strided_slice %550 {offsets = [0, 24], sizes = [8, 8], strides = [1, 1]} : vector<8x32xbf16> to vector<8x8xbf16>
    %564 = vector.extract_strided_slice %551 {offsets = [0, 24], sizes = [8, 8], strides = [1, 1]} : vector<8x32xbf16> to vector<8x8xbf16>
    %cst_199 = arith.constant dense<0.000000e+00> : vector<8x8xf32>
    %565 = tpu.matmul %563, %564, %cst_199 {dimension_numbers = #tpu.dot_dimension_numbers<[1], [1], [0], [0], [0, 0, 1, 0], [], []>} : vector<8x8xbf16>, vector<8x8xbf16>, vector<8x8xf32> -> vector<8x8xf32>
    %566 = tpu.concatenate %556, %559, %562, %565 in 0 : vector<8x8xf32>, vector<8x8xf32>, vector<8x8xf32>, vector<8x8xf32> -> vector<32x8xf32>
    %cst_200 = arith.constant 0.353553385 : f32
    %567 = vector.broadcast %cst_200 : f32 to vector<32x8xf32>
    %568 = arith.mulf %566, %567 : vector<32x8xf32>
    %cst_201 = arith.constant dense<0xFF800000> : vector<32xf32>
    %569 = vector.multi_reduction <maximumf>, %568, %cst_201 [1] : vector<32x8xf32> to vector<32xf32>
    %570 = vector.shape_cast %569 : vector<32xf32> to vector<32x1xf32>
    %571 = vector.broadcast %570 : vector<32x1xf32> to vector<32x8xf32>
    %572 = arith.subf %568, %571 : vector<32x8xf32>
    %573 = math.exp %572 : vector<32x8xf32>
    %cst_202 = arith.constant dense<0.000000e+00> : vector<32xf32>
    %574 = vector.multi_reduction <add>, %573, %cst_202 [1] : vector<32x8xf32> to vector<32xf32>
    %575 = vector.shape_cast %574 : vector<32xf32> to vector<32x1xf32>
    %576 = tpu.reciprocal %575 : vector<32x1xf32> -> vector<32x1xf32>
    %577 = vector.broadcast %576 : vector<32x1xf32> to vector<32x8xf32>
    %578 = arith.mulf %573, %577 : vector<32x8xf32>
    %579 = arith.truncf %578 : vector<32x8xf32> to vector<32x8xbf16>
    %580 = vector.extract_strided_slice %579 {offsets = [0, 0], sizes = [8, 8], strides = [1, 1]} : vector<32x8xbf16> to vector<8x8xbf16>
    %581 = vector.extract_strided_slice %552 {offsets = [0, 0], sizes = [8, 8], strides = [1, 1]} : vector<8x32xbf16> to vector<8x8xbf16>
    %cst_203 = arith.constant dense<0.000000e+00> : vector<8x8xf32>
    %582 = tpu.matmul %580, %581, %cst_203 {dimension_numbers = #tpu.dot_dimension_numbers<[1], [0], [0], [1], [0, 0, 1, 1], [], []>} : vector<8x8xbf16>, vector<8x8xbf16>, vector<8x8xf32> -> vector<8x8xf32>
    %583 = vector.extract_strided_slice %579 {offsets = [8, 0], sizes = [8, 8], strides = [1, 1]} : vector<32x8xbf16> to vector<8x8xbf16>
    %584 = vector.extract_strided_slice %552 {offsets = [0, 8], sizes = [8, 8], strides = [1, 1]} : vector<8x32xbf16> to vector<8x8xbf16>
    %cst_204 = arith.constant dense<0.000000e+00> : vector<8x8xf32>
    %585 = tpu.matmul %583, %584, %cst_204 {dimension_numbers = #tpu.dot_dimension_numbers<[1], [0], [0], [1], [0, 0, 1, 1], [], []>} : vector<8x8xbf16>, vector<8x8xbf16>, vector<8x8xf32> -> vector<8x8xf32>
    %586 = vector.extract_strided_slice %579 {offsets = [16, 0], sizes = [8, 8], strides = [1, 1]} : vector<32x8xbf16> to vector<8x8xbf16>
    %587 = vector.extract_strided_slice %552 {offsets = [0, 16], sizes = [8, 8], strides = [1, 1]} : vector<8x32xbf16> to vector<8x8xbf16>
    %cst_205 = arith.constant dense<0.000000e+00> : vector<8x8xf32>
    %588 = tpu.matmul %586, %587, %cst_205 {dimension_numbers = #tpu.dot_dimension_numbers<[1], [0], [0], [1], [0, 0, 1, 1], [], []>} : vector<8x8xbf16>, vector<8x8xbf16>, vector<8x8xf32> -> vector<8x8xf32>
    %589 = vector.extract_strided_slice %579 {offsets = [24, 0], sizes = [8, 8], strides = [1, 1]} : vector<32x8xbf16> to vector<8x8xbf16>
    %590 = vector.extract_strided_slice %552 {offsets = [0, 24], sizes = [8, 8], strides = [1, 1]} : vector<8x32xbf16> to vector<8x8xbf16>
    %cst_206 = arith.constant dense<0.000000e+00> : vector<8x8xf32>
    %591 = tpu.matmul %589, %590, %cst_206 {dimension_numbers = #tpu.dot_dimension_numbers<[1], [0], [0], [1], [0, 0, 1, 1], [], []>} : vector<8x8xbf16>, vector<8x8xbf16>, vector<8x8xf32> -> vector<8x8xf32>
    %592 = tpu.concatenate %582, %585, %588, %591 in 1 : vector<8x8xf32>, vector<8x8xf32>, vector<8x8xf32>, vector<8x8xf32> -> vector<8x32xf32>
    %593 = arith.truncf %592 : vector<8x32xf32> to vector<8x32xbf16>
    %cst_207 = arith.constant dense<0.000000e+00> : vector<8x32xf32>
    %594 = tpu.matmul %593, %553, %cst_207 {dimension_numbers = #tpu.dot_dimension_numbers<[1], [0], [0], [1], [0, 0, 1, 1], [], []>} : vector<8x32xbf16>, vector<32x32xbf16>, vector<8x32xf32> -> vector<8x32xf32>
    %595 = arith.addf %594, %3 : vector<8x32xf32>
    %596 = arith.addf %544, %595 : vector<8x32xf32>
    %cst_208 = arith.constant dense<0.000000e+00> : vector<8xf32>
    %597 = vector.multi_reduction <add>, %596, %cst_208 [1] : vector<8x32xf32> to vector<8xf32>
    %598 = vector.shape_cast %597 : vector<8xf32> to vector<8x1xf32>
    %cst_209 = arith.constant 3.200000e+01 : f32
    %599 = vector.broadcast %cst_209 : f32 to vector<8x1xf32>
    %600 = arith.divf %598, %599 : vector<8x1xf32>
    %601 = vector.broadcast %600 : vector<8x1xf32> to vector<8x32xf32>
    %602 = arith.subf %596, %601 : vector<8x32xf32>
    %603 = arith.mulf %602, %602 : vector<8x32xf32>
    %cst_210 = arith.constant dense<0.000000e+00> : vector<8xf32>
    %604 = vector.multi_reduction <add>, %603, %cst_210 [1] : vector<8x32xf32> to vector<8xf32>
    %605 = vector.shape_cast %604 : vector<8xf32> to vector<8x1xf32>
    %cst_211 = arith.constant 3.200000e+01 : f32
    %606 = vector.broadcast %cst_211 : f32 to vector<8x1xf32>
    %607 = arith.divf %605, %606 : vector<8x1xf32>
    %cst_212 = arith.constant 9.99999974E-6 : f32
    %608 = vector.broadcast %cst_212 : f32 to vector<8x1xf32>
    %609 = arith.addf %607, %608 : vector<8x1xf32>
    %610 = math.rsqrt %609 : vector<8x1xf32>
    %611 = vector.broadcast %610 : vector<8x1xf32> to vector<8x32xf32>
    %612 = arith.mulf %602, %611 : vector<8x32xf32>
    %613 = arith.mulf %612, %12 : vector<8x32xf32>
    %614 = arith.addf %613, %15 : vector<8x32xf32>
    %615 = arith.truncf %614 : vector<8x32xf32> to vector<8x32xbf16>
    %c0_213 = arith.constant 0 : index
    %c0_214 = arith.constant 0 : index
    %616 = vector.load %arg5[%c0_213, %c0_214] : memref<32x32xbf16, #tpu.memory_space<vmem>>, vector<32x32xbf16>
    %cst_215 = arith.constant dense<0.000000e+00> : vector<8x32xf32>
    %617 = tpu.matmul %615, %616, %cst_215 {dimension_numbers = #tpu.dot_dimension_numbers<[1], [0], [0], [1], [0, 0, 1, 1], [], []>} : vector<8x32xbf16>, vector<32x32xbf16>, vector<8x32xf32> -> vector<8x32xf32>
    %618 = arith.addf %617, %33 : vector<8x32xf32>
    %619 = arith.truncf %618 : vector<8x32xf32> to vector<8x32xbf16>
    %c0_216 = arith.constant 0 : index
    %c0_217 = arith.constant 0 : index
    %620 = vector.load %arg9[%c0_216, %c0_217] : memref<32x32xbf16, #tpu.memory_space<vmem>>, vector<32x32xbf16>
    %621 = vector.extract_strided_slice %619 {offsets = [0, 0], sizes = [8, 8], strides = [1, 1]} : vector<8x32xbf16> to vector<8x8xbf16>
    %622 = vector.extract_strided_slice %45 {offsets = [0, 0], sizes = [16, 8], strides = [1, 1]} : vector<16x32xbf16> to vector<16x8xbf16>
    %cst_218 = arith.constant dense<0.000000e+00> : vector<8x16xf32>
    %623 = tpu.matmul %621, %622, %cst_218 {dimension_numbers = #tpu.dot_dimension_numbers<[1], [1], [0], [0], [0, 0, 1, 0], [], []>} : vector<8x8xbf16>, vector<16x8xbf16>, vector<8x16xf32> -> vector<8x16xf32>
    %624 = vector.extract_strided_slice %619 {offsets = [0, 8], sizes = [8, 8], strides = [1, 1]} : vector<8x32xbf16> to vector<8x8xbf16>
    %625 = vector.extract_strided_slice %45 {offsets = [0, 8], sizes = [16, 8], strides = [1, 1]} : vector<16x32xbf16> to vector<16x8xbf16>
    %cst_219 = arith.constant dense<0.000000e+00> : vector<8x16xf32>
    %626 = tpu.matmul %624, %625, %cst_219 {dimension_numbers = #tpu.dot_dimension_numbers<[1], [1], [0], [0], [0, 0, 1, 0], [], []>} : vector<8x8xbf16>, vector<16x8xbf16>, vector<8x16xf32> -> vector<8x16xf32>
    %627 = vector.extract_strided_slice %619 {offsets = [0, 16], sizes = [8, 8], strides = [1, 1]} : vector<8x32xbf16> to vector<8x8xbf16>
    %628 = vector.extract_strided_slice %45 {offsets = [0, 16], sizes = [16, 8], strides = [1, 1]} : vector<16x32xbf16> to vector<16x8xbf16>
    %cst_220 = arith.constant dense<0.000000e+00> : vector<8x16xf32>
    %629 = tpu.matmul %627, %628, %cst_220 {dimension_numbers = #tpu.dot_dimension_numbers<[1], [1], [0], [0], [0, 0, 1, 0], [], []>} : vector<8x8xbf16>, vector<16x8xbf16>, vector<8x16xf32> -> vector<8x16xf32>
    %630 = vector.extract_strided_slice %619 {offsets = [0, 24], sizes = [8, 8], strides = [1, 1]} : vector<8x32xbf16> to vector<8x8xbf16>
    %631 = vector.extract_strided_slice %45 {offsets = [0, 24], sizes = [16, 8], strides = [1, 1]} : vector<16x32xbf16> to vector<16x8xbf16>
    %cst_221 = arith.constant dense<0.000000e+00> : vector<8x16xf32>
    %632 = tpu.matmul %630, %631, %cst_221 {dimension_numbers = #tpu.dot_dimension_numbers<[1], [1], [0], [0], [0, 0, 1, 0], [], []>} : vector<8x8xbf16>, vector<16x8xbf16>, vector<8x16xf32> -> vector<8x16xf32>
    %633 = tpu.concatenate %623, %626, %629, %632 in 0 : vector<8x16xf32>, vector<8x16xf32>, vector<8x16xf32>, vector<8x16xf32> -> vector<32x16xf32>
    %cst_222 = arith.constant 0.353553385 : f32
    %634 = vector.broadcast %cst_222 : f32 to vector<32x16xf32>
    %635 = arith.mulf %633, %634 : vector<32x16xf32>
    %cst_223 = arith.constant dense<0xFF800000> : vector<32xf32>
    %636 = vector.multi_reduction <maximumf>, %635, %cst_223 [1] : vector<32x16xf32> to vector<32xf32>
    %637 = vector.shape_cast %636 : vector<32xf32> to vector<32x1xf32>
    %638 = vector.broadcast %637 : vector<32x1xf32> to vector<32x16xf32>
    %639 = arith.subf %635, %638 : vector<32x16xf32>
    %640 = math.exp %639 : vector<32x16xf32>
    %cst_224 = arith.constant dense<0.000000e+00> : vector<32xf32>
    %641 = vector.multi_reduction <add>, %640, %cst_224 [1] : vector<32x16xf32> to vector<32xf32>
    %642 = vector.shape_cast %641 : vector<32xf32> to vector<32x1xf32>
    %643 = tpu.reciprocal %642 : vector<32x1xf32> -> vector<32x1xf32>
    %644 = vector.broadcast %643 : vector<32x1xf32> to vector<32x16xf32>
    %645 = arith.mulf %640, %644 : vector<32x16xf32>
    %646 = arith.truncf %645 : vector<32x16xf32> to vector<32x16xbf16>
    %647 = vector.extract_strided_slice %646 {offsets = [0, 0], sizes = [8, 16], strides = [1, 1]} : vector<32x16xbf16> to vector<8x16xbf16>
    %648 = vector.extract_strided_slice %46 {offsets = [0, 0], sizes = [16, 8], strides = [1, 1]} : vector<16x32xbf16> to vector<16x8xbf16>
    %cst_225 = arith.constant dense<0.000000e+00> : vector<8x8xf32>
    %649 = tpu.matmul %647, %648, %cst_225 {dimension_numbers = #tpu.dot_dimension_numbers<[1], [0], [0], [1], [0, 0, 1, 1], [], []>} : vector<8x16xbf16>, vector<16x8xbf16>, vector<8x8xf32> -> vector<8x8xf32>
    %650 = vector.extract_strided_slice %646 {offsets = [8, 0], sizes = [8, 16], strides = [1, 1]} : vector<32x16xbf16> to vector<8x16xbf16>
    %651 = vector.extract_strided_slice %46 {offsets = [0, 8], sizes = [16, 8], strides = [1, 1]} : vector<16x32xbf16> to vector<16x8xbf16>
    %cst_226 = arith.constant dense<0.000000e+00> : vector<8x8xf32>
    %652 = tpu.matmul %650, %651, %cst_226 {dimension_numbers = #tpu.dot_dimension_numbers<[1], [0], [0], [1], [0, 0, 1, 1], [], []>} : vector<8x16xbf16>, vector<16x8xbf16>, vector<8x8xf32> -> vector<8x8xf32>
    %653 = vector.extract_strided_slice %646 {offsets = [16, 0], sizes = [8, 16], strides = [1, 1]} : vector<32x16xbf16> to vector<8x16xbf16>
    %654 = vector.extract_strided_slice %46 {offsets = [0, 16], sizes = [16, 8], strides = [1, 1]} : vector<16x32xbf16> to vector<16x8xbf16>
    %cst_227 = arith.constant dense<0.000000e+00> : vector<8x8xf32>
    %655 = tpu.matmul %653, %654, %cst_227 {dimension_numbers = #tpu.dot_dimension_numbers<[1], [0], [0], [1], [0, 0, 1, 1], [], []>} : vector<8x16xbf16>, vector<16x8xbf16>, vector<8x8xf32> -> vector<8x8xf32>
    %656 = vector.extract_strided_slice %646 {offsets = [24, 0], sizes = [8, 16], strides = [1, 1]} : vector<32x16xbf16> to vector<8x16xbf16>
    %657 = vector.extract_strided_slice %46 {offsets = [0, 24], sizes = [16, 8], strides = [1, 1]} : vector<16x32xbf16> to vector<16x8xbf16>
    %cst_228 = arith.constant dense<0.000000e+00> : vector<8x8xf32>
    %658 = tpu.matmul %656, %657, %cst_228 {dimension_numbers = #tpu.dot_dimension_numbers<[1], [0], [0], [1], [0, 0, 1, 1], [], []>} : vector<8x16xbf16>, vector<16x8xbf16>, vector<8x8xf32> -> vector<8x8xf32>
    %659 = tpu.concatenate %649, %652, %655, %658 in 1 : vector<8x8xf32>, vector<8x8xf32>, vector<8x8xf32>, vector<8x8xf32> -> vector<8x32xf32>
    %660 = arith.truncf %659 : vector<8x32xf32> to vector<8x32xbf16>
    %cst_229 = arith.constant dense<0.000000e+00> : vector<8x32xf32>
    %661 = tpu.matmul %660, %620, %cst_229 {dimension_numbers = #tpu.dot_dimension_numbers<[1], [0], [0], [1], [0, 0, 1, 1], [], []>} : vector<8x32xbf16>, vector<32x32xbf16>, vector<8x32xf32> -> vector<8x32xf32>
    %662 = arith.addf %661, %6 : vector<8x32xf32>
    %663 = arith.addf %614, %662 : vector<8x32xf32>
    %cst_230 = arith.constant dense<0.000000e+00> : vector<8xf32>
    %664 = vector.multi_reduction <add>, %663, %cst_230 [1] : vector<8x32xf32> to vector<8xf32>
    %665 = vector.shape_cast %664 : vector<8xf32> to vector<8x1xf32>
    %cst_231 = arith.constant 3.200000e+01 : f32
    %666 = vector.broadcast %cst_231 : f32 to vector<8x1xf32>
    %667 = arith.divf %665, %666 : vector<8x1xf32>
    %668 = vector.broadcast %667 : vector<8x1xf32> to vector<8x32xf32>
    %669 = arith.subf %663, %668 : vector<8x32xf32>
    %670 = arith.mulf %669, %669 : vector<8x32xf32>
    %cst_232 = arith.constant dense<0.000000e+00> : vector<8xf32>
    %671 = vector.multi_reduction <add>, %670, %cst_232 [1] : vector<8x32xf32> to vector<8xf32>
    %672 = vector.shape_cast %671 : vector<8xf32> to vector<8x1xf32>
    %cst_233 = arith.constant 3.200000e+01 : f32
    %673 = vector.broadcast %cst_233 : f32 to vector<8x1xf32>
    %674 = arith.divf %672, %673 : vector<8x1xf32>
    %cst_234 = arith.constant 9.99999974E-6 : f32
    %675 = vector.broadcast %cst_234 : f32 to vector<8x1xf32>
    %676 = arith.addf %674, %675 : vector<8x1xf32>
    %677 = math.rsqrt %676 : vector<8x1xf32>
    %678 = vector.broadcast %677 : vector<8x1xf32> to vector<8x32xf32>
    %679 = arith.mulf %669, %678 : vector<8x32xf32>
    %680 = arith.mulf %679, %18 : vector<8x32xf32>
    %681 = arith.addf %680, %21 : vector<8x32xf32>
    %682 = arith.truncf %681 : vector<8x32xf32> to vector<8x32xbf16>
    %c0_235 = arith.constant 0 : index
    %c0_236 = arith.constant 0 : index
    %683 = vector.load %arg10[%c0_235, %c0_236] : memref<32x64xbf16, #tpu.memory_space<vmem>>, vector<32x64xbf16>
    %cst_237 = arith.constant dense<0.000000e+00> : vector<8x64xf32>
    %684 = tpu.matmul %682, %683, %cst_237 {dimension_numbers = #tpu.dot_dimension_numbers<[1], [0], [0], [1], [0, 0, 1, 1], [], []>} : vector<8x32xbf16>, vector<32x64xbf16>, vector<8x64xf32> -> vector<8x64xf32>
    %685 = arith.addf %684, %36 : vector<8x64xf32>
    %cst_238 = arith.constant 0.000000e+00 : f32
    %686 = vector.broadcast %cst_238 : f32 to vector<8x64xf32>
    %687 = arith.maximumf %685, %686 : vector<8x64xf32>
    %688 = arith.truncf %687 : vector<8x64xf32> to vector<8x64xbf16>
    %c0_239 = arith.constant 0 : index
    %c0_240 = arith.constant 0 : index
    %689 = vector.load %arg12[%c0_239, %c0_240] : memref<64x32xbf16, #tpu.memory_space<vmem>>, vector<64x32xbf16>
    %cst_241 = arith.constant dense<0.000000e+00> : vector<8x32xf32>
    %690 = tpu.matmul %688, %689, %cst_241 {dimension_numbers = #tpu.dot_dimension_numbers<[1], [0], [0], [1], [0, 0, 1, 1], [], []>} : vector<8x64xbf16>, vector<64x32xbf16>, vector<8x32xf32> -> vector<8x32xf32>
    %691 = arith.addf %690, %9 : vector<8x32xf32>
    %692 = arith.addf %681, %691 : vector<8x32xf32>
    %cst_242 = arith.constant dense<0.000000e+00> : vector<8xf32>
    %693 = vector.multi_reduction <add>, %692, %cst_242 [1] : vector<8x32xf32> to vector<8xf32>
    %694 = vector.shape_cast %693 : vector<8xf32> to vector<8x1xf32>
    %cst_243 = arith.constant 3.200000e+01 : f32
    %695 = vector.broadcast %cst_243 : f32 to vector<8x1xf32>
    %696 = arith.divf %694, %695 : vector<8x1xf32>
    %697 = vector.broadcast %696 : vector<8x1xf32> to vector<8x32xf32>
    %698 = arith.subf %692, %697 : vector<8x32xf32>
    %699 = arith.mulf %698, %698 : vector<8x32xf32>
    %cst_244 = arith.constant dense<0.000000e+00> : vector<8xf32>
    %700 = vector.multi_reduction <add>, %699, %cst_244 [1] : vector<8x32xf32> to vector<8xf32>
    %701 = vector.shape_cast %700 : vector<8xf32> to vector<8x1xf32>
    %cst_245 = arith.constant 3.200000e+01 : f32
    %702 = vector.broadcast %cst_245 : f32 to vector<8x1xf32>
    %703 = arith.divf %701, %702 : vector<8x1xf32>
    %cst_246 = arith.constant 9.99999974E-6 : f32
    %704 = vector.broadcast %cst_246 : f32 to vector<8x1xf32>
    %705 = arith.addf %703, %704 : vector<8x1xf32>
    %706 = math.rsqrt %705 : vector<8x1xf32>
    %707 = vector.broadcast %706 : vector<8x1xf32> to vector<8x32xf32>
    %708 = arith.mulf %698, %707 : vector<8x32xf32>
    %709 = arith.mulf %708, %24 : vector<8x32xf32>
    %710 = arith.addf %709, %27 : vector<8x32xf32>
    %c4_i32 = arith.constant 4 : i32
    %711 = arith.truncf %710 : vector<8x32xf32> to vector<8x32xbf16>
    %c0_247 = arith.constant 0 : index
    %c0_248 = arith.constant 0 : index
    %712 = vector.load %arg2[%c0_247, %c0_248] : memref<32x96xbf16, #tpu.memory_space<vmem>>, vector<32x96xbf16>
    %cst_249 = arith.constant dense<0.000000e+00> : vector<8x96xf32>
    %713 = tpu.matmul %711, %712, %cst_249 {dimension_numbers = #tpu.dot_dimension_numbers<[1], [0], [0], [1], [0, 0, 1, 1], [], []>} : vector<8x32xbf16>, vector<32x96xbf16>, vector<8x96xf32> -> vector<8x96xf32>
    %714 = arith.addf %713, %30 : vector<8x96xf32>
    %715 = arith.truncf %714 : vector<8x96xf32> to vector<8x96xbf16>
    %716 = vector.extract_strided_slice %715 {offsets = [0, 0], sizes = [8, 32], strides = [1, 1]} : vector<8x96xbf16> to vector<8x32xbf16>
    %717 = vector.extract_strided_slice %715 {offsets = [0, 32], sizes = [8, 32], strides = [1, 1]} : vector<8x96xbf16> to vector<8x32xbf16>
    %718 = vector.extract_strided_slice %715 {offsets = [0, 64], sizes = [8, 32], strides = [1, 1]} : vector<8x96xbf16> to vector<8x32xbf16>
    %c0_250 = arith.constant 0 : index
    %c0_251 = arith.constant 0 : index
    %719 = vector.load %arg4[%c0_250, %c0_251] : memref<32x32xbf16, #tpu.memory_space<vmem>>, vector<32x32xbf16>
    %720 = vector.extract_strided_slice %716 {offsets = [0, 0], sizes = [8, 8], strides = [1, 1]} : vector<8x32xbf16> to vector<8x8xbf16>
    %721 = vector.extract_strided_slice %717 {offsets = [0, 0], sizes = [8, 8], strides = [1, 1]} : vector<8x32xbf16> to vector<8x8xbf16>
    %cst_252 = arith.constant dense<0.000000e+00> : vector<8x8xf32>
    %722 = tpu.matmul %720, %721, %cst_252 {dimension_numbers = #tpu.dot_dimension_numbers<[1], [1], [0], [0], [0, 0, 1, 0], [], []>} : vector<8x8xbf16>, vector<8x8xbf16>, vector<8x8xf32> -> vector<8x8xf32>
    %723 = vector.extract_strided_slice %716 {offsets = [0, 8], sizes = [8, 8], strides = [1, 1]} : vector<8x32xbf16> to vector<8x8xbf16>
    %724 = vector.extract_strided_slice %717 {offsets = [0, 8], sizes = [8, 8], strides = [1, 1]} : vector<8x32xbf16> to vector<8x8xbf16>
    %cst_253 = arith.constant dense<0.000000e+00> : vector<8x8xf32>
    %725 = tpu.matmul %723, %724, %cst_253 {dimension_numbers = #tpu.dot_dimension_numbers<[1], [1], [0], [0], [0, 0, 1, 0], [], []>} : vector<8x8xbf16>, vector<8x8xbf16>, vector<8x8xf32> -> vector<8x8xf32>
    %726 = vector.extract_strided_slice %716 {offsets = [0, 16], sizes = [8, 8], strides = [1, 1]} : vector<8x32xbf16> to vector<8x8xbf16>
    %727 = vector.extract_strided_slice %717 {offsets = [0, 16], sizes = [8, 8], strides = [1, 1]} : vector<8x32xbf16> to vector<8x8xbf16>
    %cst_254 = arith.constant dense<0.000000e+00> : vector<8x8xf32>
    %728 = tpu.matmul %726, %727, %cst_254 {dimension_numbers = #tpu.dot_dimension_numbers<[1], [1], [0], [0], [0, 0, 1, 0], [], []>} : vector<8x8xbf16>, vector<8x8xbf16>, vector<8x8xf32> -> vector<8x8xf32>
    %729 = vector.extract_strided_slice %716 {offsets = [0, 24], sizes = [8, 8], strides = [1, 1]} : vector<8x32xbf16> to vector<8x8xbf16>
    %730 = vector.extract_strided_slice %717 {offsets = [0, 24], sizes = [8, 8], strides = [1, 1]} : vector<8x32xbf16> to vector<8x8xbf16>
    %cst_255 = arith.constant dense<0.000000e+00> : vector<8x8xf32>
    %731 = tpu.matmul %729, %730, %cst_255 {dimension_numbers = #tpu.dot_dimension_numbers<[1], [1], [0], [0], [0, 0, 1, 0], [], []>} : vector<8x8xbf16>, vector<8x8xbf16>, vector<8x8xf32> -> vector<8x8xf32>
    %732 = tpu.concatenate %722, %725, %728, %731 in 0 : vector<8x8xf32>, vector<8x8xf32>, vector<8x8xf32>, vector<8x8xf32> -> vector<32x8xf32>
    %cst_256 = arith.constant 0.353553385 : f32
    %733 = vector.broadcast %cst_256 : f32 to vector<32x8xf32>
    %734 = arith.mulf %732, %733 : vector<32x8xf32>
    %cst_257 = arith.constant dense<0xFF800000> : vector<32xf32>
    %735 = vector.multi_reduction <maximumf>, %734, %cst_257 [1] : vector<32x8xf32> to vector<32xf32>
    %736 = vector.shape_cast %735 : vector<32xf32> to vector<32x1xf32>
    %737 = vector.broadcast %736 : vector<32x1xf32> to vector<32x8xf32>
    %738 = arith.subf %734, %737 : vector<32x8xf32>
    %739 = math.exp %738 : vector<32x8xf32>
    %cst_258 = arith.constant dense<0.000000e+00> : vector<32xf32>
    %740 = vector.multi_reduction <add>, %739, %cst_258 [1] : vector<32x8xf32> to vector<32xf32>
    %741 = vector.shape_cast %740 : vector<32xf32> to vector<32x1xf32>
    %742 = tpu.reciprocal %741 : vector<32x1xf32> -> vector<32x1xf32>
    %743 = vector.broadcast %742 : vector<32x1xf32> to vector<32x8xf32>
    %744 = arith.mulf %739, %743 : vector<32x8xf32>
    %745 = arith.truncf %744 : vector<32x8xf32> to vector<32x8xbf16>
    %746 = vector.extract_strided_slice %745 {offsets = [0, 0], sizes = [8, 8], strides = [1, 1]} : vector<32x8xbf16> to vector<8x8xbf16>
    %747 = vector.extract_strided_slice %718 {offsets = [0, 0], sizes = [8, 8], strides = [1, 1]} : vector<8x32xbf16> to vector<8x8xbf16>
    %cst_259 = arith.constant dense<0.000000e+00> : vector<8x8xf32>
    %748 = tpu.matmul %746, %747, %cst_259 {dimension_numbers = #tpu.dot_dimension_numbers<[1], [0], [0], [1], [0, 0, 1, 1], [], []>} : vector<8x8xbf16>, vector<8x8xbf16>, vector<8x8xf32> -> vector<8x8xf32>
    %749 = vector.extract_strided_slice %745 {offsets = [8, 0], sizes = [8, 8], strides = [1, 1]} : vector<32x8xbf16> to vector<8x8xbf16>
    %750 = vector.extract_strided_slice %718 {offsets = [0, 8], sizes = [8, 8], strides = [1, 1]} : vector<8x32xbf16> to vector<8x8xbf16>
    %cst_260 = arith.constant dense<0.000000e+00> : vector<8x8xf32>
    %751 = tpu.matmul %749, %750, %cst_260 {dimension_numbers = #tpu.dot_dimension_numbers<[1], [0], [0], [1], [0, 0, 1, 1], [], []>} : vector<8x8xbf16>, vector<8x8xbf16>, vector<8x8xf32> -> vector<8x8xf32>
    %752 = vector.extract_strided_slice %745 {offsets = [16, 0], sizes = [8, 8], strides = [1, 1]} : vector<32x8xbf16> to vector<8x8xbf16>
    %753 = vector.extract_strided_slice %718 {offsets = [0, 16], sizes = [8, 8], strides = [1, 1]} : vector<8x32xbf16> to vector<8x8xbf16>
    %cst_261 = arith.constant dense<0.000000e+00> : vector<8x8xf32>
    %754 = tpu.matmul %752, %753, %cst_261 {dimension_numbers = #tpu.dot_dimension_numbers<[1], [0], [0], [1], [0, 0, 1, 1], [], []>} : vector<8x8xbf16>, vector<8x8xbf16>, vector<8x8xf32> -> vector<8x8xf32>
    %755 = vector.extract_strided_slice %745 {offsets = [24, 0], sizes = [8, 8], strides = [1, 1]} : vector<32x8xbf16> to vector<8x8xbf16>
    %756 = vector.extract_strided_slice %718 {offsets = [0, 24], sizes = [8, 8], strides = [1, 1]} : vector<8x32xbf16> to vector<8x8xbf16>
    %cst_262 = arith.constant dense<0.000000e+00> : vector<8x8xf32>
    %757 = tpu.matmul %755, %756, %cst_262 {dimension_numbers = #tpu.dot_dimension_numbers<[1], [0], [0], [1], [0, 0, 1, 1], [], []>} : vector<8x8xbf16>, vector<8x8xbf16>, vector<8x8xf32> -> vector<8x8xf32>
    %758 = tpu.concatenate %748, %751, %754, %757 in 1 : vector<8x8xf32>, vector<8x8xf32>, vector<8x8xf32>, vector<8x8xf32> -> vector<8x32xf32>
    %759 = arith.truncf %758 : vector<8x32xf32> to vector<8x32xbf16>
    %cst_263 = arith.constant dense<0.000000e+00> : vector<8x32xf32>
    %760 = tpu.matmul %759, %719, %cst_263 {dimension_numbers = #tpu.dot_dimension_numbers<[1], [0], [0], [1], [0, 0, 1, 1], [], []>} : vector<8x32xbf16>, vector<32x32xbf16>, vector<8x32xf32> -> vector<8x32xf32>
    %761 = arith.addf %760, %3 : vector<8x32xf32>
    %762 = arith.addf %710, %761 : vector<8x32xf32>
    %cst_264 = arith.constant dense<0.000000e+00> : vector<8xf32>
    %763 = vector.multi_reduction <add>, %762, %cst_264 [1] : vector<8x32xf32> to vector<8xf32>
    %764 = vector.shape_cast %763 : vector<8xf32> to vector<8x1xf32>
    %cst_265 = arith.constant 3.200000e+01 : f32
    %765 = vector.broadcast %cst_265 : f32 to vector<8x1xf32>
    %766 = arith.divf %764, %765 : vector<8x1xf32>
    %767 = vector.broadcast %766 : vector<8x1xf32> to vector<8x32xf32>
    %768 = arith.subf %762, %767 : vector<8x32xf32>
    %769 = arith.mulf %768, %768 : vector<8x32xf32>
    %cst_266 = arith.constant dense<0.000000e+00> : vector<8xf32>
    %770 = vector.multi_reduction <add>, %769, %cst_266 [1] : vector<8x32xf32> to vector<8xf32>
    %771 = vector.shape_cast %770 : vector<8xf32> to vector<8x1xf32>
    %cst_267 = arith.constant 3.200000e+01 : f32
    %772 = vector.broadcast %cst_267 : f32 to vector<8x1xf32>
    %773 = arith.divf %771, %772 : vector<8x1xf32>
    %cst_268 = arith.constant 9.99999974E-6 : f32
    %774 = vector.broadcast %cst_268 : f32 to vector<8x1xf32>
    %775 = arith.addf %773, %774 : vector<8x1xf32>
    %776 = math.rsqrt %775 : vector<8x1xf32>
    %777 = vector.broadcast %776 : vector<8x1xf32> to vector<8x32xf32>
    %778 = arith.mulf %768, %777 : vector<8x32xf32>
    %779 = arith.mulf %778, %12 : vector<8x32xf32>
    %780 = arith.addf %779, %15 : vector<8x32xf32>
    %781 = arith.truncf %780 : vector<8x32xf32> to vector<8x32xbf16>
    %c0_269 = arith.constant 0 : index
    %c0_270 = arith.constant 0 : index
    %782 = vector.load %arg5[%c0_269, %c0_270] : memref<32x32xbf16, #tpu.memory_space<vmem>>, vector<32x32xbf16>
    %cst_271 = arith.constant dense<0.000000e+00> : vector<8x32xf32>
    %783 = tpu.matmul %781, %782, %cst_271 {dimension_numbers = #tpu.dot_dimension_numbers<[1], [0], [0], [1], [0, 0, 1, 1], [], []>} : vector<8x32xbf16>, vector<32x32xbf16>, vector<8x32xf32> -> vector<8x32xf32>
    %784 = arith.addf %783, %33 : vector<8x32xf32>
    %785 = arith.truncf %784 : vector<8x32xf32> to vector<8x32xbf16>
    %c0_272 = arith.constant 0 : index
    %c0_273 = arith.constant 0 : index
    %786 = vector.load %arg9[%c0_272, %c0_273] : memref<32x32xbf16, #tpu.memory_space<vmem>>, vector<32x32xbf16>
    %787 = vector.extract_strided_slice %785 {offsets = [0, 0], sizes = [8, 8], strides = [1, 1]} : vector<8x32xbf16> to vector<8x8xbf16>
    %788 = vector.extract_strided_slice %45 {offsets = [0, 0], sizes = [16, 8], strides = [1, 1]} : vector<16x32xbf16> to vector<16x8xbf16>
    %cst_274 = arith.constant dense<0.000000e+00> : vector<8x16xf32>
    %789 = tpu.matmul %787, %788, %cst_274 {dimension_numbers = #tpu.dot_dimension_numbers<[1], [1], [0], [0], [0, 0, 1, 0], [], []>} : vector<8x8xbf16>, vector<16x8xbf16>, vector<8x16xf32> -> vector<8x16xf32>
    %790 = vector.extract_strided_slice %785 {offsets = [0, 8], sizes = [8, 8], strides = [1, 1]} : vector<8x32xbf16> to vector<8x8xbf16>
    %791 = vector.extract_strided_slice %45 {offsets = [0, 8], sizes = [16, 8], strides = [1, 1]} : vector<16x32xbf16> to vector<16x8xbf16>
    %cst_275 = arith.constant dense<0.000000e+00> : vector<8x16xf32>
    %792 = tpu.matmul %790, %791, %cst_275 {dimension_numbers = #tpu.dot_dimension_numbers<[1], [1], [0], [0], [0, 0, 1, 0], [], []>} : vector<8x8xbf16>, vector<16x8xbf16>, vector<8x16xf32> -> vector<8x16xf32>
    %793 = vector.extract_strided_slice %785 {offsets = [0, 16], sizes = [8, 8], strides = [1, 1]} : vector<8x32xbf16> to vector<8x8xbf16>
    %794 = vector.extract_strided_slice %45 {offsets = [0, 16], sizes = [16, 8], strides = [1, 1]} : vector<16x32xbf16> to vector<16x8xbf16>
    %cst_276 = arith.constant dense<0.000000e+00> : vector<8x16xf32>
    %795 = tpu.matmul %793, %794, %cst_276 {dimension_numbers = #tpu.dot_dimension_numbers<[1], [1], [0], [0], [0, 0, 1, 0], [], []>} : vector<8x8xbf16>, vector<16x8xbf16>, vector<8x16xf32> -> vector<8x16xf32>
    %796 = vector.extract_strided_slice %785 {offsets = [0, 24], sizes = [8, 8], strides = [1, 1]} : vector<8x32xbf16> to vector<8x8xbf16>
    %797 = vector.extract_strided_slice %45 {offsets = [0, 24], sizes = [16, 8], strides = [1, 1]} : vector<16x32xbf16> to vector<16x8xbf16>
    %cst_277 = arith.constant dense<0.000000e+00> : vector<8x16xf32>
    %798 = tpu.matmul %796, %797, %cst_277 {dimension_numbers = #tpu.dot_dimension_numbers<[1], [1], [0], [0], [0, 0, 1, 0], [], []>} : vector<8x8xbf16>, vector<16x8xbf16>, vector<8x16xf32> -> vector<8x16xf32>
    %799 = tpu.concatenate %789, %792, %795, %798 in 0 : vector<8x16xf32>, vector<8x16xf32>, vector<8x16xf32>, vector<8x16xf32> -> vector<32x16xf32>
    %cst_278 = arith.constant 0.353553385 : f32
    %800 = vector.broadcast %cst_278 : f32 to vector<32x16xf32>
    %801 = arith.mulf %799, %800 : vector<32x16xf32>
    %cst_279 = arith.constant dense<0xFF800000> : vector<32xf32>
    %802 = vector.multi_reduction <maximumf>, %801, %cst_279 [1] : vector<32x16xf32> to vector<32xf32>
    %803 = vector.shape_cast %802 : vector<32xf32> to vector<32x1xf32>
    %804 = vector.broadcast %803 : vector<32x1xf32> to vector<32x16xf32>
    %805 = arith.subf %801, %804 : vector<32x16xf32>
    %806 = math.exp %805 : vector<32x16xf32>
    %cst_280 = arith.constant dense<0.000000e+00> : vector<32xf32>
    %807 = vector.multi_reduction <add>, %806, %cst_280 [1] : vector<32x16xf32> to vector<32xf32>
    %808 = vector.shape_cast %807 : vector<32xf32> to vector<32x1xf32>
    %809 = tpu.reciprocal %808 : vector<32x1xf32> -> vector<32x1xf32>
    %810 = vector.broadcast %809 : vector<32x1xf32> to vector<32x16xf32>
    %811 = arith.mulf %806, %810 : vector<32x16xf32>
    %812 = arith.truncf %811 : vector<32x16xf32> to vector<32x16xbf16>
    %813 = vector.extract_strided_slice %812 {offsets = [0, 0], sizes = [8, 16], strides = [1, 1]} : vector<32x16xbf16> to vector<8x16xbf16>
    %814 = vector.extract_strided_slice %46 {offsets = [0, 0], sizes = [16, 8], strides = [1, 1]} : vector<16x32xbf16> to vector<16x8xbf16>
    %cst_281 = arith.constant dense<0.000000e+00> : vector<8x8xf32>
    %815 = tpu.matmul %813, %814, %cst_281 {dimension_numbers = #tpu.dot_dimension_numbers<[1], [0], [0], [1], [0, 0, 1, 1], [], []>} : vector<8x16xbf16>, vector<16x8xbf16>, vector<8x8xf32> -> vector<8x8xf32>
    %816 = vector.extract_strided_slice %812 {offsets = [8, 0], sizes = [8, 16], strides = [1, 1]} : vector<32x16xbf16> to vector<8x16xbf16>
    %817 = vector.extract_strided_slice %46 {offsets = [0, 8], sizes = [16, 8], strides = [1, 1]} : vector<16x32xbf16> to vector<16x8xbf16>
    %cst_282 = arith.constant dense<0.000000e+00> : vector<8x8xf32>
    %818 = tpu.matmul %816, %817, %cst_282 {dimension_numbers = #tpu.dot_dimension_numbers<[1], [0], [0], [1], [0, 0, 1, 1], [], []>} : vector<8x16xbf16>, vector<16x8xbf16>, vector<8x8xf32> -> vector<8x8xf32>
    %819 = vector.extract_strided_slice %812 {offsets = [16, 0], sizes = [8, 16], strides = [1, 1]} : vector<32x16xbf16> to vector<8x16xbf16>
    %820 = vector.extract_strided_slice %46 {offsets = [0, 16], sizes = [16, 8], strides = [1, 1]} : vector<16x32xbf16> to vector<16x8xbf16>
    %cst_283 = arith.constant dense<0.000000e+00> : vector<8x8xf32>
    %821 = tpu.matmul %819, %820, %cst_283 {dimension_numbers = #tpu.dot_dimension_numbers<[1], [0], [0], [1], [0, 0, 1, 1], [], []>} : vector<8x16xbf16>, vector<16x8xbf16>, vector<8x8xf32> -> vector<8x8xf32>
    %822 = vector.extract_strided_slice %812 {offsets = [24, 0], sizes = [8, 16], strides = [1, 1]} : vector<32x16xbf16> to vector<8x16xbf16>
    %823 = vector.extract_strided_slice %46 {offsets = [0, 24], sizes = [16, 8], strides = [1, 1]} : vector<16x32xbf16> to vector<16x8xbf16>
    %cst_284 = arith.constant dense<0.000000e+00> : vector<8x8xf32>
    %824 = tpu.matmul %822, %823, %cst_284 {dimension_numbers = #tpu.dot_dimension_numbers<[1], [0], [0], [1], [0, 0, 1, 1], [], []>} : vector<8x16xbf16>, vector<16x8xbf16>, vector<8x8xf32> -> vector<8x8xf32>
    %825 = tpu.concatenate %815, %818, %821, %824 in 1 : vector<8x8xf32>, vector<8x8xf32>, vector<8x8xf32>, vector<8x8xf32> -> vector<8x32xf32>
    %826 = arith.truncf %825 : vector<8x32xf32> to vector<8x32xbf16>
    %cst_285 = arith.constant dense<0.000000e+00> : vector<8x32xf32>
    %827 = tpu.matmul %826, %786, %cst_285 {dimension_numbers = #tpu.dot_dimension_numbers<[1], [0], [0], [1], [0, 0, 1, 1], [], []>} : vector<8x32xbf16>, vector<32x32xbf16>, vector<8x32xf32> -> vector<8x32xf32>
    %828 = arith.addf %827, %6 : vector<8x32xf32>
    %829 = arith.addf %780, %828 : vector<8x32xf32>
    %cst_286 = arith.constant dense<0.000000e+00> : vector<8xf32>
    %830 = vector.multi_reduction <add>, %829, %cst_286 [1] : vector<8x32xf32> to vector<8xf32>
    %831 = vector.shape_cast %830 : vector<8xf32> to vector<8x1xf32>
    %cst_287 = arith.constant 3.200000e+01 : f32
    %832 = vector.broadcast %cst_287 : f32 to vector<8x1xf32>
    %833 = arith.divf %831, %832 : vector<8x1xf32>
    %834 = vector.broadcast %833 : vector<8x1xf32> to vector<8x32xf32>
    %835 = arith.subf %829, %834 : vector<8x32xf32>
    %836 = arith.mulf %835, %835 : vector<8x32xf32>
    %cst_288 = arith.constant dense<0.000000e+00> : vector<8xf32>
    %837 = vector.multi_reduction <add>, %836, %cst_288 [1] : vector<8x32xf32> to vector<8xf32>
    %838 = vector.shape_cast %837 : vector<8xf32> to vector<8x1xf32>
    %cst_289 = arith.constant 3.200000e+01 : f32
    %839 = vector.broadcast %cst_289 : f32 to vector<8x1xf32>
    %840 = arith.divf %838, %839 : vector<8x1xf32>
    %cst_290 = arith.constant 9.99999974E-6 : f32
    %841 = vector.broadcast %cst_290 : f32 to vector<8x1xf32>
    %842 = arith.addf %840, %841 : vector<8x1xf32>
    %843 = math.rsqrt %842 : vector<8x1xf32>
    %844 = vector.broadcast %843 : vector<8x1xf32> to vector<8x32xf32>
    %845 = arith.mulf %835, %844 : vector<8x32xf32>
    %846 = arith.mulf %845, %18 : vector<8x32xf32>
    %847 = arith.addf %846, %21 : vector<8x32xf32>
    %848 = arith.truncf %847 : vector<8x32xf32> to vector<8x32xbf16>
    %c0_291 = arith.constant 0 : index
    %c0_292 = arith.constant 0 : index
    %849 = vector.load %arg10[%c0_291, %c0_292] : memref<32x64xbf16, #tpu.memory_space<vmem>>, vector<32x64xbf16>
    %cst_293 = arith.constant dense<0.000000e+00> : vector<8x64xf32>
    %850 = tpu.matmul %848, %849, %cst_293 {dimension_numbers = #tpu.dot_dimension_numbers<[1], [0], [0], [1], [0, 0, 1, 1], [], []>} : vector<8x32xbf16>, vector<32x64xbf16>, vector<8x64xf32> -> vector<8x64xf32>
    %851 = arith.addf %850, %36 : vector<8x64xf32>
    %cst_294 = arith.constant 0.000000e+00 : f32
    %852 = vector.broadcast %cst_294 : f32 to vector<8x64xf32>
    %853 = arith.maximumf %851, %852 : vector<8x64xf32>
    %854 = arith.truncf %853 : vector<8x64xf32> to vector<8x64xbf16>
    %c0_295 = arith.constant 0 : index
    %c0_296 = arith.constant 0 : index
    %855 = vector.load %arg12[%c0_295, %c0_296] : memref<64x32xbf16, #tpu.memory_space<vmem>>, vector<64x32xbf16>
    %cst_297 = arith.constant dense<0.000000e+00> : vector<8x32xf32>
    %856 = tpu.matmul %854, %855, %cst_297 {dimension_numbers = #tpu.dot_dimension_numbers<[1], [0], [0], [1], [0, 0, 1, 1], [], []>} : vector<8x64xbf16>, vector<64x32xbf16>, vector<8x32xf32> -> vector<8x32xf32>
    %857 = arith.addf %856, %9 : vector<8x32xf32>
    %858 = arith.addf %847, %857 : vector<8x32xf32>
    %cst_298 = arith.constant dense<0.000000e+00> : vector<8xf32>
    %859 = vector.multi_reduction <add>, %858, %cst_298 [1] : vector<8x32xf32> to vector<8xf32>
    %860 = vector.shape_cast %859 : vector<8xf32> to vector<8x1xf32>
    %cst_299 = arith.constant 3.200000e+01 : f32
    %861 = vector.broadcast %cst_299 : f32 to vector<8x1xf32>
    %862 = arith.divf %860, %861 : vector<8x1xf32>
    %863 = vector.broadcast %862 : vector<8x1xf32> to vector<8x32xf32>
    %864 = arith.subf %858, %863 : vector<8x32xf32>
    %865 = arith.mulf %864, %864 : vector<8x32xf32>
    %cst_300 = arith.constant dense<0.000000e+00> : vector<8xf32>
    %866 = vector.multi_reduction <add>, %865, %cst_300 [1] : vector<8x32xf32> to vector<8xf32>
    %867 = vector.shape_cast %866 : vector<8xf32> to vector<8x1xf32>
    %cst_301 = arith.constant 3.200000e+01 : f32
    %868 = vector.broadcast %cst_301 : f32 to vector<8x1xf32>
    %869 = arith.divf %867, %868 : vector<8x1xf32>
    %cst_302 = arith.constant 9.99999974E-6 : f32
    %870 = vector.broadcast %cst_302 : f32 to vector<8x1xf32>
    %871 = arith.addf %869, %870 : vector<8x1xf32>
    %872 = math.rsqrt %871 : vector<8x1xf32>
    %873 = vector.broadcast %872 : vector<8x1xf32> to vector<8x32xf32>
    %874 = arith.mulf %864, %873 : vector<8x32xf32>
    %875 = arith.mulf %874, %24 : vector<8x32xf32>
    %876 = arith.addf %875, %27 : vector<8x32xf32>
    %c5_i32 = arith.constant 5 : i32
    %877 = arith.truncf %876 : vector<8x32xf32> to vector<8x32xbf16>
    %c0_303 = arith.constant 0 : index
    %c0_304 = arith.constant 0 : index
    %878 = vector.load %arg2[%c0_303, %c0_304] : memref<32x96xbf16, #tpu.memory_space<vmem>>, vector<32x96xbf16>
    %cst_305 = arith.constant dense<0.000000e+00> : vector<8x96xf32>
    %879 = tpu.matmul %877, %878, %cst_305 {dimension_numbers = #tpu.dot_dimension_numbers<[1], [0], [0], [1], [0, 0, 1, 1], [], []>} : vector<8x32xbf16>, vector<32x96xbf16>, vector<8x96xf32> -> vector<8x96xf32>
    %880 = arith.addf %879, %30 : vector<8x96xf32>
    %881 = arith.truncf %880 : vector<8x96xf32> to vector<8x96xbf16>
    %882 = vector.extract_strided_slice %881 {offsets = [0, 0], sizes = [8, 32], strides = [1, 1]} : vector<8x96xbf16> to vector<8x32xbf16>
    %883 = vector.extract_strided_slice %881 {offsets = [0, 32], sizes = [8, 32], strides = [1, 1]} : vector<8x96xbf16> to vector<8x32xbf16>
    %884 = vector.extract_strided_slice %881 {offsets = [0, 64], sizes = [8, 32], strides = [1, 1]} : vector<8x96xbf16> to vector<8x32xbf16>
    %c0_306 = arith.constant 0 : index
    %c0_307 = arith.constant 0 : index
    %885 = vector.load %arg4[%c0_306, %c0_307] : memref<32x32xbf16, #tpu.memory_space<vmem>>, vector<32x32xbf16>
    %886 = vector.extract_strided_slice %882 {offsets = [0, 0], sizes = [8, 8], strides = [1, 1]} : vector<8x32xbf16> to vector<8x8xbf16>
    %887 = vector.extract_strided_slice %883 {offsets = [0, 0], sizes = [8, 8], strides = [1, 1]} : vector<8x32xbf16> to vector<8x8xbf16>
    %cst_308 = arith.constant dense<0.000000e+00> : vector<8x8xf32>
    %888 = tpu.matmul %886, %887, %cst_308 {dimension_numbers = #tpu.dot_dimension_numbers<[1], [1], [0], [0], [0, 0, 1, 0], [], []>} : vector<8x8xbf16>, vector<8x8xbf16>, vector<8x8xf32> -> vector<8x8xf32>
    %889 = vector.extract_strided_slice %882 {offsets = [0, 8], sizes = [8, 8], strides = [1, 1]} : vector<8x32xbf16> to vector<8x8xbf16>
    %890 = vector.extract_strided_slice %883 {offsets = [0, 8], sizes = [8, 8], strides = [1, 1]} : vector<8x32xbf16> to vector<8x8xbf16>
    %cst_309 = arith.constant dense<0.000000e+00> : vector<8x8xf32>
    %891 = tpu.matmul %889, %890, %cst_309 {dimension_numbers = #tpu.dot_dimension_numbers<[1], [1], [0], [0], [0, 0, 1, 0], [], []>} : vector<8x8xbf16>, vector<8x8xbf16>, vector<8x8xf32> -> vector<8x8xf32>
    %892 = vector.extract_strided_slice %882 {offsets = [0, 16], sizes = [8, 8], strides = [1, 1]} : vector<8x32xbf16> to vector<8x8xbf16>
    %893 = vector.extract_strided_slice %883 {offsets = [0, 16], sizes = [8, 8], strides = [1, 1]} : vector<8x32xbf16> to vector<8x8xbf16>
    %cst_310 = arith.constant dense<0.000000e+00> : vector<8x8xf32>
    %894 = tpu.matmul %892, %893, %cst_310 {dimension_numbers = #tpu.dot_dimension_numbers<[1], [1], [0], [0], [0, 0, 1, 0], [], []>} : vector<8x8xbf16>, vector<8x8xbf16>, vector<8x8xf32> -> vector<8x8xf32>
    %895 = vector.extract_strided_slice %882 {offsets = [0, 24], sizes = [8, 8], strides = [1, 1]} : vector<8x32xbf16> to vector<8x8xbf16>
    %896 = vector.extract_strided_slice %883 {offsets = [0, 24], sizes = [8, 8], strides = [1, 1]} : vector<8x32xbf16> to vector<8x8xbf16>
    %cst_311 = arith.constant dense<0.000000e+00> : vector<8x8xf32>
    %897 = tpu.matmul %895, %896, %cst_311 {dimension_numbers = #tpu.dot_dimension_numbers<[1], [1], [0], [0], [0, 0, 1, 0], [], []>} : vector<8x8xbf16>, vector<8x8xbf16>, vector<8x8xf32> -> vector<8x8xf32>
    %898 = tpu.concatenate %888, %891, %894, %897 in 0 : vector<8x8xf32>, vector<8x8xf32>, vector<8x8xf32>, vector<8x8xf32> -> vector<32x8xf32>
    %cst_312 = arith.constant 0.353553385 : f32
    %899 = vector.broadcast %cst_312 : f32 to vector<32x8xf32>
    %900 = arith.mulf %898, %899 : vector<32x8xf32>
    %cst_313 = arith.constant dense<0xFF800000> : vector<32xf32>
    %901 = vector.multi_reduction <maximumf>, %900, %cst_313 [1] : vector<32x8xf32> to vector<32xf32>
    %902 = vector.shape_cast %901 : vector<32xf32> to vector<32x1xf32>
    %903 = vector.broadcast %902 : vector<32x1xf32> to vector<32x8xf32>
    %904 = arith.subf %900, %903 : vector<32x8xf32>
    %905 = math.exp %904 : vector<32x8xf32>
    %cst_314 = arith.constant dense<0.000000e+00> : vector<32xf32>
    %906 = vector.multi_reduction <add>, %905, %cst_314 [1] : vector<32x8xf32> to vector<32xf32>
    %907 = vector.shape_cast %906 : vector<32xf32> to vector<32x1xf32>
    %908 = tpu.reciprocal %907 : vector<32x1xf32> -> vector<32x1xf32>
    %909 = vector.broadcast %908 : vector<32x1xf32> to vector<32x8xf32>
    %910 = arith.mulf %905, %909 : vector<32x8xf32>
    %911 = arith.truncf %910 : vector<32x8xf32> to vector<32x8xbf16>
    %912 = vector.extract_strided_slice %911 {offsets = [0, 0], sizes = [8, 8], strides = [1, 1]} : vector<32x8xbf16> to vector<8x8xbf16>
    %913 = vector.extract_strided_slice %884 {offsets = [0, 0], sizes = [8, 8], strides = [1, 1]} : vector<8x32xbf16> to vector<8x8xbf16>
    %cst_315 = arith.constant dense<0.000000e+00> : vector<8x8xf32>
    %914 = tpu.matmul %912, %913, %cst_315 {dimension_numbers = #tpu.dot_dimension_numbers<[1], [0], [0], [1], [0, 0, 1, 1], [], []>} : vector<8x8xbf16>, vector<8x8xbf16>, vector<8x8xf32> -> vector<8x8xf32>
    %915 = vector.extract_strided_slice %911 {offsets = [8, 0], sizes = [8, 8], strides = [1, 1]} : vector<32x8xbf16> to vector<8x8xbf16>
    %916 = vector.extract_strided_slice %884 {offsets = [0, 8], sizes = [8, 8], strides = [1, 1]} : vector<8x32xbf16> to vector<8x8xbf16>
    %cst_316 = arith.constant dense<0.000000e+00> : vector<8x8xf32>
    %917 = tpu.matmul %915, %916, %cst_316 {dimension_numbers = #tpu.dot_dimension_numbers<[1], [0], [0], [1], [0, 0, 1, 1], [], []>} : vector<8x8xbf16>, vector<8x8xbf16>, vector<8x8xf32> -> vector<8x8xf32>
    %918 = vector.extract_strided_slice %911 {offsets = [16, 0], sizes = [8, 8], strides = [1, 1]} : vector<32x8xbf16> to vector<8x8xbf16>
    %919 = vector.extract_strided_slice %884 {offsets = [0, 16], sizes = [8, 8], strides = [1, 1]} : vector<8x32xbf16> to vector<8x8xbf16>
    %cst_317 = arith.constant dense<0.000000e+00> : vector<8x8xf32>
    %920 = tpu.matmul %918, %919, %cst_317 {dimension_numbers = #tpu.dot_dimension_numbers<[1], [0], [0], [1], [0, 0, 1, 1], [], []>} : vector<8x8xbf16>, vector<8x8xbf16>, vector<8x8xf32> -> vector<8x8xf32>
    %921 = vector.extract_strided_slice %911 {offsets = [24, 0], sizes = [8, 8], strides = [1, 1]} : vector<32x8xbf16> to vector<8x8xbf16>
    %922 = vector.extract_strided_slice %884 {offsets = [0, 24], sizes = [8, 8], strides = [1, 1]} : vector<8x32xbf16> to vector<8x8xbf16>
    %cst_318 = arith.constant dense<0.000000e+00> : vector<8x8xf32>
    %923 = tpu.matmul %921, %922, %cst_318 {dimension_numbers = #tpu.dot_dimension_numbers<[1], [0], [0], [1], [0, 0, 1, 1], [], []>} : vector<8x8xbf16>, vector<8x8xbf16>, vector<8x8xf32> -> vector<8x8xf32>
    %924 = tpu.concatenate %914, %917, %920, %923 in 1 : vector<8x8xf32>, vector<8x8xf32>, vector<8x8xf32>, vector<8x8xf32> -> vector<8x32xf32>
    %925 = arith.truncf %924 : vector<8x32xf32> to vector<8x32xbf16>
    %cst_319 = arith.constant dense<0.000000e+00> : vector<8x32xf32>
    %926 = tpu.matmul %925, %885, %cst_319 {dimension_numbers = #tpu.dot_dimension_numbers<[1], [0], [0], [1], [0, 0, 1, 1], [], []>} : vector<8x32xbf16>, vector<32x32xbf16>, vector<8x32xf32> -> vector<8x32xf32>
    %927 = arith.addf %926, %3 : vector<8x32xf32>
    %928 = arith.addf %876, %927 : vector<8x32xf32>
    %cst_320 = arith.constant dense<0.000000e+00> : vector<8xf32>
    %929 = vector.multi_reduction <add>, %928, %cst_320 [1] : vector<8x32xf32> to vector<8xf32>
    %930 = vector.shape_cast %929 : vector<8xf32> to vector<8x1xf32>
    %cst_321 = arith.constant 3.200000e+01 : f32
    %931 = vector.broadcast %cst_321 : f32 to vector<8x1xf32>
    %932 = arith.divf %930, %931 : vector<8x1xf32>
    %933 = vector.broadcast %932 : vector<8x1xf32> to vector<8x32xf32>
    %934 = arith.subf %928, %933 : vector<8x32xf32>
    %935 = arith.mulf %934, %934 : vector<8x32xf32>
    %cst_322 = arith.constant dense<0.000000e+00> : vector<8xf32>
    %936 = vector.multi_reduction <add>, %935, %cst_322 [1] : vector<8x32xf32> to vector<8xf32>
    %937 = vector.shape_cast %936 : vector<8xf32> to vector<8x1xf32>
    %cst_323 = arith.constant 3.200000e+01 : f32
    %938 = vector.broadcast %cst_323 : f32 to vector<8x1xf32>
    %939 = arith.divf %937, %938 : vector<8x1xf32>
    %cst_324 = arith.constant 9.99999974E-6 : f32
    %940 = vector.broadcast %cst_324 : f32 to vector<8x1xf32>
    %941 = arith.addf %939, %940 : vector<8x1xf32>
    %942 = math.rsqrt %941 : vector<8x1xf32>
    %943 = vector.broadcast %942 : vector<8x1xf32> to vector<8x32xf32>
    %944 = arith.mulf %934, %943 : vector<8x32xf32>
    %945 = arith.mulf %944, %12 : vector<8x32xf32>
    %946 = arith.addf %945, %15 : vector<8x32xf32>
    %947 = arith.truncf %946 : vector<8x32xf32> to vector<8x32xbf16>
    %c0_325 = arith.constant 0 : index
    %c0_326 = arith.constant 0 : index
    %948 = vector.load %arg5[%c0_325, %c0_326] : memref<32x32xbf16, #tpu.memory_space<vmem>>, vector<32x32xbf16>
    %cst_327 = arith.constant dense<0.000000e+00> : vector<8x32xf32>
    %949 = tpu.matmul %947, %948, %cst_327 {dimension_numbers = #tpu.dot_dimension_numbers<[1], [0], [0], [1], [0, 0, 1, 1], [], []>} : vector<8x32xbf16>, vector<32x32xbf16>, vector<8x32xf32> -> vector<8x32xf32>
    %950 = arith.addf %949, %33 : vector<8x32xf32>
    %951 = arith.truncf %950 : vector<8x32xf32> to vector<8x32xbf16>
    %c0_328 = arith.constant 0 : index
    %c0_329 = arith.constant 0 : index
    %952 = vector.load %arg9[%c0_328, %c0_329] : memref<32x32xbf16, #tpu.memory_space<vmem>>, vector<32x32xbf16>
    %953 = vector.extract_strided_slice %951 {offsets = [0, 0], sizes = [8, 8], strides = [1, 1]} : vector<8x32xbf16> to vector<8x8xbf16>
    %954 = vector.extract_strided_slice %45 {offsets = [0, 0], sizes = [16, 8], strides = [1, 1]} : vector<16x32xbf16> to vector<16x8xbf16>
    %cst_330 = arith.constant dense<0.000000e+00> : vector<8x16xf32>
    %955 = tpu.matmul %953, %954, %cst_330 {dimension_numbers = #tpu.dot_dimension_numbers<[1], [1], [0], [0], [0, 0, 1, 0], [], []>} : vector<8x8xbf16>, vector<16x8xbf16>, vector<8x16xf32> -> vector<8x16xf32>
    %956 = vector.extract_strided_slice %951 {offsets = [0, 8], sizes = [8, 8], strides = [1, 1]} : vector<8x32xbf16> to vector<8x8xbf16>
    %957 = vector.extract_strided_slice %45 {offsets = [0, 8], sizes = [16, 8], strides = [1, 1]} : vector<16x32xbf16> to vector<16x8xbf16>
    %cst_331 = arith.constant dense<0.000000e+00> : vector<8x16xf32>
    %958 = tpu.matmul %956, %957, %cst_331 {dimension_numbers = #tpu.dot_dimension_numbers<[1], [1], [0], [0], [0, 0, 1, 0], [], []>} : vector<8x8xbf16>, vector<16x8xbf16>, vector<8x16xf32> -> vector<8x16xf32>
    %959 = vector.extract_strided_slice %951 {offsets = [0, 16], sizes = [8, 8], strides = [1, 1]} : vector<8x32xbf16> to vector<8x8xbf16>
    %960 = vector.extract_strided_slice %45 {offsets = [0, 16], sizes = [16, 8], strides = [1, 1]} : vector<16x32xbf16> to vector<16x8xbf16>
    %cst_332 = arith.constant dense<0.000000e+00> : vector<8x16xf32>
    %961 = tpu.matmul %959, %960, %cst_332 {dimension_numbers = #tpu.dot_dimension_numbers<[1], [1], [0], [0], [0, 0, 1, 0], [], []>} : vector<8x8xbf16>, vector<16x8xbf16>, vector<8x16xf32> -> vector<8x16xf32>
    %962 = vector.extract_strided_slice %951 {offsets = [0, 24], sizes = [8, 8], strides = [1, 1]} : vector<8x32xbf16> to vector<8x8xbf16>
    %963 = vector.extract_strided_slice %45 {offsets = [0, 24], sizes = [16, 8], strides = [1, 1]} : vector<16x32xbf16> to vector<16x8xbf16>
    %cst_333 = arith.constant dense<0.000000e+00> : vector<8x16xf32>
    %964 = tpu.matmul %962, %963, %cst_333 {dimension_numbers = #tpu.dot_dimension_numbers<[1], [1], [0], [0], [0, 0, 1, 0], [], []>} : vector<8x8xbf16>, vector<16x8xbf16>, vector<8x16xf32> -> vector<8x16xf32>
    %965 = tpu.concatenate %955, %958, %961, %964 in 0 : vector<8x16xf32>, vector<8x16xf32>, vector<8x16xf32>, vector<8x16xf32> -> vector<32x16xf32>
    %cst_334 = arith.constant 0.353553385 : f32
    %966 = vector.broadcast %cst_334 : f32 to vector<32x16xf32>
    %967 = arith.mulf %965, %966 : vector<32x16xf32>
    %cst_335 = arith.constant dense<0xFF800000> : vector<32xf32>
    %968 = vector.multi_reduction <maximumf>, %967, %cst_335 [1] : vector<32x16xf32> to vector<32xf32>
    %969 = vector.shape_cast %968 : vector<32xf32> to vector<32x1xf32>
    %970 = vector.broadcast %969 : vector<32x1xf32> to vector<32x16xf32>
    %971 = arith.subf %967, %970 : vector<32x16xf32>
    %972 = math.exp %971 : vector<32x16xf32>
    %cst_336 = arith.constant dense<0.000000e+00> : vector<32xf32>
    %973 = vector.multi_reduction <add>, %972, %cst_336 [1] : vector<32x16xf32> to vector<32xf32>
    %974 = vector.shape_cast %973 : vector<32xf32> to vector<32x1xf32>
    %975 = tpu.reciprocal %974 : vector<32x1xf32> -> vector<32x1xf32>
    %976 = vector.broadcast %975 : vector<32x1xf32> to vector<32x16xf32>
    %977 = arith.mulf %972, %976 : vector<32x16xf32>
    %978 = arith.truncf %977 : vector<32x16xf32> to vector<32x16xbf16>
    %979 = vector.extract_strided_slice %978 {offsets = [0, 0], sizes = [8, 16], strides = [1, 1]} : vector<32x16xbf16> to vector<8x16xbf16>
    %980 = vector.extract_strided_slice %46 {offsets = [0, 0], sizes = [16, 8], strides = [1, 1]} : vector<16x32xbf16> to vector<16x8xbf16>
    %cst_337 = arith.constant dense<0.000000e+00> : vector<8x8xf32>
    %981 = tpu.matmul %979, %980, %cst_337 {dimension_numbers = #tpu.dot_dimension_numbers<[1], [0], [0], [1], [0, 0, 1, 1], [], []>} : vector<8x16xbf16>, vector<16x8xbf16>, vector<8x8xf32> -> vector<8x8xf32>
    %982 = vector.extract_strided_slice %978 {offsets = [8, 0], sizes = [8, 16], strides = [1, 1]} : vector<32x16xbf16> to vector<8x16xbf16>
    %983 = vector.extract_strided_slice %46 {offsets = [0, 8], sizes = [16, 8], strides = [1, 1]} : vector<16x32xbf16> to vector<16x8xbf16>
    %cst_338 = arith.constant dense<0.000000e+00> : vector<8x8xf32>
    %984 = tpu.matmul %982, %983, %cst_338 {dimension_numbers = #tpu.dot_dimension_numbers<[1], [0], [0], [1], [0, 0, 1, 1], [], []>} : vector<8x16xbf16>, vector<16x8xbf16>, vector<8x8xf32> -> vector<8x8xf32>
    %985 = vector.extract_strided_slice %978 {offsets = [16, 0], sizes = [8, 16], strides = [1, 1]} : vector<32x16xbf16> to vector<8x16xbf16>
    %986 = vector.extract_strided_slice %46 {offsets = [0, 16], sizes = [16, 8], strides = [1, 1]} : vector<16x32xbf16> to vector<16x8xbf16>
    %cst_339 = arith.constant dense<0.000000e+00> : vector<8x8xf32>
    %987 = tpu.matmul %985, %986, %cst_339 {dimension_numbers = #tpu.dot_dimension_numbers<[1], [0], [0], [1], [0, 0, 1, 1], [], []>} : vector<8x16xbf16>, vector<16x8xbf16>, vector<8x8xf32> -> vector<8x8xf32>
    %988 = vector.extract_strided_slice %978 {offsets = [24, 0], sizes = [8, 16], strides = [1, 1]} : vector<32x16xbf16> to vector<8x16xbf16>
    %989 = vector.extract_strided_slice %46 {offsets = [0, 24], sizes = [16, 8], strides = [1, 1]} : vector<16x32xbf16> to vector<16x8xbf16>
    %cst_340 = arith.constant dense<0.000000e+00> : vector<8x8xf32>
    %990 = tpu.matmul %988, %989, %cst_340 {dimension_numbers = #tpu.dot_dimension_numbers<[1], [0], [0], [1], [0, 0, 1, 1], [], []>} : vector<8x16xbf16>, vector<16x8xbf16>, vector<8x8xf32> -> vector<8x8xf32>
    %991 = tpu.concatenate %981, %984, %987, %990 in 1 : vector<8x8xf32>, vector<8x8xf32>, vector<8x8xf32>, vector<8x8xf32> -> vector<8x32xf32>
    %992 = arith.truncf %991 : vector<8x32xf32> to vector<8x32xbf16>
    %cst_341 = arith.constant dense<0.000000e+00> : vector<8x32xf32>
    %993 = tpu.matmul %992, %952, %cst_341 {dimension_numbers = #tpu.dot_dimension_numbers<[1], [0], [0], [1], [0, 0, 1, 1], [], []>} : vector<8x32xbf16>, vector<32x32xbf16>, vector<8x32xf32> -> vector<8x32xf32>
    %994 = arith.addf %993, %6 : vector<8x32xf32>
    %995 = arith.addf %946, %994 : vector<8x32xf32>
    %cst_342 = arith.constant dense<0.000000e+00> : vector<8xf32>
    %996 = vector.multi_reduction <add>, %995, %cst_342 [1] : vector<8x32xf32> to vector<8xf32>
    %997 = vector.shape_cast %996 : vector<8xf32> to vector<8x1xf32>
    %cst_343 = arith.constant 3.200000e+01 : f32
    %998 = vector.broadcast %cst_343 : f32 to vector<8x1xf32>
    %999 = arith.divf %997, %998 : vector<8x1xf32>
    %1000 = vector.broadcast %999 : vector<8x1xf32> to vector<8x32xf32>
    %1001 = arith.subf %995, %1000 : vector<8x32xf32>
    %1002 = arith.mulf %1001, %1001 : vector<8x32xf32>
    %cst_344 = arith.constant dense<0.000000e+00> : vector<8xf32>
    %1003 = vector.multi_reduction <add>, %1002, %cst_344 [1] : vector<8x32xf32> to vector<8xf32>
    %1004 = vector.shape_cast %1003 : vector<8xf32> to vector<8x1xf32>
    %cst_345 = arith.constant 3.200000e+01 : f32
    %1005 = vector.broadcast %cst_345 : f32 to vector<8x1xf32>
    %1006 = arith.divf %1004, %1005 : vector<8x1xf32>
    %cst_346 = arith.constant 9.99999974E-6 : f32
    %1007 = vector.broadcast %cst_346 : f32 to vector<8x1xf32>
    %1008 = arith.addf %1006, %1007 : vector<8x1xf32>
    %1009 = math.rsqrt %1008 : vector<8x1xf32>
    %1010 = vector.broadcast %1009 : vector<8x1xf32> to vector<8x32xf32>
    %1011 = arith.mulf %1001, %1010 : vector<8x32xf32>
    %1012 = arith.mulf %1011, %18 : vector<8x32xf32>
    %1013 = arith.addf %1012, %21 : vector<8x32xf32>
    %1014 = arith.truncf %1013 : vector<8x32xf32> to vector<8x32xbf16>
    %c0_347 = arith.constant 0 : index
    %c0_348 = arith.constant 0 : index
    %1015 = vector.load %arg10[%c0_347, %c0_348] : memref<32x64xbf16, #tpu.memory_space<vmem>>, vector<32x64xbf16>
    %cst_349 = arith.constant dense<0.000000e+00> : vector<8x64xf32>
    %1016 = tpu.matmul %1014, %1015, %cst_349 {dimension_numbers = #tpu.dot_dimension_numbers<[1], [0], [0], [1], [0, 0, 1, 1], [], []>} : vector<8x32xbf16>, vector<32x64xbf16>, vector<8x64xf32> -> vector<8x64xf32>
    %1017 = arith.addf %1016, %36 : vector<8x64xf32>
    %cst_350 = arith.constant 0.000000e+00 : f32
    %1018 = vector.broadcast %cst_350 : f32 to vector<8x64xf32>
    %1019 = arith.maximumf %1017, %1018 : vector<8x64xf32>
    %1020 = arith.truncf %1019 : vector<8x64xf32> to vector<8x64xbf16>
    %c0_351 = arith.constant 0 : index
    %c0_352 = arith.constant 0 : index
    %1021 = vector.load %arg12[%c0_351, %c0_352] : memref<64x32xbf16, #tpu.memory_space<vmem>>, vector<64x32xbf16>
    %cst_353 = arith.constant dense<0.000000e+00> : vector<8x32xf32>
    %1022 = tpu.matmul %1020, %1021, %cst_353 {dimension_numbers = #tpu.dot_dimension_numbers<[1], [0], [0], [1], [0, 0, 1, 1], [], []>} : vector<8x64xbf16>, vector<64x32xbf16>, vector<8x32xf32> -> vector<8x32xf32>
    %1023 = arith.addf %1022, %9 : vector<8x32xf32>
    %1024 = arith.addf %1013, %1023 : vector<8x32xf32>
    %cst_354 = arith.constant dense<0.000000e+00> : vector<8xf32>
    %1025 = vector.multi_reduction <add>, %1024, %cst_354 [1] : vector<8x32xf32> to vector<8xf32>
    %1026 = vector.shape_cast %1025 : vector<8xf32> to vector<8x1xf32>
    %cst_355 = arith.constant 3.200000e+01 : f32
    %1027 = vector.broadcast %cst_355 : f32 to vector<8x1xf32>
    %1028 = arith.divf %1026, %1027 : vector<8x1xf32>
    %1029 = vector.broadcast %1028 : vector<8x1xf32> to vector<8x32xf32>
    %1030 = arith.subf %1024, %1029 : vector<8x32xf32>
    %1031 = arith.mulf %1030, %1030 : vector<8x32xf32>
    %cst_356 = arith.constant dense<0.000000e+00> : vector<8xf32>
    %1032 = vector.multi_reduction <add>, %1031, %cst_356 [1] : vector<8x32xf32> to vector<8xf32>
    %1033 = vector.shape_cast %1032 : vector<8xf32> to vector<8x1xf32>
    %cst_357 = arith.constant 3.200000e+01 : f32
    %1034 = vector.broadcast %cst_357 : f32 to vector<8x1xf32>
    %1035 = arith.divf %1033, %1034 : vector<8x1xf32>
    %cst_358 = arith.constant 9.99999974E-6 : f32
    %1036 = vector.broadcast %cst_358 : f32 to vector<8x1xf32>
    %1037 = arith.addf %1035, %1036 : vector<8x1xf32>
    %1038 = math.rsqrt %1037 : vector<8x1xf32>
    %1039 = vector.broadcast %1038 : vector<8x1xf32> to vector<8x32xf32>
    %1040 = arith.mulf %1030, %1039 : vector<8x32xf32>
    %1041 = arith.mulf %1040, %24 : vector<8x32xf32>
    %1042 = arith.addf %1041, %27 : vector<8x32xf32>
    %c6_i32 = arith.constant 6 : i32
    %1043 = arith.truncf %1042 : vector<8x32xf32> to vector<8x32xbf16>
    %c0_359 = arith.constant 0 : index
    %c0_360 = arith.constant 0 : index
    %1044 = vector.load %arg2[%c0_359, %c0_360] : memref<32x96xbf16, #tpu.memory_space<vmem>>, vector<32x96xbf16>
    %cst_361 = arith.constant dense<0.000000e+00> : vector<8x96xf32>
    %1045 = tpu.matmul %1043, %1044, %cst_361 {dimension_numbers = #tpu.dot_dimension_numbers<[1], [0], [0], [1], [0, 0, 1, 1], [], []>} : vector<8x32xbf16>, vector<32x96xbf16>, vector<8x96xf32> -> vector<8x96xf32>
    %1046 = arith.addf %1045, %30 : vector<8x96xf32>
    %1047 = arith.truncf %1046 : vector<8x96xf32> to vector<8x96xbf16>
    %1048 = vector.extract_strided_slice %1047 {offsets = [0, 0], sizes = [8, 32], strides = [1, 1]} : vector<8x96xbf16> to vector<8x32xbf16>
    %1049 = vector.extract_strided_slice %1047 {offsets = [0, 32], sizes = [8, 32], strides = [1, 1]} : vector<8x96xbf16> to vector<8x32xbf16>
    %1050 = vector.extract_strided_slice %1047 {offsets = [0, 64], sizes = [8, 32], strides = [1, 1]} : vector<8x96xbf16> to vector<8x32xbf16>
    %c0_362 = arith.constant 0 : index
    %c0_363 = arith.constant 0 : index
    %1051 = vector.load %arg4[%c0_362, %c0_363] : memref<32x32xbf16, #tpu.memory_space<vmem>>, vector<32x32xbf16>
    %1052 = vector.extract_strided_slice %1048 {offsets = [0, 0], sizes = [8, 8], strides = [1, 1]} : vector<8x32xbf16> to vector<8x8xbf16>
    %1053 = vector.extract_strided_slice %1049 {offsets = [0, 0], sizes = [8, 8], strides = [1, 1]} : vector<8x32xbf16> to vector<8x8xbf16>
    %cst_364 = arith.constant dense<0.000000e+00> : vector<8x8xf32>
    %1054 = tpu.matmul %1052, %1053, %cst_364 {dimension_numbers = #tpu.dot_dimension_numbers<[1], [1], [0], [0], [0, 0, 1, 0], [], []>} : vector<8x8xbf16>, vector<8x8xbf16>, vector<8x8xf32> -> vector<8x8xf32>
    %1055 = vector.extract_strided_slice %1048 {offsets = [0, 8], sizes = [8, 8], strides = [1, 1]} : vector<8x32xbf16> to vector<8x8xbf16>
    %1056 = vector.extract_strided_slice %1049 {offsets = [0, 8], sizes = [8, 8], strides = [1, 1]} : vector<8x32xbf16> to vector<8x8xbf16>
    %cst_365 = arith.constant dense<0.000000e+00> : vector<8x8xf32>
    %1057 = tpu.matmul %1055, %1056, %cst_365 {dimension_numbers = #tpu.dot_dimension_numbers<[1], [1], [0], [0], [0, 0, 1, 0], [], []>} : vector<8x8xbf16>, vector<8x8xbf16>, vector<8x8xf32> -> vector<8x8xf32>
    %1058 = vector.extract_strided_slice %1048 {offsets = [0, 16], sizes = [8, 8], strides = [1, 1]} : vector<8x32xbf16> to vector<8x8xbf16>
    %1059 = vector.extract_strided_slice %1049 {offsets = [0, 16], sizes = [8, 8], strides = [1, 1]} : vector<8x32xbf16> to vector<8x8xbf16>
    %cst_366 = arith.constant dense<0.000000e+00> : vector<8x8xf32>
    %1060 = tpu.matmul %1058, %1059, %cst_366 {dimension_numbers = #tpu.dot_dimension_numbers<[1], [1], [0], [0], [0, 0, 1, 0], [], []>} : vector<8x8xbf16>, vector<8x8xbf16>, vector<8x8xf32> -> vector<8x8xf32>
    %1061 = vector.extract_strided_slice %1048 {offsets = [0, 24], sizes = [8, 8], strides = [1, 1]} : vector<8x32xbf16> to vector<8x8xbf16>
    %1062 = vector.extract_strided_slice %1049 {offsets = [0, 24], sizes = [8, 8], strides = [1, 1]} : vector<8x32xbf16> to vector<8x8xbf16>
    %cst_367 = arith.constant dense<0.000000e+00> : vector<8x8xf32>
    %1063 = tpu.matmul %1061, %1062, %cst_367 {dimension_numbers = #tpu.dot_dimension_numbers<[1], [1], [0], [0], [0, 0, 1, 0], [], []>} : vector<8x8xbf16>, vector<8x8xbf16>, vector<8x8xf32> -> vector<8x8xf32>
    %1064 = tpu.concatenate %1054, %1057, %1060, %1063 in 0 : vector<8x8xf32>, vector<8x8xf32>, vector<8x8xf32>, vector<8x8xf32> -> vector<32x8xf32>
    %cst_368 = arith.constant 0.353553385 : f32
    %1065 = vector.broadcast %cst_368 : f32 to vector<32x8xf32>
    %1066 = arith.mulf %1064, %1065 : vector<32x8xf32>
    %cst_369 = arith.constant dense<0xFF800000> : vector<32xf32>
    %1067 = vector.multi_reduction <maximumf>, %1066, %cst_369 [1] : vector<32x8xf32> to vector<32xf32>
    %1068 = vector.shape_cast %1067 : vector<32xf32> to vector<32x1xf32>
    %1069 = vector.broadcast %1068 : vector<32x1xf32> to vector<32x8xf32>
    %1070 = arith.subf %1066, %1069 : vector<32x8xf32>
    %1071 = math.exp %1070 : vector<32x8xf32>
    %cst_370 = arith.constant dense<0.000000e+00> : vector<32xf32>
    %1072 = vector.multi_reduction <add>, %1071, %cst_370 [1] : vector<32x8xf32> to vector<32xf32>
    %1073 = vector.shape_cast %1072 : vector<32xf32> to vector<32x1xf32>
    %1074 = tpu.reciprocal %1073 : vector<32x1xf32> -> vector<32x1xf32>
    %1075 = vector.broadcast %1074 : vector<32x1xf32> to vector<32x8xf32>
    %1076 = arith.mulf %1071, %1075 : vector<32x8xf32>
    %1077 = arith.truncf %1076 : vector<32x8xf32> to vector<32x8xbf16>
    %1078 = vector.extract_strided_slice %1077 {offsets = [0, 0], sizes = [8, 8], strides = [1, 1]} : vector<32x8xbf16> to vector<8x8xbf16>
    %1079 = vector.extract_strided_slice %1050 {offsets = [0, 0], sizes = [8, 8], strides = [1, 1]} : vector<8x32xbf16> to vector<8x8xbf16>
    %cst_371 = arith.constant dense<0.000000e+00> : vector<8x8xf32>
    %1080 = tpu.matmul %1078, %1079, %cst_371 {dimension_numbers = #tpu.dot_dimension_numbers<[1], [0], [0], [1], [0, 0, 1, 1], [], []>} : vector<8x8xbf16>, vector<8x8xbf16>, vector<8x8xf32> -> vector<8x8xf32>
    %1081 = vector.extract_strided_slice %1077 {offsets = [8, 0], sizes = [8, 8], strides = [1, 1]} : vector<32x8xbf16> to vector<8x8xbf16>
    %1082 = vector.extract_strided_slice %1050 {offsets = [0, 8], sizes = [8, 8], strides = [1, 1]} : vector<8x32xbf16> to vector<8x8xbf16>
    %cst_372 = arith.constant dense<0.000000e+00> : vector<8x8xf32>
    %1083 = tpu.matmul %1081, %1082, %cst_372 {dimension_numbers = #tpu.dot_dimension_numbers<[1], [0], [0], [1], [0, 0, 1, 1], [], []>} : vector<8x8xbf16>, vector<8x8xbf16>, vector<8x8xf32> -> vector<8x8xf32>
    %1084 = vector.extract_strided_slice %1077 {offsets = [16, 0], sizes = [8, 8], strides = [1, 1]} : vector<32x8xbf16> to vector<8x8xbf16>
    %1085 = vector.extract_strided_slice %1050 {offsets = [0, 16], sizes = [8, 8], strides = [1, 1]} : vector<8x32xbf16> to vector<8x8xbf16>
    %cst_373 = arith.constant dense<0.000000e+00> : vector<8x8xf32>
    %1086 = tpu.matmul %1084, %1085, %cst_373 {dimension_numbers = #tpu.dot_dimension_numbers<[1], [0], [0], [1], [0, 0, 1, 1], [], []>} : vector<8x8xbf16>, vector<8x8xbf16>, vector<8x8xf32> -> vector<8x8xf32>
    %1087 = vector.extract_strided_slice %1077 {offsets = [24, 0], sizes = [8, 8], strides = [1, 1]} : vector<32x8xbf16> to vector<8x8xbf16>
    %1088 = vector.extract_strided_slice %1050 {offsets = [0, 24], sizes = [8, 8], strides = [1, 1]} : vector<8x32xbf16> to vector<8x8xbf16>
    %cst_374 = arith.constant dense<0.000000e+00> : vector<8x8xf32>
    %1089 = tpu.matmul %1087, %1088, %cst_374 {dimension_numbers = #tpu.dot_dimension_numbers<[1], [0], [0], [1], [0, 0, 1, 1], [], []>} : vector<8x8xbf16>, vector<8x8xbf16>, vector<8x8xf32> -> vector<8x8xf32>
    %1090 = tpu.concatenate %1080, %1083, %1086, %1089 in 1 : vector<8x8xf32>, vector<8x8xf32>, vector<8x8xf32>, vector<8x8xf32> -> vector<8x32xf32>
    %1091 = arith.truncf %1090 : vector<8x32xf32> to vector<8x32xbf16>
    %cst_375 = arith.constant dense<0.000000e+00> : vector<8x32xf32>
    %1092 = tpu.matmul %1091, %1051, %cst_375 {dimension_numbers = #tpu.dot_dimension_numbers<[1], [0], [0], [1], [0, 0, 1, 1], [], []>} : vector<8x32xbf16>, vector<32x32xbf16>, vector<8x32xf32> -> vector<8x32xf32>
    %1093 = arith.addf %1092, %3 : vector<8x32xf32>
    %1094 = arith.addf %1042, %1093 : vector<8x32xf32>
    %cst_376 = arith.constant dense<0.000000e+00> : vector<8xf32>
    %1095 = vector.multi_reduction <add>, %1094, %cst_376 [1] : vector<8x32xf32> to vector<8xf32>
    %1096 = vector.shape_cast %1095 : vector<8xf32> to vector<8x1xf32>
    %cst_377 = arith.constant 3.200000e+01 : f32
    %1097 = vector.broadcast %cst_377 : f32 to vector<8x1xf32>
    %1098 = arith.divf %1096, %1097 : vector<8x1xf32>
    %1099 = vector.broadcast %1098 : vector<8x1xf32> to vector<8x32xf32>
    %1100 = arith.subf %1094, %1099 : vector<8x32xf32>
    %1101 = arith.mulf %1100, %1100 : vector<8x32xf32>
    %cst_378 = arith.constant dense<0.000000e+00> : vector<8xf32>
    %1102 = vector.multi_reduction <add>, %1101, %cst_378 [1] : vector<8x32xf32> to vector<8xf32>
    %1103 = vector.shape_cast %1102 : vector<8xf32> to vector<8x1xf32>
    %cst_379 = arith.constant 3.200000e+01 : f32
    %1104 = vector.broadcast %cst_379 : f32 to vector<8x1xf32>
    %1105 = arith.divf %1103, %1104 : vector<8x1xf32>
    %cst_380 = arith.constant 9.99999974E-6 : f32
    %1106 = vector.broadcast %cst_380 : f32 to vector<8x1xf32>
    %1107 = arith.addf %1105, %1106 : vector<8x1xf32>
    %1108 = math.rsqrt %1107 : vector<8x1xf32>
    %1109 = vector.broadcast %1108 : vector<8x1xf32> to vector<8x32xf32>
    %1110 = arith.mulf %1100, %1109 : vector<8x32xf32>
    %1111 = arith.mulf %1110, %12 : vector<8x32xf32>
    %1112 = arith.addf %1111, %15 : vector<8x32xf32>
    %1113 = arith.truncf %1112 : vector<8x32xf32> to vector<8x32xbf16>
    %c0_381 = arith.constant 0 : index
    %c0_382 = arith.constant 0 : index
    %1114 = vector.load %arg5[%c0_381, %c0_382] : memref<32x32xbf16, #tpu.memory_space<vmem>>, vector<32x32xbf16>
    %cst_383 = arith.constant dense<0.000000e+00> : vector<8x32xf32>
    %1115 = tpu.matmul %1113, %1114, %cst_383 {dimension_numbers = #tpu.dot_dimension_numbers<[1], [0], [0], [1], [0, 0, 1, 1], [], []>} : vector<8x32xbf16>, vector<32x32xbf16>, vector<8x32xf32> -> vector<8x32xf32>
    %1116 = arith.addf %1115, %33 : vector<8x32xf32>
    %1117 = arith.truncf %1116 : vector<8x32xf32> to vector<8x32xbf16>
    %c0_384 = arith.constant 0 : index
    %c0_385 = arith.constant 0 : index
    %1118 = vector.load %arg9[%c0_384, %c0_385] : memref<32x32xbf16, #tpu.memory_space<vmem>>, vector<32x32xbf16>
    %1119 = vector.extract_strided_slice %1117 {offsets = [0, 0], sizes = [8, 8], strides = [1, 1]} : vector<8x32xbf16> to vector<8x8xbf16>
    %1120 = vector.extract_strided_slice %45 {offsets = [0, 0], sizes = [16, 8], strides = [1, 1]} : vector<16x32xbf16> to vector<16x8xbf16>
    %cst_386 = arith.constant dense<0.000000e+00> : vector<8x16xf32>
    %1121 = tpu.matmul %1119, %1120, %cst_386 {dimension_numbers = #tpu.dot_dimension_numbers<[1], [1], [0], [0], [0, 0, 1, 0], [], []>} : vector<8x8xbf16>, vector<16x8xbf16>, vector<8x16xf32> -> vector<8x16xf32>
    %1122 = vector.extract_strided_slice %1117 {offsets = [0, 8], sizes = [8, 8], strides = [1, 1]} : vector<8x32xbf16> to vector<8x8xbf16>
    %1123 = vector.extract_strided_slice %45 {offsets = [0, 8], sizes = [16, 8], strides = [1, 1]} : vector<16x32xbf16> to vector<16x8xbf16>
    %cst_387 = arith.constant dense<0.000000e+00> : vector<8x16xf32>
    %1124 = tpu.matmul %1122, %1123, %cst_387 {dimension_numbers = #tpu.dot_dimension_numbers<[1], [1], [0], [0], [0, 0, 1, 0], [], []>} : vector<8x8xbf16>, vector<16x8xbf16>, vector<8x16xf32> -> vector<8x16xf32>
    %1125 = vector.extract_strided_slice %1117 {offsets = [0, 16], sizes = [8, 8], strides = [1, 1]} : vector<8x32xbf16> to vector<8x8xbf16>
    %1126 = vector.extract_strided_slice %45 {offsets = [0, 16], sizes = [16, 8], strides = [1, 1]} : vector<16x32xbf16> to vector<16x8xbf16>
    %cst_388 = arith.constant dense<0.000000e+00> : vector<8x16xf32>
    %1127 = tpu.matmul %1125, %1126, %cst_388 {dimension_numbers = #tpu.dot_dimension_numbers<[1], [1], [0], [0], [0, 0, 1, 0], [], []>} : vector<8x8xbf16>, vector<16x8xbf16>, vector<8x16xf32> -> vector<8x16xf32>
    %1128 = vector.extract_strided_slice %1117 {offsets = [0, 24], sizes = [8, 8], strides = [1, 1]} : vector<8x32xbf16> to vector<8x8xbf16>
    %1129 = vector.extract_strided_slice %45 {offsets = [0, 24], sizes = [16, 8], strides = [1, 1]} : vector<16x32xbf16> to vector<16x8xbf16>
    %cst_389 = arith.constant dense<0.000000e+00> : vector<8x16xf32>
    %1130 = tpu.matmul %1128, %1129, %cst_389 {dimension_numbers = #tpu.dot_dimension_numbers<[1], [1], [0], [0], [0, 0, 1, 0], [], []>} : vector<8x8xbf16>, vector<16x8xbf16>, vector<8x16xf32> -> vector<8x16xf32>
    %1131 = tpu.concatenate %1121, %1124, %1127, %1130 in 0 : vector<8x16xf32>, vector<8x16xf32>, vector<8x16xf32>, vector<8x16xf32> -> vector<32x16xf32>
    %cst_390 = arith.constant 0.353553385 : f32
    %1132 = vector.broadcast %cst_390 : f32 to vector<32x16xf32>
    %1133 = arith.mulf %1131, %1132 : vector<32x16xf32>
    %cst_391 = arith.constant dense<0xFF800000> : vector<32xf32>
    %1134 = vector.multi_reduction <maximumf>, %1133, %cst_391 [1] : vector<32x16xf32> to vector<32xf32>
    %1135 = vector.shape_cast %1134 : vector<32xf32> to vector<32x1xf32>
    %1136 = vector.broadcast %1135 : vector<32x1xf32> to vector<32x16xf32>
    %1137 = arith.subf %1133, %1136 : vector<32x16xf32>
    %1138 = math.exp %1137 : vector<32x16xf32>
    %cst_392 = arith.constant dense<0.000000e+00> : vector<32xf32>
    %1139 = vector.multi_reduction <add>, %1138, %cst_392 [1] : vector<32x16xf32> to vector<32xf32>
    %1140 = vector.shape_cast %1139 : vector<32xf32> to vector<32x1xf32>
    %1141 = tpu.reciprocal %1140 : vector<32x1xf32> -> vector<32x1xf32>
    %1142 = vector.broadcast %1141 : vector<32x1xf32> to vector<32x16xf32>
    %1143 = arith.mulf %1138, %1142 : vector<32x16xf32>
    %1144 = arith.truncf %1143 : vector<32x16xf32> to vector<32x16xbf16>
    %1145 = vector.extract_strided_slice %1144 {offsets = [0, 0], sizes = [8, 16], strides = [1, 1]} : vector<32x16xbf16> to vector<8x16xbf16>
    %1146 = vector.extract_strided_slice %46 {offsets = [0, 0], sizes = [16, 8], strides = [1, 1]} : vector<16x32xbf16> to vector<16x8xbf16>
    %cst_393 = arith.constant dense<0.000000e+00> : vector<8x8xf32>
    %1147 = tpu.matmul %1145, %1146, %cst_393 {dimension_numbers = #tpu.dot_dimension_numbers<[1], [0], [0], [1], [0, 0, 1, 1], [], []>} : vector<8x16xbf16>, vector<16x8xbf16>, vector<8x8xf32> -> vector<8x8xf32>
    %1148 = vector.extract_strided_slice %1144 {offsets = [8, 0], sizes = [8, 16], strides = [1, 1]} : vector<32x16xbf16> to vector<8x16xbf16>
    %1149 = vector.extract_strided_slice %46 {offsets = [0, 8], sizes = [16, 8], strides = [1, 1]} : vector<16x32xbf16> to vector<16x8xbf16>
    %cst_394 = arith.constant dense<0.000000e+00> : vector<8x8xf32>
    %1150 = tpu.matmul %1148, %1149, %cst_394 {dimension_numbers = #tpu.dot_dimension_numbers<[1], [0], [0], [1], [0, 0, 1, 1], [], []>} : vector<8x16xbf16>, vector<16x8xbf16>, vector<8x8xf32> -> vector<8x8xf32>
    %1151 = vector.extract_strided_slice %1144 {offsets = [16, 0], sizes = [8, 16], strides = [1, 1]} : vector<32x16xbf16> to vector<8x16xbf16>
    %1152 = vector.extract_strided_slice %46 {offsets = [0, 16], sizes = [16, 8], strides = [1, 1]} : vector<16x32xbf16> to vector<16x8xbf16>
    %cst_395 = arith.constant dense<0.000000e+00> : vector<8x8xf32>
    %1153 = tpu.matmul %1151, %1152, %cst_395 {dimension_numbers = #tpu.dot_dimension_numbers<[1], [0], [0], [1], [0, 0, 1, 1], [], []>} : vector<8x16xbf16>, vector<16x8xbf16>, vector<8x8xf32> -> vector<8x8xf32>
    %1154 = vector.extract_strided_slice %1144 {offsets = [24, 0], sizes = [8, 16], strides = [1, 1]} : vector<32x16xbf16> to vector<8x16xbf16>
    %1155 = vector.extract_strided_slice %46 {offsets = [0, 24], sizes = [16, 8], strides = [1, 1]} : vector<16x32xbf16> to vector<16x8xbf16>
    %cst_396 = arith.constant dense<0.000000e+00> : vector<8x8xf32>
    %1156 = tpu.matmul %1154, %1155, %cst_396 {dimension_numbers = #tpu.dot_dimension_numbers<[1], [0], [0], [1], [0, 0, 1, 1], [], []>} : vector<8x16xbf16>, vector<16x8xbf16>, vector<8x8xf32> -> vector<8x8xf32>
    %1157 = tpu.concatenate %1147, %1150, %1153, %1156 in 1 : vector<8x8xf32>, vector<8x8xf32>, vector<8x8xf32>, vector<8x8xf32> -> vector<8x32xf32>
    %1158 = arith.truncf %1157 : vector<8x32xf32> to vector<8x32xbf16>
    %cst_397 = arith.constant dense<0.000000e+00> : vector<8x32xf32>
    %1159 = tpu.matmul %1158, %1118, %cst_397 {dimension_numbers = #tpu.dot_dimension_numbers<[1], [0], [0], [1], [0, 0, 1, 1], [], []>} : vector<8x32xbf16>, vector<32x32xbf16>, vector<8x32xf32> -> vector<8x32xf32>
    %1160 = arith.addf %1159, %6 : vector<8x32xf32>
    %1161 = arith.addf %1112, %1160 : vector<8x32xf32>
    %cst_398 = arith.constant dense<0.000000e+00> : vector<8xf32>
    %1162 = vector.multi_reduction <add>, %1161, %cst_398 [1] : vector<8x32xf32> to vector<8xf32>
    %1163 = vector.shape_cast %1162 : vector<8xf32> to vector<8x1xf32>
    %cst_399 = arith.constant 3.200000e+01 : f32
    %1164 = vector.broadcast %cst_399 : f32 to vector<8x1xf32>
    %1165 = arith.divf %1163, %1164 : vector<8x1xf32>
    %1166 = vector.broadcast %1165 : vector<8x1xf32> to vector<8x32xf32>
    %1167 = arith.subf %1161, %1166 : vector<8x32xf32>
    %1168 = arith.mulf %1167, %1167 : vector<8x32xf32>
    %cst_400 = arith.constant dense<0.000000e+00> : vector<8xf32>
    %1169 = vector.multi_reduction <add>, %1168, %cst_400 [1] : vector<8x32xf32> to vector<8xf32>
    %1170 = vector.shape_cast %1169 : vector<8xf32> to vector<8x1xf32>
    %cst_401 = arith.constant 3.200000e+01 : f32
    %1171 = vector.broadcast %cst_401 : f32 to vector<8x1xf32>
    %1172 = arith.divf %1170, %1171 : vector<8x1xf32>
    %cst_402 = arith.constant 9.99999974E-6 : f32
    %1173 = vector.broadcast %cst_402 : f32 to vector<8x1xf32>
    %1174 = arith.addf %1172, %1173 : vector<8x1xf32>
    %1175 = math.rsqrt %1174 : vector<8x1xf32>
    %1176 = vector.broadcast %1175 : vector<8x1xf32> to vector<8x32xf32>
    %1177 = arith.mulf %1167, %1176 : vector<8x32xf32>
    %1178 = arith.mulf %1177, %18 : vector<8x32xf32>
    %1179 = arith.addf %1178, %21 : vector<8x32xf32>
    %1180 = arith.truncf %1179 : vector<8x32xf32> to vector<8x32xbf16>
    %c0_403 = arith.constant 0 : index
    %c0_404 = arith.constant 0 : index
    %1181 = vector.load %arg10[%c0_403, %c0_404] : memref<32x64xbf16, #tpu.memory_space<vmem>>, vector<32x64xbf16>
    %cst_405 = arith.constant dense<0.000000e+00> : vector<8x64xf32>
    %1182 = tpu.matmul %1180, %1181, %cst_405 {dimension_numbers = #tpu.dot_dimension_numbers<[1], [0], [0], [1], [0, 0, 1, 1], [], []>} : vector<8x32xbf16>, vector<32x64xbf16>, vector<8x64xf32> -> vector<8x64xf32>
    %1183 = arith.addf %1182, %36 : vector<8x64xf32>
    %cst_406 = arith.constant 0.000000e+00 : f32
    %1184 = vector.broadcast %cst_406 : f32 to vector<8x64xf32>
    %1185 = arith.maximumf %1183, %1184 : vector<8x64xf32>
    %1186 = arith.truncf %1185 : vector<8x64xf32> to vector<8x64xbf16>
    %c0_407 = arith.constant 0 : index
    %c0_408 = arith.constant 0 : index
    %1187 = vector.load %arg12[%c0_407, %c0_408] : memref<64x32xbf16, #tpu.memory_space<vmem>>, vector<64x32xbf16>
    %cst_409 = arith.constant dense<0.000000e+00> : vector<8x32xf32>
    %1188 = tpu.matmul %1186, %1187, %cst_409 {dimension_numbers = #tpu.dot_dimension_numbers<[1], [0], [0], [1], [0, 0, 1, 1], [], []>} : vector<8x64xbf16>, vector<64x32xbf16>, vector<8x32xf32> -> vector<8x32xf32>
    %1189 = arith.addf %1188, %9 : vector<8x32xf32>
    %1190 = arith.addf %1179, %1189 : vector<8x32xf32>
    %cst_410 = arith.constant dense<0.000000e+00> : vector<8xf32>
    %1191 = vector.multi_reduction <add>, %1190, %cst_410 [1] : vector<8x32xf32> to vector<8xf32>
    %1192 = vector.shape_cast %1191 : vector<8xf32> to vector<8x1xf32>
    %cst_411 = arith.constant 3.200000e+01 : f32
    %1193 = vector.broadcast %cst_411 : f32 to vector<8x1xf32>
    %1194 = arith.divf %1192, %1193 : vector<8x1xf32>
    %1195 = vector.broadcast %1194 : vector<8x1xf32> to vector<8x32xf32>
    %1196 = arith.subf %1190, %1195 : vector<8x32xf32>
    %1197 = arith.mulf %1196, %1196 : vector<8x32xf32>
    %cst_412 = arith.constant dense<0.000000e+00> : vector<8xf32>
    %1198 = vector.multi_reduction <add>, %1197, %cst_412 [1] : vector<8x32xf32> to vector<8xf32>
    %1199 = vector.shape_cast %1198 : vector<8xf32> to vector<8x1xf32>
    %cst_413 = arith.constant 3.200000e+01 : f32
    %1200 = vector.broadcast %cst_413 : f32 to vector<8x1xf32>
    %1201 = arith.divf %1199, %1200 : vector<8x1xf32>
    %cst_414 = arith.constant 9.99999974E-6 : f32
    %1202 = vector.broadcast %cst_414 : f32 to vector<8x1xf32>
    %1203 = arith.addf %1201, %1202 : vector<8x1xf32>
    %1204 = math.rsqrt %1203 : vector<8x1xf32>
    %1205 = vector.broadcast %1204 : vector<8x1xf32> to vector<8x32xf32>
    %1206 = arith.mulf %1196, %1205 : vector<8x32xf32>
    %1207 = arith.mulf %1206, %24 : vector<8x32xf32>
    %1208 = arith.addf %1207, %27 : vector<8x32xf32>
    %c7_i32 = arith.constant 7 : i32
    %1209 = arith.truncf %1208 : vector<8x32xf32> to vector<8x32xbf16>
    %c0_415 = arith.constant 0 : index
    %c0_416 = arith.constant 0 : index
    %1210 = vector.load %arg2[%c0_415, %c0_416] : memref<32x96xbf16, #tpu.memory_space<vmem>>, vector<32x96xbf16>
    %cst_417 = arith.constant dense<0.000000e+00> : vector<8x96xf32>
    %1211 = tpu.matmul %1209, %1210, %cst_417 {dimension_numbers = #tpu.dot_dimension_numbers<[1], [0], [0], [1], [0, 0, 1, 1], [], []>} : vector<8x32xbf16>, vector<32x96xbf16>, vector<8x96xf32> -> vector<8x96xf32>
    %1212 = arith.addf %1211, %30 : vector<8x96xf32>
    %1213 = arith.truncf %1212 : vector<8x96xf32> to vector<8x96xbf16>
    %1214 = vector.extract_strided_slice %1213 {offsets = [0, 0], sizes = [8, 32], strides = [1, 1]} : vector<8x96xbf16> to vector<8x32xbf16>
    %1215 = vector.extract_strided_slice %1213 {offsets = [0, 32], sizes = [8, 32], strides = [1, 1]} : vector<8x96xbf16> to vector<8x32xbf16>
    %1216 = vector.extract_strided_slice %1213 {offsets = [0, 64], sizes = [8, 32], strides = [1, 1]} : vector<8x96xbf16> to vector<8x32xbf16>
    %c0_418 = arith.constant 0 : index
    %c0_419 = arith.constant 0 : index
    %1217 = vector.load %arg4[%c0_418, %c0_419] : memref<32x32xbf16, #tpu.memory_space<vmem>>, vector<32x32xbf16>
    %1218 = vector.extract_strided_slice %1214 {offsets = [0, 0], sizes = [8, 8], strides = [1, 1]} : vector<8x32xbf16> to vector<8x8xbf16>
    %1219 = vector.extract_strided_slice %1215 {offsets = [0, 0], sizes = [8, 8], strides = [1, 1]} : vector<8x32xbf16> to vector<8x8xbf16>
    %cst_420 = arith.constant dense<0.000000e+00> : vector<8x8xf32>
    %1220 = tpu.matmul %1218, %1219, %cst_420 {dimension_numbers = #tpu.dot_dimension_numbers<[1], [1], [0], [0], [0, 0, 1, 0], [], []>} : vector<8x8xbf16>, vector<8x8xbf16>, vector<8x8xf32> -> vector<8x8xf32>
    %1221 = vector.extract_strided_slice %1214 {offsets = [0, 8], sizes = [8, 8], strides = [1, 1]} : vector<8x32xbf16> to vector<8x8xbf16>
    %1222 = vector.extract_strided_slice %1215 {offsets = [0, 8], sizes = [8, 8], strides = [1, 1]} : vector<8x32xbf16> to vector<8x8xbf16>
    %cst_421 = arith.constant dense<0.000000e+00> : vector<8x8xf32>
    %1223 = tpu.matmul %1221, %1222, %cst_421 {dimension_numbers = #tpu.dot_dimension_numbers<[1], [1], [0], [0], [0, 0, 1, 0], [], []>} : vector<8x8xbf16>, vector<8x8xbf16>, vector<8x8xf32> -> vector<8x8xf32>
    %1224 = vector.extract_strided_slice %1214 {offsets = [0, 16], sizes = [8, 8], strides = [1, 1]} : vector<8x32xbf16> to vector<8x8xbf16>
    %1225 = vector.extract_strided_slice %1215 {offsets = [0, 16], sizes = [8, 8], strides = [1, 1]} : vector<8x32xbf16> to vector<8x8xbf16>
    %cst_422 = arith.constant dense<0.000000e+00> : vector<8x8xf32>
    %1226 = tpu.matmul %1224, %1225, %cst_422 {dimension_numbers = #tpu.dot_dimension_numbers<[1], [1], [0], [0], [0, 0, 1, 0], [], []>} : vector<8x8xbf16>, vector<8x8xbf16>, vector<8x8xf32> -> vector<8x8xf32>
    %1227 = vector.extract_strided_slice %1214 {offsets = [0, 24], sizes = [8, 8], strides = [1, 1]} : vector<8x32xbf16> to vector<8x8xbf16>
    %1228 = vector.extract_strided_slice %1215 {offsets = [0, 24], sizes = [8, 8], strides = [1, 1]} : vector<8x32xbf16> to vector<8x8xbf16>
    %cst_423 = arith.constant dense<0.000000e+00> : vector<8x8xf32>
    %1229 = tpu.matmul %1227, %1228, %cst_423 {dimension_numbers = #tpu.dot_dimension_numbers<[1], [1], [0], [0], [0, 0, 1, 0], [], []>} : vector<8x8xbf16>, vector<8x8xbf16>, vector<8x8xf32> -> vector<8x8xf32>
    %1230 = tpu.concatenate %1220, %1223, %1226, %1229 in 0 : vector<8x8xf32>, vector<8x8xf32>, vector<8x8xf32>, vector<8x8xf32> -> vector<32x8xf32>
    %cst_424 = arith.constant 0.353553385 : f32
    %1231 = vector.broadcast %cst_424 : f32 to vector<32x8xf32>
    %1232 = arith.mulf %1230, %1231 : vector<32x8xf32>
    %cst_425 = arith.constant dense<0xFF800000> : vector<32xf32>
    %1233 = vector.multi_reduction <maximumf>, %1232, %cst_425 [1] : vector<32x8xf32> to vector<32xf32>
    %1234 = vector.shape_cast %1233 : vector<32xf32> to vector<32x1xf32>
    %1235 = vector.broadcast %1234 : vector<32x1xf32> to vector<32x8xf32>
    %1236 = arith.subf %1232, %1235 : vector<32x8xf32>
    %1237 = math.exp %1236 : vector<32x8xf32>
    %cst_426 = arith.constant dense<0.000000e+00> : vector<32xf32>
    %1238 = vector.multi_reduction <add>, %1237, %cst_426 [1] : vector<32x8xf32> to vector<32xf32>
    %1239 = vector.shape_cast %1238 : vector<32xf32> to vector<32x1xf32>
    %1240 = tpu.reciprocal %1239 : vector<32x1xf32> -> vector<32x1xf32>
    %1241 = vector.broadcast %1240 : vector<32x1xf32> to vector<32x8xf32>
    %1242 = arith.mulf %1237, %1241 : vector<32x8xf32>
    %1243 = arith.truncf %1242 : vector<32x8xf32> to vector<32x8xbf16>
    %1244 = vector.extract_strided_slice %1243 {offsets = [0, 0], sizes = [8, 8], strides = [1, 1]} : vector<32x8xbf16> to vector<8x8xbf16>
    %1245 = vector.extract_strided_slice %1216 {offsets = [0, 0], sizes = [8, 8], strides = [1, 1]} : vector<8x32xbf16> to vector<8x8xbf16>
    %cst_427 = arith.constant dense<0.000000e+00> : vector<8x8xf32>
    %1246 = tpu.matmul %1244, %1245, %cst_427 {dimension_numbers = #tpu.dot_dimension_numbers<[1], [0], [0], [1], [0, 0, 1, 1], [], []>} : vector<8x8xbf16>, vector<8x8xbf16>, vector<8x8xf32> -> vector<8x8xf32>
    %1247 = vector.extract_strided_slice %1243 {offsets = [8, 0], sizes = [8, 8], strides = [1, 1]} : vector<32x8xbf16> to vector<8x8xbf16>
    %1248 = vector.extract_strided_slice %1216 {offsets = [0, 8], sizes = [8, 8], strides = [1, 1]} : vector<8x32xbf16> to vector<8x8xbf16>
    %cst_428 = arith.constant dense<0.000000e+00> : vector<8x8xf32>
    %1249 = tpu.matmul %1247, %1248, %cst_428 {dimension_numbers = #tpu.dot_dimension_numbers<[1], [0], [0], [1], [0, 0, 1, 1], [], []>} : vector<8x8xbf16>, vector<8x8xbf16>, vector<8x8xf32> -> vector<8x8xf32>
    %1250 = vector.extract_strided_slice %1243 {offsets = [16, 0], sizes = [8, 8], strides = [1, 1]} : vector<32x8xbf16> to vector<8x8xbf16>
    %1251 = vector.extract_strided_slice %1216 {offsets = [0, 16], sizes = [8, 8], strides = [1, 1]} : vector<8x32xbf16> to vector<8x8xbf16>
    %cst_429 = arith.constant dense<0.000000e+00> : vector<8x8xf32>
    %1252 = tpu.matmul %1250, %1251, %cst_429 {dimension_numbers = #tpu.dot_dimension_numbers<[1], [0], [0], [1], [0, 0, 1, 1], [], []>} : vector<8x8xbf16>, vector<8x8xbf16>, vector<8x8xf32> -> vector<8x8xf32>
    %1253 = vector.extract_strided_slice %1243 {offsets = [24, 0], sizes = [8, 8], strides = [1, 1]} : vector<32x8xbf16> to vector<8x8xbf16>
    %1254 = vector.extract_strided_slice %1216 {offsets = [0, 24], sizes = [8, 8], strides = [1, 1]} : vector<8x32xbf16> to vector<8x8xbf16>
    %cst_430 = arith.constant dense<0.000000e+00> : vector<8x8xf32>
    %1255 = tpu.matmul %1253, %1254, %cst_430 {dimension_numbers = #tpu.dot_dimension_numbers<[1], [0], [0], [1], [0, 0, 1, 1], [], []>} : vector<8x8xbf16>, vector<8x8xbf16>, vector<8x8xf32> -> vector<8x8xf32>
    %1256 = tpu.concatenate %1246, %1249, %1252, %1255 in 1 : vector<8x8xf32>, vector<8x8xf32>, vector<8x8xf32>, vector<8x8xf32> -> vector<8x32xf32>
    %1257 = arith.truncf %1256 : vector<8x32xf32> to vector<8x32xbf16>
    %cst_431 = arith.constant dense<0.000000e+00> : vector<8x32xf32>
    %1258 = tpu.matmul %1257, %1217, %cst_431 {dimension_numbers = #tpu.dot_dimension_numbers<[1], [0], [0], [1], [0, 0, 1, 1], [], []>} : vector<8x32xbf16>, vector<32x32xbf16>, vector<8x32xf32> -> vector<8x32xf32>
    %1259 = arith.addf %1258, %3 : vector<8x32xf32>
    %1260 = arith.addf %1208, %1259 : vector<8x32xf32>
    %cst_432 = arith.constant dense<0.000000e+00> : vector<8xf32>
    %1261 = vector.multi_reduction <add>, %1260, %cst_432 [1] : vector<8x32xf32> to vector<8xf32>
    %1262 = vector.shape_cast %1261 : vector<8xf32> to vector<8x1xf32>
    %cst_433 = arith.constant 3.200000e+01 : f32
    %1263 = vector.broadcast %cst_433 : f32 to vector<8x1xf32>
    %1264 = arith.divf %1262, %1263 : vector<8x1xf32>
    %1265 = vector.broadcast %1264 : vector<8x1xf32> to vector<8x32xf32>
    %1266 = arith.subf %1260, %1265 : vector<8x32xf32>
    %1267 = arith.mulf %1266, %1266 : vector<8x32xf32>
    %cst_434 = arith.constant dense<0.000000e+00> : vector<8xf32>
    %1268 = vector.multi_reduction <add>, %1267, %cst_434 [1] : vector<8x32xf32> to vector<8xf32>
    %1269 = vector.shape_cast %1268 : vector<8xf32> to vector<8x1xf32>
    %cst_435 = arith.constant 3.200000e+01 : f32
    %1270 = vector.broadcast %cst_435 : f32 to vector<8x1xf32>
    %1271 = arith.divf %1269, %1270 : vector<8x1xf32>
    %cst_436 = arith.constant 9.99999974E-6 : f32
    %1272 = vector.broadcast %cst_436 : f32 to vector<8x1xf32>
    %1273 = arith.addf %1271, %1272 : vector<8x1xf32>
    %1274 = math.rsqrt %1273 : vector<8x1xf32>
    %1275 = vector.broadcast %1274 : vector<8x1xf32> to vector<8x32xf32>
    %1276 = arith.mulf %1266, %1275 : vector<8x32xf32>
    %1277 = arith.mulf %1276, %12 : vector<8x32xf32>
    %1278 = arith.addf %1277, %15 : vector<8x32xf32>
    %1279 = arith.truncf %1278 : vector<8x32xf32> to vector<8x32xbf16>
    %c0_437 = arith.constant 0 : index
    %c0_438 = arith.constant 0 : index
    %1280 = vector.load %arg5[%c0_437, %c0_438] : memref<32x32xbf16, #tpu.memory_space<vmem>>, vector<32x32xbf16>
    %cst_439 = arith.constant dense<0.000000e+00> : vector<8x32xf32>
    %1281 = tpu.matmul %1279, %1280, %cst_439 {dimension_numbers = #tpu.dot_dimension_numbers<[1], [0], [0], [1], [0, 0, 1, 1], [], []>} : vector<8x32xbf16>, vector<32x32xbf16>, vector<8x32xf32> -> vector<8x32xf32>
    %1282 = arith.addf %1281, %33 : vector<8x32xf32>
    %1283 = arith.truncf %1282 : vector<8x32xf32> to vector<8x32xbf16>
    %c0_440 = arith.constant 0 : index
    %c0_441 = arith.constant 0 : index
    %1284 = vector.load %arg9[%c0_440, %c0_441] : memref<32x32xbf16, #tpu.memory_space<vmem>>, vector<32x32xbf16>
    %1285 = vector.extract_strided_slice %1283 {offsets = [0, 0], sizes = [8, 8], strides = [1, 1]} : vector<8x32xbf16> to vector<8x8xbf16>
    %1286 = vector.extract_strided_slice %45 {offsets = [0, 0], sizes = [16, 8], strides = [1, 1]} : vector<16x32xbf16> to vector<16x8xbf16>
    %cst_442 = arith.constant dense<0.000000e+00> : vector<8x16xf32>
    %1287 = tpu.matmul %1285, %1286, %cst_442 {dimension_numbers = #tpu.dot_dimension_numbers<[1], [1], [0], [0], [0, 0, 1, 0], [], []>} : vector<8x8xbf16>, vector<16x8xbf16>, vector<8x16xf32> -> vector<8x16xf32>
    %1288 = vector.extract_strided_slice %1283 {offsets = [0, 8], sizes = [8, 8], strides = [1, 1]} : vector<8x32xbf16> to vector<8x8xbf16>
    %1289 = vector.extract_strided_slice %45 {offsets = [0, 8], sizes = [16, 8], strides = [1, 1]} : vector<16x32xbf16> to vector<16x8xbf16>
    %cst_443 = arith.constant dense<0.000000e+00> : vector<8x16xf32>
    %1290 = tpu.matmul %1288, %1289, %cst_443 {dimension_numbers = #tpu.dot_dimension_numbers<[1], [1], [0], [0], [0, 0, 1, 0], [], []>} : vector<8x8xbf16>, vector<16x8xbf16>, vector<8x16xf32> -> vector<8x16xf32>
    %1291 = vector.extract_strided_slice %1283 {offsets = [0, 16], sizes = [8, 8], strides = [1, 1]} : vector<8x32xbf16> to vector<8x8xbf16>
    %1292 = vector.extract_strided_slice %45 {offsets = [0, 16], sizes = [16, 8], strides = [1, 1]} : vector<16x32xbf16> to vector<16x8xbf16>
    %cst_444 = arith.constant dense<0.000000e+00> : vector<8x16xf32>
    %1293 = tpu.matmul %1291, %1292, %cst_444 {dimension_numbers = #tpu.dot_dimension_numbers<[1], [1], [0], [0], [0, 0, 1, 0], [], []>} : vector<8x8xbf16>, vector<16x8xbf16>, vector<8x16xf32> -> vector<8x16xf32>
    %1294 = vector.extract_strided_slice %1283 {offsets = [0, 24], sizes = [8, 8], strides = [1, 1]} : vector<8x32xbf16> to vector<8x8xbf16>
    %1295 = vector.extract_strided_slice %45 {offsets = [0, 24], sizes = [16, 8], strides = [1, 1]} : vector<16x32xbf16> to vector<16x8xbf16>
    %cst_445 = arith.constant dense<0.000000e+00> : vector<8x16xf32>
    %1296 = tpu.matmul %1294, %1295, %cst_445 {dimension_numbers = #tpu.dot_dimension_numbers<[1], [1], [0], [0], [0, 0, 1, 0], [], []>} : vector<8x8xbf16>, vector<16x8xbf16>, vector<8x16xf32> -> vector<8x16xf32>
    %1297 = tpu.concatenate %1287, %1290, %1293, %1296 in 0 : vector<8x16xf32>, vector<8x16xf32>, vector<8x16xf32>, vector<8x16xf32> -> vector<32x16xf32>
    %cst_446 = arith.constant 0.353553385 : f32
    %1298 = vector.broadcast %cst_446 : f32 to vector<32x16xf32>
    %1299 = arith.mulf %1297, %1298 : vector<32x16xf32>
    %cst_447 = arith.constant dense<0xFF800000> : vector<32xf32>
    %1300 = vector.multi_reduction <maximumf>, %1299, %cst_447 [1] : vector<32x16xf32> to vector<32xf32>
    %1301 = vector.shape_cast %1300 : vector<32xf32> to vector<32x1xf32>
    %1302 = vector.broadcast %1301 : vector<32x1xf32> to vector<32x16xf32>
    %1303 = arith.subf %1299, %1302 : vector<32x16xf32>
    %1304 = math.exp %1303 : vector<32x16xf32>
    %cst_448 = arith.constant dense<0.000000e+00> : vector<32xf32>
    %1305 = vector.multi_reduction <add>, %1304, %cst_448 [1] : vector<32x16xf32> to vector<32xf32>
    %1306 = vector.shape_cast %1305 : vector<32xf32> to vector<32x1xf32>
    %1307 = tpu.reciprocal %1306 : vector<32x1xf32> -> vector<32x1xf32>
    %1308 = vector.broadcast %1307 : vector<32x1xf32> to vector<32x16xf32>
    %1309 = arith.mulf %1304, %1308 : vector<32x16xf32>
    %1310 = arith.truncf %1309 : vector<32x16xf32> to vector<32x16xbf16>
    %1311 = vector.extract_strided_slice %1310 {offsets = [0, 0], sizes = [8, 16], strides = [1, 1]} : vector<32x16xbf16> to vector<8x16xbf16>
    %1312 = vector.extract_strided_slice %46 {offsets = [0, 0], sizes = [16, 8], strides = [1, 1]} : vector<16x32xbf16> to vector<16x8xbf16>
    %cst_449 = arith.constant dense<0.000000e+00> : vector<8x8xf32>
    %1313 = tpu.matmul %1311, %1312, %cst_449 {dimension_numbers = #tpu.dot_dimension_numbers<[1], [0], [0], [1], [0, 0, 1, 1], [], []>} : vector<8x16xbf16>, vector<16x8xbf16>, vector<8x8xf32> -> vector<8x8xf32>
    %1314 = vector.extract_strided_slice %1310 {offsets = [8, 0], sizes = [8, 16], strides = [1, 1]} : vector<32x16xbf16> to vector<8x16xbf16>
    %1315 = vector.extract_strided_slice %46 {offsets = [0, 8], sizes = [16, 8], strides = [1, 1]} : vector<16x32xbf16> to vector<16x8xbf16>
    %cst_450 = arith.constant dense<0.000000e+00> : vector<8x8xf32>
    %1316 = tpu.matmul %1314, %1315, %cst_450 {dimension_numbers = #tpu.dot_dimension_numbers<[1], [0], [0], [1], [0, 0, 1, 1], [], []>} : vector<8x16xbf16>, vector<16x8xbf16>, vector<8x8xf32> -> vector<8x8xf32>
    %1317 = vector.extract_strided_slice %1310 {offsets = [16, 0], sizes = [8, 16], strides = [1, 1]} : vector<32x16xbf16> to vector<8x16xbf16>
    %1318 = vector.extract_strided_slice %46 {offsets = [0, 16], sizes = [16, 8], strides = [1, 1]} : vector<16x32xbf16> to vector<16x8xbf16>
    %cst_451 = arith.constant dense<0.000000e+00> : vector<8x8xf32>
    %1319 = tpu.matmul %1317, %1318, %cst_451 {dimension_numbers = #tpu.dot_dimension_numbers<[1], [0], [0], [1], [0, 0, 1, 1], [], []>} : vector<8x16xbf16>, vector<16x8xbf16>, vector<8x8xf32> -> vector<8x8xf32>
    %1320 = vector.extract_strided_slice %1310 {offsets = [24, 0], sizes = [8, 16], strides = [1, 1]} : vector<32x16xbf16> to vector<8x16xbf16>
    %1321 = vector.extract_strided_slice %46 {offsets = [0, 24], sizes = [16, 8], strides = [1, 1]} : vector<16x32xbf16> to vector<16x8xbf16>
    %cst_452 = arith.constant dense<0.000000e+00> : vector<8x8xf32>
    %1322 = tpu.matmul %1320, %1321, %cst_452 {dimension_numbers = #tpu.dot_dimension_numbers<[1], [0], [0], [1], [0, 0, 1, 1], [], []>} : vector<8x16xbf16>, vector<16x8xbf16>, vector<8x8xf32> -> vector<8x8xf32>
    %1323 = tpu.concatenate %1313, %1316, %1319, %1322 in 1 : vector<8x8xf32>, vector<8x8xf32>, vector<8x8xf32>, vector<8x8xf32> -> vector<8x32xf32>
    %1324 = arith.truncf %1323 : vector<8x32xf32> to vector<8x32xbf16>
    %cst_453 = arith.constant dense<0.000000e+00> : vector<8x32xf32>
    %1325 = tpu.matmul %1324, %1284, %cst_453 {dimension_numbers = #tpu.dot_dimension_numbers<[1], [0], [0], [1], [0, 0, 1, 1], [], []>} : vector<8x32xbf16>, vector<32x32xbf16>, vector<8x32xf32> -> vector<8x32xf32>
    %1326 = arith.addf %1325, %6 : vector<8x32xf32>
    %1327 = arith.addf %1278, %1326 : vector<8x32xf32>
    %cst_454 = arith.constant dense<0.000000e+00> : vector<8xf32>
    %1328 = vector.multi_reduction <add>, %1327, %cst_454 [1] : vector<8x32xf32> to vector<8xf32>
    %1329 = vector.shape_cast %1328 : vector<8xf32> to vector<8x1xf32>
    %cst_455 = arith.constant 3.200000e+01 : f32
    %1330 = vector.broadcast %cst_455 : f32 to vector<8x1xf32>
    %1331 = arith.divf %1329, %1330 : vector<8x1xf32>
    %1332 = vector.broadcast %1331 : vector<8x1xf32> to vector<8x32xf32>
    %1333 = arith.subf %1327, %1332 : vector<8x32xf32>
    %1334 = arith.mulf %1333, %1333 : vector<8x32xf32>
    %cst_456 = arith.constant dense<0.000000e+00> : vector<8xf32>
    %1335 = vector.multi_reduction <add>, %1334, %cst_456 [1] : vector<8x32xf32> to vector<8xf32>
    %1336 = vector.shape_cast %1335 : vector<8xf32> to vector<8x1xf32>
    %cst_457 = arith.constant 3.200000e+01 : f32
    %1337 = vector.broadcast %cst_457 : f32 to vector<8x1xf32>
    %1338 = arith.divf %1336, %1337 : vector<8x1xf32>
    %cst_458 = arith.constant 9.99999974E-6 : f32
    %1339 = vector.broadcast %cst_458 : f32 to vector<8x1xf32>
    %1340 = arith.addf %1338, %1339 : vector<8x1xf32>
    %1341 = math.rsqrt %1340 : vector<8x1xf32>
    %1342 = vector.broadcast %1341 : vector<8x1xf32> to vector<8x32xf32>
    %1343 = arith.mulf %1333, %1342 : vector<8x32xf32>
    %1344 = arith.mulf %1343, %18 : vector<8x32xf32>
    %1345 = arith.addf %1344, %21 : vector<8x32xf32>
    %1346 = arith.truncf %1345 : vector<8x32xf32> to vector<8x32xbf16>
    %c0_459 = arith.constant 0 : index
    %c0_460 = arith.constant 0 : index
    %1347 = vector.load %arg10[%c0_459, %c0_460] : memref<32x64xbf16, #tpu.memory_space<vmem>>, vector<32x64xbf16>
    %cst_461 = arith.constant dense<0.000000e+00> : vector<8x64xf32>
    %1348 = tpu.matmul %1346, %1347, %cst_461 {dimension_numbers = #tpu.dot_dimension_numbers<[1], [0], [0], [1], [0, 0, 1, 1], [], []>} : vector<8x32xbf16>, vector<32x64xbf16>, vector<8x64xf32> -> vector<8x64xf32>
    %1349 = arith.addf %1348, %36 : vector<8x64xf32>
    %cst_462 = arith.constant 0.000000e+00 : f32
    %1350 = vector.broadcast %cst_462 : f32 to vector<8x64xf32>
    %1351 = arith.maximumf %1349, %1350 : vector<8x64xf32>
    %1352 = arith.truncf %1351 : vector<8x64xf32> to vector<8x64xbf16>
    %c0_463 = arith.constant 0 : index
    %c0_464 = arith.constant 0 : index
    %1353 = vector.load %arg12[%c0_463, %c0_464] : memref<64x32xbf16, #tpu.memory_space<vmem>>, vector<64x32xbf16>
    %cst_465 = arith.constant dense<0.000000e+00> : vector<8x32xf32>
    %1354 = tpu.matmul %1352, %1353, %cst_465 {dimension_numbers = #tpu.dot_dimension_numbers<[1], [0], [0], [1], [0, 0, 1, 1], [], []>} : vector<8x64xbf16>, vector<64x32xbf16>, vector<8x32xf32> -> vector<8x32xf32>
    %1355 = arith.addf %1354, %9 : vector<8x32xf32>
    %1356 = arith.addf %1345, %1355 : vector<8x32xf32>
    %cst_466 = arith.constant dense<0.000000e+00> : vector<8xf32>
    %1357 = vector.multi_reduction <add>, %1356, %cst_466 [1] : vector<8x32xf32> to vector<8xf32>
    %1358 = vector.shape_cast %1357 : vector<8xf32> to vector<8x1xf32>
    %cst_467 = arith.constant 3.200000e+01 : f32
    %1359 = vector.broadcast %cst_467 : f32 to vector<8x1xf32>
    %1360 = arith.divf %1358, %1359 : vector<8x1xf32>
    %1361 = vector.broadcast %1360 : vector<8x1xf32> to vector<8x32xf32>
    %1362 = arith.subf %1356, %1361 : vector<8x32xf32>
    %1363 = arith.mulf %1362, %1362 : vector<8x32xf32>
    %cst_468 = arith.constant dense<0.000000e+00> : vector<8xf32>
    %1364 = vector.multi_reduction <add>, %1363, %cst_468 [1] : vector<8x32xf32> to vector<8xf32>
    %1365 = vector.shape_cast %1364 : vector<8xf32> to vector<8x1xf32>
    %cst_469 = arith.constant 3.200000e+01 : f32
    %1366 = vector.broadcast %cst_469 : f32 to vector<8x1xf32>
    %1367 = arith.divf %1365, %1366 : vector<8x1xf32>
    %cst_470 = arith.constant 9.99999974E-6 : f32
    %1368 = vector.broadcast %cst_470 : f32 to vector<8x1xf32>
    %1369 = arith.addf %1367, %1368 : vector<8x1xf32>
    %1370 = math.rsqrt %1369 : vector<8x1xf32>
    %1371 = vector.broadcast %1370 : vector<8x1xf32> to vector<8x32xf32>
    %1372 = arith.mulf %1362, %1371 : vector<8x32xf32>
    %1373 = arith.mulf %1372, %24 : vector<8x32xf32>
    %1374 = arith.addf %1373, %27 : vector<8x32xf32>
    %c0_471 = arith.constant 0 : index
    %c0_472 = arith.constant 0 : index
    %1375 = vector.load %arg14[%c0_471, %c0_472] : memref<8x32xf32, #tpu.memory_space<vmem>>, vector<8x32xf32>
    tpu.vector_store %arg14[%c0_471, %c0_472], %1374 {strides = array<i32>} : memref<8x32xf32, #tpu.memory_space<vmem>>, vector<8x32xf32>,
    return
  }
}

</mosaic_0001>

<bundles_post_ra>
// kernel: tmatcher_decoder.1
= control target key start
LH: loop header
LB: loop body
LE: loop exit
PB: predicated region body
PF: predicated region fallthrough
CT: control target
= control target key end

     0   :  { %19 = vsyncpa [#allocation3], 0  ;;  %s8973_s0 = inlined_call_operand.hbm [shape: f32[8,32], index: 0, kind: input, shape index: {}]   ;;  %s8974_s1 = inlined_call_operand.vmem [shape: f32[16,32], index: 1, kind: input, shape index: {}]   ;;  %s8975_s2 = inlined_call_operand.vmem [shape: bf16[32,96], index: 2, kind: input, shape index: {}]   ;;  %s8976_s3 = inlined_call_operand.vmem [shape: f32[1,96], index: 3, kind: input, shape index: {}]   ;;  %s8977_s4 = inlined_call_operand.vmem [shape: bf16[32,32], index: 4, kind: input, shape index: {}]   ;;  %s8978_s5 = inlined_call_operand.hbm [shape: bf16[32,32], index: 5, kind: input, shape index: {}]   ;;  %s8979_s6 = inlined_call_operand.vmem [shape: f32[1,32], index: 6, kind: input, shape index: {}]   ;;  %s8980_s7 = inlined_call_operand.hbm [shape: bf16[32,64], index: 7, kind: input, shape index: {}]   ;;  %s8981_s8 = inlined_call_operand.vmem [shape: f32[1,64], index: 8, kind: input, shape index: {}]   ;;  %s8982_s9 = inlined_call_operand.hbm [shape: bf16[32,32], index: 9, kind: input, shape index: {}]   ;;  %s8983_s10 = inlined_call_operand.hbm [shape: bf16[32,64], index: 10, kind: input, shape index: {}]   ;;  %s8984_s11 = inlined_call_operand.vmem [shape: f32[1,64], index: 11, kind: input, shape index: {}]   ;;  %s8985_s12 = inlined_call_operand.vmem [shape: bf16[64,32], index: 12, kind: input, shape index: {}]   ;;  %s8986_s13 = inlined_call_operand.hbm [shape: f32[9,32], index: 13, kind: input, shape index: {}]   ;;  %s8987_s14 = inlined_call_operand.hbm [shape: f32[8,32], index: 14, kind: output, shape index: {}]  }
   0x1   :  { %20 = vsyncpa [#allocation6], 0 }
   0x2   :  { %21 = vsyncpa [#allocation9], 0 }
   0x3   :  { %22 = vsyncpa [#allocation12], 0  ;;  %s47_s15 = sshll.u32 %s8978_s5, 4  ;;  %s48_s15 = int_to_ptr.hbm [resolvable:$true] %s47_s15 }
   0x4   :  { %23 = vsyncpa [#allocation4], 0  ;;  %s7111_s16 = smov [#allocation5]   ;;  %s77_s20 = sshll.u32 %s8982_s9, 4  ;;  %s78_s20 = int_to_ptr.hbm [resolvable:$true] %s77_s20 }
   0x5   :  { %s49_s17 = sshll.u32 %s7111_s16, 4  ;;  %s7112_s21 = smov 64   ;;  %s50_s17 = int_to_ptr.vmem [resolvable:$true] %s49_s17 }
   0x6   :  { %s7113_s22 = smov 4   ;;  %s7114_s23 = smov [#allocation8]  }
   0x7   :  { %55 = dma.hbm_to_vmem [thread:$0]  %s48_s15, 256, %s50_s17, [#allocation6], %s7112_s21, %s7112_s21, %s7113_s22  }
   0x8   :  { %s79_s24 = sshll.u32 %s7114_s23, 4  ;;  %s29_s26 = sshll.u32 %s8973_s0, 4  ;;  %s80_s24 = int_to_ptr.vmem [resolvable:$true] %s79_s24  ;;  %s30_s26 = int_to_ptr.hbm [resolvable:$true] %s29_s26 }
   0x9   :  { %85 = dma.hbm_to_vmem [thread:$0]  %s78_s20, 256, %s80_s24, [#allocation9], %s7112_s21, %s7112_s21, %s7113_s22  }
   0xa   :  { %s62_s28 = sshll.u32 %s8980_s7, 4  ;;  %s7115_s29 = smov [#allocation2]   ;;  %s63_s28 = int_to_ptr.hbm [resolvable:$true] %s62_s28 }
   0xb   :  { %s31_s30 = sshll.u32 %s7115_s29, 4  ;;  %s7116_s15 = smov [#allocation7]   ;;  %s32_s30 = int_to_ptr.vmem [resolvable:$true] %s31_s30 }
   0xc   :  { %34 = dma.hbm_to_vmem [thread:$0]  %s30_s26, 128, %s32_s30, [#allocation3]  }
   0xd   :  { %s64_s16 = sshll.u32 %s7116_s15, 4  ;;  %s90_s0 = sshll.u32 %s8983_s10, 4  ;;  %s65_s16 = int_to_ptr.vmem [resolvable:$true] %s64_s16  ;;  %s91_s0 = int_to_ptr.hbm [resolvable:$true] %s90_s0 }
   0xe   :  { %70 = dma.hbm_to_vmem [thread:$0]  %s63_s28, 256, %s65_s16, [#allocation6], %s7112_s21, %s7112_s21, %s7113_s22  }
   0xf   :  { %s107_s7 = sshll.u32 %s8986_s13, 4  ;;  %s7117_s23 = smov [#allocation10]   ;;  %s108_s7 = int_to_ptr.hbm [resolvable:$true] %s107_s7 }
  0x10   :  { %s92_s24 = sshll.u32 %s7117_s23, 4  ;;  %s7118_s25 = smov [#allocation11]   ;;  %s93_s24 = int_to_ptr.vmem [resolvable:$true] %s92_s24 }
  0x11   :  { %98 = dma.hbm_to_vmem [thread:$0]  %s91_s0, 256, %s93_s24, [#allocation9], %s7112_s21, %s7112_s21, %s7113_s22  }
  0x12   :  { %s109_s10 = sshll.u32 %s7118_s25, 4  ;;  %s7119_s5 = smov 128   ;;  %s110_s10 = int_to_ptr.vmem [resolvable:$true] %s109_s10 }
  0x13   :  { %s7120_s26 = smov 8  }
  0x14   :  { %115 = dma.hbm_to_vmem [thread:$0]  %s108_s7, 256, %s110_s10, [#allocation12], %s7119_s5, %s7119_s5, %s7120_s26  }
  0x15   :  { %7101 = dma.done.wait [#allocation3], 128  }
  0x16   :  { %7102 = vsyncadd [#allocation3], 4294967168 }
  0x17   :  { %7103 = dma.done.wait [#allocation6], 512  }
  0x18   :  { %7104 = vsyncadd [#allocation6], 4294966784 }
  0x19   :  { %7105 = dma.done.wait [#allocation9], 512  }
  0x1a   :  { %7106 = vsyncadd [#allocation9], 4294966784 }
  0x1b   :  { %7107 = dma.done.wait [#allocation12], 256  }
  0x1c   :  { %7108 = vsyncadd [#allocation12], 4294967040  ;;  %v7244_v0 = vld [vmem:[%s8975_s2 + $0x8] sm:$0xff]  ;;  %v7249_v1 = vld [vmem:[%s8975_s2] sm:$0xff]  ;;  %vm195_vm0 = vcmask 261120   ;;  %s7121_s30 = smov 112  }
  0x1d   :  { %v7251_v2 = vld [vmem:[#allocation2] sm:$0xff]  ;;  %241 = vmatpush.bf16.msra.mxu1 %v7244_v0  ;;  %s7122_s15 = smov 80   ;;  %s7123_s16 = smov 88   ;;  %v6492_v12 = vld [vmem:[#allocation7] sm:$0xff]  ;;  %v173_v14 = vld [vmem:[%s8974_s1 + $0x8] sm:$0xff]  ;;  %vm258_vm1 = vcmask 64512  }
  0x1e   :  { %v215_v3 = vpack.c.bf16 %v7251_v2, %v7251_v2  ;;  %v6532_v4 = vld [vmem:[%s8976_s3] ss:$0 sm:$0xff]  ;;  %s7124_s17 = smov 104   ;;  %s7125_s18 = smov 72   ;;  %vm456_vm2 = vcmask 1043456  }
  0x1f   :  { %s7126_s0 = smov 120   ;;  %s7127_s19 = smov 96   ;;  %v6493_v11 = vld [vmem:[#allocation7 + $0x8] sm:$0xff] }
  0x20   :  { %205 = vmatpush.bf16.msra.mxu0 %v6493_v11  ;;  %v172_v13 = vld [vmem:[%s8974_s1] sm:$0xff]  ;;  %s7128_s1 = smov 48   ;;  %s7129_s25 = smov 40  }
  0x21   :  { %242 = vmatpush.bf16.msra.mxu1 %v7249_v1  ;;  %v174_v15 = vpack.c.bf16 %v173_v14, %v172_v13  ;;  %s7130_s10 = smov 56   ;;  %s7131_s28 = smov 16  }
  0x22   :  { %s7132_s29 = smov 24  }
  0x24   :  { %6268 = vmatmul.msk.bf16.vlgmr.msra.gmra.mxu1 %vm195_vm0, %v215_v3  ;;  %206 = vmatpush.bf16.msra.mxu0 %v6492_v12 }
  0x27   :  { %6259 = vmatmul.msk.bf16.vlgmr.msra.gmra.mxu0 %vm195_vm0, %v174_v15 }
  0xa1   :  { %v244_v5 = vpop.f32.mrf.mxu1 }
  0xa2   :  { %v245_v6 = vadd.f32 %v6532_v4, %v244_v5  ;;  %v6533_v4 = vld [vmem:[%s8981_s8] ss:$0 sm:$0xff] }
  0xa4   :  { %v248_v7 = vpack.c.bf16 %v245_v6, %v245_v6  ;;  %v208_v27 = vpop.f32.mrf.mxu0 }
  0xa5   :  { %v209_v5 = vadd.f32 %v6533_v4, %v208_v27 }
  0xa6   :  { %v254_v8 = vunpack.c.l.b16 %v248_v7 }
  0xa8   :  { %v7261_v9 = vpack.c.b16 %v254_v8, %v254_v8 }
  0xa9   :  { %v246_v10 = vpop.f32.mrf.mxu1 }
  0xaa   :  { %301 = vrot.lane.b32.xlu2 %v7261_v9, %s7121_s30  ;;  %303 = vrot.lane.b32.xlu1 %v7261_v9, %s7122_s15 }
  0xab   :  { %280 = vrot.lane.b32.xlu0 %v7261_v9, %s7123_s16 }
  0xac   :  { %v210_v28 = vpop.f32.mrf.mxu0 }
  0xad   :  { %v211_v6 = vadd.f32 %v6533_v4, %v210_v28 }
  0xaf   :  { %v214_v8 = vpack.c.bf16 %v211_v6, %v211_v6 }
  0xb2   :  { %324 = vrot.lane.b32.xlu2 %v7261_v9, %s7124_s17  ;;  %326 = vrot.lane.b32.xlu1 %v7261_v9, %s7125_s18 }
  0xb3   :  { %278 = vrot.lane.b32.xlu0 %v7261_v9, %s7126_s0 }
  0xbb   :  { %256 = vrot.lane.b32.xlu0 %v7261_v9, %s7127_s19 }
 0x104   :  { %v302_v20 = vpop.permute.xlu2 %301 }
 0x10c   :  { %v325_v24 = vpop.permute.xlu2 %324 }
 0x11c   :  { %v304_v16 = vpop.permute.xlu1 %303 }
 0x11d   :  { %v281_v17 = vpop.permute.xlu0 %280  ;;  %v309_v18 = vsel %vm258_vm1, %v304_v16, 0 }
 0x11e   :  { %v286_v19 = vsel %vm258_vm1, %v281_v17, 0  ;;  %318 = vmatpush.bf16.xpose.msrb.mxu0 %v309_v18 }
 0x11f   :  { %295 = vmatpush.bf16.xpose.msra.mxu3 %v286_v19 }
 0x124   :  { %v327_v21 = vpop.permute.xlu1 %326 }
 0x125   :  { %v279_v22 = vpop.permute.xlu0 %278  ;;  %6271 = vmatmul.msk.bf16.vlgmr.msrb.gmra.mxu0 %vm258_vm1, %v302_v20  ;;  %v332_v23 = vsel %vm258_vm1, %v327_v21, 0 }
 0x126   :  { %6270 = vmatmul.msk.bf16.vlgmr.msra.gmra.mxu3 %vm258_vm1, %v279_v22  ;;  %341 = vmatpush.bf16.xpose.msrb.mxu1 %v332_v23 }
 0x12d   :  { %v257_v25 = vpop.permute.xlu0 %256  ;;  %6272 = vmatmul.msk.bf16.vlgmr.msrb.gmra.mxu1 %vm258_vm1, %v325_v24 }
 0x12e   :  { %v263_v26 = vsel %vm258_vm1, %v257_v25, 0 }
 0x12f   :  { %272 = vmatpush.bf16.xpose.msra.mxu2 %v263_v26 }
 0x136   :  { %6269 = vmatmul.msk.bf16.vlgmr.msra.gmra.mxu2 %vm258_vm1, %v248_v7  ;;  %v213_v7 = vpack.c.bf16 %v209_v5, %v209_v5 }
 0x138   :  { %v654_v10 = vunpack.c.l.b16 %v213_v7 }
 0x1a2   :  { %v320_v29 = vpop.f32.mrf.mxu0 }
 0x1a3   :  { %v349_v30 = vmul.f32 0.35355338, %v320_v29 }
 0x1a5   :  { %v357_v31 = vsel %vm258_vm1, %v349_v30, -inf }
 0x1a6   :  { %358 = vmax.xlane.f32.xlu2 %v357_v31 }
 0x1a9   :  { %v297_v32 = vpop.f32.mrf.mxu3 }
 0x1aa   :  { %v348_v33 = vmul.f32 0.35355338, %v297_v32  ;;  %v322_v34 = vpop.f32.mrf.mxu0  ;;  %v343_v35 = vpop.f32.mrf.mxu1 }
 0x1ab   :  { %v350_v36 = vmul.f32 0.35355338, %v343_v35 }
 0x1ac   :  { %v354_v37 = vsel %vm258_vm1, %v348_v33, -inf }
 0x1ad   :  { %355 = vmax.xlane.f32.xlu1 %v354_v37  ;;  %v360_v38 = vsel %vm258_vm1, %v350_v36, -inf }
 0x1ae   :  { %361 = vmax.xlane.f32.xlu0 %v360_v38 }
 0x1b1   :  { %v299_v39 = vpop.f32.mrf.mxu3 }
 0x1b2   :  { %v345_v40 = vpop.f32.mrf.mxu1 }
 0x1b9   :  { %v274_v41 = vpop.f32.mrf.mxu2 }
 0x1ba   :  { %v347_v42 = vmul.f32 0.35355338, %v274_v41 }
 0x1bc   :  { %v351_v43 = vsel %vm258_vm1, %v347_v42, -inf }
 0x1bd   :  { %352 = vmax.xlane.f32.xlu2 %v351_v43 }
 0x1c1   :  { %v276_v44 = vpop.f32.mrf.mxu2 }
 0x219   :  { %v359_v45 = vpop.xlane.xlu2 %358 }
 0x21a   :  { %v365_v46 = vsub.f32 %v349_v30, %v359_v45 }
 0x21c   :  { %v371_v47 = vmul.f32 1.442695, %v365_v46 }
 0x21e   :  { %6545 = vpow2.f32 %v371_v47 }
 0x220   :  { %v356_v48 = vpop.xlane.xlu1 %355 }
 0x221   :  { %v364_v49 = vsub.f32 %v348_v33, %v356_v48  ;;  %v362_v50 = vpop.xlane.xlu0 %361 }
 0x222   :  { %v366_v51 = vsub.f32 %v350_v36, %v362_v50 }
 0x223   :  { %v369_v52 = vmul.f32 1.442695, %v364_v49 }
 0x224   :  { %v7296_v53 = vpop.eup %6545  ;;  %v373_v54 = vmul.f32 1.442695, %v366_v51 }
 0x225   :  { %6547 = vpow2.f32 %v369_v52  ;;  %v381_v55 = vsel %vm258_vm1, %v7296_v53, 0.0 }
 0x226   :  { %6549 = vpow2.f32 %v373_v54  ;;  %382 = vadd.xlane.f32.xlu2 %v381_v55 }
 0x22b   :  { %v7300_v56 = vpop.eup %6547 }
 0x22c   :  { %v7302_v57 = vpop.eup %6549  ;;  %v378_v58 = vsel %vm258_vm1, %v7300_v56, 0.0 }
 0x22d   :  { %379 = vadd.xlane.f32.xlu1 %v378_v58  ;;  %v384_v59 = vsel %vm258_vm1, %v7302_v57, 0.0 }
 0x22e   :  { %385 = vadd.xlane.f32.xlu0 %v384_v59 }
 0x230   :  { %v353_v60 = vpop.xlane.xlu2 %352 }
 0x231   :  { %v363_v61 = vsub.f32 %v347_v42, %v353_v60 }
 0x233   :  { %v367_v62 = vmul.f32 1.442695, %v363_v61 }
 0x235   :  { %6551 = vpow2.f32 %v367_v62  ;;  %v7351_v62 = vld [vmem:[%s8977_s4 + $0x8] sm:$0xff] }
 0x23b   :  { %v7316_v63 = vpop.eup %6551 }
 0x23c   :  { %v375_v3 = vsel %vm258_vm1, %v7316_v63, 0.0 }
 0x23e   :  { %494 = vrot.lane.b32.xlu2 %v7261_v9, %s7128_s1 }
 0x242   :  { %515 = vrot.lane.b32.xlu0 %v7261_v9, %s7129_s25 }
 0x246   :  { %473 = vrot.lane.b32.xlu1 %v7261_v9, %s7130_s10 }
 0x24a   :  { %451 = vrot.lane.b32.xlu0 %v7261_v9, %s7112_s21  ;;  %v655_v9 = vunpack.c.l.b16 %v214_v8 }
 0x24c   :  { %v7323_v11 = vpack.c.b16 %v655_v9, %v654_v10 }
 0x24e   :  { %v7330_v20 = vsel %vm258_vm1, %v7323_v11, 0 }
 0x270   :  { %376 = vadd.xlane.f32.xlu1 %v375_v3 }
 0x289   :  { %704 = vrot.lane.b32.xlu1 %v7323_v11, %s7121_s30 }
 0x299   :  { %v383_v12 = vpop.xlane.xlu2 %382 }
 0x29a   :  { %6553 = vrcp.f32 %v383_v12  ;;  %v426_v21 = vand.u32 2147483648, %v383_v12  ;;  %v424_v23 = vand.u32 2147483647, %v383_v12  ;;  %vm420_vm4 = vweird.f32 %v383_v12 }
 0x29c   :  { %v427_v27 = vor.u32 1.1754944e-38, %v426_v21  ;;  %vm425_vm6 = vcmp.eq.f32.partialorder %v424_v23, 8.507059e+37 }
 0x2a0   :  { %v6554_v13 = vpop.eup %6553  ;;  %v380_v14 = vpop.xlane.xlu1 %379 }
 0x2a1   :  { %v416_v15 = vmul.f32 %v6554_v13, %v383_v12  ;;  %6555 = vrcp.f32 %v380_v14  ;;  %v495_v16 = vpop.permute.xlu2 %494  ;;  %v386_v17 = vpop.xlane.xlu0 %385  ;;  %vm421_vm3 = vweird.f32 %v6554_v13  ;;  %vm406_vm9 = vweird.f32 %v380_v14 }
 0x2a2   :  { %v500_v18 = vsel %vm456_vm2, %v495_v16, 0  ;;  %6557 = vrcp.f32 %v386_v17  ;;  %vm422_vm5 = vmor %vm420_vm4, %vm421_vm3  ;;  %v440_v36 = vand.u32 2147483648, %v386_v17  ;;  %v438_v38 = vand.u32 2147483647, %v386_v17 }
 0x2a3   :  { %v417_v19 = vsub.f32 1.0, %v416_v15  ;;  %509 = vmatpush.bf16.msra.mxu0 %v500_v18  ;;  %v412_v40 = vand.u32 2147483648, %v380_v14  ;;  %vm434_vm11 = vweird.f32 %v386_v17  ;;  %v410_v44 = vand.u32 2147483647, %v380_v14 }
 0x2a4   :  { %v441_v45 = vor.u32 1.1754944e-38, %v440_v36  ;;  %vm439_vm13 = vcmp.eq.f32.partialorder %v438_v38, 8.507059e+37 }
 0x2a5   :  { %v418_v22 = vmul.f32 %v6554_v13, %v417_v19  ;;  %v413_v48 = vor.u32 1.1754944e-38, %v412_v40  ;;  %vm411_vm14 = vcmp.eq.f32.partialorder %v410_v44, 8.507059e+37  ;;  %v7133_v40 = vmov 32.0  }
 0x2a7   :  { %670 = vmatpush.bf16.xpose.msrb.mxu0 %v7330_v20  ;;  %v6556_v24 = vpop.eup %6555  ;;  %v419_v25 = vadd.f32 %v6554_v13, %v418_v22 }
 0x2a8   :  { %v6558_v26 = vpop.eup %6557  ;;  %v402_v28 = vmul.f32 %v6556_v24, %v380_v14  ;;  %vm407_vm7 = vweird.f32 %v6556_v24 }
 0x2a9   :  { %v423_v29 = vsel %vm422_vm5, %v6554_v13, %v419_v25  ;;  %v430_v30 = vmul.f32 %v6558_v26, %v386_v17  ;;  %vm435_vm8 = vweird.f32 %v6558_v26  ;;  %vm7334_vm10 = vmor %vm406_vm9, %vm407_vm7  ;;  %vm551_vm7 = vcmask 195584  }
 0x2aa   :  { %v403_v31 = vsub.f32 1.0, %v402_v28  ;;  %v428_v32 = vsel %vm425_vm6, %v427_v27, %v423_v29  ;;  %vm436_vm12 = vmor %vm434_vm11, %vm435_vm8  ;;  %vm549_vm6 = vcmask 130048  }
 0x2ab   :  { %v431_v33 = vsub.f32 1.0, %v430_v30  ;;  %v445_v34 = vmul.f32 %v7296_v53, %v428_v32 }
 0x2ac   :  { %v404_v35 = vmul.f32 %v6556_v24, %v403_v31 }
 0x2ad   :  { %v432_v37 = vmul.f32 %v6558_v26, %v431_v33  ;;  %v449_v39 = vpack.c.bf16 %v445_v34, %v445_v34  ;;  %v6534_v34 = vld [vmem:[#allocation11] ss:$0 sm:$0xff] }
 0x2ae   :  { %v405_v41 = vadd.f32 %v6556_v24, %v404_v35 }
 0x2af   :  { %v433_v43 = vadd.f32 %v6558_v26, %v432_v37  ;;  %6275 = vmatmul.msk.bf16.vlgmr.msra.gmra.mxu0 %vm258_vm1, %v449_v39 }
 0x2b0   :  { %v409_v47 = vsel %vm7334_vm10, %v6556_v24, %v405_v41  ;;  %v7374_v41 = vld [vmem:[#allocation5 + $0x8] sm:$0xff] }
 0x2b1   :  { %v437_v46 = vsel %vm436_vm12, %v6558_v26, %v433_v43  ;;  %v414_v52 = vsel %vm411_vm14, %v413_v48, %v409_v47 }
 0x2b2   :  { %v442_v49 = vsel %vm439_vm13, %v441_v45, %v437_v46  ;;  %v444_v55 = vmul.f32 %v7300_v56, %v414_v52  ;;  %v6496_v56 = vld [vmem:[%s8977_s4] sm:$0xff]  ;;  %v7377_v45 = vld [vmem:[#allocation5] sm:$0xff] }
 0x2b3   :  { %v446_v50 = vmul.f32 %v7302_v57, %v442_v49 }
 0x2b4   :  { %v516_v51 = vpop.permute.xlu0 %515  ;;  %v448_v60 = vpack.c.bf16 %v444_v55, %v444_v55 }
 0x2b5   :  { %v521_v53 = vsel %vm456_vm2, %v516_v51, 0  ;;  %v450_v54 = vpack.c.bf16 %v446_v50, %v446_v50 }
 0x2b6   :  { %530 = vmatpush.bf16.msra.mxu1 %v521_v53 }
 0x2b8   :  { %v474_v58 = vpop.permute.xlu1 %473 }
 0x2b9   :  { %v479_v59 = vsel %vm456_vm2, %v474_v58, 0  ;;  %6276 = vmatmul.msk.bf16.vlgmr.msra.gmra.mxu1 %vm258_vm1, %v450_v54 }
 0x2ba   :  { %488 = vmatpush.bf16.msrb.mxu3 %v479_v59 }
 0x2bc   :  { %v452_v61 = vpop.permute.xlu0 %451 }
 0x2bd   :  { %6274 = vmatmul.msk.bf16.vlgmr.msrb.gmra.mxu3 %vm258_vm1, %v448_v60  ;;  %v458_v57 = vsel %vm456_vm2, %v452_v61, 0 }
 0x2be   :  { %467 = vmatpush.bf16.msrb.mxu2 %v458_v57  ;;  %640 = vmatpush.bf16.msra.mxu3 %v7374_v41 }
 0x2c2   :  { %575 = vmatpush.bf16.msra.mxu2 %v7351_v62  ;;  %641 = vmatpush.bf16.msra.mxu3 %v7377_v45 }
 0x2c6   :  { %576 = vmatpush.bf16.msra.mxu2 %v6496_v56 }
 0x2e3   :  { %v377_v3 = vpop.xlane.xlu1 %376 }
 0x2e4   :  { %6559 = vrcp.f32 %v377_v3  ;;  %v398_v7 = vand.u32 2147483648, %v377_v3  ;;  %v396_v10 = vand.u32 2147483647, %v377_v3  ;;  %vm392_vm3 = vweird.f32 %v377_v3 }
 0x2e5   :  { %6561 = vrcp.f32 %v7133_v40 }
 0x2e6   :  { %v399_v12 = vor.u32 1.1754944e-38, %v398_v7  ;;  %vm397_vm5 = vcmp.eq.f32.partialorder %v396_v10, 8.507059e+37 }
 0x2ea   :  { %v6560_v4 = vpop.eup %6559 }
 0x2eb   :  { %v388_v5 = vmul.f32 %v6560_v4, %v377_v3  ;;  %vm393_vm15 = vweird.f32 %v6560_v4  ;;  %v6562_v42 = vpop.eup %6561 }
 0x2ec   :  { %vm394_vm4 = vmor %vm392_vm3, %vm393_vm15  ;;  %v587_v43 = vmul.f32 32.0, %v6562_v42  ;;  %vm591_vm8 = vweird.f32 %v6562_v42 }
 0x2ed   :  { %v389_v6 = vsub.f32 1.0, %v388_v5  ;;  %v7389_v5 = vld [vmem:[#allocation11 + $0x3] ss:$0 sm:$0xff] }
 0x2ee   :  { %v588_v44 = vsub.f32 1.0, %v587_v43 }
 0x2ef   :  { %v390_v8 = vmul.f32 %v6560_v4, %v389_v6 }
 0x2f0   :  { %v589_v46 = vmul.f32 %v6562_v42, %v588_v44 }
 0x2f1   :  { %v391_v9 = vadd.f32 %v6560_v4, %v390_v8  ;;  %v7391_v8 = vld [vmem:[#allocation11 + $0x4] ss:$0 sm:$0xff] }
 0x2f3   :  { %v395_v13 = vsel %vm394_vm4, %v6560_v4, %v391_v9 }
 0x2f4   :  { %v400_v14 = vsel %vm397_vm5, %v399_v12, %v395_v13  ;;  %v7403_v13 = vld [vmem:[%s8979_s6] ss:$0 sm:$0xff] }
 0x2f5   :  { %v443_v15 = vmul.f32 %v7316_v63, %v400_v14 }
 0x2f7   :  { %v447_v16 = vpack.c.bf16 %v443_v15, %v443_v15 }
 0x2f9   :  { %6273 = vmatmul.msk.bf16.vlgmr.msrb.gmra.mxu2 %vm258_vm1, %v447_v16 }
 0x2fb   :  { %v705_v17 = vpop.permute.xlu1 %704 }
 0x2fc   :  { %v7360_v18 = vsel %vm258_vm1, %v705_v17, 0 }
 0x2fd   :  { %719 = vmatpush.bf16.xpose.msrb.mxu2 %v7360_v18 }
 0x32c   :  { %v511_v19 = vpop.f32.mrf.mxu0 }
 0x32d   :  { %541 = vrot.lane.b32.xlu0 %v511_v19, %s7131_s28 }
 0x334   :  { %v513_v21 = vpop.f32.mrf.mxu0 }
 0x336   :  { %v532_v22 = vpop.f32.mrf.mxu1 }
 0x33e   :  { %v534_v23 = vpop.f32.mrf.mxu1 }
 0x340   :  { %v490_v24 = vpop.f32.mrf.mxu3 }
 0x341   :  { %537 = vrot.lane.b32.xlu2 %v490_v24, %s7120_s26 }
 0x348   :  { %v492_v63 = vpop.f32.mrf.mxu3 }
 0x349   :  { %545 = vrot.lane.b32.xlu2 %v532_v22, %s7132_s29 }
 0x37c   :  { %v469_v25 = vpop.f32.mrf.mxu2 }
 0x384   :  { %v471_v26 = vpop.f32.mrf.mxu2 }
 0x39b   :  { %v538_v27 = vpop.permute.xlu2 %537 }
 0x39c   :  { %v548_v29 = vsel %vm258_vm1, %v469_v25, %v538_v27 }
 0x39f   :  { %v542_v28 = vpop.permute.xlu0 %541 }
 0x3a0   :  { %v550_v30 = vsel %vm549_vm6, %v548_v29, %v542_v28 }
 0x3a3   :  { %v546_v31 = vpop.permute.xlu2 %545 }
 0x3a4   :  { %v552_v32 = vsel %vm551_vm7, %v550_v30, %v546_v31 }
 0x3a5   :  { %v553_v33 = vpack.c.bf16 %v552_v32, %v552_v32 }
 0x3a7   :  { %6285 = vmatmul.msk.bf16.vlgmr.msra.gmra.mxu2 %vm195_vm0, %v553_v33 }
 0x42a   :  { %v578_v35 = vpop.f32.mrf.mxu2 }
 0x42b   :  { %v579_v36 = vadd.f32 %v6534_v34, %v578_v35 }
 0x42d   :  { %v582_v37 = vadd.f32 %v579_v36, %v7251_v2  ;;  %v590_v2 = vadd.f32 %v6562_v42, %v589_v46 }
 0x42f   :  { %v583_v38 = vsel %vm195_vm0, %v582_v37, 0.0  ;;  %v7380_v47 = vsel %vm591_vm8, %v6562_v42, %v590_v2 }
 0x430   :  { %584 = vadd.xlane.f32.xlu0 %v583_v38 }
 0x432   :  { %v580_v39 = vpop.f32.mrf.mxu2 }
 0x444   :  { %727 = vrot.lane.b32.xlu0 %v7323_v11, %s7124_s17 }
 0x4a3   :  { %v585_v48 = vpop.xlane.xlu0 %584 }
 0x4a4   :  { %v593_v49 = vmul.f32 %v7380_v47, %v585_v48 }
 0x4a6   :  { %v594_v50 = vsub.f32 %v582_v37, %v593_v49 }
 0x4a8   :  { %v595_v51 = vmul.f32 %v594_v50, %v594_v50 }
 0x4aa   :  { %v596_v52 = vsel %vm195_vm0, %v595_v51, 0.0 }
 0x4ab   :  { %597 = vadd.xlane.f32.xlu2 %v596_v52 }
 0x4b6   :  { %v728_v53 = vpop.permute.xlu0 %727 }
 0x4b7   :  { %v7385_v54 = vsel %vm258_vm1, %v728_v53, 0 }
 0x4b8   :  { %742 = vmatpush.bf16.xpose.msrb.mxu3 %v7385_v54 }
 0x51e   :  { %v598_v55 = vpop.xlane.xlu2 %597 }
 0x51f   :  { %v599_v58 = vmul.f32 %v598_v55, %v7380_v47 }
 0x521   :  { %v600_v59 = vadd.f32 1e-05, %v599_v58 }
 0x523   :  { %6563 = vrsqrt.f32 %v600_v59  ;;  %vm607_vm10 = vweird.f32 %v600_v59 }
 0x529   :  { %v6564_v60 = vpop.eup %6563 }
 0x52a   :  { %v602_v61 = vmul.f32 %v6564_v60, %v600_v59  ;;  %vm608_vm9 = vweird.f32 %v6564_v60 }
 0x52b   :  { %vm609_vm11 = vmor %vm607_vm10, %vm608_vm9 }
 0x52c   :  { %v603_v57 = vmul.f32 %v6564_v60, %v602_v61 }
 0x52e   :  { %v604_v56 = vmul.f32 0.5, %v603_v57 }
 0x530   :  { %v605_v3 = vsub.f32 1.5, %v604_v56 }
 0x532   :  { %v606_v4 = vmul.f32 %v6564_v60, %v605_v3 }
 0x534   :  { %v610_v6 = vsel %vm609_vm11, %v6564_v60, %v606_v4 }
 0x535   :  { %v611_v7 = vmul.f32 %v610_v6, %v594_v50 }
 0x537   :  { %v612_v10 = vmul.f32 %v7389_v5, %v611_v7 }
 0x539   :  { %v7395_v9 = vadd.f32 %v7391_v8, %v612_v10 }
 0x53b   :  { %v614_v12 = vpack.c.bf16 %v7395_v9, %v7395_v9 }
 0x53d   :  { %6294 = vmatmul.msk.bf16.vlgmr.msra.gmra.mxu3 %vm195_vm0, %v614_v12 }
 0x5c0   :  { %v643_v14 = vpop.f32.mrf.mxu3 }
 0x5c1   :  { %v644_v15 = vadd.f32 %v7403_v13, %v643_v14 }
 0x5c3   :  { %v647_v16 = vpack.c.bf16 %v644_v15, %v644_v15 }
 0x5c5   :  { %v677_v17 = vunpack.c.l.b16 %v647_v16  ;;  %6295 = vmatmul.msk.bf16.vlgmr.msrb.gmra.mxu0 %vm258_vm1, %v647_v16 }
 0x5c7   :  { %v678_v19 = vpack.c.b16 %v677_v17, %v677_v17 }
 0x5c8   :  { %v645_v21 = vpop.f32.mrf.mxu3 }
 0x5c9   :  { %679 = vrot.lane.b32.xlu0 %v678_v19, %s7126_s0  ;;  %725 = vrot.lane.b32.xlu1 %v678_v19, %s7124_s17 }
 0x5ca   :  { %702 = vrot.lane.b32.xlu2 %v678_v19, %s7121_s30 }
 0x5d1   :  { %681 = vrot.lane.b32.xlu1 %v7323_v11, %s7126_s0 }
 0x624   :  { %v703_v22 = vpop.permute.xlu2 %702 }
 0x625   :  { %6297 = vmatmul.msk.bf16.vlgmr.msrb.gmra.mxu2 %vm258_vm1, %v703_v22 }
 0x63b   :  { %v726_v23 = vpop.permute.xlu1 %725  ;;  %v680_v27 = vpop.permute.xlu0 %679 }
 0x63c   :  { %6298 = vmatmul.msk.bf16.vlgmr.msrb.gmra.mxu3 %vm258_vm1, %v726_v23 }
 0x642   :  { %v672_v24 = vpop.f32.mrf.mxu0 }
 0x643   :  { %v682_v63 = vpop.permute.xlu1 %681  ;;  %v748_v31 = vmul.f32 0.35355338, %v672_v24 }
 0x644   :  { %v7415_v25 = vsel %vm258_vm1, %v682_v63, 0 }
 0x645   :  { %696 = vmatpush.bf16.xpose.msrb.mxu1 %v7415_v25  ;;  %v752_v33 = vsel %vm549_vm6, %v748_v31, -inf }
 0x64a   :  { %v674_v26 = vpop.f32.mrf.mxu0 }
 0x64c   :  { %6296 = vmatmul.msk.bf16.vlgmr.msrb.gmra.mxu1 %vm258_vm1, %v680_v27 }
 0x6a8   :  { %v721_v28 = vpop.f32.mrf.mxu2 }
 0x6a9   :  { %v750_v29 = vmul.f32 0.35355338, %v721_v28 }
 0x6ab   :  { %v758_v30 = vsel %vm549_vm6, %v750_v29, -inf }
 0x6ac   :  { %759 = vmax.xlane.f32.xlu1 %v758_v30 }
 0x6b0   :  { %v723_v32 = vpop.f32.mrf.mxu2 }
 0x6b4   :  { %753 = vmax.xlane.f32.xlu1 %v752_v33 }
 0x6bf   :  { %v744_v34 = vpop.f32.mrf.mxu3 }
 0x6c0   :  { %v751_v35 = vmul.f32 0.35355338, %v744_v34 }
 0x6c2   :  { %v761_v36 = vsel %vm549_vm6, %v751_v35, -inf }
 0x6c3   :  { %762 = vmax.xlane.f32.xlu2 %v761_v36 }
 0x6c7   :  { %v746_v37 = vpop.f32.mrf.mxu3 }
 0x6c9   :  { %v698_v38 = vpop.f32.mrf.mxu1 }
 0x6ca   :  { %v749_v39 = vmul.f32 0.35355338, %v698_v38 }
 0x6cc   :  { %v755_v40 = vsel %vm549_vm6, %v749_v39, -inf }
 0x6cd   :  { %756 = vmax.xlane.f32.xlu0 %v755_v40 }
 0x6d1   :  { %v700_v42 = vpop.f32.mrf.mxu1 }
 0x71f   :  { %v760_v43 = vpop.xlane.xlu1 %759 }
 0x720   :  { %v766_v44 = vsub.f32 %v750_v29, %v760_v43 }
 0x722   :  { %v772_v46 = vmul.f32 1.442695, %v766_v44 }
 0x724   :  { %6565 = vpow2.f32 %v772_v46 }
 0x727   :  { %v754_v57 = vpop.xlane.xlu1 %753 }
 0x728   :  { %v764_v56 = vsub.f32 %v748_v31, %v754_v57 }
 0x72a   :  { %v6566_v2 = vpop.eup %6565  ;;  %v768_v3 = vmul.f32 1.442695, %v764_v56 }
 0x72b   :  { %v782_v48 = vsel %vm549_vm6, %v6566_v2, 0.0 }
 0x72c   :  { %783 = vadd.xlane.f32.xlu2 %v782_v48 }
 0x736   :  { %v763_v49 = vpop.xlane.xlu2 %762 }
 0x737   :  { %v767_v50 = vsub.f32 %v751_v35, %v763_v49 }
 0x739   :  { %v774_v51 = vmul.f32 1.442695, %v767_v50 }
 0x73b   :  { %6567 = vpow2.f32 %v774_v51 }
 0x740   :  { %v757_v52 = vpop.xlane.xlu0 %756 }
 0x741   :  { %v7424_v53 = vpop.eup %6567  ;;  %v765_v55 = vsub.f32 %v749_v39, %v757_v52 }
 0x742   :  { %v785_v58 = vsel %vm549_vm6, %v7424_v53, 0.0 }
 0x743   :  { %v770_v59 = vmul.f32 1.442695, %v765_v55  ;;  %786 = vadd.xlane.f32.xlu0 %v785_v58 }
 0x744   :  { %890 = vrot.lane.b32.xlu2 %v7323_v11, %s7122_s15 }
 0x745   :  { %6569 = vpow2.f32 %v770_v59 }
 0x746   :  { %6571 = vpow2.f32 %v768_v3 }
 0x74b   :  { %v7430_v60 = vpop.eup %6569 }
 0x74c   :  { %852 = vrot.lane.b32.xlu2 %v7323_v11, %s7127_s19  ;;  %v779_v61 = vsel %vm549_vm6, %v7430_v60, 0.0  ;;  %v7440_v4 = vpop.eup %6571 }
 0x74d   :  { %780 = vadd.xlane.f32.xlu1 %v779_v61  ;;  %v776_v6 = vsel %vm549_vm6, %v7440_v4, 0.0 }
 0x757   :  { %909 = vrot.lane.b32.xlu0 %v7323_v11, %s7125_s18 }
 0x766   :  { %871 = vrot.lane.b32.xlu1 %v7323_v11, %s7123_s16 }
 0x781   :  { %777 = vadd.xlane.f32.xlu0 %v776_v6 }
 0x79f   :  { %v784_v7 = vpop.xlane.xlu2 %783 }
 0x7a0   :  { %6573 = vrcp.f32 %v784_v7  ;;  %v827_v11 = vand.u32 2147483648, %v784_v7  ;;  %v825_v17 = vand.u32 2147483647, %v784_v7  ;;  %vm821_vm13 = vweird.f32 %v784_v7 }
 0x7a2   :  { %v828_v21 = vor.u32 1.1754944e-38, %v827_v11  ;;  %vm826_vm15 = vcmp.eq.f32.partialorder %v825_v17, 8.507059e+37 }
 0x7a6   :  { %v6574_v10 = vpop.eup %6573 }
 0x7a7   :  { %v817_v12 = vmul.f32 %v6574_v10, %v784_v7  ;;  %v7444_v14 = vpop.permute.xlu2 %890  ;;  %vm822_vm12 = vweird.f32 %v6574_v10 }
 0x7a8   :  { %903 = vmatpush.bf16.msra.mxu2 %v7444_v14  ;;  %vm823_vm14 = vmor %vm821_vm13, %vm822_vm12 }
 0x7a9   :  { %v818_v15 = vsub.f32 1.0, %v817_v12 }
 0x7ab   :  { %v819_v16 = vmul.f32 %v6574_v10, %v818_v15 }
 0x7ad   :  { %v820_v19 = vadd.f32 %v6574_v10, %v819_v16 }
 0x7af   :  { %v824_v22 = vsel %vm823_vm14, %v6574_v10, %v820_v19  ;;  %v7447_v23 = vpop.permute.xlu2 %852 }
 0x7b0   :  { %865 = vmatpush.bf16.msra.mxu0 %v7447_v23  ;;  %v829_v24 = vsel %vm826_vm15, %v828_v21, %v824_v22 }
 0x7b1   :  { %v846_v63 = vmul.f32 %v6566_v2, %v829_v24 }
 0x7b3   :  { %v850_v26 = vpack.c.bf16 %v846_v63, %v846_v63 }
 0x7b5   :  { %6301 = vmatmul.msk.bf16.vlgmr.msra.gmra.mxu2 %vm549_vm6, %v850_v26 }
 0x7b6   :  { %v787_v27 = vpop.xlane.xlu0 %786 }
 0x7b7   :  { %6575 = vrcp.f32 %v787_v27  ;;  %v841_v32 = vand.u32 2147483648, %v787_v27  ;;  %v839_v34 = vand.u32 2147483647, %v787_v27  ;;  %vm835_vm4 = vweird.f32 %v787_v27 }
 0x7b9   :  { %v842_v36 = vor.u32 1.1754944e-38, %v841_v32  ;;  %vm840_vm8 = vcmp.eq.f32.partialorder %v839_v34, 8.507059e+37 }
 0x7bd   :  { %v6576_v28 = vpop.eup %6575 }
 0x7be   :  { %v831_v29 = vmul.f32 %v6576_v28, %v787_v27  ;;  %vm836_vm3 = vweird.f32 %v6576_v28  ;;  %v7468_v27 = vld [vmem:[#allocation8 + $0x8] sm:$0xff] }
 0x7bf   :  { %vm837_vm5 = vmor %vm835_vm4, %vm836_vm3  ;;  %965 = vmatpush.bf16.msrb.mxu0 %v7468_v27 }
 0x7c0   :  { %v832_v30 = vsub.f32 1.0, %v831_v29  ;;  %v781_v31 = vpop.xlane.xlu1 %780 }
 0x7c1   :  { %6577 = vrcp.f32 %v781_v31  ;;  %v813_v48 = vand.u32 2147483648, %v781_v31  ;;  %vm807_vm10 = vweird.f32 %v781_v31  ;;  %v811_v50 = vand.u32 2147483647, %v781_v31 }
 0x7c2   :  { %v833_v33 = vmul.f32 %v6576_v28, %v832_v30 }
 0x7c3   :  { %v814_v52 = vor.u32 1.1754944e-38, %v813_v48  ;;  %vm812_vm12 = vcmp.eq.f32.partialorder %v811_v50, 8.507059e+37  ;;  %v7488_v50 = vld [vmem:[#allocation10] sm:$0xff] }
 0x7c4   :  { %v834_v35 = vadd.f32 %v6576_v28, %v833_v33 }
 0x7c6   :  { %v838_v37 = vsel %vm837_vm5, %v6576_v28, %v834_v35  ;;  %v7478_v35 = vld [vmem:[#allocation11 + $0x1] ss:$0 sm:$0xff] }
 0x7c7   :  { %v6578_v38 = vpop.eup %6577  ;;  %v843_v39 = vsel %vm840_vm8, %v842_v36, %v838_v37 }
 0x7c8   :  { %v803_v40 = vmul.f32 %v6578_v38, %v781_v31  ;;  %v847_v42 = vmul.f32 %v7424_v53, %v843_v39  ;;  %vm808_vm9 = vweird.f32 %v6578_v38 }
 0x7c9   :  { %v7452_v43 = vpop.permute.xlu0 %909  ;;  %vm809_vm11 = vmor %vm807_vm10, %vm808_vm9  ;;  %vm8988_vm9 = vcmask 523264  }
 0x7ca   :  { %v804_v44 = vsub.f32 1.0, %v803_v40  ;;  %922 = vmatpush.bf16.msra.mxu3 %v7452_v43  ;;  %v851_v46 = vpack.c.bf16 %v847_v42, %v847_v42 }
 0x7cc   :  { %v805_v2 = vmul.f32 %v6578_v38, %v804_v44 }
 0x7cd   :  { %6302 = vmatmul.msk.bf16.vlgmr.msra.gmra.mxu3 %vm549_vm6, %v851_v46 }
 0x7ce   :  { %1116 = vmatpush.bf16.msrb.mxu3 %v7244_v0  ;;  %v806_v49 = vadd.f32 %v6578_v38, %v805_v2 }
 0x7d0   :  { %v810_v51 = vsel %vm809_vm11, %v6578_v38, %v806_v49  ;;  %v7485_v49 = vld [vmem:[#allocation10 + $0x8] sm:$0xff] }
 0x7d1   :  { %v815_v53 = vsel %vm812_vm12, %v814_v52, %v810_v51 }
 0x7d2   :  { %1117 = vmatpush.bf16.msrb.mxu3 %v7249_v1  ;;  %v845_v55 = vmul.f32 %v7430_v60, %v815_v53  ;;  %v7501_v53 = vld [vmem:[%s8985_s12 + $0x10] sm:$0xff] }
 0x7d4   :  { %v849_v0 = vpack.c.bf16 %v845_v55, %v845_v55 }
 0x7d8   :  { %v7459_v58 = vpop.permute.xlu1 %871 }
 0x7d9   :  { %884 = vmatpush.bf16.msra.mxu1 %v7459_v58 }
 0x7dc   :  { %6300 = vmatmul.msk.bf16.vlgmr.msra.gmra.mxu1 %vm549_vm6, %v849_v0 }
 0x7dd   :  { %1023 = vmatpush.bf16.msrb.mxu1 %v7485_v49 }
 0x7e1   :  { %1024 = vmatpush.bf16.msrb.mxu1 %v7488_v50 }
 0x7f4   :  { %v778_v59 = vpop.xlane.xlu0 %777 }
 0x7f5   :  { %6579 = vrcp.f32 %v778_v59  ;;  %v799_v3 = vand.u32 2147483648, %v778_v59  ;;  %v797_v6 = vand.u32 2147483647, %v778_v59  ;;  %vm793_vm14 = vweird.f32 %v778_v59 }
 0x7f7   :  { %v800_v60 = vor.u32 1.1754944e-38, %v799_v3  ;;  %vm798_vm3 = vcmp.eq.f32.partialorder %v797_v6, 8.507059e+37 }
 0x7fb   :  { %v6580_v61 = vpop.eup %6579 }
 0x7fc   :  { %v789_v57 = vmul.f32 %v6580_v61, %v778_v59  ;;  %vm794_vm13 = vweird.f32 %v6580_v61 }
 0x7fd   :  { %vm795_vm15 = vmor %vm793_vm14, %vm794_vm13 }
 0x7fe   :  { %v790_v56 = vsub.f32 1.0, %v789_v57 }
 0x800   :  { %v791_v1 = vmul.f32 %v6580_v61, %v790_v56 }
 0x802   :  { %v792_v7 = vadd.f32 %v6580_v61, %v791_v1  ;;  %v7504_v1 = vld [vmem:[#allocation11 + $0x5] ss:$0 sm:$0xff] }
 0x804   :  { %v796_v10 = vsel %vm795_vm15, %v6580_v61, %v792_v7 }
 0x805   :  { %v801_v12 = vsel %vm798_vm3, %v800_v60, %v796_v10  ;;  %v7506_v60 = vld [vmem:[#allocation11 + $0x6] ss:$0 sm:$0xff] }
 0x806   :  { %v844_v15 = vmul.f32 %v7440_v4, %v801_v12  ;;  %v7471_v4 = vld [vmem:[#allocation8] sm:$0xff] }
 0x807   :  { %966 = vmatpush.bf16.msrb.mxu0 %v7471_v4 }
 0x808   :  { %v848_v11 = vpack.c.bf16 %v844_v15, %v844_v15 }
 0x80a   :  { %6299 = vmatmul.msk.bf16.vlgmr.msra.gmra.mxu0 %vm549_vm6, %v848_v11  ;;  %v7514_v11 = vld [vmem:[%s8985_s12 + $0x8] sm:$0xff] }
 0x838   :  { %v905_v16 = vpop.f32.mrf.mxu2 }
 0x839   :  { %933 = vrot.lane.b32.xlu2 %v905_v16, %s7131_s28  ;;  %v7520_v16 = vld [vmem:[%s8985_s12] sm:$0xff] }
 0x840   :  { %v907_v17 = vpop.f32.mrf.mxu2 }
 0x841   :  { %v7526_v17 = vld [vmem:[%s8984_s11] ss:$0 sm:$0xff] }
 0x850   :  { %v924_v19 = vpop.f32.mrf.mxu3 }
 0x858   :  { %v926_v21 = vpop.f32.mrf.mxu3 }
 0x859   :  { %v886_v22 = vpop.f32.mrf.mxu1 }
 0x85a   :  { %929 = vrot.lane.b32.xlu1 %v886_v22, %s7120_s26 }
 0x861   :  { %v888_v24 = vpop.f32.mrf.mxu1 }
 0x862   :  { %937 = vrot.lane.b32.xlu1 %v924_v19, %s7132_s29 }
 0x887   :  { %v867_v63 = vpop.f32.mrf.mxu0 }
 0x88f   :  { %v869_v26 = vpop.f32.mrf.mxu0 }
 0x890   :  { %v7530_v26 = vld [vmem:[#allocation11 + $0x2] ss:$0 sm:$0xff] }
 0x893   :  { %v934_v30 = vpop.permute.xlu2 %933 }
 0x8cc   :  { %v930_v28 = vpop.permute.xlu1 %929 }
 0x8cd   :  { %v940_v29 = vsel %vm258_vm1, %v867_v63, %v930_v28 }
 0x8ce   :  { %v941_v31 = vsel %vm549_vm6, %v940_v29, %v934_v30 }
 0x8d4   :  { %v938_v32 = vpop.permute.xlu1 %937 }
 0x8d5   :  { %v942_v33 = vsel %vm551_vm7, %v941_v31, %v938_v32 }
 0x8d6   :  { %v943_v34 = vpack.c.bf16 %v942_v33, %v942_v33 }
 0x8d8   :  { %6311 = vmatmul.msk.bf16.vlgmr.msrb.gmra.mxu0 %vm195_vm0, %v943_v34 }
 0x955   :  { %v968_v36 = vpop.f32.mrf.mxu0 }
 0x956   :  { %v969_v37 = vadd.f32 %v7478_v35, %v968_v36 }
 0x958   :  { %v972_v38 = vadd.f32 %v969_v37, %v7395_v9  ;;  %v7494_v9 = vld [vmem:[%s8985_s12 + $0x18] sm:$0xff] }
 0x959   :  { %1072 = vmatpush.bf16.msrb.mxu2 %v7494_v9 }
 0x95a   :  { %v973_v39 = vsel %vm195_vm0, %v972_v38, 0.0 }
 0x95b   :  { %974 = vadd.xlane.f32.xlu2 %v973_v39 }
 0x95d   :  { %v970_v40 = vpop.f32.mrf.mxu0  ;;  %1073 = vmatpush.bf16.msrb.mxu2 %v7501_v53 }
 0x961   :  { %1074 = vmatpush.bf16.msrb.mxu2 %v7514_v11 }
 0x965   :  { %1075 = vmatpush.bf16.msrb.mxu2 %v7520_v16 }
 0x9ce   :  { %v975_v42 = vpop.xlane.xlu2 %974 }
 0x9cf   :  { %v976_v44 = vmul.f32 %v975_v42, %v7380_v47 }
 0x9d1   :  { %v977_v46 = vsub.f32 %v972_v38, %v976_v44 }
 0x9d3   :  { %v978_v2 = vmul.f32 %v977_v46, %v977_v46 }
 0x9d5   :  { %v979_v48 = vsel %vm195_vm0, %v978_v2, 0.0 }
 0x9d6   :  { %980 = vadd.xlane.f32.xlu1 %v979_v48 }
 0xa49   :  { %v981_v51 = vpop.xlane.xlu1 %980 }
 0xa4a   :  { %v982_v52 = vmul.f32 %v981_v51, %v7380_v47 }
 0xa4c   :  { %v983_v55 = vadd.f32 1e-05, %v982_v52 }
 0xa4e   :  { %6581 = vrsqrt.f32 %v983_v55  ;;  %vm990_vm5 = vweird.f32 %v983_v55 }
 0xa54   :  { %v6582_v0 = vpop.eup %6581 }
 0xa55   :  { %v985_v59 = vmul.f32 %v6582_v0, %v983_v55  ;;  %vm991_vm4 = vweird.f32 %v6582_v0  ;;  %v7537_v55 = vld [vmem:[#allocation11 + $0x7] ss:$0 sm:$0xff] }
 0xa56   :  { %vm992_vm8 = vmor %vm990_vm5, %vm991_vm4 }
 0xa57   :  { %v986_v61 = vmul.f32 %v6582_v0, %v985_v59 }
 0xa59   :  { %v987_v57 = vmul.f32 0.5, %v986_v61  ;;  %v7539_v61 = vld [vmem:[#allocation11 + $0x8] ss:$0 sm:$0xff] }
 0xa5b   :  { %v988_v56 = vsub.f32 1.5, %v987_v57 }
 0xa5d   :  { %v989_v3 = vmul.f32 %v6582_v0, %v988_v56 }
 0xa5f   :  { %v993_v6 = vsel %vm992_vm8, %v6582_v0, %v989_v3 }
 0xa60   :  { %v994_v7 = vmul.f32 %v993_v6, %v977_v46 }
 0xa62   :  { %v995_v10 = vmul.f32 %v7504_v1, %v994_v7  ;;  %v7551_v7 = vld [vmem:[%s8976_s3] ss:$0 sm:$0xff] }
 0xa64   :  { %v996_v12 = vadd.f32 %v7506_v60, %v995_v10 }
 0xa66   :  { %v997_v15 = vpack.c.bf16 %v996_v12, %v996_v12 }
 0xa68   :  { %6320 = vmatmul.msk.bf16.vlgmr.msrb.gmra.mxu1 %vm195_vm0, %v997_v15 }
 0xae5   :  { %v1026_v19 = vpop.f32.mrf.mxu1 }
 0xae6   :  { %v1027_v21 = vadd.f32 %v7526_v17, %v1026_v19 }
 0xae8   :  { %v1030_v22 = vmax.f32 %v1027_v21, 0.0 }
 0xaea   :  { %v1031_v24 = vpack.c.bf16 %v1030_v22, %v1030_v22 }
 0xaec   :  { %6337 = vmatmul.msk.bf16.vlgmr.msrb.gmra.mxu2 %vm8988_vm9, %v1031_v24 }
 0xaed   :  { %v1028_v63 = vpop.f32.mrf.mxu1 }
 0xb6f   :  { %v1077_v28 = vpop.f32.mrf.mxu2 }
 0xb70   :  { %v1078_v29 = vadd.f32 %v7530_v26, %v1077_v28 }
 0xb72   :  { %v1081_v30 = vadd.f32 %v1078_v29, %v996_v12 }
 0xb74   :  { %v1082_v31 = vsel %vm195_vm0, %v1081_v30, 0.0 }
 0xb75   :  { %1083 = vadd.xlane.f32.xlu0 %v1082_v31 }
 0xb77   :  { %v1079_v32 = vpop.f32.mrf.mxu2 }
 0xbe8   :  { %v1084_v33 = vpop.xlane.xlu0 %1083 }
 0xbe9   :  { %v1085_v34 = vmul.f32 %v1084_v33, %v7380_v47 }
 0xbeb   :  { %v1086_v36 = vsub.f32 %v1081_v30, %v1085_v34 }
 0xbed   :  { %v1087_v37 = vmul.f32 %v1086_v36, %v1086_v36 }
 0xbef   :  { %v1088_v38 = vsel %vm195_vm0, %v1087_v37, 0.0 }
 0xbf0   :  { %1089 = vadd.xlane.f32.xlu0 %v1088_v38 }
 0xc63   :  { %v1090_v39 = vpop.xlane.xlu0 %1089 }
 0xc64   :  { %v1091_v40 = vmul.f32 %v1090_v39, %v7380_v47 }
 0xc66   :  { %v1092_v42 = vadd.f32 1e-05, %v1091_v40 }
 0xc68   :  { %6583 = vrsqrt.f32 %v1092_v42  ;;  %vm1099_vm11 = vweird.f32 %v1092_v42 }
 0xc6e   :  { %v6584_v44 = vpop.eup %6583 }
 0xc6f   :  { %v1094_v46 = vmul.f32 %v6584_v44, %v1092_v42  ;;  %vm1100_vm10 = vweird.f32 %v6584_v44 }
 0xc70   :  { %vm1101_vm12 = vmor %vm1099_vm11, %vm1100_vm10 }
 0xc71   :  { %v1095_v2 = vmul.f32 %v6584_v44, %v1094_v46 }
 0xc73   :  { %v1096_v48 = vmul.f32 0.5, %v1095_v2 }
 0xc75   :  { %v1097_v51 = vsub.f32 1.5, %v1096_v48 }
 0xc77   :  { %v1098_v52 = vmul.f32 %v6584_v44, %v1097_v51 }
 0xc79   :  { %v1102_v0 = vsel %vm1101_vm12, %v6584_v44, %v1098_v52 }
 0xc7a   :  { %v1103_v59 = vmul.f32 %v1102_v0, %v1086_v36 }
 0xc7c   :  { %v1104_v57 = vmul.f32 %v7537_v55, %v1103_v59 }
 0xc7e   :  { %v7543_v56 = vadd.f32 %v7539_v61, %v1104_v57 }
 0xc80   :  { %v1106_v3 = vpack.c.bf16 %v7543_v56, %v7543_v56 }
 0xc82   :  { %6338 = vmatmul.msk.bf16.vlgmr.msrb.gmra.mxu3 %vm195_vm0, %v1106_v3 }
 0xd05   :  { %v1119_v6 = vpop.f32.mrf.mxu3 }
 0xd06   :  { %v1120_v10 = vadd.f32 %v7551_v7, %v1119_v6 }
 0xd08   :  { %v1123_v12 = vpack.c.bf16 %v1120_v10, %v1120_v10 }
 0xd0a   :  { %v1125_v15 = vunpack.c.l.b16 %v1123_v12 }
 0xd0c   :  { %v7554_v19 = vpack.c.b16 %v1125_v15, %v1125_v15 }
 0xd0d   :  { %v1121_v21 = vpop.f32.mrf.mxu3 }
 0xd0e   :  { %1171 = vrot.lane.b32.xlu1 %v7554_v19, %s7121_s30  ;;  %1196 = vrot.lane.b32.xlu2 %v7554_v19, %s7125_s18 }
 0xd0f   :  { %1173 = vrot.lane.b32.xlu0 %v7554_v19, %s7122_s15 }
 0xd16   :  { %1127 = vrot.lane.b32.xlu1 %v7554_v19, %s7127_s19  ;;  %1150 = vrot.lane.b32.xlu2 %v7554_v19, %s7123_s16 }
 0xd17   :  { %1194 = vrot.lane.b32.xlu0 %v7554_v19, %s7124_s17 }
 0xd1f   :  { %1148 = vrot.lane.b32.xlu0 %v7554_v19, %s7126_s0 }
 0xd68   :  { %v1197_v22 = vpop.permute.xlu2 %1196 }
 0xd69   :  { %v1202_v24 = vsel %vm258_vm1, %v1197_v22, 0 }
 0xd6a   :  { %1211 = vmatpush.bf16.xpose.msra.mxu3 %v1202_v24 }
 0xd70   :  { %v1151_v63 = vpop.permute.xlu2 %1150 }
 0xd71   :  { %v1156_v28 = vsel %vm258_vm1, %v1151_v63, 0 }
 0xd72   :  { %1165 = vmatpush.bf16.xpose.msra.mxu1 %v1156_v28 }
 0xd80   :  { %v1172_v29 = vpop.permute.xlu1 %1171 }
 0xd81   :  { %v1174_v30 = vpop.permute.xlu0 %1173 }
 0xd82   :  { %v1179_v31 = vsel %vm258_vm1, %v1174_v30, 0 }
 0xd83   :  { %1188 = vmatpush.bf16.xpose.msra.mxu2 %v1179_v31 }
 0xd88   :  { %v1128_v32 = vpop.permute.xlu1 %1127 }
 0xd89   :  { %v1133_v33 = vsel %vm258_vm1, %v1128_v32, 0  ;;  %v1195_v34 = vpop.permute.xlu0 %1194 }
 0xd8a   :  { %6341 = vmatmul.msk.bf16.vlgmr.msra.gmra.mxu2 %vm258_vm1, %v1172_v29  ;;  %6342 = vmatmul.msk.bf16.vlgmr.msra.gmra.mxu3 %vm258_vm1, %v1195_v34 }
 0xd8b   :  { %1142 = vmatpush.bf16.xpose.msra.mxu0 %v1133_v33 }
 0xd91   :  { %v1149_v36 = vpop.permute.xlu0 %1148 }
 0xd92   :  { %6339 = vmatmul.msk.bf16.vlgmr.msra.gmra.mxu0 %vm258_vm1, %v1123_v12  ;;  %6340 = vmatmul.msk.bf16.vlgmr.msra.gmra.mxu1 %vm258_vm1, %v1149_v36 }
 0xe0d   :  { %v1190_v37 = vpop.f32.mrf.mxu2  ;;  %v1213_v38 = vpop.f32.mrf.mxu3 }
 0xe0e   :  { %v1219_v39 = vmul.f32 0.35355338, %v1190_v37  ;;  %v1220_v40 = vmul.f32 0.35355338, %v1213_v38 }
 0xe0f   :  { %v1144_v42 = vpop.f32.mrf.mxu0  ;;  %v1167_v44 = vpop.f32.mrf.mxu1 }
 0xe10   :  { %v1218_v46 = vmul.f32 0.35355338, %v1167_v44  ;;  %v1227_v2 = vsel %vm258_vm1, %v1219_v39, -inf  ;;  %v1230_v48 = vsel %vm258_vm1, %v1220_v40, -inf  ;;  %v1217_v52 = vmul.f32 0.35355338, %v1144_v42 }
 0xe11   :  { %1228 = vmax.xlane.f32.xlu2 %v1227_v2  ;;  %1231 = vmax.xlane.f32.xlu0 %v1230_v48 }
 0xe12   :  { %v1224_v51 = vsel %vm258_vm1, %v1218_v46, -inf  ;;  %v1221_v6 = vsel %vm258_vm1, %v1217_v52, -inf }
 0xe13   :  { %1225 = vmax.xlane.f32.xlu1 %v1224_v51 }
 0xe15   :  { %v1192_v0 = vpop.f32.mrf.mxu2  ;;  %v1215_v59 = vpop.f32.mrf.mxu3 }
 0xe17   :  { %v1146_v57 = vpop.f32.mrf.mxu0  ;;  %v1169_v3 = vpop.f32.mrf.mxu1 }
 0xe19   :  { %1222 = vmax.xlane.f32.xlu2 %v1221_v6 }
 0xe84   :  { %v1229_v10 = vpop.xlane.xlu2 %1228  ;;  %v1232_v12 = vpop.xlane.xlu0 %1231 }
 0xe85   :  { %v1235_v15 = vsub.f32 %v1219_v39, %v1229_v10  ;;  %v1236_v21 = vsub.f32 %v1220_v40, %v1232_v12 }
 0xe86   :  { %v1226_v22 = vpop.xlane.xlu1 %1225 }
 0xe87   :  { %v1241_v24 = vmul.f32 1.442695, %v1235_v15  ;;  %v1243_v63 = vmul.f32 1.442695, %v1236_v21  ;;  %v1234_v28 = vsub.f32 %v1218_v46, %v1226_v22 }
 0xe89   :  { %6585 = vpow2.f32 %v1241_v24  ;;  %v1239_v29 = vmul.f32 1.442695, %v1234_v28 }
 0xe8a   :  { %6587 = vpow2.f32 %v1243_v63 }
 0xe8b   :  { %6589 = vpow2.f32 %v1239_v29 }
 0xe8c   :  { %v1223_v37 = vpop.xlane.xlu2 %1222 }
 0xe8d   :  { %v1233_v38 = vsub.f32 %v1217_v52, %v1223_v37 }
 0xe8f   :  { %v7582_v30 = vpop.eup %6585  ;;  %v1237_v39 = vmul.f32 1.442695, %v1233_v38 }
 0xe90   :  { %v7584_v31 = vpop.eup %6587  ;;  %v1251_v32 = vsel %vm258_vm1, %v7582_v30, 0.0 }
 0xe91   :  { %v7588_v33 = vpop.eup %6589  ;;  %1252 = vadd.xlane.f32.xlu0 %v1251_v32  ;;  %v1254_v34 = vsel %vm258_vm1, %v7584_v31, 0.0  ;;  %6591 = vpow2.f32 %v1237_v39 }
 0xe92   :  { %1255 = vadd.xlane.f32.xlu2 %v1254_v34  ;;  %v1248_v36 = vsel %vm258_vm1, %v7588_v33, 0.0 }
 0xe93   :  { %1249 = vadd.xlane.f32.xlu1 %v1248_v36 }
 0xe97   :  { %v7602_v40 = vpop.eup %6591 }
 0xe98   :  { %v1245_v42 = vsel %vm258_vm1, %v7602_v40, 0.0 }
 0xea5   :  { %1363 = vrot.lane.b32.xlu0 %v7554_v19, %s7128_s1 }
 0xeaa   :  { %1384 = vrot.lane.b32.xlu2 %v7554_v19, %s7129_s25 }
 0xeac   :  { %1342 = vrot.lane.b32.xlu1 %v7554_v19, %s7130_s10 }
 0xeb2   :  { %1321 = vrot.lane.b32.xlu2 %v7554_v19, %s7112_s21 }
 0xecf   :  { %1246 = vadd.xlane.f32.xlu0 %v1245_v42 }
 0xf04   :  { %v1253_v44 = vpop.xlane.xlu0 %1252 }
 0xf05   :  { %v1256_v46 = vpop.xlane.xlu2 %1255  ;;  %6593 = vrcp.f32 %v1253_v44  ;;  %v1294_v3 = vand.u32 2147483647, %v1253_v44  ;;  %v1296_v15 = vand.u32 2147483648, %v1253_v44  ;;  %vm1290_vm15 = vweird.f32 %v1253_v44 }
 0xf06   :  { %6595 = vrcp.f32 %v1256_v46  ;;  %v1250_v2 = vpop.xlane.xlu1 %1249  ;;  %v1310_v21 = vand.u32 2147483648, %v1256_v46  ;;  %v1308_v28 = vand.u32 2147483647, %v1256_v46  ;;  %vm1304_vm3 = vweird.f32 %v1256_v46 }
 0xf07   :  { %6597 = vrcp.f32 %v1250_v2  ;;  %vm7608_vm4 = vcmp.eq.f32.partialorder %v1294_v3, 8.507059e+37  ;;  %v1297_v37 = vor.u32 1.1754944e-38, %v1296_v15  ;;  %vm1276_vm8 = vweird.f32 %v1250_v2 }
 0xf08   :  { %v1311_v38 = vor.u32 1.1754944e-38, %v1310_v21  ;;  %vm1309_vm12 = vcmp.eq.f32.partialorder %v1308_v28, 8.507059e+37 }
 0xf0b   :  { %v6594_v48 = vpop.eup %6593 }
 0xf0c   :  { %v6596_v51 = vpop.eup %6595  ;;  %v1286_v0 = vmul.f32 %v6594_v48, %v1253_v44  ;;  %vm1291_vm13 = vweird.f32 %v6594_v48  ;;  %v1280_v44 = vand.u32 2147483647, %v1250_v2 }
 0xf0d   :  { %v6598_v19 = vpop.eup %6597  ;;  %v1300_v59 = vmul.f32 %v6596_v51, %v1256_v46  ;;  %v1385_v52 = vpop.permute.xlu2 %1384  ;;  %vm1305_vm14 = vweird.f32 %v6596_v51  ;;  %vm1292_vm5 = vmor %vm1290_vm15, %vm1291_vm13 }
 0xf0e   :  { %v1287_v57 = vsub.f32 1.0, %v1286_v0  ;;  %v1272_v6 = vmul.f32 %v6598_v19, %v1250_v2  ;;  %v1390_v10 = vsel %vm456_vm2, %v1385_v52, 0  ;;  %vm1277_vm10 = vweird.f32 %v6598_v19  ;;  %vm1306_vm11 = vmor %vm1304_vm3, %vm1305_vm14 }
 0xf0f   :  { %v1301_v12 = vsub.f32 1.0, %v1300_v59  ;;  %1399 = vmatpush.bf16.msrb.mxu3 %v1390_v10  ;;  %v1282_v0 = vand.u32 2147483648, %v1250_v2  ;;  %vm7614_vm9 = vmor %vm1276_vm8, %vm1277_vm10  ;;  %vm1281_vm13 = vcmp.eq.f32.partialorder %v1280_v44, 8.507059e+37 }
 0xf10   :  { %v1288_v22 = vmul.f32 %v6594_v48, %v1287_v57  ;;  %v1273_v24 = vsub.f32 1.0, %v1272_v6 }
 0xf11   :  { %v1302_v63 = vmul.f32 %v6596_v51, %v1301_v12  ;;  %v1283_v12 = vor.u32 1.1754944e-38, %v1282_v0 }
 0xf12   :  { %v1289_v29 = vadd.f32 %v6594_v48, %v1288_v22  ;;  %v1274_v34 = vmul.f32 %v6598_v19, %v1273_v24 }
 0xf13   :  { %1511 = vmatpush.bf16.xpose.msra.mxu3 %v7415_v25  ;;  %v1303_v36 = vadd.f32 %v6596_v51, %v1302_v63 }
 0xf14   :  { %v1293_v39 = vsel %vm1292_vm5, %v6594_v48, %v1289_v29  ;;  %v1275_v42 = vadd.f32 %v6598_v19, %v1274_v34 }
 0xf15   :  { %v1307_v59 = vsel %vm1306_vm11, %v6596_v51, %v1303_v36  ;;  %v1322_v46 = vpop.permute.xlu2 %1321  ;;  %v1298_v52 = vsel %vm7608_vm4, %v1297_v37, %v1293_v39 }
 0xf16   :  { %v1327_v3 = vsel %vm456_vm2, %v1322_v46, 0  ;;  %v1312_v6 = vsel %vm1309_vm12, %v1311_v38, %v1307_v59  ;;  %v1315_v10 = vmul.f32 %v7582_v30, %v1298_v52  ;;  %v1279_v48 = vsel %vm7614_vm9, %v6598_v19, %v1275_v42 }
 0xf17   :  { %1336 = vmatpush.bf16.msrb.mxu0 %v1327_v3  ;;  %v1364_v51 = vpop.permute.xlu0 %1363  ;;  %v1316_v2 = vmul.f32 %v7584_v31, %v1312_v6  ;;  %v1284_v24 = vsel %vm1281_vm13, %v1283_v12, %v1279_v48 }
 0xf18   :  { %v1369_v15 = vsel %vm456_vm2, %v1364_v51, 0  ;;  %v1319_v22 = vpack.c.bf16 %v1315_v10, %v1315_v10  ;;  %v1314_v30 = vmul.f32 %v7588_v33, %v1284_v24  ;;  %v7653_v24 = vld [vmem:[#allocation11] ss:$0 sm:$0xff] }
 0xf19   :  { %1378 = vmatpush.bf16.msrb.mxu2 %v1369_v15  ;;  %v1320_v21 = vpack.c.bf16 %v1316_v2, %v1316_v2 }
 0xf1a   :  { %v1318_v63 = vpack.c.bf16 %v1314_v30, %v1314_v30 }
 0xf1b   :  { %1430 = vmatpush.bf16.msra.mxu0 %v7351_v62  ;;  %6346 = vmatmul.msk.bf16.vlgmr.msrb.gmra.mxu3 %vm258_vm1, %v1320_v21  ;;  %v7634_v62 = vld [vmem:[%s8977_s4] sm:$0xff] }
 0xf1c   :  { %1683 = vmatpush.bf16.msrb.mxu3 %v7459_v58  ;;  %6345 = vmatmul.msk.bf16.vlgmr.msrb.gmra.mxu2 %vm258_vm1, %v1319_v22 }
 0xf1d   :  { %1490 = vmatpush.bf16.xpose.msra.mxu2 %v7330_v20 }
 0xf1e   :  { %v1343_v31 = vpop.permute.xlu1 %1342 }
 0xf1f   :  { %1431 = vmatpush.bf16.msra.mxu0 %v7634_v62  ;;  %v1348_v19 = vsel %vm456_vm2, %v1343_v31, 0 }
 0xf20   :  { %1357 = vmatpush.bf16.msrb.mxu1 %v1348_v19 }
 0xf23   :  { %6344 = vmatmul.msk.bf16.vlgmr.msrb.gmra.mxu1 %vm258_vm1, %v1318_v63 }
 0xf24   :  { %1472 = vmatpush.bf16.msra.mxu1 %v7374_v41 }
 0xf25   :  { %1667 = vmatpush.bf16.msrb.mxu2 %v7447_v23 }
 0xf28   :  { %1473 = vmatpush.bf16.msra.mxu1 %v7377_v45 }
 0xf2c   :  { %1547 = vmatpush.bf16.xpose.msrb.mxu1 %v7385_v54 }
 0xf42   :  { %v1247_v33 = vpop.xlane.xlu0 %1246 }
 0xf43   :  { %6599 = vrcp.f32 %v1247_v33  ;;  %v1268_v34 = vand.u32 2147483648, %v1247_v33  ;;  %v1266_v37 = vand.u32 2147483647, %v1247_v33  ;;  %vm1262_vm14 = vweird.f32 %v1247_v33 }
 0xf45   :  { %v1269_v41 = vor.u32 1.1754944e-38, %v1268_v34  ;;  %vm1267_vm3 = vcmp.eq.f32.partialorder %v1266_v37, 8.507059e+37 }
 0xf49   :  { %v6600_v28 = vpop.eup %6599 }
 0xf4a   :  { %v1258_v29 = vmul.f32 %v6600_v28, %v1247_v33  ;;  %vm1263_vm9 = vweird.f32 %v6600_v28 }
 0xf4b   :  { %vm1264_vm15 = vmor %vm1262_vm14, %vm1263_vm9 }
 0xf4c   :  { %v1259_v32 = vsub.f32 1.0, %v1258_v29 }
 0xf4e   :  { %v1260_v36 = vmul.f32 %v6600_v28, %v1259_v32 }
 0xf50   :  { %v1261_v38 = vadd.f32 %v6600_v28, %v1260_v36 }
 0xf52   :  { %v1265_v39 = vsel %vm1264_vm15, %v6600_v28, %v1261_v38 }
 0xf53   :  { %v1270_v42 = vsel %vm1267_vm3, %v1269_v41, %v1265_v39 }
 0xf54   :  { %v1313_v45 = vmul.f32 %v7602_v40, %v1270_v42 }
 0xf56   :  { %v1317_v0 = vpack.c.bf16 %v1313_v45, %v1313_v45 }
 0xf58   :  { %6343 = vmatmul.msk.bf16.vlgmr.msrb.gmra.mxu0 %vm258_vm1, %v1317_v0 }
 0xf59   :  { %1529 = vmatpush.bf16.xpose.msrb.mxu0 %v7360_v18 }
 0xf9e   :  { %v1401_v59 = vpop.f32.mrf.mxu3 }
 0xf9f   :  { %v1380_v44 = vpop.f32.mrf.mxu2 }
 0xfa0   :  { %v1359_v46 = vpop.f32.mrf.mxu1  ;;  %1410 = vrot.lane.b32.xlu2 %v1380_v44, %s7131_s28 }
 0xfa1   :  { %1406 = vrot.lane.b32.xlu1 %v1359_v46, %s7120_s26 }
 0xfa6   :  { %v1403_v52 = vpop.f32.mrf.mxu3 }
 0xfa7   :  { %v1382_v57 = vpop.f32.mrf.mxu2 }
 0xfa8   :  { %v1361_v3 = vpop.f32.mrf.mxu1 }
 0xfa9   :  { %1414 = vrot.lane.b32.xlu1 %v1401_v59, %s7132_s29 }
 0xfd5   :  { %v1338_v6 = vpop.f32.mrf.mxu0 }
 0xfdd   :  { %v1340_v10 = vpop.f32.mrf.mxu0 }
 0xffa   :  { %v1411_v51 = vpop.permute.xlu2 %1410 }
0x1013   :  { %v1407_v40 = vpop.permute.xlu1 %1406 }
0x1014   :  { %v1417_v48 = vsel %vm258_vm1, %v1338_v6, %v1407_v40 }
0x1015   :  { %v1418_v12 = vsel %vm549_vm6, %v1417_v48, %v1411_v51 }
0x101b   :  { %v1415_v2 = vpop.permute.xlu1 %1414 }
0x101c   :  { %v1419_v15 = vsel %vm551_vm7, %v1418_v12, %v1415_v2 }
0x101d   :  { %v1420_v21 = vpack.c.bf16 %v1419_v15, %v1419_v15 }
0x101f   :  { %6347 = vmatmul.msk.bf16.vlgmr.msra.gmra.mxu0 %vm195_vm0, %v1420_v21 }
0x1020   :  { %1699 = vmatpush.bf16.msra.mxu0 %v7444_v14 }
0x109c   :  { %v1433_v22 = vpop.f32.mrf.mxu0 }
0x109d   :  { %v1434_v30 = vadd.f32 %v7653_v24, %v1433_v22 }
0x109f   :  { %v1437_v31 = vadd.f32 %v1434_v30, %v7543_v56 }
0x10a1   :  { %v1438_v19 = vsel %vm195_vm0, %v1437_v31, 0.0 }
0x10a2   :  { %1439 = vadd.xlane.f32.xlu2 %v1438_v19 }
0x10a4   :  { %v1435_v63 = vpop.f32.mrf.mxu0 }
0x1115   :  { %v1440_v33 = vpop.xlane.xlu2 %1439 }
0x1116   :  { %v1441_v28 = vmul.f32 %v1440_v33, %v7380_v47 }
0x1118   :  { %v1442_v29 = vsub.f32 %v1437_v31, %v1441_v28 }
0x111a   :  { %v1443_v32 = vmul.f32 %v1442_v29, %v1442_v29 }
0x111c   :  { %v1444_v34 = vsel %vm195_vm0, %v1443_v32, 0.0 }
0x111d   :  { %1445 = vadd.xlane.f32.xlu1 %v1444_v34 }
0x1190   :  { %v1446_v36 = vpop.xlane.xlu1 %1445 }
0x1191   :  { %v1447_v37 = vmul.f32 %v1446_v36, %v7380_v47 }
0x1193   :  { %v1448_v38 = vadd.f32 1e-05, %v1447_v37 }
0x1195   :  { %6601 = vrsqrt.f32 %v1448_v38  ;;  %vm1455_vm5 = vweird.f32 %v1448_v38 }
0x119b   :  { %v6602_v41 = vpop.eup %6601 }
0x119c   :  { %v1450_v39 = vmul.f32 %v6602_v41, %v1448_v38  ;;  %vm1456_vm4 = vweird.f32 %v6602_v41 }
0x119d   :  { %vm1457_vm8 = vmor %vm1455_vm5, %vm1456_vm4 }
0x119e   :  { %v1451_v56 = vmul.f32 %v6602_v41, %v1450_v39 }
0x11a0   :  { %v1452_v42 = vmul.f32 0.5, %v1451_v56 }
0x11a2   :  { %v1453_v45 = vsub.f32 1.5, %v1452_v42 }
0x11a4   :  { %v1454_v0 = vmul.f32 %v6602_v41, %v1453_v45 }
0x11a6   :  { %v1458_v59 = vsel %vm1457_vm8, %v6602_v41, %v1454_v0 }
0x11a7   :  { %v1459_v44 = vmul.f32 %v1458_v59, %v1442_v29 }
0x11a9   :  { %v1460_v46 = vmul.f32 %v7389_v5, %v1459_v44 }
0x11ab   :  { %v7663_v52 = vadd.f32 %v7391_v8, %v1460_v46 }
0x11ad   :  { %v1462_v57 = vpack.c.bf16 %v7663_v52, %v7663_v52 }
0x11af   :  { %6348 = vmatmul.msk.bf16.vlgmr.msra.gmra.mxu1 %vm195_vm0, %v1462_v57 }
0x11b0   :  { %1715 = vmatpush.bf16.msra.mxu1 %v7452_v43 }
0x122c   :  { %v1475_v3 = vpop.f32.mrf.mxu1 }
0x122d   :  { %v1476_v6 = vadd.f32 %v7403_v13, %v1475_v3  ;;  %v7680_v13 = vld [vmem:[%s8975_s2 + $0x8] sm:$0xff] }
0x122f   :  { %v1479_v10 = vpack.c.bf16 %v1476_v6, %v1476_v6 }
0x1231   :  { %v1497_v40 = vunpack.c.l.b16 %v1479_v10  ;;  %6349 = vmatmul.msk.bf16.vlgmr.msra.gmra.mxu2 %vm258_vm1, %v1479_v10 }
0x1232   :  { %1746 = vmatpush.bf16.msra.mxu2 %v7468_v27  ;;  %v7686_v27 = vld [vmem:[%s8975_s2] sm:$0xff] }
0x1233   :  { %v1498_v5 = vpack.c.b16 %v1497_v40, %v1497_v40 }
0x1234   :  { %v1477_v48 = vpop.f32.mrf.mxu1 }
0x1235   :  { %1535 = vrot.lane.b32.xlu2 %v1498_v5, %s7124_s17  ;;  %1499 = vrot.lane.b32.xlu0 %v1498_v5, %s7126_s0 }
0x1236   :  { %1747 = vmatpush.bf16.msra.mxu2 %v7471_v4 }
0x123d   :  { %1517 = vrot.lane.b32.xlu0 %v1498_v5, %s7121_s30 }
0x128f   :  { %v1536_v8 = vpop.permute.xlu2 %1535 }
0x1290   :  { %6352 = vmatmul.msk.bf16.vlgmr.msrb.gmra.mxu1 %vm258_vm1, %v1536_v8 }
0x1291   :  { %1848 = vmatpush.bf16.msrb.mxu1 %v7680_v13 }
0x1295   :  { %1849 = vmatpush.bf16.msrb.mxu1 %v7686_v27 }
0x12a7   :  { %v1500_v4 = vpop.permute.xlu0 %1499 }
0x12a8   :  { %6350 = vmatmul.msk.bf16.vlgmr.msra.gmra.mxu3 %vm258_vm1, %v1500_v4 }
0x12a9   :  { %1788 = vmatpush.bf16.msra.mxu3 %v7485_v49 }
0x12ad   :  { %1789 = vmatpush.bf16.msra.mxu3 %v7488_v50 }
0x12af   :  { %v1518_v51 = vpop.permute.xlu0 %1517 }
0x12b0   :  { %6351 = vmatmul.msk.bf16.vlgmr.msrb.gmra.mxu0 %vm258_vm1, %v1518_v51 }
0x12b1   :  { %1804 = vmatpush.bf16.msrb.mxu0 %v7494_v9 }
0x12b4   :  { %v1492_v2 = vpop.f32.mrf.mxu2 }
0x12b5   :  { %1805 = vmatpush.bf16.msrb.mxu0 %v7501_v53  ;;  %v1553_v33 = vmul.f32 0.35355338, %v1492_v2 }
0x12b9   :  { %1806 = vmatpush.bf16.msrb.mxu0 %v7514_v11 }
0x12bc   :  { %v1494_v12 = vpop.f32.mrf.mxu2 }
0x12bd   :  { %1807 = vmatpush.bf16.msrb.mxu0 %v7520_v16  ;;  %v1557_v16 = vsel %vm549_vm6, %v1553_v33, -inf }
0x130d   :  { %v1549_v15 = vpop.f32.mrf.mxu1 }
0x130e   :  { %v1556_v9 = vmul.f32 0.35355338, %v1549_v15 }
0x1310   :  { %v1566_v11 = vsel %vm549_vm6, %v1556_v9, -inf }
0x1315   :  { %v1551_v21 = vpop.f32.mrf.mxu1 }
0x132b   :  { %v1513_v22 = vpop.f32.mrf.mxu3 }
0x132c   :  { %v1554_v30 = vmul.f32 0.35355338, %v1513_v22 }
0x132d   :  { %v1531_v49 = vpop.f32.mrf.mxu0 }
0x132e   :  { %v1555_v31 = vmul.f32 0.35355338, %v1531_v49  ;;  %v1560_v50 = vsel %vm549_vm6, %v1554_v30, -inf }
0x132f   :  { %1561 = vmax.xlane.f32.xlu1 %v1560_v50 }
0x1330   :  { %v1563_v19 = vsel %vm549_vm6, %v1555_v31, -inf }
0x1331   :  { %1564 = vmax.xlane.f32.xlu0 %v1563_v19 }
0x1333   :  { %v1515_v63 = vpop.f32.mrf.mxu3 }
0x1335   :  { %v1533_v53 = vpop.f32.mrf.mxu0 }
0x1337   :  { %1567 = vmax.xlane.f32.xlu1 %v1566_v11 }
0x133f   :  { %1558 = vmax.xlane.f32.xlu1 %v1557_v16 }
0x13a2   :  { %v1562_v28 = vpop.xlane.xlu1 %1561 }
0x13a3   :  { %v1570_v29 = vsub.f32 %v1554_v30, %v1562_v28 }
0x13a4   :  { %v1565_v32 = vpop.xlane.xlu0 %1564 }
0x13a5   :  { %v1575_v34 = vmul.f32 1.442695, %v1570_v29  ;;  %v1571_v36 = vsub.f32 %v1555_v31, %v1565_v32 }
0x13a7   :  { %6603 = vpow2.f32 %v1575_v34  ;;  %v1577_v37 = vmul.f32 1.442695, %v1571_v36 }
0x13a9   :  { %6605 = vpow2.f32 %v1577_v37 }
0x13aa   :  { %v1568_v38 = vpop.xlane.xlu1 %1567 }
0x13ab   :  { %v1572_v41 = vsub.f32 %v1556_v9, %v1568_v38 }
0x13ad   :  { %v6604_v39 = vpop.eup %6603  ;;  %v1579_v56 = vmul.f32 1.442695, %v1572_v41 }
0x13ae   :  { %v1584_v42 = vsel %vm549_vm6, %v6604_v39, 0.0 }
0x13af   :  { %v6606_v45 = vpop.eup %6605  ;;  %6607 = vpow2.f32 %v1579_v56  ;;  %1585 = vadd.xlane.f32.xlu2 %v1584_v42 }
0x13b0   :  { %v1587_v0 = vsel %vm549_vm6, %v6606_v45, 0.0 }
0x13b1   :  { %1588 = vadd.xlane.f32.xlu1 %v1587_v0 }
0x13b2   :  { %v1559_v59 = vpop.xlane.xlu1 %1558 }
0x13b3   :  { %v1569_v44 = vsub.f32 %v1553_v33, %v1559_v59 }
0x13b5   :  { %v7703_v46 = vpop.eup %6607  ;;  %v1573_v57 = vmul.f32 1.442695, %v1569_v44 }
0x13b6   :  { %v1590_v3 = vsel %vm549_vm6, %v7703_v46, 0.0 }
0x13b7   :  { %6609 = vpow2.f32 %v1573_v57 }
0x13b9   :  { %1591 = vadd.xlane.f32.xlu1 %v1590_v3 }
0x13bd   :  { %v7707_v6 = vpop.eup %6609 }
0x13be   :  { %v1581_v10 = vsel %vm549_vm6, %v7707_v6, 0.0 }
0x13c1   :  { %1582 = vadd.xlane.f32.xlu1 %v1581_v10 }
0x1422   :  { %v1586_v40 = vpop.xlane.xlu2 %1585 }
0x1423   :  { %6611 = vrcp.f32 %v1586_v40  ;;  %v1618_v15 = vand.u32 2147483648, %v1586_v40  ;;  %v1616_v22 = vand.u32 2147483647, %v1586_v40  ;;  %vm1612_vm11 = vweird.f32 %v1586_v40 }
0x1424   :  { %v1589_v5 = vpop.xlane.xlu1 %1588 }
0x1425   :  { %6613 = vrcp.f32 %v1589_v5  ;;  %v1632_v50 = vand.u32 2147483648, %v1589_v5  ;;  %v1619_v19 = vor.u32 1.1754944e-38, %v1618_v15  ;;  %v1630_v9 = vand.u32 2147483647, %v1589_v5 }
0x1426   :  { %vm1617_vm9 = vcmp.eq.f32.partialorder %v1616_v22, 8.507059e+37  ;;  %vm1626_vm14 = vweird.f32 %v1589_v5 }
0x1427   :  { %v1633_v28 = vor.u32 1.1754944e-38, %v1632_v50  ;;  %vm1631_vm3 = vcmp.eq.f32.partialorder %v1630_v9, 8.507059e+37 }
0x1429   :  { %v6612_v48 = vpop.eup %6611 }
0x142a   :  { %v1608_v8 = vmul.f32 %v6612_v48, %v1586_v40  ;;  %vm1613_vm10 = vweird.f32 %v6612_v48 }
0x142b   :  { %v6614_v4 = vpop.eup %6613  ;;  %vm1614_vm13 = vmor %vm1612_vm11, %vm1613_vm10 }
0x142c   :  { %v1609_v51 = vsub.f32 1.0, %v1608_v8  ;;  %v1622_v2 = vmul.f32 %v6614_v4, %v1589_v5  ;;  %v1592_v12 = vpop.xlane.xlu1 %1591  ;;  %vm1627_vm12 = vweird.f32 %v6614_v4 }
0x142d   :  { %6615 = vrcp.f32 %v1592_v12  ;;  %vm1628_vm15 = vmor %vm1626_vm14, %vm1627_vm12  ;;  %v1646_v41 = vand.u32 2147483648, %v1592_v12  ;;  %v1644_v0 = vand.u32 2147483647, %v1592_v12  ;;  %vm1640_vm5 = vweird.f32 %v1592_v12 }
0x142e   :  { %v1610_v21 = vmul.f32 %v6612_v48, %v1609_v51  ;;  %v1623_v30 = vsub.f32 1.0, %v1622_v2 }
0x142f   :  { %v1647_v3 = vor.u32 1.1754944e-38, %v1646_v41  ;;  %vm1645_vm10 = vcmp.eq.f32.partialorder %v1644_v0, 8.507059e+37 }
0x1430   :  { %v1611_v49 = vadd.f32 %v6612_v48, %v1610_v21  ;;  %v1624_v31 = vmul.f32 %v6614_v4, %v1623_v30 }
0x1432   :  { %v1615_v63 = vsel %vm1614_vm13, %v6612_v48, %v1611_v49  ;;  %v1625_v53 = vadd.f32 %v6614_v4, %v1624_v31 }
0x1433   :  { %v6616_v11 = vpop.eup %6615  ;;  %v1620_v33 = vsel %vm1617_vm9, %v1619_v19, %v1615_v63 }
0x1434   :  { %v1629_v16 = vsel %vm1628_vm15, %v6614_v4, %v1625_v53  ;;  %v1636_v29 = vmul.f32 %v6616_v11, %v1592_v12  ;;  %v1583_v32 = vpop.xlane.xlu1 %1582  ;;  %v1650_v34 = vmul.f32 %v6604_v39, %v1620_v33  ;;  %vm1641_vm4 = vweird.f32 %v6616_v11 }
0x1435   :  { %6617 = vrcp.f32 %v1583_v32  ;;  %v1634_v38 = vsel %vm1631_vm3, %v1633_v28, %v1629_v16  ;;  %vm1642_vm8 = vmor %vm1640_vm5, %vm1641_vm4  ;;  %v1604_v48 = vand.u32 2147483648, %v1583_v32  ;;  %v1602_v4 = vand.u32 2147483647, %v1583_v32 }
0x1436   :  { %v1637_v36 = vsub.f32 1.0, %v1636_v29  ;;  %v1654_v37 = vpack.c.bf16 %v1650_v34, %v1650_v34  ;;  %v1651_v56 = vmul.f32 %v6606_v45, %v1634_v38  ;;  %vm1598_vm12 = vweird.f32 %v1583_v32 }
0x1437   :  { %v1605_v12 = vor.u32 1.1754944e-38, %v1604_v48  ;;  %vm1603_vm9 = vcmp.eq.f32.partialorder %v1602_v4, 8.507059e+37  ;;  %vm8995_vm4 = vcmask 523264  }
0x1438   :  { %v1638_v42 = vmul.f32 %v6616_v11, %v1637_v36  ;;  %6354 = vmatmul.msk.bf16.vlgmr.msrb.gmra.mxu3 %vm549_vm6, %v1654_v37  ;;  %v1655_v59 = vpack.c.bf16 %v1651_v56, %v1651_v56 }
0x143a   :  { %v1639_v44 = vadd.f32 %v6616_v11, %v1638_v42  ;;  %6355 = vmatmul.msk.bf16.vlgmr.msra.gmra.mxu0 %vm549_vm6, %v1655_v59 }
0x143b   :  { %v6618_v57 = vpop.eup %6617 }
0x143c   :  { %v1643_v39 = vsel %vm1642_vm8, %v6616_v11, %v1639_v44  ;;  %v1594_v10 = vmul.f32 %v6618_v57, %v1583_v32  ;;  %vm1599_vm11 = vweird.f32 %v6618_v57 }
0x143d   :  { %v1648_v40 = vsel %vm1645_vm10, %v1647_v3, %v1643_v39  ;;  %vm1600_vm13 = vmor %vm1598_vm12, %vm1599_vm11 }
0x143e   :  { %v1595_v5 = vsub.f32 1.0, %v1594_v10  ;;  %v1652_v45 = vmul.f32 %v7703_v46, %v1648_v40 }
0x1440   :  { %v1596_v8 = vmul.f32 %v6618_v57, %v1595_v5  ;;  %v1656_v51 = vpack.c.bf16 %v1652_v45, %v1652_v45 }
0x1442   :  { %v1597_v2 = vadd.f32 %v6618_v57, %v1596_v8  ;;  %6356 = vmatmul.msk.bf16.vlgmr.msra.gmra.mxu1 %vm549_vm6, %v1656_v51 }
0x1444   :  { %v1601_v15 = vsel %vm1600_vm13, %v6618_v57, %v1597_v2 }
0x1445   :  { %v1606_v21 = vsel %vm1603_vm9, %v1605_v12, %v1601_v15 }
0x1446   :  { %v1649_v22 = vmul.f32 %v7707_v6, %v1606_v21 }
0x1448   :  { %v1653_v30 = vpack.c.bf16 %v1649_v22, %v1649_v22 }
0x144a   :  { %6353 = vmatmul.msk.bf16.vlgmr.msrb.gmra.mxu2 %vm549_vm6, %v1653_v30 }
0x14b7   :  { %v1701_v46 = vpop.f32.mrf.mxu0 }
0x14b8   :  { %1726 = vrot.lane.b32.xlu1 %v1701_v46, %s7131_s28 }
0x14bb   :  { %v1685_v49 = vpop.f32.mrf.mxu3 }
0x14bc   :  { %1722 = vrot.lane.b32.xlu0 %v1685_v49, %s7120_s26 }
0x14bf   :  { %v1717_v31 = vpop.f32.mrf.mxu1  ;;  %v1703_v50 = vpop.f32.mrf.mxu0 }
0x14c0   :  { %1730 = vrot.lane.b32.xlu2 %v1717_v31, %s7132_s29 }
0x14c3   :  { %v1687_v19 = vpop.f32.mrf.mxu3 }
0x14c7   :  { %v1719_v9 = vpop.f32.mrf.mxu1 }
0x14cd   :  { %v1669_v63 = vpop.f32.mrf.mxu2 }
0x14d5   :  { %v1671_v53 = vpop.f32.mrf.mxu2 }
0x151a   :  { %v1731_v16 = vpop.permute.xlu2 %1730 }
0x152a   :  { %v1727_v33 = vpop.permute.xlu1 %1726 }
0x152e   :  { %v1723_v11 = vpop.permute.xlu0 %1722 }
0x152f   :  { %v1733_v6 = vsel %vm258_vm1, %v1669_v63, %v1723_v11 }
0x1530   :  { %v1734_v28 = vsel %vm549_vm6, %v1733_v6, %v1727_v33 }
0x1531   :  { %v1735_v29 = vsel %vm551_vm7, %v1734_v28, %v1731_v16 }
0x1532   :  { %v1736_v32 = vpack.c.bf16 %v1735_v29, %v1735_v29 }
0x1534   :  { %6357 = vmatmul.msk.bf16.vlgmr.msra.gmra.mxu2 %vm195_vm0, %v1736_v32 }
0x15b7   :  { %v1749_v34 = vpop.f32.mrf.mxu2 }
0x15b8   :  { %v1750_v36 = vadd.f32 %v7478_v35, %v1749_v34 }
0x15ba   :  { %v1753_v37 = vadd.f32 %v1750_v36, %v7663_v52 }
0x15bc   :  { %v1754_v38 = vsel %vm195_vm0, %v1753_v37, 0.0 }
0x15bd   :  { %1755 = vadd.xlane.f32.xlu0 %v1754_v38 }
0x15bf   :  { %v1751_v41 = vpop.f32.mrf.mxu2 }
0x1630   :  { %v1756_v56 = vpop.xlane.xlu0 %1755 }
0x1631   :  { %v1757_v42 = vmul.f32 %v1756_v56, %v7380_v47 }
0x1633   :  { %v1758_v0 = vsub.f32 %v1753_v37, %v1757_v42 }
0x1635   :  { %v1759_v59 = vmul.f32 %v1758_v0, %v1758_v0 }
0x1637   :  { %v1760_v44 = vsel %vm195_vm0, %v1759_v59, 0.0 }
0x1638   :  { %1761 = vadd.xlane.f32.xlu1 %v1760_v44 }
0x16ab   :  { %v1762_v57 = vpop.xlane.xlu1 %1761 }
0x16ac   :  { %v1763_v3 = vmul.f32 %v1762_v57, %v7380_v47 }
0x16ae   :  { %v1764_v39 = vadd.f32 1e-05, %v1763_v3 }
0x16b0   :  { %6619 = vrsqrt.f32 %v1764_v39  ;;  %vm1771_vm15 = vweird.f32 %v1764_v39 }
0x16b6   :  { %v6620_v35 = vpop.eup %6619 }
0x16b7   :  { %v1766_v10 = vmul.f32 %v6620_v35, %v1764_v39  ;;  %vm1772_vm14 = vweird.f32 %v6620_v35 }
0x16b8   :  { %vm1773_vm3 = vmor %vm1771_vm15, %vm1772_vm14 }
0x16b9   :  { %v1767_v52 = vmul.f32 %v6620_v35, %v1766_v10 }
0x16bb   :  { %v1768_v40 = vmul.f32 0.5, %v1767_v52 }
0x16bd   :  { %v1769_v5 = vsub.f32 1.5, %v1768_v40 }
0x16bf   :  { %v1770_v45 = vmul.f32 %v6620_v35, %v1769_v5 }
0x16c1   :  { %v1774_v48 = vsel %vm1773_vm3, %v6620_v35, %v1770_v45 }
0x16c2   :  { %v1775_v8 = vmul.f32 %v1774_v48, %v1758_v0 }
0x16c4   :  { %v1776_v4 = vmul.f32 %v7504_v1, %v1775_v8 }
0x16c6   :  { %v1777_v51 = vadd.f32 %v7506_v60, %v1776_v4 }
0x16c8   :  { %v1778_v2 = vpack.c.bf16 %v1777_v51, %v1777_v51 }
0x16ca   :  { %6358 = vmatmul.msk.bf16.vlgmr.msra.gmra.mxu3 %vm195_vm0, %v1778_v2 }
0x174d   :  { %v1791_v12 = vpop.f32.mrf.mxu3 }
0x174e   :  { %v1792_v15 = vadd.f32 %v7526_v17, %v1791_v12 }
0x1750   :  { %v1795_v21 = vmax.f32 %v1792_v15, 0.0 }
0x1752   :  { %v1796_v22 = vpack.c.bf16 %v1795_v21, %v1795_v21 }
0x1754   :  { %6359 = vmatmul.msk.bf16.vlgmr.msrb.gmra.mxu0 %vm8995_vm4, %v1796_v22 }
0x1755   :  { %v1793_v30 = vpop.f32.mrf.mxu3 }
0x17d1   :  { %v1809_v46 = vpop.f32.mrf.mxu0 }
0x17d2   :  { %v1810_v49 = vadd.f32 %v7530_v26, %v1809_v46 }
0x17d4   :  { %v1813_v31 = vadd.f32 %v1810_v49, %v1777_v51 }
0x17d6   :  { %v1814_v50 = vsel %vm195_vm0, %v1813_v31, 0.0 }
0x17d7   :  { %1815 = vadd.xlane.f32.xlu2 %v1814_v50 }
0x17d9   :  { %v1811_v1 = vpop.f32.mrf.mxu0 }
0x184a   :  { %v1816_v60 = vpop.xlane.xlu2 %1815 }
0x184b   :  { %v1817_v19 = vmul.f32 %v1816_v60, %v7380_v47 }
0x184d   :  { %v1818_v9 = vsub.f32 %v1813_v31, %v1817_v19 }
0x184f   :  { %v1819_v63 = vmul.f32 %v1818_v9, %v1818_v9 }
0x1851   :  { %v1820_v17 = vsel %vm195_vm0, %v1819_v63, 0.0 }
0x1852   :  { %1821 = vadd.xlane.f32.xlu0 %v1820_v17 }
0x18c5   :  { %v1822_v53 = vpop.xlane.xlu0 %1821 }
0x18c6   :  { %v1823_v11 = vmul.f32 %v1822_v53, %v7380_v47 }
0x18c8   :  { %v1824_v33 = vadd.f32 1e-05, %v1823_v11 }
0x18ca   :  { %6621 = vrsqrt.f32 %v1824_v33  ;;  %vm1831_vm8 = vweird.f32 %v1824_v33 }
0x18d0   :  { %v6622_v6 = vpop.eup %6621 }
0x18d1   :  { %v1826_v26 = vmul.f32 %v6622_v6, %v1824_v33  ;;  %vm1832_vm5 = vweird.f32 %v6622_v6 }
0x18d2   :  { %vm1833_vm10 = vmor %vm1831_vm8, %vm1832_vm5 }
0x18d3   :  { %v1827_v16 = vmul.f32 %v6622_v6, %v1826_v26 }
0x18d5   :  { %v1828_v28 = vmul.f32 0.5, %v1827_v16 }
0x18d7   :  { %v1829_v29 = vsub.f32 1.5, %v1828_v28 }
0x18d9   :  { %v1830_v32 = vmul.f32 %v6622_v6, %v1829_v29 }
0x18db   :  { %v1834_v34 = vsel %vm1833_vm10, %v6622_v6, %v1830_v32 }
0x18dc   :  { %v1835_v36 = vmul.f32 %v1834_v34, %v1818_v9 }
0x18de   :  { %v1836_v37 = vmul.f32 %v7537_v55, %v1835_v36 }
0x18e0   :  { %v7742_v38 = vadd.f32 %v7539_v61, %v1836_v37 }
0x18e2   :  { %v1838_v41 = vpack.c.bf16 %v7742_v38, %v7742_v38 }
0x18e4   :  { %6360 = vmatmul.msk.bf16.vlgmr.msrb.gmra.mxu1 %vm195_vm0, %v1838_v41 }
0x1961   :  { %v1851_v56 = vpop.f32.mrf.mxu1 }
0x1962   :  { %v1852_v42 = vadd.f32 %v7551_v7, %v1851_v56 }
0x1964   :  { %v1855_v0 = vpack.c.bf16 %v1852_v42, %v1852_v42 }
0x1966   :  { %v1857_v59 = vunpack.c.l.b16 %v1855_v0 }
0x1968   :  { %v7748_v44 = vpack.c.b16 %v1857_v59, %v1857_v59 }
0x1969   :  { %v1853_v57 = vpop.f32.mrf.mxu1 }
0x196a   :  { %1905 = vrot.lane.b32.xlu2 %v7748_v44, %s7122_s15  ;;  %1880 = vrot.lane.b32.xlu1 %v7748_v44, %s7126_s0 }
0x196b   :  { %1882 = vrot.lane.b32.xlu0 %v7748_v44, %s7123_s16 }
0x1972   :  { %1903 = vrot.lane.b32.xlu1 %v7748_v44, %s7121_s30 }
0x1973   :  { %1928 = vrot.lane.b32.xlu0 %v7748_v44, %s7125_s18 }
0x197a   :  { %1859 = vrot.lane.b32.xlu1 %v7748_v44, %s7127_s19 }
0x197b   :  { %1926 = vrot.lane.b32.xlu0 %v7748_v44, %s7124_s17 }
0x19c4   :  { %v1906_v55 = vpop.permute.xlu2 %1905 }
0x19c5   :  { %v1911_v61 = vsel %vm258_vm1, %v1906_v55, 0 }
0x19c6   :  { %1920 = vmatpush.bf16.xpose.msra.mxu0 %v1911_v61 }
0x19dc   :  { %v1881_v7 = vpop.permute.xlu1 %1880 }
0x19dd   :  { %v1883_v3 = vpop.permute.xlu0 %1882 }
0x19de   :  { %v1888_v39 = vsel %vm258_vm1, %v1883_v3, 0 }
0x19df   :  { %1897 = vmatpush.bf16.xpose.msrb.mxu3 %v1888_v39 }
0x19e4   :  { %v1904_v35 = vpop.permute.xlu1 %1903 }
0x19e5   :  { %v1929_v10 = vpop.permute.xlu0 %1928  ;;  %6363 = vmatmul.msk.bf16.vlgmr.msra.gmra.mxu0 %vm258_vm1, %v1904_v35 }
0x19e6   :  { %v1934_v52 = vsel %vm258_vm1, %v1929_v10, 0  ;;  %6362 = vmatmul.msk.bf16.vlgmr.msrb.gmra.mxu3 %vm258_vm1, %v1881_v7 }
0x19e7   :  { %1943 = vmatpush.bf16.xpose.msra.mxu1 %v1934_v52 }
0x19ec   :  { %v1860_v40 = vpop.permute.xlu1 %1859 }
0x19ed   :  { %v1865_v5 = vsel %vm258_vm1, %v1860_v40, 0  ;;  %v1927_v45 = vpop.permute.xlu0 %1926 }
0x19ee   :  { %6364 = vmatmul.msk.bf16.vlgmr.msra.gmra.mxu1 %vm258_vm1, %v1927_v45  ;;  %1874 = vmatpush.bf16.xpose.msrb.mxu2 %v1865_v5 }
0x19f5   :  { %6361 = vmatmul.msk.bf16.vlgmr.msrb.gmra.mxu2 %vm258_vm1, %v1855_v0 }
0x1a62   :  { %v1922_v48 = vpop.f32.mrf.mxu0 }
0x1a63   :  { %v1951_v8 = vmul.f32 0.35355338, %v1922_v48 }
0x1a65   :  { %v1959_v4 = vsel %vm258_vm1, %v1951_v8, -inf }
0x1a66   :  { %1960 = vmax.xlane.f32.xlu2 %v1959_v4 }
0x1a69   :  { %v1899_v51 = vpop.f32.mrf.mxu3 }
0x1a6a   :  { %v1950_v2 = vmul.f32 0.35355338, %v1899_v51  ;;  %v1924_v12 = vpop.f32.mrf.mxu0 }
0x1a6b   :  { %v1945_v15 = vpop.f32.mrf.mxu1 }
0x1a6c   :  { %v1952_v21 = vmul.f32 0.35355338, %v1945_v15  ;;  %v1956_v22 = vsel %vm258_vm1, %v1950_v2, -inf }
0x1a6d   :  { %1957 = vmax.xlane.f32.xlu0 %v1956_v22 }
0x1a6e   :  { %v1962_v30 = vsel %vm258_vm1, %v1952_v21, -inf }
0x1a6f   :  { %1963 = vmax.xlane.f32.xlu1 %v1962_v30 }
0x1a71   :  { %v1901_v46 = vpop.f32.mrf.mxu3 }
0x1a73   :  { %v1947_v49 = vpop.f32.mrf.mxu1 }
0x1a78   :  { %v1876_v31 = vpop.f32.mrf.mxu2 }
0x1a79   :  { %v1949_v50 = vmul.f32 0.35355338, %v1876_v31 }
0x1a7b   :  { %v1953_v1 = vsel %vm258_vm1, %v1949_v50, -inf }
0x1a7c   :  { %1954 = vmax.xlane.f32.xlu2 %v1953_v1 }
0x1a80   :  { %v1878_v60 = vpop.f32.mrf.mxu2 }
0x1ad9   :  { %v1961_v19 = vpop.xlane.xlu2 %1960 }
0x1ada   :  { %v1967_v9 = vsub.f32 %v1951_v8, %v1961_v19 }
0x1adc   :  { %v1973_v63 = vmul.f32 1.442695, %v1967_v9 }
0x1ade   :  { %6623 = vpow2.f32 %v1973_v63 }
0x1ae0   :  { %v1958_v17 = vpop.xlane.xlu0 %1957 }
0x1ae1   :  { %v1966_v53 = vsub.f32 %v1950_v2, %v1958_v17 }
0x1ae2   :  { %v1964_v11 = vpop.xlane.xlu1 %1963 }
0x1ae3   :  { %v1971_v33 = vmul.f32 1.442695, %v1966_v53  ;;  %v1968_v6 = vsub.f32 %v1952_v21, %v1964_v11 }
0x1ae4   :  { %v7776_v26 = vpop.eup %6623 }
0x1ae5   :  { %6625 = vpow2.f32 %v1971_v33  ;;  %v1975_v16 = vmul.f32 1.442695, %v1968_v6  ;;  %v1983_v28 = vsel %vm258_vm1, %v7776_v26, 0.0 }
0x1ae6   :  { %1984 = vadd.xlane.f32.xlu1 %v1983_v28 }
0x1ae7   :  { %6627 = vpow2.f32 %v1975_v16 }
0x1aeb   :  { %v7780_v29 = vpop.eup %6625 }
0x1aec   :  { %v1980_v32 = vsel %vm258_vm1, %v7780_v29, 0.0 }
0x1aed   :  { %v7784_v34 = vpop.eup %6627  ;;  %1981 = vadd.xlane.f32.xlu0 %v1980_v32 }
0x1aee   :  { %v1986_v36 = vsel %vm258_vm1, %v7784_v34, 0.0 }
0x1aef   :  { %1987 = vadd.xlane.f32.xlu2 %v1986_v36  ;;  %v1955_v37 = vpop.xlane.xlu2 %1954 }
0x1af0   :  { %v1965_v41 = vsub.f32 %v1949_v50, %v1955_v37 }
0x1af2   :  { %v1969_v56 = vmul.f32 1.442695, %v1965_v41 }
0x1af4   :  { %6629 = vpow2.f32 %v1969_v56  ;;  %v7808_v56 = vld [vmem:[#allocation5 + $0x8] sm:$0xff] }
0x1afa   :  { %v7796_v42 = vpop.eup %6629 }
0x1afb   :  { %v1977_v0 = vsel %vm258_vm1, %v7796_v42, 0.0 }
0x1aff   :  { %2095 = vrot.lane.b32.xlu1 %v7748_v44, %s7128_s1 }
0x1b01   :  { %2074 = vrot.lane.b32.xlu0 %v7748_v44, %s7130_s10 }
0x1b07   :  { %2116 = vrot.lane.b32.xlu2 %v7748_v44, %s7129_s25  ;;  %2053 = vrot.lane.b32.xlu1 %v7748_v44, %s7112_s21 }
0x1b2b   :  { %1978 = vadd.xlane.f32.xlu0 %v1977_v0  ;;  %v7817_v0 = vld [vmem:[#allocation5] sm:$0xff] }
0x1b59   :  { %v1985_v59 = vpop.xlane.xlu1 %1984 }
0x1b5a   :  { %6631 = vrcp.f32 %v1985_v59  ;;  %v2026_v10 = vand.u32 2147483647, %v1985_v59  ;;  %v2028_v52 = vand.u32 2147483648, %v1985_v59  ;;  %vm2022_vm12 = vweird.f32 %v1985_v59 }
0x1b5c   :  { %vm2027_vm9 = vcmp.eq.f32.partialorder %v2026_v10, 8.507059e+37  ;;  %v2029_v51 = vor.u32 1.1754944e-38, %v2028_v52 }
0x1b60   :  { %v6632_v57 = vpop.eup %6631  ;;  %v1982_v55 = vpop.xlane.xlu0 %1981 }
0x1b61   :  { %v2018_v61 = vmul.f32 %v6632_v57, %v1985_v59  ;;  %6633 = vrcp.f32 %v1982_v55  ;;  %vm2023_vm11 = vweird.f32 %v6632_v57  ;;  %v2014_v2 = vand.u32 2147483648, %v1982_v55  ;;  %v7824_v59 = vld [vmem:[%s8977_s4 + $0x8] sm:$0xff] }
0x1b62   :  { %v1988_v7 = vpop.xlane.xlu2 %1987  ;;  %vm2024_vm13 = vmor %vm2022_vm12, %vm2023_vm11  ;;  %v2012_v21 = vand.u32 2147483647, %v1982_v55  ;;  %vm2008_vm15 = vweird.f32 %v1982_v55 }
0x1b63   :  { %v2019_v3 = vsub.f32 1.0, %v2018_v61  ;;  %6635 = vrcp.f32 %v1988_v7  ;;  %v2042_v46 = vand.u32 2147483648, %v1988_v7  ;;  %v2040_v50 = vand.u32 2147483647, %v1988_v7 }
0x1b64   :  { %v2015_v1 = vor.u32 1.1754944e-38, %v2014_v2  ;;  %vm2036_vm5 = vweird.f32 %v1988_v7  ;;  %vm2013_vm8 = vcmp.eq.f32.partialorder %v2012_v21, 8.507059e+37 }
0x1b65   :  { %v2020_v44 = vmul.f32 %v6632_v57, %v2019_v3  ;;  %v2043_v17 = vor.u32 1.1754944e-38, %v2042_v46  ;;  %vm2041_vm11 = vcmp.eq.f32.partialorder %v2040_v50, 8.507059e+37 }
0x1b67   :  { %v6634_v39 = vpop.eup %6633  ;;  %v2021_v35 = vadd.f32 %v6632_v57, %v2020_v44 }
0x1b68   :  { %v2004_v40 = vmul.f32 %v6634_v39, %v1982_v55  ;;  %vm2009_vm14 = vweird.f32 %v6634_v39 }
0x1b69   :  { %v6636_v5 = vpop.eup %6635  ;;  %v2025_v45 = vsel %vm2024_vm13, %v6632_v57, %v2021_v35  ;;  %vm2010_vm4 = vmor %vm2008_vm15, %vm2009_vm14 }
0x1b6a   :  { %v2005_v48 = vsub.f32 1.0, %v2004_v40  ;;  %v2032_v8 = vmul.f32 %v6636_v5, %v1988_v7  ;;  %v2117_v4 = vpop.permute.xlu2 %2116  ;;  %v2030_v30 = vsel %vm2027_vm9, %v2029_v51, %v2025_v45  ;;  %vm2037_vm3 = vweird.f32 %v6636_v5 }
0x1b6b   :  { %v2122_v12 = vsel %vm456_vm2, %v2117_v4, 0  ;;  %v2047_v60 = vmul.f32 %v7776_v26, %v2030_v30  ;;  %vm2038_vm10 = vmor %vm2036_vm5, %vm2037_vm3 }
0x1b6c   :  { %v2006_v15 = vmul.f32 %v6634_v39, %v2005_v48  ;;  %v2033_v22 = vsub.f32 1.0, %v2032_v8  ;;  %2131 = vmatpush.bf16.msrb.mxu1 %v2122_v12 }
0x1b6d   :  { %v2051_v32 = vpack.c.bf16 %v2047_v60, %v2047_v60 }
0x1b6e   :  { %v2007_v49 = vadd.f32 %v6634_v39, %v2006_v15  ;;  %v2034_v31 = vmul.f32 %v6636_v5, %v2033_v22 }
0x1b70   :  { %2243 = vmatpush.bf16.xpose.msra.mxu1 %v7415_v25  ;;  %v2011_v19 = vsel %vm2010_vm4, %v6634_v39, %v2007_v49  ;;  %v2035_v9 = vadd.f32 %v6636_v5, %v2034_v31 }
0x1b71   :  { %v2016_v63 = vsel %vm2013_vm8, %v2015_v1, %v2011_v19  ;;  %v2096_v53 = vpop.permute.xlu1 %2095 }
0x1b72   :  { %v2046_v11 = vmul.f32 %v7780_v29, %v2016_v63  ;;  %v2039_v33 = vsel %vm2038_vm10, %v6636_v5, %v2035_v9  ;;  %v2101_v6 = vsel %vm456_vm2, %v2096_v53, 0 }
0x1b73   :  { %v2044_v16 = vsel %vm2041_vm11, %v2043_v17, %v2039_v33  ;;  %v2075_v28 = vpop.permute.xlu0 %2074  ;;  %2110 = vmatpush.bf16.msrb.mxu0 %v2101_v6 }
0x1b74   :  { %v2048_v36 = vmul.f32 %v7784_v34, %v2044_v16  ;;  %v2080_v26 = vsel %vm456_vm2, %v2075_v28, 0  ;;  %v2050_v37 = vpack.c.bf16 %v2046_v11, %v2046_v11 }
0x1b75   :  { %2089 = vmatpush.bf16.msra.mxu3 %v2080_v26 }
0x1b76   :  { %v2052_v41 = vpack.c.bf16 %v2048_v36, %v2048_v36  ;;  %6367 = vmatmul.msk.bf16.vlgmr.msrb.gmra.mxu0 %vm258_vm1, %v2051_v32 }
0x1b77   :  { %2222 = vmatpush.bf16.xpose.msra.mxu0 %v7330_v20 }
0x1b78   :  { %6366 = vmatmul.msk.bf16.vlgmr.msra.gmra.mxu3 %vm258_vm1, %v2050_v37  ;;  %6368 = vmatmul.msk.bf16.vlgmr.msrb.gmra.mxu1 %vm258_vm1, %v2052_v41 }
0x1b79   :  { %2204 = vmatpush.bf16.msrb.mxu3 %v7808_v56  ;;  %2415 = vmatpush.bf16.msrb.mxu1 %v7459_v58  ;;  %v2054_v29 = vpop.permute.xlu1 %2053 }
0x1b7a   :  { %v2059_v34 = vsel %vm456_vm2, %v2054_v29, 0 }
0x1b7b   :  { %2068 = vmatpush.bf16.msra.mxu2 %v2059_v34  ;;  %v7845_v34 = vld [vmem:[#allocation11 + $0x3] ss:$0 sm:$0xff] }
0x1b7d   :  { %2205 = vmatpush.bf16.msrb.mxu3 %v7817_v0 }
0x1b7f   :  { %2399 = vmatpush.bf16.msrb.mxu0 %v7447_v23  ;;  %2162 = vmatpush.bf16.msrb.mxu2 %v7824_v59 }
0x1b81   :  { %2279 = vmatpush.bf16.xpose.msra.mxu3 %v7385_v54 }
0x1b83   :  { %2163 = vmatpush.bf16.msrb.mxu2 %v7634_v62 }
0x1b9e   :  { %v1979_v57 = vpop.xlane.xlu0 %1978 }
0x1b9f   :  { %6637 = vrcp.f32 %v1979_v57  ;;  %v2000_v3 = vand.u32 2147483648, %v1979_v57  ;;  %v1998_v39 = vand.u32 2147483647, %v1979_v57  ;;  %vm1994_vm13 = vweird.f32 %v1979_v57 }
0x1ba1   :  { %v2001_v10 = vor.u32 1.1754944e-38, %v2000_v3  ;;  %vm1999_vm14 = vcmp.eq.f32.partialorder %v1998_v39, 8.507059e+37 }
0x1ba5   :  { %v6638_v55 = vpop.eup %6637 }
0x1ba6   :  { %v1990_v61 = vmul.f32 %v6638_v55, %v1979_v57  ;;  %vm1995_vm12 = vweird.f32 %v6638_v55 }
0x1ba7   :  { %vm1996_vm9 = vmor %vm1994_vm13, %vm1995_vm12 }
0x1ba8   :  { %v1991_v7 = vsub.f32 1.0, %v1990_v61 }
0x1baa   :  { %v1992_v44 = vmul.f32 %v6638_v55, %v1991_v7 }
0x1bac   :  { %v1993_v35 = vadd.f32 %v6638_v55, %v1992_v44  ;;  %v7860_v44 = vld [vmem:[%s8979_s6] ss:$0 sm:$0xff] }
0x1bae   :  { %v1997_v52 = vsel %vm1996_vm9, %v6638_v55, %v1993_v35  ;;  %v7848_v55 = vld [vmem:[#allocation11 + $0x4] ss:$0 sm:$0xff] }
0x1baf   :  { %v2002_v40 = vsel %vm1999_vm14, %v2001_v10, %v1997_v52  ;;  %v7864_v52 = vld [vmem:[#allocation8 + $0x8] sm:$0xff] }
0x1bb0   :  { %v2045_v5 = vmul.f32 %v7796_v42, %v2002_v40 }
0x1bb2   :  { %v2049_v45 = vpack.c.bf16 %v2045_v5, %v2045_v5 }
0x1bb4   :  { %6365 = vmatmul.msk.bf16.vlgmr.msra.gmra.mxu2 %vm258_vm1, %v2049_v45  ;;  %v7869_v45 = vld [vmem:[#allocation8] sm:$0xff] }
0x1bb5   :  { %2261 = vmatpush.bf16.xpose.msra.mxu2 %v7360_v18 }
0x1bf3   :  { %v2112_v62 = vpop.f32.mrf.mxu0 }
0x1bf4   :  { %2142 = vrot.lane.b32.xlu1 %v2112_v62, %s7131_s28 }
0x1bf5   :  { %v2133_v48 = vpop.f32.mrf.mxu1 }
0x1bfb   :  { %v2091_v8 = vpop.f32.mrf.mxu3  ;;  %v2114_v4 = vpop.f32.mrf.mxu0 }
0x1bfc   :  { %2138 = vrot.lane.b32.xlu2 %v2091_v8, %s7120_s26  ;;  %v7875_v8 = vld [vmem:[#allocation10 + $0x8] sm:$0xff]  ;;  %v7881_v4 = vld [vmem:[%s8985_s12 + $0x18] sm:$0xff] }
0x1bfd   :  { %v2135_v51 = vpop.f32.mrf.mxu1 }
0x1bfe   :  { %v7884_v51 = vld [vmem:[#allocation10] sm:$0xff] }
0x1c03   :  { %v2093_v2 = vpop.f32.mrf.mxu3 }
0x1c04   :  { %2146 = vrot.lane.b32.xlu2 %v2133_v48, %s7132_s29  ;;  %v7890_v2 = vld [vmem:[%s8985_s12 + $0x10] sm:$0xff] }
0x1c37   :  { %v2070_v12 = vpop.f32.mrf.mxu2 }
0x1c3f   :  { %v2072_v15 = vpop.f32.mrf.mxu2 }
0x1c56   :  { %v2139_v42 = vpop.permute.xlu2 %2138 }
0x1c57   :  { %v2149_v21 = vsel %vm258_vm1, %v2070_v12, %v2139_v42  ;;  %v7897_v42 = vld [vmem:[%s8985_s12 + $0x8] sm:$0xff] }
0x1c5e   :  { %v2147_v30 = vpop.permute.xlu2 %2146 }
0x1c66   :  { %v2143_v22 = vpop.permute.xlu1 %2142 }
0x1c67   :  { %v2150_v46 = vsel %vm549_vm6, %v2149_v21, %v2143_v22  ;;  %v7904_v21 = vld [vmem:[%s8985_s12] sm:$0xff] }
0x1c68   :  { %v2151_v49 = vsel %vm551_vm7, %v2150_v46, %v2147_v30 }
0x1c69   :  { %v2152_v31 = vpack.c.bf16 %v2151_v49, %v2151_v49 }
0x1c6b   :  { %6369 = vmatmul.msk.bf16.vlgmr.msrb.gmra.mxu2 %vm195_vm0, %v2152_v31 }
0x1c6c   :  { %2431 = vmatpush.bf16.msrb.mxu2 %v7444_v14 }
0x1cee   :  { %v2165_v50 = vpop.f32.mrf.mxu2 }
0x1cef   :  { %v2166_v1 = vadd.f32 %v7653_v24, %v2165_v50 }
0x1cf1   :  { %v2169_v60 = vadd.f32 %v2166_v1, %v7742_v38 }
0x1cf3   :  { %v2170_v19 = vsel %vm195_vm0, %v2169_v60, 0.0 }
0x1cf4   :  { %2171 = vadd.xlane.f32.xlu1 %v2170_v19 }
0x1cf6   :  { %v2167_v9 = vpop.f32.mrf.mxu2 }
0x1d67   :  { %v2172_v63 = vpop.xlane.xlu1 %2171 }
0x1d68   :  { %v2173_v17 = vmul.f32 %v2172_v63, %v7380_v47 }
0x1d6a   :  { %v2174_v53 = vsub.f32 %v2169_v60, %v2173_v17 }
0x1d6c   :  { %v2175_v11 = vmul.f32 %v2174_v53, %v2174_v53 }
0x1d6e   :  { %v2176_v33 = vsel %vm195_vm0, %v2175_v11, 0.0 }
0x1d6f   :  { %2177 = vadd.xlane.f32.xlu2 %v2176_v33 }
0x1de2   :  { %v2178_v6 = vpop.xlane.xlu2 %2177 }
0x1de3   :  { %v2179_v16 = vmul.f32 %v2178_v6, %v7380_v47 }
0x1de5   :  { %v2180_v28 = vadd.f32 1e-05, %v2179_v16 }
0x1de7   :  { %6639 = vrsqrt.f32 %v2180_v28  ;;  %vm2187_vm3 = vweird.f32 %v2180_v28 }
0x1ded   :  { %v6640_v24 = vpop.eup %6639 }
0x1dee   :  { %v2182_v32 = vmul.f32 %v6640_v24, %v2180_v28  ;;  %vm2188_vm15 = vweird.f32 %v6640_v24 }
0x1def   :  { %vm2189_vm4 = vmor %vm2187_vm3, %vm2188_vm15 }
0x1df0   :  { %v2183_v38 = vmul.f32 %v6640_v24, %v2182_v32 }
0x1df2   :  { %v2184_v36 = vmul.f32 0.5, %v2183_v38 }
0x1df4   :  { %v2185_v26 = vsub.f32 1.5, %v2184_v36 }
0x1df6   :  { %v2186_v37 = vmul.f32 %v6640_v24, %v2185_v26 }
0x1df8   :  { %v2190_v41 = vsel %vm2189_vm4, %v6640_v24, %v2186_v37 }
0x1df9   :  { %v2191_v29 = vmul.f32 %v2190_v41, %v2174_v53 }
0x1dfb   :  { %v2192_v57 = vmul.f32 %v7845_v34, %v2191_v29 }
0x1dfd   :  { %v7851_v61 = vadd.f32 %v7848_v55, %v2192_v57 }
0x1dff   :  { %v2194_v7 = vpack.c.bf16 %v7851_v61, %v7851_v61 }
0x1e01   :  { %6370 = vmatmul.msk.bf16.vlgmr.msrb.gmra.mxu3 %vm195_vm0, %v2194_v7 }
0x1e02   :  { %2447 = vmatpush.bf16.msrb.mxu3 %v7452_v43 }
0x1e84   :  { %v2207_v3 = vpop.f32.mrf.mxu3 }
0x1e85   :  { %v2208_v39 = vadd.f32 %v7860_v44, %v2207_v3 }
0x1e87   :  { %v2211_v35 = vpack.c.bf16 %v2208_v39, %v2208_v39 }
0x1e89   :  { %v2229_v10 = vunpack.c.l.b16 %v2211_v35  ;;  %6371 = vmatmul.msk.bf16.vlgmr.msra.gmra.mxu0 %vm258_vm1, %v2211_v35 }
0x1e8a   :  { %2478 = vmatpush.bf16.msra.mxu0 %v7864_v52 }
0x1e8b   :  { %v2230_v40 = vpack.c.b16 %v2229_v10, %v2229_v10 }
0x1e8c   :  { %v2209_v5 = vpop.f32.mrf.mxu3 }
0x1e8d   :  { %2231 = vrot.lane.b32.xlu1 %v2230_v40, %s7126_s0  ;;  %2249 = vrot.lane.b32.xlu0 %v2230_v40, %s7121_s30 }
0x1e8e   :  { %2479 = vmatpush.bf16.msra.mxu0 %v7869_v45 }
0x1e95   :  { %2267 = vrot.lane.b32.xlu0 %v2230_v40, %s7124_s17 }
0x1eff   :  { %v2232_v62 = vpop.permute.xlu1 %2231  ;;  %v2250_v48 = vpop.permute.xlu0 %2249 }
0x1f00   :  { %6372 = vmatmul.msk.bf16.vlgmr.msra.gmra.mxu1 %vm258_vm1, %v2232_v62  ;;  %6373 = vmatmul.msk.bf16.vlgmr.msra.gmra.mxu2 %vm258_vm1, %v2250_v48 }
0x1f01   :  { %2520 = vmatpush.bf16.msra.mxu1 %v7875_v8  ;;  %2536 = vmatpush.bf16.msra.mxu2 %v7881_v4 }
0x1f05   :  { %2521 = vmatpush.bf16.msra.mxu1 %v7884_v51  ;;  %2537 = vmatpush.bf16.msra.mxu2 %v7890_v2 }
0x1f06   :  { %v2224_v12 = vpop.f32.mrf.mxu0 }
0x1f07   :  { %v2268_v15 = vpop.permute.xlu0 %2267  ;;  %v2285_v17 = vmul.f32 0.35355338, %v2224_v12 }
0x1f08   :  { %6374 = vmatmul.msk.bf16.vlgmr.msra.gmra.mxu3 %vm258_vm1, %v2268_v15 }
0x1f09   :  { %2538 = vmatpush.bf16.msra.mxu2 %v7897_v42  ;;  %2580 = vmatpush.bf16.msra.mxu3 %v7680_v13  ;;  %v2289_v53 = vsel %vm549_vm6, %v2285_v17, -inf }
0x1f0d   :  { %2539 = vmatpush.bf16.msra.mxu2 %v7904_v21  ;;  %2581 = vmatpush.bf16.msra.mxu3 %v7686_v27 }
0x1f0e   :  { %v2226_v22 = vpop.f32.mrf.mxu0 }
0x1f7d   :  { %v2245_v30 = vpop.f32.mrf.mxu1 }
0x1f7e   :  { %v2286_v1 = vmul.f32 0.35355338, %v2245_v30 }
0x1f80   :  { %v2292_v9 = vsel %vm549_vm6, %v2286_v1, -inf }
0x1f83   :  { %v2263_v46 = vpop.f32.mrf.mxu2 }
0x1f84   :  { %v2287_v49 = vmul.f32 0.35355338, %v2263_v46 }
0x1f85   :  { %v2247_v31 = vpop.f32.mrf.mxu1 }
0x1f86   :  { %v2295_v50 = vsel %vm549_vm6, %v2287_v49, -inf }
0x1f87   :  { %2296 = vmax.xlane.f32.xlu2 %v2295_v50 }
0x1f8b   :  { %v2265_v60 = vpop.f32.mrf.mxu2  ;;  %v2281_v13 = vpop.f32.mrf.mxu3 }
0x1f8c   :  { %v2288_v19 = vmul.f32 0.35355338, %v2281_v13 }
0x1f8e   :  { %v2298_v63 = vsel %vm549_vm6, %v2288_v19, -inf }
0x1f8f   :  { %2293 = vmax.xlane.f32.xlu2 %v2292_v9  ;;  %2299 = vmax.xlane.f32.xlu0 %v2298_v63 }
0x1f93   :  { %v2283_v27 = vpop.f32.mrf.mxu3 }
0x1f97   :  { %2290 = vmax.xlane.f32.xlu2 %v2289_v53 }
0x1ffa   :  { %v2297_v11 = vpop.xlane.xlu2 %2296 }
0x1ffb   :  { %v2303_v33 = vsub.f32 %v2287_v49, %v2297_v11 }
0x1ffd   :  { %v2309_v6 = vmul.f32 1.442695, %v2303_v33 }
0x1fff   :  { %6641 = vpow2.f32 %v2309_v6 }
0x2002   :  { %v2294_v16 = vpop.xlane.xlu2 %2293  ;;  %v2300_v28 = vpop.xlane.xlu0 %2299 }
0x2003   :  { %v2302_v24 = vsub.f32 %v2286_v1, %v2294_v16  ;;  %v2304_v32 = vsub.f32 %v2288_v19, %v2300_v28 }
0x2005   :  { %v6642_v38 = vpop.eup %6641  ;;  %v2307_v36 = vmul.f32 1.442695, %v2302_v24  ;;  %v2311_v26 = vmul.f32 1.442695, %v2304_v32 }
0x2006   :  { %v2319_v37 = vsel %vm549_vm6, %v6642_v38, 0.0 }
0x2007   :  { %6643 = vpow2.f32 %v2307_v36  ;;  %2320 = vadd.xlane.f32.xlu2 %v2319_v37 }
0x2008   :  { %6645 = vpow2.f32 %v2311_v26 }
0x200a   :  { %v2291_v41 = vpop.xlane.xlu2 %2290 }
0x200b   :  { %v2301_v29 = vsub.f32 %v2285_v17, %v2291_v41 }
0x200d   :  { %v7913_v57 = vpop.eup %6643  ;;  %v2305_v7 = vmul.f32 1.442695, %v2301_v29 }
0x200e   :  { %v7915_v3 = vpop.eup %6645  ;;  %v2316_v39 = vsel %vm549_vm6, %v7913_v57, 0.0 }
0x200f   :  { %6647 = vpow2.f32 %v2305_v7  ;;  %v2322_v35 = vsel %vm549_vm6, %v7915_v3, 0.0  ;;  %2317 = vadd.xlane.f32.xlu2 %v2316_v39 }
0x2010   :  { %2323 = vadd.xlane.f32.xlu1 %v2322_v35 }
0x2015   :  { %v7921_v10 = vpop.eup %6647 }
0x2016   :  { %v2313_v40 = vsel %vm549_vm6, %v7921_v10, 0.0 }
0x2017   :  { %2314 = vadd.xlane.f32.xlu2 %v2313_v40 }
0x207a   :  { %v2321_v5 = vpop.xlane.xlu2 %2320 }
0x207b   :  { %6649 = vrcp.f32 %v2321_v5  ;;  %v2364_v30 = vand.u32 2147483648, %v2321_v5  ;;  %v2362_v49 = vand.u32 2147483647, %v2321_v5  ;;  %vm2358_vm8 = vweird.f32 %v2321_v5 }
0x207d   :  { %v2365_v1 = vor.u32 1.1754944e-38, %v2364_v30  ;;  %vm2363_vm11 = vcmp.eq.f32.partialorder %v2362_v49, 8.507059e+37 }
0x2081   :  { %v6650_v62 = vpop.eup %6649 }
0x2082   :  { %v2354_v48 = vmul.f32 %v6650_v62, %v2321_v5  ;;  %v2318_v12 = vpop.xlane.xlu2 %2317  ;;  %vm2359_vm5 = vweird.f32 %v6650_v62 }
0x2083   :  { %v2324_v15 = vpop.xlane.xlu1 %2323  ;;  %6651 = vrcp.f32 %v2318_v12  ;;  %vm2360_vm10 = vmor %vm2358_vm8, %vm2359_vm5  ;;  %v2348_v33 = vand.u32 2147483647, %v2318_v12  ;;  %v2350_v6 = vand.u32 2147483648, %v2318_v12  ;;  %vm2344_vm9 = vweird.f32 %v2318_v12 }
0x2084   :  { %v2355_v22 = vsub.f32 1.0, %v2354_v48  ;;  %6653 = vrcp.f32 %v2324_v15  ;;  %v2378_v28 = vand.u32 2147483648, %v2324_v15  ;;  %v2376_v36 = vand.u32 2147483647, %v2324_v15 }
0x2085   :  { %vm2372_vm14 = vweird.f32 %v2324_v15  ;;  %vm2349_vm4 = vcmp.eq.f32.partialorder %v2348_v33, 8.507059e+37 }
0x2086   :  { %v2356_v46 = vmul.f32 %v6650_v62, %v2355_v22  ;;  %v2379_v29 = vor.u32 1.1754944e-38, %v2378_v28  ;;  %vm2377_vm5 = vcmp.eq.f32.partialorder %v2376_v36, 8.507059e+37 }
0x2088   :  { %v2357_v31 = vadd.f32 %v6650_v62, %v2356_v46 }
0x2089   :  { %v6652_v50 = vpop.eup %6651 }
0x208a   :  { %v6654_v60 = vpop.eup %6653  ;;  %v2361_v13 = vsel %vm2360_vm10, %v6650_v62, %v2357_v31  ;;  %v2340_v19 = vmul.f32 %v6652_v50, %v2318_v12  ;;  %v2315_v9 = vpop.xlane.xlu2 %2314  ;;  %vm2345_vm12 = vweird.f32 %v6652_v50 }
0x208b   :  { %v2366_v63 = vsel %vm2363_vm11, %v2365_v1, %v2361_v13  ;;  %v2368_v17 = vmul.f32 %v6654_v60, %v2324_v15  ;;  %6655 = vrcp.f32 %v2315_v9  ;;  %vm2373_vm13 = vweird.f32 %v6654_v60  ;;  %vm2346_vm15 = vmor %vm2344_vm9, %vm2345_vm12 }
0x208c   :  { %v2383_v27 = vmul.f32 %v6642_v38, %v2366_v63  ;;  %v2341_v53 = vsub.f32 1.0, %v2340_v19  ;;  %v2351_v38 = vor.u32 1.1754944e-38, %v2350_v6  ;;  %vm2374_vm3 = vmor %vm2372_vm14, %vm2373_vm13  ;;  %v2336_v22 = vand.u32 2147483648, %v2315_v9 }
0x208d   :  { %v2369_v11 = vsub.f32 1.0, %v2368_v17  ;;  %v2334_v15 = vand.u32 2147483647, %v2315_v9  ;;  %vm2330_vm10 = vweird.f32 %v2315_v9 }
0x208e   :  { %v2387_v16 = vpack.c.bf16 %v2383_v27, %v2383_v27  ;;  %v2342_v24 = vmul.f32 %v6652_v50, %v2341_v53 }
0x208f   :  { %v2370_v32 = vmul.f32 %v6654_v60, %v2369_v11  ;;  %vm2335_vm12 = vcmp.eq.f32.partialorder %v2334_v15, 8.507059e+37 }
0x2090   :  { %v2343_v26 = vadd.f32 %v6652_v50, %v2342_v24  ;;  %6377 = vmatmul.msk.bf16.vlgmr.msrb.gmra.mxu2 %vm549_vm6, %v2387_v16 }
0x2091   :  { %v6656_v37 = vpop.eup %6655  ;;  %v2371_v41 = vadd.f32 %v6654_v60, %v2370_v32 }
0x2092   :  { %v2347_v7 = vsel %vm2346_vm15, %v6652_v50, %v2343_v26  ;;  %v2326_v39 = vmul.f32 %v6656_v37, %v2315_v9  ;;  %vm2331_vm8 = vweird.f32 %v6656_v37  ;;  %v2337_v50 = vor.u32 1.1754944e-38, %v2336_v22  ;;  %v7939_v26 = vld [vmem:[#allocation11 + $0x1] ss:$0 sm:$0xff] }
0x2093   :  { %v2375_v35 = vsel %vm2374_vm3, %v6654_v60, %v2371_v41  ;;  %v2352_v40 = vsel %vm2349_vm4, %v2351_v38, %v2347_v7  ;;  %vm2332_vm11 = vmor %vm2330_vm10, %vm2331_vm8  ;;  %vm8996_vm15 = vcmask 523264  }
0x2094   :  { %v2380_v5 = vsel %vm2377_vm5, %v2379_v29, %v2375_v35  ;;  %v2382_v62 = vmul.f32 %v7913_v57, %v2352_v40  ;;  %v2327_v48 = vsub.f32 1.0, %v2326_v39 }
0x2095   :  { %v2384_v12 = vmul.f32 %v7915_v3, %v2380_v5 }
0x2096   :  { %v2386_v30 = vpack.c.bf16 %v2382_v62, %v2382_v62  ;;  %v2328_v46 = vmul.f32 %v6656_v37, %v2327_v48 }
0x2097   :  { %v2388_v49 = vpack.c.bf16 %v2384_v12, %v2384_v12 }
0x2098   :  { %v2329_v31 = vadd.f32 %v6656_v37, %v2328_v46  ;;  %6376 = vmatmul.msk.bf16.vlgmr.msrb.gmra.mxu1 %vm549_vm6, %v2386_v30 }
0x2099   :  { %6378 = vmatmul.msk.bf16.vlgmr.msrb.gmra.mxu3 %vm549_vm6, %v2388_v49 }
0x209a   :  { %v2333_v1 = vsel %vm2332_vm11, %v6656_v37, %v2329_v31 }
0x209b   :  { %v2338_v57 = vsel %vm2335_vm12, %v2337_v50, %v2333_v1  ;;  %v7947_v1 = vld [vmem:[#allocation11 + $0x5] ss:$0 sm:$0xff] }
0x209c   :  { %v2381_v60 = vmul.f32 %v7921_v10, %v2338_v57 }
0x209e   :  { %v2385_v3 = vpack.c.bf16 %v2381_v60, %v2381_v60  ;;  %v7950_v60 = vld [vmem:[#allocation11 + $0x6] ss:$0 sm:$0xff] }
0x20a0   :  { %6375 = vmatmul.msk.bf16.vlgmr.msrb.gmra.mxu0 %vm549_vm6, %v2385_v3 }
0x2113   :  { %v2433_v13 = vpop.f32.mrf.mxu2 }
0x2114   :  { %2458 = vrot.lane.b32.xlu2 %v2433_v13, %s7131_s28 }
0x2115   :  { %v2417_v19 = vpop.f32.mrf.mxu1 }
0x2116   :  { %2454 = vrot.lane.b32.xlu0 %v2417_v19, %s7120_s26 }
0x211b   :  { %v2435_v9 = vpop.f32.mrf.mxu2 }
0x211c   :  { %v2449_v63 = vpop.f32.mrf.mxu3  ;;  %v7957_v9 = vld [vmem:[%s8984_s11] ss:$0 sm:$0xff] }
0x211d   :  { %v2401_v17 = vpop.f32.mrf.mxu0  ;;  %v2419_v27 = vpop.f32.mrf.mxu1 }
0x211e   :  { %2462 = vrot.lane.b32.xlu0 %v2449_v63, %s7132_s29 }
0x2124   :  { %v2451_v53 = vpop.f32.mrf.mxu3 }
0x2125   :  { %v2403_v11 = vpop.f32.mrf.mxu0 }
0x216e   :  { %v2459_v6 = vpop.permute.xlu2 %2458 }
0x2188   :  { %v2455_v33 = vpop.permute.xlu0 %2454 }
0x2189   :  { %v2465_v10 = vsel %vm258_vm1, %v2401_v17, %v2455_v33  ;;  %v7961_v33 = vld [vmem:[#allocation11 + $0x2] ss:$0 sm:$0xff] }
0x218a   :  { %v2466_v28 = vsel %vm549_vm6, %v2465_v10, %v2459_v6 }
0x2190   :  { %v2463_v16 = vpop.permute.xlu0 %2462 }
0x2191   :  { %v2467_v24 = vsel %vm551_vm7, %v2466_v28, %v2463_v16 }
0x2192   :  { %v2468_v32 = vpack.c.bf16 %v2467_v24, %v2467_v24 }
0x2194   :  { %6379 = vmatmul.msk.bf16.vlgmr.msra.gmra.mxu0 %vm195_vm0, %v2468_v32 }
0x2211   :  { %v2481_v36 = vpop.f32.mrf.mxu0 }
0x2212   :  { %v2482_v37 = vadd.f32 %v7939_v26, %v2481_v36 }
0x2214   :  { %v2485_v41 = vadd.f32 %v2482_v37, %v7851_v61 }
0x2216   :  { %v2486_v38 = vsel %vm195_vm0, %v2485_v41, 0.0 }
0x2217   :  { %2487 = vadd.xlane.f32.xlu1 %v2486_v38 }
0x2219   :  { %v2483_v29 = vpop.f32.mrf.mxu0 }
0x228a   :  { %v2488_v7 = vpop.xlane.xlu1 %2487 }
0x228b   :  { %v2489_v39 = vmul.f32 %v2488_v7, %v7380_v47 }
0x228d   :  { %v2490_v35 = vsub.f32 %v2485_v41, %v2489_v39 }
0x228f   :  { %v2491_v40 = vmul.f32 %v2490_v35, %v2490_v35 }
0x2291   :  { %v2492_v5 = vsel %vm195_vm0, %v2491_v40, 0.0 }
0x2292   :  { %2493 = vadd.xlane.f32.xlu0 %v2492_v5 }
0x2305   :  { %v2494_v62 = vpop.xlane.xlu0 %2493 }
0x2306   :  { %v2495_v48 = vmul.f32 %v2494_v62, %v7380_v47 }
0x2308   :  { %v2496_v12 = vadd.f32 1e-05, %v2495_v48 }
0x230a   :  { %6657 = vrsqrt.f32 %v2496_v12  ;;  %vm2503_vm9 = vweird.f32 %v2496_v12 }
0x2310   :  { %v6658_v22 = vpop.eup %6657 }
0x2311   :  { %v2498_v30 = vmul.f32 %v6658_v22, %v2496_v12  ;;  %vm2504_vm13 = vweird.f32 %v6658_v22 }
0x2312   :  { %vm2505_vm14 = vmor %vm2503_vm9, %vm2504_vm13 }
0x2313   :  { %v2499_v61 = vmul.f32 %v6658_v22, %v2498_v30  ;;  %v7968_v30 = vld [vmem:[#allocation11 + $0x7] ss:$0 sm:$0xff] }
0x2315   :  { %v2500_v46 = vmul.f32 0.5, %v2499_v61 }
0x2317   :  { %v2501_v15 = vsub.f32 1.5, %v2500_v46  ;;  %v7971_v46 = vld [vmem:[#allocation11 + $0x8] ss:$0 sm:$0xff] }
0x2319   :  { %v2502_v49 = vmul.f32 %v6658_v22, %v2501_v15 }
0x231b   :  { %v2506_v31 = vsel %vm2505_vm14, %v6658_v22, %v2502_v49 }
0x231c   :  { %v2507_v50 = vmul.f32 %v2506_v31, %v2490_v35 }
0x231e   :  { %v2508_v57 = vmul.f32 %v7947_v1, %v2507_v50  ;;  %v7982_v50 = vld [vmem:[%s8976_s3] ss:$0 sm:$0xff] }
0x2320   :  { %v2509_v3 = vadd.f32 %v7950_v60, %v2508_v57 }
0x2322   :  { %v2510_v13 = vpack.c.bf16 %v2509_v3, %v2509_v3 }
0x2324   :  { %6380 = vmatmul.msk.bf16.vlgmr.msra.gmra.mxu1 %vm195_vm0, %v2510_v13 }
0x23a1   :  { %v2523_v19 = vpop.f32.mrf.mxu1 }
0x23a2   :  { %v2524_v63 = vadd.f32 %v7957_v9, %v2523_v19 }
0x23a4   :  { %v2527_v17 = vmax.f32 %v2524_v63, 0.0 }
0x23a6   :  { %v2528_v27 = vpack.c.bf16 %v2527_v17, %v2527_v17 }
0x23a8   :  { %6381 = vmatmul.msk.bf16.vlgmr.msra.gmra.mxu2 %vm8996_vm15, %v2528_v27 }
0x23a9   :  { %v2525_v53 = vpop.f32.mrf.mxu1 }
0x242b   :  { %v2541_v11 = vpop.f32.mrf.mxu2 }
0x242c   :  { %v2542_v10 = vadd.f32 %v7961_v33, %v2541_v11 }
0x242e   :  { %v2545_v6 = vadd.f32 %v2542_v10, %v2509_v3 }
0x2430   :  { %v2546_v16 = vsel %vm195_vm0, %v2545_v6, 0.0 }
0x2431   :  { %2547 = vadd.xlane.f32.xlu2 %v2546_v16 }
0x2433   :  { %v2543_v28 = vpop.f32.mrf.mxu2 }
0x24a4   :  { %v2548_v24 = vpop.xlane.xlu2 %2547 }
0x24a5   :  { %v2549_v32 = vmul.f32 %v2548_v24, %v7380_v47 }
0x24a7   :  { %v2550_v36 = vsub.f32 %v2545_v6, %v2549_v32 }
0x24a9   :  { %v2551_v37 = vmul.f32 %v2550_v36, %v2550_v36 }
0x24ab   :  { %v2552_v41 = vsel %vm195_vm0, %v2551_v37, 0.0 }
0x24ac   :  { %2553 = vadd.xlane.f32.xlu1 %v2552_v41 }
0x251f   :  { %v2554_v38 = vpop.xlane.xlu1 %2553 }
0x2520   :  { %v2555_v29 = vmul.f32 %v2554_v38, %v7380_v47 }
0x2522   :  { %v2556_v7 = vadd.f32 1e-05, %v2555_v29 }
0x2524   :  { %6659 = vrsqrt.f32 %v2556_v7  ;;  %vm2563_vm4 = vweird.f32 %v2556_v7 }
0x252a   :  { %v6660_v39 = vpop.eup %6659 }
0x252b   :  { %v2558_v35 = vmul.f32 %v6660_v39, %v2556_v7  ;;  %vm2564_vm3 = vweird.f32 %v6660_v39 }
0x252c   :  { %vm2565_vm5 = vmor %vm2563_vm4, %vm2564_vm3 }
0x252d   :  { %v2559_v40 = vmul.f32 %v6660_v39, %v2558_v35 }
0x252f   :  { %v2560_v5 = vmul.f32 0.5, %v2559_v40 }
0x2531   :  { %v2561_v62 = vsub.f32 1.5, %v2560_v5 }
0x2533   :  { %v2562_v48 = vmul.f32 %v6660_v39, %v2561_v62 }
0x2535   :  { %v2566_v12 = vsel %vm2565_vm5, %v6660_v39, %v2562_v48 }
0x2536   :  { %v2567_v22 = vmul.f32 %v2566_v12, %v2550_v36 }
0x2538   :  { %v2568_v61 = vmul.f32 %v7968_v30, %v2567_v22 }
0x253a   :  { %v7974_v15 = vadd.f32 %v7971_v46, %v2568_v61 }
0x253c   :  { %v2570_v49 = vpack.c.bf16 %v7974_v15, %v7974_v15 }
0x253e   :  { %6382 = vmatmul.msk.bf16.vlgmr.msra.gmra.mxu3 %vm195_vm0, %v2570_v49 }
0x25c1   :  { %v2583_v31 = vpop.f32.mrf.mxu3 }
0x25c2   :  { %v2584_v57 = vadd.f32 %v7982_v50, %v2583_v31 }
0x25c4   :  { %v2587_v3 = vpack.c.bf16 %v2584_v57, %v2584_v57 }
0x25c6   :  { %v2589_v13 = vunpack.c.l.b16 %v2587_v3 }
0x25c8   :  { %v7985_v19 = vpack.c.b16 %v2589_v13, %v2589_v13 }
0x25c9   :  { %v2585_v63 = vpop.f32.mrf.mxu3 }
0x25ca   :  { %2658 = vrot.lane.b32.xlu0 %v7985_v19, %s7124_s17  ;;  %2635 = vrot.lane.b32.xlu2 %v7985_v19, %s7121_s30 }
0x25cb   :  { %2637 = vrot.lane.b32.xlu1 %v7985_v19, %s7122_s15 }
0x25d3   :  { %2660 = vrot.lane.b32.xlu1 %v7985_v19, %s7125_s18 }
0x25db   :  { %2614 = vrot.lane.b32.xlu1 %v7985_v19, %s7123_s16 }
0x25e3   :  { %2612 = vrot.lane.b32.xlu1 %v7985_v19, %s7126_s0 }
0x25eb   :  { %2591 = vrot.lane.b32.xlu1 %v7985_v19, %s7127_s19 }
0x2624   :  { %v2636_v53 = vpop.permute.xlu2 %2635 }
0x263c   :  { %v2659_v6 = vpop.permute.xlu0 %2658 }
0x263d   :  { %v2638_v17 = vpop.permute.xlu1 %2637 }
0x263e   :  { %v2643_v27 = vsel %vm258_vm1, %v2638_v17, 0 }
0x263f   :  { %2652 = vmatpush.bf16.xpose.msrb.mxu2 %v2643_v27 }
0x2645   :  { %v2661_v11 = vpop.permute.xlu1 %2660 }
0x2646   :  { %v2666_v10 = vsel %vm258_vm1, %v2661_v11, 0  ;;  %6385 = vmatmul.msk.bf16.vlgmr.msrb.gmra.mxu2 %vm258_vm1, %v2636_v53 }
0x2647   :  { %2675 = vmatpush.bf16.xpose.msrb.mxu3 %v2666_v10 }
0x264d   :  { %v2615_v16 = vpop.permute.xlu1 %2614 }
0x264e   :  { %v2620_v28 = vsel %vm258_vm1, %v2615_v16, 0  ;;  %6386 = vmatmul.msk.bf16.vlgmr.msrb.gmra.mxu3 %vm258_vm1, %v2659_v6 }
0x264f   :  { %2629 = vmatpush.bf16.xpose.msrb.mxu1 %v2620_v28 }
0x2655   :  { %v2613_v24 = vpop.permute.xlu1 %2612 }
0x2656   :  { %6384 = vmatmul.msk.bf16.vlgmr.msrb.gmra.mxu1 %vm258_vm1, %v2613_v24 }
0x265d   :  { %v2592_v32 = vpop.permute.xlu1 %2591 }
0x265e   :  { %v2597_v36 = vsel %vm258_vm1, %v2592_v32, 0 }
0x265f   :  { %2606 = vmatpush.bf16.xpose.msrb.mxu0 %v2597_v36 }
0x2666   :  { %6383 = vmatmul.msk.bf16.vlgmr.msrb.gmra.mxu0 %vm258_vm1, %v2587_v3 }
0x26c9   :  { %v2654_v37 = vpop.f32.mrf.mxu2 }
0x26ca   :  { %v2683_v41 = vmul.f32 0.35355338, %v2654_v37 }
0x26cc   :  { %v2691_v38 = vsel %vm258_vm1, %v2683_v41, -inf }
0x26cd   :  { %2692 = vmax.xlane.f32.xlu0 %v2691_v38 }
0x26d1   :  { %v2656_v29 = vpop.f32.mrf.mxu2  ;;  %v2677_v7 = vpop.f32.mrf.mxu3 }
0x26d2   :  { %v2684_v39 = vmul.f32 0.35355338, %v2677_v7 }
0x26d3   :  { %v2631_v35 = vpop.f32.mrf.mxu1 }
0x26d4   :  { %v2682_v40 = vmul.f32 0.35355338, %v2631_v35  ;;  %v2694_v5 = vsel %vm258_vm1, %v2684_v39, -inf }
0x26d5   :  { %2695 = vmax.xlane.f32.xlu2 %v2694_v5 }
0x26d6   :  { %v2688_v62 = vsel %vm258_vm1, %v2682_v40, -inf }
0x26d7   :  { %2689 = vmax.xlane.f32.xlu1 %v2688_v62 }
0x26d9   :  { %v2679_v48 = vpop.f32.mrf.mxu3 }
0x26db   :  { %v2633_v12 = vpop.f32.mrf.mxu1 }
0x26e3   :  { %v2608_v22 = vpop.f32.mrf.mxu0 }
0x26e4   :  { %v2681_v61 = vmul.f32 0.35355338, %v2608_v22 }
0x26e6   :  { %v2685_v49 = vsel %vm258_vm1, %v2681_v61, -inf }
0x26e7   :  { %2686 = vmax.xlane.f32.xlu0 %v2685_v49 }
0x26eb   :  { %v2610_v31 = vpop.f32.mrf.mxu0 }
0x2740   :  { %v2693_v57 = vpop.xlane.xlu0 %2692 }
0x2741   :  { %v2699_v3 = vsub.f32 %v2683_v41, %v2693_v57 }
0x2743   :  { %v2705_v13 = vmul.f32 1.442695, %v2699_v3 }
0x2745   :  { %6661 = vpow2.f32 %v2705_v13 }
0x2748   :  { %v2696_v63 = vpop.xlane.xlu2 %2695 }
0x2749   :  { %v2700_v17 = vsub.f32 %v2684_v39, %v2696_v63 }
0x274a   :  { %v2690_v27 = vpop.xlane.xlu1 %2689 }
0x274b   :  { %v6662_v53 = vpop.eup %6661  ;;  %v2707_v11 = vmul.f32 1.442695, %v2700_v17  ;;  %v2698_v10 = vsub.f32 %v2682_v40, %v2690_v27 }
0x274c   :  { %v2715_v6 = vsel %vm258_vm1, %v6662_v53, 0.0 }
0x274d   :  { %6663 = vpow2.f32 %v2707_v11  ;;  %v2703_v16 = vmul.f32 1.442695, %v2698_v10  ;;  %2716 = vadd.xlane.f32.xlu2 %v2715_v6 }
0x274f   :  { %6665 = vpow2.f32 %v2703_v16 }
0x2753   :  { %v8014_v28 = vpop.eup %6663 }
0x2754   :  { %v2718_v24 = vsel %vm258_vm1, %v8014_v28, 0.0 }
0x2755   :  { %v8018_v32 = vpop.eup %6665  ;;  %2719 = vadd.xlane.f32.xlu1 %v2718_v24 }
0x2756   :  { %v2712_v36 = vsel %vm258_vm1, %v8018_v32, 0.0 }
0x2757   :  { %2713 = vadd.xlane.f32.xlu0 %v2712_v36 }
0x275a   :  { %v2687_v37 = vpop.xlane.xlu0 %2686 }
0x275b   :  { %v2697_v41 = vsub.f32 %v2681_v61, %v2687_v37 }
0x275d   :  { %v2701_v38 = vmul.f32 1.442695, %v2697_v41 }
0x275f   :  { %6667 = vpow2.f32 %v2701_v38 }
0x2765   :  { %2827 = vrot.lane.b32.xlu2 %v7985_v19, %s7128_s1  ;;  %v8030_v29 = vpop.eup %6667 }
0x2766   :  { %v2709_v7 = vsel %vm258_vm1, %v8030_v29, 0.0 }
0x276b   :  { %2806 = vrot.lane.b32.xlu0 %v7985_v19, %s7130_s10 }
0x276e   :  { %2848 = vrot.lane.b32.xlu1 %v7985_v19, %s7129_s25 }
0x2773   :  { %2785 = vrot.lane.b32.xlu0 %v7985_v19, %s7112_s21 }
0x278e   :  { %2710 = vadd.xlane.f32.xlu2 %v2709_v7 }
0x27c0   :  { %v2717_v39 = vpop.xlane.xlu2 %2716 }
0x27c1   :  { %6669 = vrcp.f32 %v2717_v39  ;;  %v2760_v22 = vand.u32 2147483648, %v2717_v39  ;;  %v2758_v49 = vand.u32 2147483647, %v2717_v39  ;;  %vm2754_vm10 = vweird.f32 %v2717_v39 }
0x27c3   :  { %v2761_v3 = vor.u32 1.1754944e-38, %v2760_v22  ;;  %vm2759_vm12 = vcmp.eq.f32.partialorder %v2758_v49, 8.507059e+37 }
0x27c7   :  { %v6670_v35 = vpop.eup %6669 }
0x27c8   :  { %v2750_v40 = vmul.f32 %v6670_v35, %v2717_v39  ;;  %v2828_v5 = vpop.permute.xlu2 %2827  ;;  %v2720_v62 = vpop.xlane.xlu1 %2719  ;;  %vm2755_vm8 = vweird.f32 %v6670_v35 }
0x27c9   :  { %v2833_v48 = vsel %vm456_vm2, %v2828_v5, 0  ;;  %6671 = vrcp.f32 %v2720_v62  ;;  %vm2756_vm11 = vmor %vm2754_vm10, %vm2755_vm8  ;;  %v2774_v37 = vand.u32 2147483648, %v2720_v62  ;;  %vm2768_vm14 = vweird.f32 %v2720_v62 }
0x27ca   :  { %v2751_v19 = vsub.f32 1.0, %v2750_v40  ;;  %2842 = vmatpush.bf16.msra.mxu2 %v2833_v48  ;;  %v2714_v12 = vpop.xlane.xlu0 %2713 }
0x27cb   :  { %6673 = vrcp.f32 %v2714_v12  ;;  %v2746_v41 = vand.u32 2147483648, %v2714_v12  ;;  %v2744_v39 = vand.u32 2147483647, %v2714_v12  ;;  %vm2740_vm3 = vweird.f32 %v2714_v12 }
0x27cc   :  { %v2752_v61 = vmul.f32 %v6670_v35, %v2751_v19  ;;  %v2775_v48 = vor.u32 1.1754944e-38, %v2774_v37 }
0x27cd   :  { %v2747_v5 = vor.u32 1.1754944e-38, %v2746_v41  ;;  %vm2745_vm5 = vcmp.eq.f32.partialorder %v2744_v39, 8.507059e+37 }
0x27ce   :  { %2954 = vmatpush.bf16.xpose.msrb.mxu2 %v7330_v20  ;;  %v2753_v31 = vadd.f32 %v6670_v35, %v2752_v61 }
0x27cf   :  { %v6672_v57 = vpop.eup %6671 }
0x27d0   :  { %v2757_v13 = vsel %vm2756_vm11, %v6670_v35, %v2753_v31  ;;  %v2764_v63 = vmul.f32 %v6672_v57, %v2720_v62  ;;  %vm2769_vm13 = vweird.f32 %v6672_v57  ;;  %v2772_v35 = vand.u32 2147483647, %v2720_v62 }
0x27d1   :  { %v6674_v17 = vpop.eup %6673  ;;  %v2762_v27 = vsel %vm2759_vm12, %v2761_v3, %v2757_v13  ;;  %vm2770_vm15 = vmor %vm2768_vm14, %vm2769_vm13 }
0x27d2   :  { %v2779_v11 = vmul.f32 %v6662_v53, %v2762_v27  ;;  %v2765_v10 = vsub.f32 1.0, %v2764_v63  ;;  %v2736_v6 = vmul.f32 %v6674_v17, %v2714_v12  ;;  %vm2741_vm9 = vweird.f32 %v6674_v17 }
0x27d3   :  { %vm2742_vm4 = vmor %vm2740_vm3, %vm2741_vm9  ;;  %vm2773_vm8 = vcmp.eq.f32.partialorder %v2772_v35, 8.507059e+37 }
0x27d4   :  { %v2783_v16 = vpack.c.bf16 %v2779_v11, %v2779_v11  ;;  %v2766_v24 = vmul.f32 %v6672_v57, %v2765_v10  ;;  %v2737_v36 = vsub.f32 1.0, %v2736_v6 }
0x27d6   :  { %v2767_v38 = vadd.f32 %v6672_v57, %v2766_v24  ;;  %v2738_v7 = vmul.f32 %v6674_v17, %v2737_v36  ;;  %6389 = vmatmul.msk.bf16.vlgmr.msra.gmra.mxu2 %vm258_vm1, %v2783_v16 }
0x27d7   :  { %3131 = vmatpush.bf16.msra.mxu2 %v7447_v23 }
0x27d8   :  { %v2739_v53 = vadd.f32 %v6674_v17, %v2738_v7  ;;  %v2771_v40 = vsel %vm2770_vm15, %v6672_v57, %v2767_v38 }
0x27d9   :  { %v2776_v61 = vsel %vm2773_vm8, %v2775_v48, %v2771_v40 }
0x27da   :  { %v2743_v19 = vsel %vm2742_vm4, %v6674_v17, %v2739_v53  ;;  %v2780_v62 = vmul.f32 %v8014_v28, %v2776_v61 }
0x27db   :  { %v2748_v22 = vsel %vm2745_vm5, %v2747_v5, %v2743_v19 }
0x27dc   :  { %v2778_v49 = vmul.f32 %v8018_v32, %v2748_v22  ;;  %v2784_v63 = vpack.c.bf16 %v2780_v62, %v2780_v62 }
0x27dd   :  { %v2807_v31 = vpop.permute.xlu0 %2806 }
0x27de   :  { %v2812_v3 = vsel %vm456_vm2, %v2807_v31, 0  ;;  %v2782_v13 = vpack.c.bf16 %v2778_v49, %v2778_v49 }
0x27df   :  { %2821 = vmatpush.bf16.msra.mxu1 %v2812_v3 }
0x27e0   :  { %v2849_v12 = vpop.permute.xlu1 %2848 }
0x27e1   :  { %v2854_v57 = vsel %vm456_vm2, %v2849_v12, 0  ;;  %v8068_v12 = vld [vmem:[#allocation11] ss:$0 sm:$0xff] }
0x27e2   :  { %6388 = vmatmul.msk.bf16.vlgmr.msra.gmra.mxu1 %vm258_vm1, %v2782_v13  ;;  %2863 = vmatpush.bf16.msra.mxu3 %v2854_v57 }
0x27e3   :  { %2936 = vmatpush.bf16.msrb.mxu1 %v7808_v56  ;;  %v8054_v56 = vld [vmem:[%s8977_s4] sm:$0xff] }
0x27e5   :  { %v2786_v32 = vpop.permute.xlu0 %2785  ;;  %6390 = vmatmul.msk.bf16.vlgmr.msra.gmra.mxu3 %vm258_vm1, %v2784_v63 }
0x27e6   :  { %2975 = vmatpush.bf16.xpose.msrb.mxu3 %v7415_v25  ;;  %v2791_v28 = vsel %vm456_vm2, %v2786_v32, 0 }
0x27e7   :  { %2937 = vmatpush.bf16.msrb.mxu1 %v7817_v0  ;;  %2800 = vmatpush.bf16.msra.mxu0 %v2791_v28 }
0x27eb   :  { %3011 = vmatpush.bf16.xpose.msra.mxu1 %v7385_v54  ;;  %2894 = vmatpush.bf16.msrb.mxu0 %v7824_v59 }
0x27ee   :  { %3147 = vmatpush.bf16.msra.mxu3 %v7459_v58 }
0x27ef   :  { %2895 = vmatpush.bf16.msrb.mxu0 %v8054_v56 }
0x2801   :  { %v2711_v0 = vpop.xlane.xlu2 %2710 }
0x2802   :  { %6675 = vrcp.f32 %v2711_v0  ;;  %v2732_v10 = vand.u32 2147483648, %v2711_v0  ;;  %v2730_v16 = vand.u32 2147483647, %v2711_v0  ;;  %vm2726_vm11 = vweird.f32 %v2711_v0 }
0x2804   :  { %v2733_v59 = vor.u32 1.1754944e-38, %v2732_v10  ;;  %vm2731_vm13 = vcmp.eq.f32.partialorder %v2730_v16, 8.507059e+37 }
0x2808   :  { %v6676_v17 = vpop.eup %6675 }
0x2809   :  { %v2722_v27 = vmul.f32 %v6676_v17, %v2711_v0  ;;  %vm2727_vm10 = vweird.f32 %v6676_v17 }
0x280a   :  { %vm2728_vm12 = vmor %vm2726_vm11, %vm2727_vm10 }
0x280b   :  { %v2723_v11 = vsub.f32 1.0, %v2722_v27 }
0x280d   :  { %v2724_v6 = vmul.f32 %v6676_v17, %v2723_v11 }
0x280f   :  { %v2725_v24 = vadd.f32 %v6676_v17, %v2724_v6 }
0x2811   :  { %v2729_v36 = vsel %vm2728_vm12, %v6676_v17, %v2725_v24 }
0x2812   :  { %v2734_v37 = vsel %vm2731_vm13, %v2733_v59, %v2729_v36 }
0x2813   :  { %v2777_v41 = vmul.f32 %v8030_v29, %v2734_v37 }
0x2815   :  { %v2781_v38 = vpack.c.bf16 %v2777_v41, %v2777_v41 }
0x2817   :  { %6387 = vmatmul.msk.bf16.vlgmr.msra.gmra.mxu0 %vm258_vm1, %v2781_v38 }
0x2818   :  { %2993 = vmatpush.bf16.xpose.msra.mxu0 %v7360_v18 }
0x2859   :  { %v2844_v7 = vpop.f32.mrf.mxu2 }
0x285a   :  { %2874 = vrot.lane.b32.xlu0 %v2844_v7, %s7131_s28 }
0x285f   :  { %v2823_v39 = vpop.f32.mrf.mxu1 }
0x2860   :  { %2870 = vrot.lane.b32.xlu1 %v2823_v39, %s7120_s26 }
0x2861   :  { %v2846_v35 = vpop.f32.mrf.mxu2 }
0x2867   :  { %v2825_v53 = vpop.f32.mrf.mxu1 }
0x2868   :  { %v2865_v40 = vpop.f32.mrf.mxu3 }
0x2869   :  { %2878 = vrot.lane.b32.xlu1 %v2865_v40, %s7132_s29 }
0x2870   :  { %v2867_v5 = vpop.f32.mrf.mxu3 }
0x2894   :  { %v2802_v48 = vpop.f32.mrf.mxu0 }
0x289c   :  { %v2804_v19 = vpop.f32.mrf.mxu0 }
0x28cc   :  { %v2875_v61 = vpop.permute.xlu0 %2874 }
0x28d2   :  { %v2871_v29 = vpop.permute.xlu1 %2870 }
0x28d3   :  { %v2881_v22 = vsel %vm258_vm1, %v2802_v48, %v2871_v29 }
0x28d4   :  { %v2882_v49 = vsel %vm549_vm6, %v2881_v22, %v2875_v61 }
0x28db   :  { %v2879_v31 = vpop.permute.xlu1 %2878 }
0x28dc   :  { %v2883_v3 = vsel %vm551_vm7, %v2882_v49, %v2879_v31 }
0x28dd   :  { %v2884_v62 = vpack.c.bf16 %v2883_v3, %v2883_v3 }
0x28df   :  { %6391 = vmatmul.msk.bf16.vlgmr.msrb.gmra.mxu0 %vm195_vm0, %v2884_v62 }
0x28e0   :  { %3163 = vmatpush.bf16.msrb.mxu0 %v7444_v14 }
0x295c   :  { %v2897_v13 = vpop.f32.mrf.mxu0 }
0x295d   :  { %v2898_v57 = vadd.f32 %v8068_v12, %v2897_v13 }
0x295f   :  { %v2901_v63 = vadd.f32 %v2898_v57, %v7974_v15 }
0x2961   :  { %v2902_v32 = vsel %vm195_vm0, %v2901_v63, 0.0 }
0x2962   :  { %2903 = vadd.xlane.f32.xlu0 %v2902_v32 }
0x2964   :  { %v2899_v28 = vpop.f32.mrf.mxu0 }
0x29d5   :  { %v2904_v0 = vpop.xlane.xlu0 %2903 }
0x29d6   :  { %v2905_v17 = vmul.f32 %v2904_v0, %v7380_v47 }
0x29d8   :  { %v2906_v27 = vsub.f32 %v2901_v63, %v2905_v17 }
0x29da   :  { %v2907_v11 = vmul.f32 %v2906_v27, %v2906_v27 }
0x29dc   :  { %v2908_v10 = vsel %vm195_vm0, %v2907_v11, 0.0 }
0x29dd   :  { %2909 = vadd.xlane.f32.xlu1 %v2908_v10 }
0x2a50   :  { %v2910_v6 = vpop.xlane.xlu1 %2909 }
0x2a51   :  { %v2911_v16 = vmul.f32 %v2910_v6, %v7380_v47 }
0x2a53   :  { %v2912_v24 = vadd.f32 1e-05, %v2911_v16 }
0x2a55   :  { %6677 = vrsqrt.f32 %v2912_v24  ;;  %vm2919_vm14 = vweird.f32 %v2912_v24 }
0x2a5b   :  { %v6678_v59 = vpop.eup %6677 }
0x2a5c   :  { %v2914_v36 = vmul.f32 %v6678_v59, %v2912_v24  ;;  %vm2920_vm9 = vweird.f32 %v6678_v59 }
0x2a5d   :  { %vm2921_vm15 = vmor %vm2919_vm14, %vm2920_vm9 }
0x2a5e   :  { %v2915_v15 = vmul.f32 %v6678_v59, %v2914_v36 }
0x2a60   :  { %v2916_v37 = vmul.f32 0.5, %v2915_v15 }
0x2a62   :  { %v2917_v41 = vsub.f32 1.5, %v2916_v37 }
0x2a64   :  { %v2918_v38 = vmul.f32 %v6678_v59, %v2917_v41 }
0x2a66   :  { %v2922_v7 = vsel %vm2921_vm15, %v6678_v59, %v2918_v38 }
0x2a67   :  { %v2923_v39 = vmul.f32 %v2922_v7, %v2906_v27 }
0x2a69   :  { %v2924_v35 = vmul.f32 %v7845_v34, %v2923_v39 }
0x2a6b   :  { %v8078_v53 = vadd.f32 %v7848_v55, %v2924_v35 }
0x2a6d   :  { %v2926_v40 = vpack.c.bf16 %v8078_v53, %v8078_v53 }
0x2a6f   :  { %6392 = vmatmul.msk.bf16.vlgmr.msrb.gmra.mxu1 %vm195_vm0, %v2926_v40 }
0x2a70   :  { %3179 = vmatpush.bf16.msrb.mxu1 %v7452_v43 }
0x2aec   :  { %v2939_v5 = vpop.f32.mrf.mxu1 }
0x2aed   :  { %v2940_v48 = vadd.f32 %v7860_v44, %v2939_v5 }
0x2aef   :  { %v2943_v19 = vpack.c.bf16 %v2940_v48, %v2940_v48 }
0x2af1   :  { %v2961_v29 = vunpack.c.l.b16 %v2943_v19  ;;  %6393 = vmatmul.msk.bf16.vlgmr.msrb.gmra.mxu2 %vm258_vm1, %v2943_v19 }
0x2af2   :  { %3210 = vmatpush.bf16.msrb.mxu2 %v7864_v52  ;;  %v8100_v52 = vld [vmem:[%s8975_s2 + $0x8] sm:$0xff] }
0x2af3   :  { %v2962_v34 = vpack.c.b16 %v2961_v29, %v2961_v29 }
0x2af4   :  { %v2941_v22 = vpop.f32.mrf.mxu1 }
0x2af5   :  { %2999 = vrot.lane.b32.xlu1 %v2962_v34, %s7124_s17  ;;  %2981 = vrot.lane.b32.xlu0 %v2962_v34, %s7121_s30 }
0x2af6   :  { %2963 = vrot.lane.b32.xlu2 %v2962_v34, %s7126_s0  ;;  %3211 = vmatpush.bf16.msrb.mxu2 %v7869_v45  ;;  %v8107_v45 = vld [vmem:[%s8975_s2] sm:$0xff] }
0x2b50   :  { %v2964_v55 = vpop.permute.xlu2 %2963 }
0x2b51   :  { %6394 = vmatmul.msk.bf16.vlgmr.msrb.gmra.mxu3 %vm258_vm1, %v2964_v55 }
0x2b52   :  { %3252 = vmatpush.bf16.msrb.mxu3 %v7875_v8 }
0x2b56   :  { %3253 = vmatpush.bf16.msrb.mxu3 %v7884_v51 }
0x2b67   :  { %v3000_v44 = vpop.permute.xlu1 %2999  ;;  %v2982_v61 = vpop.permute.xlu0 %2981 }
0x2b68   :  { %6395 = vmatmul.msk.bf16.vlgmr.msra.gmra.mxu0 %vm258_vm1, %v2982_v61  ;;  %6396 = vmatmul.msk.bf16.vlgmr.msra.gmra.mxu1 %vm258_vm1, %v3000_v44 }
0x2b69   :  { %3268 = vmatpush.bf16.msra.mxu0 %v7881_v4  ;;  %3312 = vmatpush.bf16.msra.mxu1 %v8100_v52 }
0x2b6d   :  { %3269 = vmatpush.bf16.msra.mxu0 %v7890_v2  ;;  %3313 = vmatpush.bf16.msra.mxu1 %v8107_v45 }
0x2b71   :  { %3270 = vmatpush.bf16.msra.mxu0 %v7897_v42 }
0x2b74   :  { %v2956_v8 = vpop.f32.mrf.mxu2 }
0x2b75   :  { %3271 = vmatpush.bf16.msra.mxu0 %v7904_v21  ;;  %v3017_v3 = vmul.f32 0.35355338, %v2956_v8 }
0x2b77   :  { %v3021_v62 = vsel %vm549_vm6, %v3017_v3, -inf }
0x2b7c   :  { %v2958_v4 = vpop.f32.mrf.mxu2 }
0x2bd4   :  { %v2977_v51 = vpop.f32.mrf.mxu3 }
0x2bd5   :  { %v3018_v49 = vmul.f32 0.35355338, %v2977_v51 }
0x2bd7   :  { %v3024_v31 = vsel %vm549_vm6, %v3018_v49, -inf }
0x2bd8   :  { %3025 = vmax.xlane.f32.xlu2 %v3024_v31 }
0x2bdc   :  { %v2979_v2 = vpop.f32.mrf.mxu3 }
0x2be0   :  { %3022 = vmax.xlane.f32.xlu2 %v3021_v62 }
0x2be5   :  { %v2995_v13 = vpop.f32.mrf.mxu0  ;;  %v3013_v57 = vpop.f32.mrf.mxu1 }
0x2be6   :  { %v3019_v63 = vmul.f32 0.35355338, %v2995_v13  ;;  %v3020_v32 = vmul.f32 0.35355338, %v3013_v57 }
0x2be8   :  { %v3030_v42 = vsel %vm549_vm6, %v3020_v32, -inf  ;;  %v3027_v28 = vsel %vm549_vm6, %v3019_v63, -inf }
0x2be9   :  { %3031 = vmax.xlane.f32.xlu1 %v3030_v42  ;;  %3028 = vmax.xlane.f32.xlu0 %v3027_v28 }
0x2bed   :  { %v2997_v21 = vpop.f32.mrf.mxu0  ;;  %v3015_v0 = vpop.f32.mrf.mxu1 }
0x2c4b   :  { %v3026_v17 = vpop.xlane.xlu2 %3025 }
0x2c4c   :  { %v3034_v27 = vsub.f32 %v3018_v49, %v3026_v17 }
0x2c4e   :  { %v3039_v11 = vmul.f32 1.442695, %v3034_v27 }
0x2c50   :  { %6679 = vpow2.f32 %v3039_v11 }
0x2c53   :  { %v3023_v59 = vpop.xlane.xlu2 %3022 }
0x2c54   :  { %v3033_v38 = vsub.f32 %v3017_v3, %v3023_v59 }
0x2c56   :  { %v6680_v10 = vpop.eup %6679  ;;  %v3037_v7 = vmul.f32 1.442695, %v3033_v38 }
0x2c57   :  { %v3048_v6 = vsel %vm549_vm6, %v6680_v10, 0.0 }
0x2c58   :  { %3049 = vadd.xlane.f32.xlu2 %v3048_v6 }
0x2c5c   :  { %v3032_v16 = vpop.xlane.xlu1 %3031  ;;  %v3029_v24 = vpop.xlane.xlu0 %3028 }
0x2c5d   :  { %v3036_v36 = vsub.f32 %v3020_v32, %v3032_v16  ;;  %v3035_v15 = vsub.f32 %v3019_v63, %v3029_v24 }
0x2c5f   :  { %v3043_v37 = vmul.f32 1.442695, %v3036_v36  ;;  %v3041_v41 = vmul.f32 1.442695, %v3035_v15 }
0x2c61   :  { %6681 = vpow2.f32 %v3043_v37 }
0x2c62   :  { %6683 = vpow2.f32 %v3041_v41 }
0x2c63   :  { %6685 = vpow2.f32 %v3037_v7 }
0x2c67   :  { %v8117_v39 = vpop.eup %6681 }
0x2c68   :  { %v8119_v35 = vpop.eup %6683  ;;  %v3054_v40 = vsel %vm549_vm6, %v8117_v39, 0.0 }
0x2c69   :  { %v3051_v5 = vsel %vm549_vm6, %v8119_v35, 0.0  ;;  %3055 = vadd.xlane.f32.xlu2 %v3054_v40  ;;  %v8125_v48 = vpop.eup %6685 }
0x2c6a   :  { %3052 = vadd.xlane.f32.xlu0 %v3051_v5  ;;  %v3045_v19 = vsel %vm549_vm6, %v8125_v48, 0.0 }
0x2c72   :  { %3046 = vadd.xlane.f32.xlu0 %v3045_v19 }
0x2ccb   :  { %v3050_v29 = vpop.xlane.xlu2 %3049 }
0x2ccc   :  { %6687 = vrcp.f32 %v3050_v29  ;;  %v3082_v44 = vand.u32 2147483648, %v3050_v29  ;;  %v3080_v8 = vand.u32 2147483647, %v3050_v29  ;;  %vm3076_vm4 = vweird.f32 %v3050_v29 }
0x2cce   :  { %v3083_v51 = vor.u32 1.1754944e-38, %v3082_v44  ;;  %vm3081_vm8 = vcmp.eq.f32.partialorder %v3080_v8, 8.507059e+37 }
0x2cd2   :  { %v6688_v34 = vpop.eup %6687 }
0x2cd3   :  { %v3072_v22 = vmul.f32 %v6688_v34, %v3050_v29  ;;  %vm3077_vm3 = vweird.f32 %v6688_v34 }
0x2cd4   :  { %vm3078_vm5 = vmor %vm3076_vm4, %vm3077_vm3 }
0x2cd5   :  { %v3073_v55 = vsub.f32 1.0, %v3072_v22 }
0x2cd7   :  { %v3074_v61 = vmul.f32 %v6688_v34, %v3073_v55 }
0x2cd9   :  { %v3075_v4 = vadd.f32 %v6688_v34, %v3074_v61 }
0x2cdb   :  { %v3079_v49 = vsel %vm3078_vm5, %v6688_v34, %v3075_v4 }
0x2cdc   :  { %v3084_v31 = vsel %vm3081_vm8, %v3083_v51, %v3079_v49  ;;  %v3056_v3 = vpop.xlane.xlu2 %3055 }
0x2cdd   :  { %v3114_v2 = vmul.f32 %v6680_v10, %v3084_v31  ;;  %v3053_v62 = vpop.xlane.xlu0 %3052  ;;  %6689 = vrcp.f32 %v3056_v3  ;;  %v3110_v17 = vand.u32 2147483648, %v3056_v3  ;;  %v3108_v6 = vand.u32 2147483647, %v3056_v3 }
0x2cde   :  { %6691 = vrcp.f32 %v3053_v62  ;;  %v3096_v27 = vand.u32 2147483648, %v3053_v62  ;;  %v3094_v16 = vand.u32 2147483647, %v3053_v62  ;;  %vm3104_vm12 = vweird.f32 %v3056_v3 }
0x2cdf   :  { %v3118_v13 = vpack.c.bf16 %v3114_v2, %v3114_v2  ;;  %vm3090_vm13 = vweird.f32 %v3053_v62  ;;  %v3111_v36 = vor.u32 1.1754944e-38, %v3110_v17  ;;  %vm3109_vm15 = vcmp.eq.f32.partialorder %v3108_v6, 8.507059e+37 }
0x2ce0   :  { %v3097_v37 = vor.u32 1.1754944e-38, %v3096_v27  ;;  %vm3095_vm3 = vcmp.eq.f32.partialorder %v3094_v16, 8.507059e+37 }
0x2ce1   :  { %6398 = vmatmul.msk.bf16.vlgmr.msra.gmra.mxu3 %vm549_vm6, %v3118_v13 }
0x2ce3   :  { %v6690_v57 = vpop.eup %6689 }
0x2ce4   :  { %v6692_v63 = vpop.eup %6691  ;;  %v3100_v32 = vmul.f32 %v6690_v57, %v3056_v3  ;;  %vm3105_vm10 = vweird.f32 %v6690_v57 }
0x2ce5   :  { %v3086_v42 = vmul.f32 %v6692_v63, %v3053_v62  ;;  %v3047_v28 = vpop.xlane.xlu0 %3046  ;;  %vm3091_vm11 = vweird.f32 %v6692_v63  ;;  %vm3106_vm9 = vmor %vm3104_vm12, %vm3105_vm10 }
0x2ce6   :  { %v3101_v21 = vsub.f32 1.0, %v3100_v32  ;;  %6693 = vrcp.f32 %v3047_v28  ;;  %vm3092_vm14 = vmor %vm3090_vm13, %vm3091_vm11  ;;  %v3068_v55 = vand.u32 2147483648, %v3047_v28  ;;  %v3066_v8 = vand.u32 2147483647, %v3047_v28 }
0x2ce7   :  { %v3087_v0 = vsub.f32 1.0, %v3086_v42  ;;  %vm3062_vm5 = vweird.f32 %v3047_v28 }
0x2ce8   :  { %v3102_v11 = vmul.f32 %v6690_v57, %v3101_v21  ;;  %v3069_v51 = vor.u32 1.1754944e-38, %v3068_v55  ;;  %vm3067_vm10 = vcmp.eq.f32.partialorder %v3066_v8, 8.507059e+37 }
0x2ce9   :  { %v3088_v10 = vmul.f32 %v6692_v63, %v3087_v0 }
0x2cea   :  { %v3103_v24 = vadd.f32 %v6690_v57, %v3102_v11 }
0x2ceb   :  { %v3089_v59 = vadd.f32 %v6692_v63, %v3088_v10 }
0x2cec   :  { %v6694_v15 = vpop.eup %6693  ;;  %v3107_v41 = vsel %vm3106_vm9, %v6690_v57, %v3103_v24  ;;  %vm8997_vm9 = vcmask 523264  }
0x2ced   :  { %v3093_v38 = vsel %vm3092_vm14, %v6692_v63, %v3089_v59  ;;  %v3112_v7 = vsel %vm3109_vm15, %v3111_v36, %v3107_v41  ;;  %v3058_v40 = vmul.f32 %v6694_v15, %v3047_v28  ;;  %vm3063_vm4 = vweird.f32 %v6694_v15 }
0x2cee   :  { %v3098_v5 = vsel %vm3095_vm3, %v3097_v37, %v3093_v38  ;;  %v3116_v19 = vmul.f32 %v8117_v39, %v3112_v7  ;;  %vm3064_vm8 = vmor %vm3062_vm5, %vm3063_vm4 }
0x2cef   :  { %v3115_v29 = vmul.f32 %v8119_v35, %v3098_v5  ;;  %v3059_v34 = vsub.f32 1.0, %v3058_v40 }
0x2cf0   :  { %v3120_v22 = vpack.c.bf16 %v3116_v19, %v3116_v19 }
0x2cf1   :  { %v3119_v44 = vpack.c.bf16 %v3115_v29, %v3115_v29  ;;  %v3060_v61 = vmul.f32 %v6694_v15, %v3059_v34 }
0x2cf2   :  { %6400 = vmatmul.msk.bf16.vlgmr.msrb.gmra.mxu1 %vm549_vm6, %v3120_v22 }
0x2cf3   :  { %v3061_v4 = vadd.f32 %v6694_v15, %v3060_v61  ;;  %6399 = vmatmul.msk.bf16.vlgmr.msrb.gmra.mxu0 %vm549_vm6, %v3119_v44 }
0x2cf5   :  { %v3065_v49 = vsel %vm3064_vm8, %v6694_v15, %v3061_v4 }
0x2cf6   :  { %v3070_v39 = vsel %vm3067_vm10, %v3069_v51, %v3065_v49 }
0x2cf7   :  { %v3113_v35 = vmul.f32 %v8125_v48, %v3070_v39 }
0x2cf9   :  { %v3117_v31 = vpack.c.bf16 %v3113_v35, %v3113_v35 }
0x2cfb   :  { %6397 = vmatmul.msk.bf16.vlgmr.msra.gmra.mxu2 %vm549_vm6, %v3117_v31 }
0x2d64   :  { %v3149_v3 = vpop.f32.mrf.mxu3 }
0x2d65   :  { %3186 = vrot.lane.b32.xlu1 %v3149_v3, %s7120_s26 }
0x2d6c   :  { %v3151_v2 = vpop.f32.mrf.mxu3 }
0x2d6f   :  { %v3181_v62 = vpop.f32.mrf.mxu1 }
0x2d70   :  { %v3165_v13 = vpop.f32.mrf.mxu0  ;;  %3194 = vrot.lane.b32.xlu0 %v3181_v62, %s7132_s29 }
0x2d71   :  { %3190 = vrot.lane.b32.xlu2 %v3165_v13, %s7131_s28 }
0x2d77   :  { %v3183_v57 = vpop.f32.mrf.mxu1 }
0x2d78   :  { %v3167_v63 = vpop.f32.mrf.mxu0 }
0x2d7e   :  { %v3133_v32 = vpop.f32.mrf.mxu2 }
0x2d86   :  { %v3135_v42 = vpop.f32.mrf.mxu2 }
0x2dcb   :  { %v3191_v21 = vpop.permute.xlu2 %3190 }
0x2dd7   :  { %v3187_v28 = vpop.permute.xlu1 %3186 }
0x2dd8   :  { %v3197_v48 = vsel %vm258_vm1, %v3133_v32, %v3187_v28 }
0x2dd9   :  { %v3198_v17 = vsel %vm549_vm6, %v3197_v48, %v3191_v21 }
0x2de2   :  { %v3195_v0 = vpop.permute.xlu0 %3194 }
0x2de3   :  { %v3199_v27 = vsel %vm551_vm7, %v3198_v17, %v3195_v0 }
0x2de4   :  { %v3200_v11 = vpack.c.bf16 %v3199_v27, %v3199_v27 }
0x2de6   :  { %6401 = vmatmul.msk.bf16.vlgmr.msrb.gmra.mxu2 %vm195_vm0, %v3200_v11 }
0x2e69   :  { %v3213_v6 = vpop.f32.mrf.mxu2 }
0x2e6a   :  { %v3214_v10 = vadd.f32 %v7939_v26, %v3213_v6 }
0x2e6c   :  { %v3217_v16 = vadd.f32 %v3214_v10, %v8078_v53 }
0x2e6e   :  { %v3218_v24 = vsel %vm195_vm0, %v3217_v16, 0.0 }
0x2e6f   :  { %3219 = vadd.xlane.f32.xlu2 %v3218_v24 }
0x2e71   :  { %v3215_v59 = vpop.f32.mrf.mxu2 }
0x2ee2   :  { %v3220_v36 = vpop.xlane.xlu2 %3219 }
0x2ee3   :  { %v3221_v15 = vmul.f32 %v3220_v36, %v7380_v47 }
0x2ee5   :  { %v3222_v37 = vsub.f32 %v3217_v16, %v3221_v15 }
0x2ee7   :  { %v3223_v41 = vmul.f32 %v3222_v37, %v3222_v37 }
0x2ee9   :  { %v3224_v38 = vsel %vm195_vm0, %v3223_v41, 0.0 }
0x2eea   :  { %3225 = vadd.xlane.f32.xlu1 %v3224_v38 }
0x2f5d   :  { %v3226_v7 = vpop.xlane.xlu1 %3225 }
0x2f5e   :  { %v3227_v40 = vmul.f32 %v3226_v7, %v7380_v47 }
0x2f60   :  { %v3228_v5 = vadd.f32 1e-05, %v3227_v40 }
0x2f62   :  { %6695 = vrsqrt.f32 %v3228_v5  ;;  %vm3235_vm12 = vweird.f32 %v3228_v5 }
0x2f68   :  { %v6696_v26 = vpop.eup %6695 }
0x2f69   :  { %v3230_v19 = vmul.f32 %v6696_v26, %v3228_v5  ;;  %vm3236_vm11 = vweird.f32 %v6696_v26 }
0x2f6a   :  { %vm3237_vm13 = vmor %vm3235_vm12, %vm3236_vm11 }
0x2f6b   :  { %v3231_v53 = vmul.f32 %v6696_v26, %v3230_v19 }
0x2f6d   :  { %v3232_v29 = vmul.f32 0.5, %v3231_v53 }
0x2f6f   :  { %v3233_v34 = vsub.f32 1.5, %v3232_v29 }
0x2f71   :  { %v3234_v22 = vmul.f32 %v6696_v26, %v3233_v34 }
0x2f73   :  { %v3238_v55 = vsel %vm3237_vm13, %v6696_v26, %v3234_v22 }
0x2f74   :  { %v3239_v44 = vmul.f32 %v3238_v55, %v3222_v37 }
0x2f76   :  { %v3240_v61 = vmul.f32 %v7947_v1, %v3239_v44 }
0x2f78   :  { %v3241_v8 = vadd.f32 %v7950_v60, %v3240_v61 }
0x2f7a   :  { %v3242_v4 = vpack.c.bf16 %v3241_v8, %v3241_v8 }
0x2f7c   :  { %6402 = vmatmul.msk.bf16.vlgmr.msrb.gmra.mxu3 %vm195_vm0, %v3242_v4 }
0x2fff   :  { %v3255_v51 = vpop.f32.mrf.mxu3 }
0x3000   :  { %v3256_v49 = vadd.f32 %v7957_v9, %v3255_v51 }
0x3002   :  { %v3259_v39 = vmax.f32 %v3256_v49, 0.0 }
0x3004   :  { %v3260_v35 = vpack.c.bf16 %v3259_v39, %v3259_v39 }
0x3006   :  { %6403 = vmatmul.msk.bf16.vlgmr.msra.gmra.mxu0 %vm8997_vm9, %v3260_v35 }
0x3007   :  { %v3257_v31 = vpop.f32.mrf.mxu3 }
0x3083   :  { %v3273_v3 = vpop.f32.mrf.mxu0 }
0x3084   :  { %v3274_v2 = vadd.f32 %v7961_v33, %v3273_v3 }
0x3086   :  { %v3277_v62 = vadd.f32 %v3274_v2, %v3241_v8 }
0x3088   :  { %v3278_v13 = vsel %vm195_vm0, %v3277_v62, 0.0 }
0x3089   :  { %3279 = vadd.xlane.f32.xlu0 %v3278_v13 }
0x308b   :  { %v3275_v1 = vpop.f32.mrf.mxu0 }
0x30fc   :  { %v3280_v60 = vpop.xlane.xlu0 %3279 }
0x30fd   :  { %v3281_v57 = vmul.f32 %v3280_v60, %v7380_v47 }
0x30ff   :  { %v3282_v63 = vsub.f32 %v3277_v62, %v3281_v57 }
0x3101   :  { %v3283_v32 = vmul.f32 %v3282_v63, %v3282_v63 }
0x3103   :  { %v3284_v9 = vsel %vm195_vm0, %v3283_v32, 0.0 }
0x3104   :  { %3285 = vadd.xlane.f32.xlu2 %v3284_v9 }
0x3177   :  { %v3286_v42 = vpop.xlane.xlu2 %3285 }
0x3178   :  { %v3287_v28 = vmul.f32 %v3286_v42, %v7380_v47 }
0x317a   :  { %v3288_v48 = vadd.f32 1e-05, %v3287_v28 }
0x317c   :  { %6697 = vrsqrt.f32 %v3288_v48  ;;  %vm3295_vm15 = vweird.f32 %v3288_v48 }
0x3182   :  { %v6698_v21 = vpop.eup %6697 }
0x3183   :  { %v3290_v33 = vmul.f32 %v6698_v21, %v3288_v48  ;;  %vm3296_vm14 = vweird.f32 %v6698_v21 }
0x3184   :  { %vm3297_vm3 = vmor %vm3295_vm15, %vm3296_vm14 }
0x3185   :  { %v3291_v0 = vmul.f32 %v6698_v21, %v3290_v33 }
0x3187   :  { %v3292_v17 = vmul.f32 0.5, %v3291_v0 }
0x3189   :  { %v3293_v27 = vsub.f32 1.5, %v3292_v17 }
0x318b   :  { %v3294_v11 = vmul.f32 %v6698_v21, %v3293_v27 }
0x318d   :  { %v3298_v6 = vsel %vm3297_vm3, %v6698_v21, %v3294_v11 }
0x318e   :  { %v3299_v10 = vmul.f32 %v3298_v6, %v3282_v63 }
0x3190   :  { %v3300_v16 = vmul.f32 %v7968_v30, %v3299_v10 }
0x3192   :  { %v8161_v24 = vadd.f32 %v7971_v46, %v3300_v16 }
0x3194   :  { %v3302_v59 = vpack.c.bf16 %v8161_v24, %v8161_v24 }
0x3196   :  { %6404 = vmatmul.msk.bf16.vlgmr.msra.gmra.mxu1 %vm195_vm0, %v3302_v59 }
0x3213   :  { %v3315_v36 = vpop.f32.mrf.mxu1 }
0x3214   :  { %v3316_v15 = vadd.f32 %v7982_v50, %v3315_v36 }
0x3216   :  { %v3319_v37 = vpack.c.bf16 %v3316_v15, %v3316_v15 }
0x3218   :  { %v3321_v41 = vunpack.c.l.b16 %v3319_v37 }
0x321a   :  { %v8167_v38 = vpack.c.b16 %v3321_v41, %v3321_v41 }
0x321b   :  { %v3317_v7 = vpop.f32.mrf.mxu1 }
0x321c   :  { %3369 = vrot.lane.b32.xlu2 %v8167_v38, %s7122_s15  ;;  %3344 = vrot.lane.b32.xlu0 %v8167_v38, %s7126_s0 }
0x321d   :  { %3346 = vrot.lane.b32.xlu1 %v8167_v38, %s7123_s16 }
0x3224   :  { %3390 = vrot.lane.b32.xlu2 %v8167_v38, %s7124_s17  ;;  %3392 = vrot.lane.b32.xlu0 %v8167_v38, %s7125_s18 }
0x3225   :  { %3367 = vrot.lane.b32.xlu1 %v8167_v38, %s7121_s30 }
0x322c   :  { %3323 = vrot.lane.b32.xlu0 %v8167_v38, %s7127_s19 }
0x3276   :  { %v3370_v30 = vpop.permute.xlu2 %3369 }
0x3277   :  { %v3375_v46 = vsel %vm258_vm1, %v3370_v30, 0 }
0x3278   :  { %3384 = vmatpush.bf16.xpose.msrb.mxu0 %v3375_v46 }
0x327e   :  { %v3391_v34 = vpop.permute.xlu2 %3390 }
0x328e   :  { %v3345_v50 = vpop.permute.xlu0 %3344 }
0x328f   :  { %v3347_v40 = vpop.permute.xlu1 %3346 }
0x3290   :  { %v3352_v5 = vsel %vm258_vm1, %v3347_v40, 0 }
0x3291   :  { %3361 = vmatpush.bf16.xpose.msra.mxu3 %v3352_v5 }
0x3296   :  { %v3393_v26 = vpop.permute.xlu0 %3392 }
0x3297   :  { %v3398_v19 = vsel %vm258_vm1, %v3393_v26, 0  ;;  %v3368_v53 = vpop.permute.xlu1 %3367 }
0x3298   :  { %6406 = vmatmul.msk.bf16.vlgmr.msra.gmra.mxu3 %vm258_vm1, %v3345_v50  ;;  %6407 = vmatmul.msk.bf16.vlgmr.msrb.gmra.mxu0 %vm258_vm1, %v3368_v53 }
0x3299   :  { %3407 = vmatpush.bf16.xpose.msrb.mxu1 %v3398_v19 }
0x329e   :  { %v3324_v29 = vpop.permute.xlu0 %3323 }
0x329f   :  { %v3329_v22 = vsel %vm258_vm1, %v3324_v29, 0 }
0x32a0   :  { %6408 = vmatmul.msk.bf16.vlgmr.msrb.gmra.mxu1 %vm258_vm1, %v3391_v34  ;;  %3338 = vmatpush.bf16.xpose.msra.mxu2 %v3329_v22 }
0x32a7   :  { %6405 = vmatmul.msk.bf16.vlgmr.msra.gmra.mxu2 %vm258_vm1, %v3319_v37 }
0x3315   :  { %v3386_v55 = vpop.f32.mrf.mxu0 }
0x3316   :  { %v3415_v44 = vmul.f32 0.35355338, %v3386_v55 }
0x3318   :  { %v3423_v61 = vsel %vm258_vm1, %v3415_v44, -inf }
0x3319   :  { %3424 = vmax.xlane.f32.xlu2 %v3423_v61 }
0x331b   :  { %v3363_v8 = vpop.f32.mrf.mxu3 }
0x331c   :  { %v3414_v4 = vmul.f32 0.35355338, %v3363_v8 }
0x331d   :  { %v3388_v51 = vpop.f32.mrf.mxu0  ;;  %v3409_v49 = vpop.f32.mrf.mxu1 }
0x331e   :  { %v3416_v39 = vmul.f32 0.35355338, %v3409_v49  ;;  %v3420_v35 = vsel %vm258_vm1, %v3414_v4, -inf }
0x331f   :  { %3421 = vmax.xlane.f32.xlu1 %v3420_v35  ;;  %v6882_v35 = vld [vmem:[#allocation5 + $0x8] sm:$0xff] }
0x3320   :  { %v3426_v31 = vsel %vm258_vm1, %v3416_v39, -inf }
0x3321   :  { %3427 = vmax.xlane.f32.xlu0 %v3426_v31 }
0x3323   :  { %v3365_v3 = vpop.f32.mrf.mxu3 }
0x3325   :  { %v3411_v2 = vpop.f32.mrf.mxu1 }
0x332a   :  { %v3340_v62 = vpop.f32.mrf.mxu2 }
0x332b   :  { %v3413_v13 = vmul.f32 0.35355338, %v3340_v62 }
0x332d   :  { %v3417_v1 = vsel %vm258_vm1, %v3413_v13, -inf }
0x332e   :  { %3418 = vmax.xlane.f32.xlu1 %v3417_v1 }
0x3332   :  { %v3342_v60 = vpop.f32.mrf.mxu2 }
0x338c   :  { %v3425_v57 = vpop.xlane.xlu2 %3424 }
0x338d   :  { %v3431_v63 = vsub.f32 %v3415_v44, %v3425_v57 }
0x338f   :  { %v3437_v32 = vmul.f32 1.442695, %v3431_v63  ;;  %v8218_v63 = vld [vmem:[#allocation5] sm:$0xff] }
0x3391   :  { %6699 = vpow2.f32 %v3437_v32 }
0x3392   :  { %v3422_v9 = vpop.xlane.xlu1 %3421 }
0x3393   :  { %v3430_v42 = vsub.f32 %v3414_v4, %v3422_v9 }
0x3394   :  { %v3428_v28 = vpop.xlane.xlu0 %3427 }
0x3395   :  { %v3435_v48 = vmul.f32 1.442695, %v3430_v42  ;;  %v3432_v21 = vsub.f32 %v3416_v39, %v3428_v28 }
0x3397   :  { %v6700_v33 = vpop.eup %6699  ;;  %6701 = vpow2.f32 %v3435_v48  ;;  %v3439_v0 = vmul.f32 1.442695, %v3432_v21 }
0x3398   :  { %v3447_v17 = vsel %vm258_vm1, %v6700_v33, 0.0 }
0x3399   :  { %6703 = vpow2.f32 %v3439_v0  ;;  %3448 = vadd.xlane.f32.xlu0 %v3447_v17 }
0x339d   :  { %v8196_v27 = vpop.eup %6701 }
0x339e   :  { %v3444_v11 = vsel %vm258_vm1, %v8196_v27, 0.0 }
0x339f   :  { %v8200_v6 = vpop.eup %6703  ;;  %3445 = vadd.xlane.f32.xlu2 %v3444_v11 }
0x33a0   :  { %v3450_v10 = vsel %vm258_vm1, %v8200_v6, 0.0 }
0x33a1   :  { %3451 = vadd.xlane.f32.xlu1 %v3450_v10  ;;  %v3419_v16 = vpop.xlane.xlu1 %3418  ;;  %v8230_v10 = vld [vmem:[%s8977_s4 + $0x8] sm:$0xff] }
0x33a2   :  { %v3429_v59 = vsub.f32 %v3413_v13, %v3419_v16 }
0x33a4   :  { %v3433_v36 = vmul.f32 1.442695, %v3429_v59 }
0x33a6   :  { %6705 = vpow2.f32 %v3433_v36 }
0x33ac   :  { %v8212_v15 = vpop.eup %6705 }
0x33ad   :  { %3559 = vrot.lane.b32.xlu0 %v8167_v38, %s7128_s1  ;;  %v3441_v37 = vsel %vm258_vm1, %v8212_v15, 0.0 }
0x33b7   :  { %3538 = vrot.lane.b32.xlu2 %v8167_v38, %s7130_s10 }
0x33ba   :  { %3580 = vrot.lane.b32.xlu1 %v8167_v38, %s7129_s25 }
0x33bf   :  { %3517 = vrot.lane.b32.xlu2 %v8167_v38, %s7112_s21 }
0x33d7   :  { %3442 = vadd.xlane.f32.xlu0 %v3441_v37 }
0x340c   :  { %v3449_v41 = vpop.xlane.xlu0 %3448 }
0x340d   :  { %6707 = vrcp.f32 %v3449_v41  ;;  %v3492_v38 = vand.u32 2147483648, %v3449_v41  ;;  %v3490_v26 = vand.u32 2147483647, %v3449_v41  ;;  %vm3486_vm5 = vweird.f32 %v3449_v41 }
0x340f   :  { %v3493_v55 = vor.u32 1.1754944e-38, %v3492_v38  ;;  %vm3491_vm10 = vcmp.eq.f32.partialorder %v3490_v26, 8.507059e+37 }
0x3412   :  { %v3446_v7 = vpop.xlane.xlu2 %3445 }
0x3413   :  { %v6708_v30 = vpop.eup %6707  ;;  %6709 = vrcp.f32 %v3446_v7  ;;  %v3476_v49 = vand.u32 2147483647, %v3446_v7  ;;  %v3478_v39 = vand.u32 2147483648, %v3446_v7  ;;  %vm3472_vm12 = vweird.f32 %v3446_v7 }
0x3414   :  { %v3482_v46 = vmul.f32 %v6708_v30, %v3449_v41  ;;  %v3452_v50 = vpop.xlane.xlu1 %3451  ;;  %vm3487_vm4 = vweird.f32 %v6708_v30 }
0x3415   :  { %6711 = vrcp.f32 %v3452_v50  ;;  %vm3488_vm8 = vmor %vm3486_vm5, %vm3487_vm4  ;;  %vm3477_vm9 = vcmp.eq.f32.partialorder %v3476_v49, 8.507059e+37  ;;  %v3479_v57 = vor.u32 1.1754944e-38, %v3478_v39  ;;  %v3506_v28 = vand.u32 2147483648, %v3452_v50 }
0x3416   :  { %v3483_v40 = vsub.f32 1.0, %v3482_v46  ;;  %vm3500_vm15 = vweird.f32 %v3452_v50 }
0x3417   :  { %v3507_v59 = vor.u32 1.1754944e-38, %v3506_v28 }
0x3418   :  { %v3484_v5 = vmul.f32 %v6708_v30, %v3483_v40 }
0x3419   :  { %v6710_v19 = vpop.eup %6709 }
0x341a   :  { %v3485_v53 = vadd.f32 %v6708_v30, %v3484_v5  ;;  %v3468_v29 = vmul.f32 %v6710_v19, %v3446_v7  ;;  %v3539_v34 = vpop.permute.xlu2 %3538  ;;  %vm3473_vm11 = vweird.f32 %v6710_v19 }
0x341b   :  { %v6712_v22 = vpop.eup %6711  ;;  %v3544_v44 = vsel %vm456_vm2, %v3539_v34, 0  ;;  %vm3474_vm13 = vmor %vm3472_vm12, %vm3473_vm11 }
0x341c   :  { %v3489_v61 = vsel %vm3488_vm8, %v6708_v30, %v3485_v53  ;;  %v3469_v8 = vsub.f32 1.0, %v3468_v29  ;;  %v3496_v4 = vmul.f32 %v6712_v22, %v3452_v50  ;;  %3553 = vmatpush.bf16.msrb.mxu3 %v3544_v44  ;;  %vm3501_vm14 = vweird.f32 %v6712_v22 }
0x341d   :  { %v3494_v51 = vsel %vm3491_vm10, %v3493_v55, %v3489_v61  ;;  %vm3502_vm3 = vmor %vm3500_vm15, %vm3501_vm14 }
0x341e   :  { %v3511_v31 = vmul.f32 %v6700_v33, %v3494_v51  ;;  %v3470_v3 = vmul.f32 %v6710_v19, %v3469_v8  ;;  %v3497_v2 = vsub.f32 1.0, %v3496_v4  ;;  %v3504_v33 = vand.u32 2147483647, %v3452_v50 }
0x341f   :  { %v3560_v62 = vpop.permute.xlu0 %3559 }
0x3420   :  { %3668 = vmatpush.bf16.msra.mxu3 %v6882_v35  ;;  %v3471_v13 = vadd.f32 %v6710_v19, %v3470_v3  ;;  %v3498_v1 = vmul.f32 %v6712_v22, %v3497_v2  ;;  %v3565_v60 = vsel %vm456_vm2, %v3560_v62, 0  ;;  %v3515_v32 = vpack.c.bf16 %v3511_v31, %v3511_v31 }
0x3421   :  { %3574 = vmatpush.bf16.msra.mxu0 %v3565_v60  ;;  %vm3505_vm4 = vcmp.eq.f32.partialorder %v3504_v33, 8.507059e+37 }
0x3422   :  { %v3475_v9 = vsel %vm3474_vm13, %v6710_v19, %v3471_v13  ;;  %v3499_v42 = vadd.f32 %v6712_v22, %v3498_v1  ;;  %v3518_v48 = vpop.permute.xlu2 %3517 }
0x3423   :  { %v3480_v21 = vsel %vm3477_vm9, %v3479_v57, %v3475_v9  ;;  %v3523_v0 = vsel %vm456_vm2, %v3518_v48, 0 }
0x3424   :  { %3669 = vmatpush.bf16.msra.mxu3 %v8218_v63  ;;  %v3510_v17 = vmul.f32 %v8196_v27, %v3480_v21  ;;  %3532 = vmatpush.bf16.msrb.mxu2 %v3523_v0  ;;  %v3503_v11 = vsel %vm3502_vm3, %v6712_v22, %v3499_v42 }
0x3425   :  { %3686 = vmatpush.bf16.xpose.msrb.mxu0 %v7330_v20  ;;  %v3508_v36 = vsel %vm3505_vm4, %v3507_v59, %v3503_v11 }
0x3426   :  { %6411 = vmatmul.msk.bf16.vlgmr.msra.gmra.mxu0 %vm258_vm1, %v3515_v32  ;;  %v3514_v16 = vpack.c.bf16 %v3510_v17, %v3510_v17  ;;  %v3512_v27 = vmul.f32 %v8200_v6, %v3508_v36 }
0x3428   :  { %3626 = vmatpush.bf16.msra.mxu2 %v8230_v10  ;;  %6410 = vmatmul.msk.bf16.vlgmr.msrb.gmra.mxu3 %vm258_vm1, %v3514_v16  ;;  %v3516_v7 = vpack.c.bf16 %v3512_v27, %v3512_v27 }
0x3429   :  { %3743 = vmatpush.bf16.xpose.msrb.mxu3 %v7385_v54 }
0x342c   :  { %3627 = vmatpush.bf16.msra.mxu2 %v8054_v56  ;;  %v3581_v37 = vpop.permute.xlu1 %3580 }
0x342d   :  { %3863 = vmatpush.bf16.msra.mxu0 %v7447_v23  ;;  %v3586_v41 = vsel %vm456_vm2, %v3581_v37, 0 }
0x342e   :  { %3595 = vmatpush.bf16.msra.mxu1 %v3586_v41  ;;  %v8258_v41 = vld [vmem:[#allocation11 + $0x3] ss:$0 sm:$0xff] }
0x3431   :  { %6412 = vmatmul.msk.bf16.vlgmr.msra.gmra.mxu1 %vm258_vm1, %v3516_v7 }
0x3432   :  { %3707 = vmatpush.bf16.xpose.msrb.mxu1 %v7415_v25 }
0x343a   :  { %3879 = vmatpush.bf16.msra.mxu1 %v7459_v58 }
0x344a   :  { %v3443_v30 = vpop.xlane.xlu0 %3442 }
0x344b   :  { %6713 = vrcp.f32 %v3443_v30  ;;  %v3464_v38 = vand.u32 2147483648, %v3443_v30  ;;  %v3462_v6 = vand.u32 2147483647, %v3443_v30  ;;  %vm3458_vm8 = vweird.f32 %v3443_v30 }
0x344d   :  { %v3465_v26 = vor.u32 1.1754944e-38, %v3464_v38  ;;  %vm3463_vm11 = vcmp.eq.f32.partialorder %v3462_v6, 8.507059e+37  ;;  %v8273_v38 = vld [vmem:[%s8979_s6] ss:$0 sm:$0xff] }
0x3451   :  { %v6714_v46 = vpop.eup %6713 }
0x3452   :  { %v3454_v50 = vmul.f32 %v6714_v46, %v3443_v30  ;;  %vm3459_vm5 = vweird.f32 %v6714_v46  ;;  %v8261_v30 = vld [vmem:[#allocation11 + $0x4] ss:$0 sm:$0xff] }
0x3453   :  { %vm3460_vm10 = vmor %vm3458_vm8, %vm3459_vm5 }
0x3454   :  { %v3455_v40 = vsub.f32 1.0, %v3454_v50 }
0x3456   :  { %v3456_v56 = vmul.f32 %v6714_v46, %v3455_v40 }
0x3458   :  { %v3457_v5 = vadd.f32 %v6714_v46, %v3456_v56 }
0x345a   :  { %v3461_v19 = vsel %vm3460_vm10, %v6714_v46, %v3457_v5 }
0x345b   :  { %v3466_v53 = vsel %vm3463_vm11, %v3465_v26, %v3461_v19  ;;  %v8277_v26 = vld [vmem:[#allocation8 + $0x8] sm:$0xff] }
0x345c   :  { %v3509_v29 = vmul.f32 %v8212_v15, %v3466_v53 }
0x345e   :  { %v3513_v34 = vpack.c.bf16 %v3509_v29, %v3509_v29  ;;  %v8282_v29 = vld [vmem:[#allocation8] sm:$0xff] }
0x3460   :  { %6409 = vmatmul.msk.bf16.vlgmr.msrb.gmra.mxu2 %vm258_vm1, %v3513_v34 }
0x3461   :  { %3725 = vmatpush.bf16.xpose.msrb.mxu2 %v7360_v18 }
0x34a3   :  { %v3576_v22 = vpop.f32.mrf.mxu0 }
0x34a4   :  { %3606 = vrot.lane.b32.xlu2 %v3576_v22, %s7131_s28 }
0x34ab   :  { %v3578_v55 = vpop.f32.mrf.mxu0  ;;  %v3555_v44 = vpop.f32.mrf.mxu3 }
0x34ac   :  { %3602 = vrot.lane.b32.xlu1 %v3555_v44, %s7120_s26  ;;  %v8293_v55 = vld [vmem:[%s8985_s12 + $0x18] sm:$0xff]  ;;  %v8299_v44 = vld [vmem:[%s8985_s12 + $0x10] sm:$0xff] }
0x34ae   :  { %v3597_v61 = vpop.f32.mrf.mxu1 }
0x34b3   :  { %v3557_v8 = vpop.f32.mrf.mxu3 }
0x34b4   :  { %3610 = vrot.lane.b32.xlu1 %v3597_v61, %s7132_s29  ;;  %v8309_v8 = vld [vmem:[%s8985_s12 + $0x8] sm:$0xff] }
0x34b6   :  { %v3599_v4 = vpop.f32.mrf.mxu1 }
0x34b7   :  { %v8312_v4 = vld [vmem:[#allocation10] sm:$0xff] }
0x34e3   :  { %v3534_v51 = vpop.f32.mrf.mxu2 }
0x34eb   :  { %v3536_v49 = vpop.f32.mrf.mxu2 }
0x34fe   :  { %v3607_v35 = vpop.permute.xlu2 %3606 }
0x351e   :  { %v3603_v15 = vpop.permute.xlu1 %3602 }
0x351f   :  { %v3613_v39 = vsel %vm258_vm1, %v3534_v51, %v3603_v15  ;;  %v8318_v51 = vld [vmem:[%s8985_s12] sm:$0xff] }
0x3520   :  { %v3614_v31 = vsel %vm549_vm6, %v3613_v39, %v3607_v35 }
0x3526   :  { %v3611_v3 = vpop.permute.xlu1 %3610 }
0x3527   :  { %v3615_v2 = vsel %vm551_vm7, %v3614_v31, %v3611_v3 }
0x3528   :  { %v3616_v62 = vpack.c.bf16 %v3615_v2, %v3615_v2 }
0x352a   :  { %6413 = vmatmul.msk.bf16.vlgmr.msra.gmra.mxu2 %vm195_vm0, %v3616_v62 }
0x352b   :  { %3895 = vmatpush.bf16.msra.mxu2 %v7444_v14 }
0x35ad   :  { %v3629_v13 = vpop.f32.mrf.mxu2 }
0x35ae   :  { %v3630_v1 = vadd.f32 %v8068_v12, %v3629_v13 }
0x35b0   :  { %v3633_v60 = vadd.f32 %v3630_v1, %v8161_v24 }
0x35b2   :  { %v3634_v57 = vsel %vm195_vm0, %v3633_v60, 0.0 }
0x35b3   :  { %3635 = vadd.xlane.f32.xlu2 %v3634_v57 }
0x35b5   :  { %v3631_v32 = vpop.f32.mrf.mxu2 }
0x3626   :  { %v3636_v9 = vpop.xlane.xlu2 %3635 }
0x3627   :  { %v3637_v42 = vmul.f32 %v3636_v9, %v7380_v47 }
0x3629   :  { %v3638_v28 = vsub.f32 %v3633_v60, %v3637_v42 }
0x362b   :  { %v3639_v48 = vmul.f32 %v3638_v28, %v3638_v28 }
0x362d   :  { %v3640_v21 = vsel %vm195_vm0, %v3639_v48, 0.0 }
0x362e   :  { %3641 = vadd.xlane.f32.xlu1 %v3640_v21 }
0x36a1   :  { %v3642_v33 = vpop.xlane.xlu1 %3641 }
0x36a2   :  { %v3643_v0 = vmul.f32 %v3642_v33, %v7380_v47 }
0x36a4   :  { %v3644_v17 = vadd.f32 1e-05, %v3643_v0 }
0x36a6   :  { %6715 = vrsqrt.f32 %v3644_v17  ;;  %vm3651_vm13 = vweird.f32 %v3644_v17 }
0x36ac   :  { %v6716_v12 = vpop.eup %6715 }
0x36ad   :  { %v3646_v11 = vmul.f32 %v6716_v12, %v3644_v17  ;;  %vm3652_vm12 = vweird.f32 %v6716_v12 }
0x36ae   :  { %vm3653_vm9 = vmor %vm3651_vm13, %vm3652_vm12 }
0x36af   :  { %v3647_v24 = vmul.f32 %v6716_v12, %v3646_v11 }
0x36b1   :  { %v3648_v16 = vmul.f32 0.5, %v3647_v24 }
0x36b3   :  { %v3649_v59 = vsub.f32 1.5, %v3648_v16 }
0x36b5   :  { %v3650_v36 = vmul.f32 %v6716_v12, %v3649_v59 }
0x36b7   :  { %v3654_v27 = vsel %vm3653_vm9, %v6716_v12, %v3650_v36 }
0x36b8   :  { %v3655_v37 = vmul.f32 %v3654_v27, %v3638_v28 }
0x36ba   :  { %v3656_v7 = vmul.f32 %v8258_v41, %v3655_v37 }
0x36bc   :  { %v8264_v46 = vadd.f32 %v8261_v30, %v3656_v7 }
0x36be   :  { %v3658_v50 = vpack.c.bf16 %v8264_v46, %v8264_v46 }
0x36c0   :  { %6414 = vmatmul.msk.bf16.vlgmr.msra.gmra.mxu3 %vm195_vm0, %v3658_v50 }
0x36c1   :  { %3911 = vmatpush.bf16.msra.mxu3 %v7452_v43 }
0x3743   :  { %v3671_v40 = vpop.f32.mrf.mxu3 }
0x3744   :  { %v3672_v56 = vadd.f32 %v8273_v38, %v3671_v40 }
0x3746   :  { %v3675_v6 = vpack.c.bf16 %v3672_v56, %v3672_v56 }
0x3748   :  { %v3693_v5 = vunpack.c.l.b16 %v3675_v6  ;;  %6415 = vmatmul.msk.bf16.vlgmr.msrb.gmra.mxu0 %vm258_vm1, %v3675_v6 }
0x3749   :  { %3942 = vmatpush.bf16.msrb.mxu0 %v8277_v26 }
0x374a   :  { %v3694_v19 = vpack.c.b16 %v3693_v5, %v3693_v5 }
0x374b   :  { %v3673_v53 = vpop.f32.mrf.mxu3 }
0x374c   :  { %3731 = vrot.lane.b32.xlu2 %v3694_v19, %s7124_s17  ;;  %3713 = vrot.lane.b32.xlu0 %v3694_v19, %s7121_s30 }
0x374d   :  { %3943 = vmatpush.bf16.msrb.mxu0 %v8282_v29 }
0x3754   :  { %3695 = vrot.lane.b32.xlu0 %v3694_v19, %s7126_s0 }
0x37a6   :  { %v3732_v34 = vpop.permute.xlu2 %3731 }
0x37a7   :  { %6418 = vmatmul.msk.bf16.vlgmr.msrb.gmra.mxu3 %vm258_vm1, %v3732_v34 }
0x37a8   :  { %4044 = vmatpush.bf16.msrb.mxu3 %v8100_v52 }
0x37ac   :  { %4045 = vmatpush.bf16.msrb.mxu3 %v8107_v45  ;;  %v8303_v45 = vld [vmem:[#allocation10 + $0x8] sm:$0xff] }
0x37be   :  { %v3714_v22 = vpop.permute.xlu0 %3713 }
0x37bf   :  { %6417 = vmatmul.msk.bf16.vlgmr.msrb.gmra.mxu2 %vm258_vm1, %v3714_v22 }
0x37c0   :  { %4000 = vmatpush.bf16.msrb.mxu2 %v8293_v55 }
0x37c4   :  { %4001 = vmatpush.bf16.msrb.mxu2 %v8299_v44 }
0x37c5   :  { %v3688_v52 = vpop.f32.mrf.mxu0 }
0x37c6   :  { %v3696_v61 = vpop.permute.xlu0 %3695  ;;  %v3749_v9 = vmul.f32 0.35355338, %v3688_v52 }
0x37c7   :  { %6416 = vmatmul.msk.bf16.vlgmr.msrb.gmra.mxu1 %vm258_vm1, %v3696_v61 }
0x37c8   :  { %3984 = vmatpush.bf16.msrb.mxu1 %v8303_v45  ;;  %4002 = vmatpush.bf16.msrb.mxu2 %v8309_v8  ;;  %v3753_v42 = vsel %vm549_vm6, %v3749_v9, -inf }
0x37cc   :  { %3985 = vmatpush.bf16.msrb.mxu1 %v8312_v4  ;;  %4003 = vmatpush.bf16.msrb.mxu2 %v8318_v51 }
0x37cd   :  { %v3690_v49 = vpop.f32.mrf.mxu0 }
0x382a   :  { %v3745_v15 = vpop.f32.mrf.mxu3 }
0x382b   :  { %v3752_v39 = vmul.f32 0.35355338, %v3745_v15 }
0x382d   :  { %v3762_v35 = vsel %vm549_vm6, %v3752_v39, -inf }
0x382e   :  { %3763 = vmax.xlane.f32.xlu0 %v3762_v35 }
0x3832   :  { %v3747_v31 = vpop.f32.mrf.mxu3 }
0x3842   :  { %v3727_v3 = vpop.f32.mrf.mxu2 }
0x3843   :  { %v3751_v2 = vmul.f32 0.35355338, %v3727_v3 }
0x3844   :  { %v3709_v62 = vpop.f32.mrf.mxu1 }
0x3845   :  { %v3759_v13 = vsel %vm549_vm6, %v3751_v2, -inf  ;;  %v3750_v1 = vmul.f32 0.35355338, %v3709_v62 }
0x3846   :  { %3760 = vmax.xlane.f32.xlu1 %v3759_v13 }
0x3847   :  { %v3756_v32 = vsel %vm549_vm6, %v3750_v1, -inf }
0x384a   :  { %v3729_v60 = vpop.f32.mrf.mxu2 }
0x384c   :  { %v3711_v57 = vpop.f32.mrf.mxu1 }
0x384e   :  { %3757 = vmax.xlane.f32.xlu1 %v3756_v32 }
0x3856   :  { %3754 = vmax.xlane.f32.xlu1 %v3753_v42 }
0x38a1   :  { %v3764_v28 = vpop.xlane.xlu0 %3763 }
0x38a2   :  { %v3768_v48 = vsub.f32 %v3752_v39, %v3764_v28 }
0x38a4   :  { %v3775_v21 = vmul.f32 1.442695, %v3768_v48 }
0x38a6   :  { %6717 = vpow2.f32 %v3775_v21 }
0x38ac   :  { %v6718_v33 = vpop.eup %6717 }
0x38ad   :  { %v3786_v0 = vsel %vm549_vm6, %v6718_v33, 0.0 }
0x38ae   :  { %3787 = vadd.xlane.f32.xlu1 %v3786_v0 }
0x38b9   :  { %v3761_v17 = vpop.xlane.xlu1 %3760 }
0x38ba   :  { %v3767_v12 = vsub.f32 %v3751_v2, %v3761_v17 }
0x38bc   :  { %v3773_v11 = vmul.f32 1.442695, %v3767_v12 }
0x38be   :  { %6719 = vpow2.f32 %v3773_v11 }
0x38c1   :  { %v3758_v24 = vpop.xlane.xlu1 %3757 }
0x38c2   :  { %v3766_v16 = vsub.f32 %v3750_v1, %v3758_v24 }
0x38c4   :  { %v6720_v59 = vpop.eup %6719  ;;  %v3771_v36 = vmul.f32 1.442695, %v3766_v16 }
0x38c5   :  { %v3783_v27 = vsel %vm549_vm6, %v6720_v59, 0.0 }
0x38c6   :  { %6721 = vpow2.f32 %v3771_v36  ;;  %3784 = vadd.xlane.f32.xlu2 %v3783_v27 }
0x38c9   :  { %v3755_v37 = vpop.xlane.xlu1 %3754 }
0x38ca   :  { %v3765_v7 = vsub.f32 %v3749_v9, %v3755_v37 }
0x38cc   :  { %v8327_v50 = vpop.eup %6721  ;;  %v3769_v40 = vmul.f32 1.442695, %v3765_v7 }
0x38cd   :  { %v3780_v56 = vsel %vm549_vm6, %v8327_v50, 0.0 }
0x38ce   :  { %6723 = vpow2.f32 %v3769_v40  ;;  %3781 = vadd.xlane.f32.xlu1 %v3780_v56 }
0x38d4   :  { %v8331_v6 = vpop.eup %6723 }
0x38d5   :  { %v3777_v5 = vsel %vm549_vm6, %v8331_v6, 0.0 }
0x38d6   :  { %3778 = vadd.xlane.f32.xlu1 %v3777_v5 }
0x3921   :  { %v3788_v19 = vpop.xlane.xlu1 %3787 }
0x3922   :  { %6725 = vrcp.f32 %v3788_v19  ;;  %v3842_v52 = vand.u32 2147483648, %v3788_v19  ;;  %v3840_v49 = vand.u32 2147483647, %v3788_v19  ;;  %vm3836_vm15 = vweird.f32 %v3788_v19 }
0x3924   :  { %v3843_v39 = vor.u32 1.1754944e-38, %v3842_v52  ;;  %vm3841_vm4 = vcmp.eq.f32.partialorder %v3840_v49, 8.507059e+37 }
0x3928   :  { %v6726_v53 = vpop.eup %6725 }
0x3929   :  { %v3832_v34 = vmul.f32 %v6726_v53, %v3788_v19  ;;  %vm3837_vm14 = vweird.f32 %v6726_v53 }
0x392a   :  { %vm3838_vm3 = vmor %vm3836_vm15, %vm3837_vm14 }
0x392b   :  { %v3833_v22 = vsub.f32 1.0, %v3832_v34 }
0x392d   :  { %v3834_v61 = vmul.f32 %v6726_v53, %v3833_v22 }
0x392f   :  { %v3835_v15 = vadd.f32 %v6726_v53, %v3834_v61 }
0x3931   :  { %v3839_v35 = vsel %vm3838_vm3, %v6726_v53, %v3835_v15 }
0x3932   :  { %v3844_v31 = vsel %vm3841_vm4, %v3843_v39, %v3839_v35 }
0x3933   :  { %v3848_v3 = vmul.f32 %v6718_v33, %v3844_v31 }
0x3935   :  { %v3852_v2 = vpack.c.bf16 %v3848_v3, %v3848_v3 }
0x3937   :  { %6422 = vmatmul.msk.bf16.vlgmr.msra.gmra.mxu3 %vm549_vm6, %v3852_v2 }
0x3939   :  { %v3785_v62 = vpop.xlane.xlu2 %3784 }
0x393a   :  { %6727 = vrcp.f32 %v3785_v62  ;;  %v3828_v32 = vand.u32 2147483648, %v3785_v62  ;;  %v3826_v42 = vand.u32 2147483647, %v3785_v62  ;;  %vm3822_vm8 = vweird.f32 %v3785_v62 }
0x393c   :  { %v3829_v21 = vor.u32 1.1754944e-38, %v3828_v32  ;;  %vm3827_vm11 = vcmp.eq.f32.partialorder %v3826_v42, 8.507059e+37 }
0x3940   :  { %v6728_v13 = vpop.eup %6727 }
0x3941   :  { %v3818_v1 = vmul.f32 %v6728_v13, %v3785_v62  ;;  %v3782_v60 = vpop.xlane.xlu1 %3781  ;;  %vm3823_vm5 = vweird.f32 %v6728_v13 }
0x3942   :  { %6729 = vrcp.f32 %v3782_v60  ;;  %vm3824_vm10 = vmor %vm3822_vm8, %vm3823_vm5  ;;  %v3814_v16 = vand.u32 2147483648, %v3782_v60  ;;  %v3812_v37 = vand.u32 2147483647, %v3782_v60  ;;  %vm3808_vm13 = vweird.f32 %v3782_v60 }
0x3943   :  { %v3819_v57 = vsub.f32 1.0, %v3818_v1 }
0x3944   :  { %v3815_v56 = vor.u32 1.1754944e-38, %v3814_v16  ;;  %vm3813_vm14 = vcmp.eq.f32.partialorder %v3812_v37, 8.507059e+37 }
0x3945   :  { %v3820_v9 = vmul.f32 %v6728_v13, %v3819_v57 }
0x3947   :  { %v3821_v28 = vadd.f32 %v6728_v13, %v3820_v9 }
0x3948   :  { %v6730_v48 = vpop.eup %6729 }
0x3949   :  { %v3825_v33 = vsel %vm3824_vm10, %v6728_v13, %v3821_v28  ;;  %v3804_v0 = vmul.f32 %v6730_v48, %v3782_v60  ;;  %v3779_v17 = vpop.xlane.xlu1 %3778  ;;  %vm3809_vm12 = vweird.f32 %v6730_v48 }
0x394a   :  { %v3830_v12 = vsel %vm3827_vm11, %v3829_v21, %v3825_v33  ;;  %6731 = vrcp.f32 %v3779_v17  ;;  %vm3810_vm9 = vmor %vm3808_vm13, %vm3809_vm12  ;;  %v3800_v22 = vand.u32 2147483648, %v3779_v17  ;;  %v3798_v49 = vand.u32 2147483647, %v3779_v17 }
0x394b   :  { %v3847_v11 = vmul.f32 %v6720_v59, %v3830_v12  ;;  %v3805_v24 = vsub.f32 1.0, %v3804_v0  ;;  %vm3794_vm3 = vweird.f32 %v3779_v17  ;;  %v8348_v12 = vld [vmem:[#allocation11 + $0x1] ss:$0 sm:$0xff]  ;;  %vm8998_vm12 = vcmask 523264  }
0x394c   :  { %v3801_v39 = vor.u32 1.1754944e-38, %v3800_v22  ;;  %vm3799_vm5 = vcmp.eq.f32.partialorder %v3798_v49, 8.507059e+37 }
0x394d   :  { %v3851_v36 = vpack.c.bf16 %v3847_v11, %v3847_v11  ;;  %v3806_v27 = vmul.f32 %v6730_v48, %v3805_v24 }
0x394f   :  { %v3807_v7 = vadd.f32 %v6730_v48, %v3806_v27  ;;  %6421 = vmatmul.msk.bf16.vlgmr.msra.gmra.mxu2 %vm549_vm6, %v3851_v36 }
0x3950   :  { %v6732_v40 = vpop.eup %6731 }
0x3951   :  { %v3811_v5 = vsel %vm3810_vm9, %v6730_v48, %v3807_v7  ;;  %v3790_v19 = vmul.f32 %v6732_v40, %v3779_v17  ;;  %vm3795_vm15 = vweird.f32 %v6732_v40 }
0x3952   :  { %v3816_v53 = vsel %vm3813_vm14, %v3815_v56, %v3811_v5  ;;  %vm3796_vm4 = vmor %vm3794_vm3, %vm3795_vm15 }
0x3953   :  { %v3846_v34 = vmul.f32 %v8327_v50, %v3816_v53  ;;  %v3791_v59 = vsub.f32 1.0, %v3790_v19 }
0x3955   :  { %v3850_v52 = vpack.c.bf16 %v3846_v34, %v3846_v34  ;;  %v3792_v61 = vmul.f32 %v6732_v40, %v3791_v59 }
0x3957   :  { %v3793_v15 = vadd.f32 %v6732_v40, %v3792_v61  ;;  %6420 = vmatmul.msk.bf16.vlgmr.msra.gmra.mxu1 %vm549_vm6, %v3850_v52 }
0x3959   :  { %v3797_v35 = vsel %vm3796_vm4, %v6732_v40, %v3793_v15 }
0x395a   :  { %v3802_v31 = vsel %vm3799_vm5, %v3801_v39, %v3797_v35  ;;  %v8356_v39 = vld [vmem:[#allocation11 + $0x5] ss:$0 sm:$0xff] }
0x395b   :  { %v3845_v3 = vmul.f32 %v8331_v6, %v3802_v31  ;;  %v8359_v31 = vld [vmem:[#allocation11 + $0x6] ss:$0 sm:$0xff] }
0x395d   :  { %v3849_v2 = vpack.c.bf16 %v3845_v3, %v3845_v3 }
0x395f   :  { %6419 = vmatmul.msk.bf16.vlgmr.msra.gmra.mxu0 %vm549_vm6, %v3849_v2 }
0x39ba   :  { %v3913_v50 = vpop.f32.mrf.mxu3 }
0x39bb   :  { %3926 = vrot.lane.b32.xlu2 %v3913_v50, %s7132_s29 }
0x39c2   :  { %v3915_v62 = vpop.f32.mrf.mxu3 }
0x39c3   :  { %v8366_v62 = vld [vmem:[%s8984_s11] ss:$0 sm:$0xff] }
0x39d2   :  { %v3897_v13 = vpop.f32.mrf.mxu2 }
0x39d3   :  { %3922 = vrot.lane.b32.xlu1 %v3897_v13, %s7131_s28 }
0x39d4   :  { %v3881_v1 = vpop.f32.mrf.mxu1 }
0x39d5   :  { %3918 = vrot.lane.b32.xlu0 %v3881_v1, %s7120_s26 }
0x39da   :  { %v3899_v60 = vpop.f32.mrf.mxu2 }
0x39dc   :  { %v3865_v57 = vpop.f32.mrf.mxu0  ;;  %v3883_v32 = vpop.f32.mrf.mxu1 }
0x39e4   :  { %v3867_v9 = vpop.f32.mrf.mxu0 }
0x39e5   :  { %v8370_v9 = vld [vmem:[#allocation11 + $0x2] ss:$0 sm:$0xff] }
0x3a15   :  { %v3927_v48 = vpop.permute.xlu2 %3926 }
0x3a45   :  { %v3923_v28 = vpop.permute.xlu1 %3922 }
0x3a47   :  { %v3919_v42 = vpop.permute.xlu0 %3918 }
0x3a48   :  { %v3929_v6 = vsel %vm258_vm1, %v3865_v57, %v3919_v42 }
0x3a49   :  { %v3930_v21 = vsel %vm549_vm6, %v3929_v6, %v3923_v28 }
0x3a4a   :  { %v3931_v33 = vsel %vm551_vm7, %v3930_v21, %v3927_v48 }
0x3a4b   :  { %v3932_v0 = vpack.c.bf16 %v3931_v33, %v3931_v33 }
0x3a4d   :  { %6423 = vmatmul.msk.bf16.vlgmr.msrb.gmra.mxu0 %vm195_vm0, %v3932_v0 }
0x3aca   :  { %v3945_v17 = vpop.f32.mrf.mxu0 }
0x3acb   :  { %v3946_v11 = vadd.f32 %v8348_v12, %v3945_v17 }
0x3acd   :  { %v3949_v24 = vadd.f32 %v3946_v11, %v8264_v46 }
0x3acf   :  { %v3950_v16 = vsel %vm195_vm0, %v3949_v24, 0.0 }
0x3ad0   :  { %3951 = vadd.xlane.f32.xlu0 %v3950_v16 }
0x3ad2   :  { %v3947_v36 = vpop.f32.mrf.mxu0 }
0x3b43   :  { %v3952_v27 = vpop.xlane.xlu0 %3951 }
0x3b44   :  { %v3953_v37 = vmul.f32 %v3952_v27, %v7380_v47 }
0x3b46   :  { %v3954_v7 = vsub.f32 %v3949_v24, %v3953_v37 }
0x3b48   :  { %v3955_v40 = vmul.f32 %v3954_v7, %v3954_v7 }
0x3b4a   :  { %v3956_v56 = vsel %vm195_vm0, %v3955_v40, 0.0 }
0x3b4b   :  { %3957 = vadd.xlane.f32.xlu1 %v3956_v56 }
0x3bbe   :  { %v3958_v5 = vpop.xlane.xlu1 %3957 }
0x3bbf   :  { %v3959_v19 = vmul.f32 %v3958_v5, %v7380_v47 }
0x3bc1   :  { %v3960_v53 = vadd.f32 1e-05, %v3959_v19 }
0x3bc3   :  { %6733 = vrsqrt.f32 %v3960_v53  ;;  %vm3967_vm10 = vweird.f32 %v3960_v53 }
0x3bc9   :  { %v6734_v34 = vpop.eup %6733 }
0x3bca   :  { %v3962_v59 = vmul.f32 %v6734_v34, %v3960_v53  ;;  %vm3968_vm8 = vweird.f32 %v6734_v34 }
0x3bcb   :  { %vm3969_vm11 = vmor %vm3967_vm10, %vm3968_vm8 }
0x3bcc   :  { %v3963_v46 = vmul.f32 %v6734_v34, %v3962_v59 }
0x3bce   :  { %v3964_v22 = vmul.f32 0.5, %v3963_v46  ;;  %v8380_v46 = vld [vmem:[#allocation11 + $0x8] ss:$0 sm:$0xff] }
0x3bd0   :  { %v3965_v52 = vsub.f32 1.5, %v3964_v22 }
0x3bd2   :  { %v3966_v61 = vmul.f32 %v6734_v34, %v3965_v52 }
0x3bd4   :  { %v3970_v49 = vsel %vm3969_vm11, %v6734_v34, %v3966_v61  ;;  %v8377_v34 = vld [vmem:[#allocation11 + $0x7] ss:$0 sm:$0xff] }
0x3bd5   :  { %v3971_v15 = vmul.f32 %v3970_v49, %v3954_v7  ;;  %v8391_v49 = vld [vmem:[%s8976_s3] ss:$0 sm:$0xff] }
0x3bd7   :  { %v3972_v35 = vmul.f32 %v8356_v39, %v3971_v15 }
0x3bd9   :  { %v3973_v3 = vadd.f32 %v8359_v31, %v3972_v35 }
0x3bdb   :  { %v3974_v2 = vpack.c.bf16 %v3973_v3, %v3973_v3 }
0x3bdd   :  { %6424 = vmatmul.msk.bf16.vlgmr.msrb.gmra.mxu1 %vm195_vm0, %v3974_v2 }
0x3c5a   :  { %v3987_v50 = vpop.f32.mrf.mxu1 }
0x3c5b   :  { %v3988_v13 = vadd.f32 %v8366_v62, %v3987_v50 }
0x3c5d   :  { %v3991_v1 = vmax.f32 %v3988_v13, 0.0 }
0x3c5f   :  { %v3992_v60 = vpack.c.bf16 %v3991_v1, %v3991_v1 }
0x3c61   :  { %6425 = vmatmul.msk.bf16.vlgmr.msrb.gmra.mxu2 %vm8998_vm12, %v3992_v60 }
0x3c62   :  { %v3989_v57 = vpop.f32.mrf.mxu1 }
0x3ce4   :  { %v4005_v32 = vpop.f32.mrf.mxu2 }
0x3ce5   :  { %v4006_v42 = vadd.f32 %v8370_v9, %v4005_v32 }
0x3ce7   :  { %v4009_v28 = vadd.f32 %v4006_v42, %v3973_v3 }
0x3ce9   :  { %v4010_v6 = vsel %vm195_vm0, %v4009_v28, 0.0 }
0x3cea   :  { %4011 = vadd.xlane.f32.xlu2 %v4010_v6 }
0x3cec   :  { %v4007_v48 = vpop.f32.mrf.mxu2 }
0x3d5d   :  { %v4012_v21 = vpop.xlane.xlu2 %4011 }
0x3d5e   :  { %v4013_v33 = vmul.f32 %v4012_v21, %v7380_v47 }
0x3d60   :  { %v4014_v0 = vsub.f32 %v4009_v28, %v4013_v33 }
0x3d62   :  { %v4015_v17 = vmul.f32 %v4014_v0, %v4014_v0 }
0x3d64   :  { %v4016_v11 = vsel %vm195_vm0, %v4015_v17, 0.0 }
0x3d65   :  { %4017 = vadd.xlane.f32.xlu0 %v4016_v11 }
0x3dd8   :  { %v4018_v24 = vpop.xlane.xlu0 %4017 }
0x3dd9   :  { %v4019_v16 = vmul.f32 %v4018_v24, %v7380_v47 }
0x3ddb   :  { %v4020_v36 = vadd.f32 1e-05, %v4019_v16 }
0x3ddd   :  { %6735 = vrsqrt.f32 %v4020_v36  ;;  %vm4027_vm9 = vweird.f32 %v4020_v36 }
0x3de3   :  { %v6736_v27 = vpop.eup %6735 }
0x3de4   :  { %v4022_v37 = vmul.f32 %v6736_v27, %v4020_v36  ;;  %vm4028_vm13 = vweird.f32 %v6736_v27 }
0x3de5   :  { %vm4029_vm14 = vmor %vm4027_vm9, %vm4028_vm13 }
0x3de6   :  { %v4023_v7 = vmul.f32 %v6736_v27, %v4022_v37 }
0x3de8   :  { %v4024_v40 = vmul.f32 0.5, %v4023_v7 }
0x3dea   :  { %v4025_v56 = vsub.f32 1.5, %v4024_v40 }
0x3dec   :  { %v4026_v5 = vmul.f32 %v6736_v27, %v4025_v56 }
0x3dee   :  { %v4030_v19 = vsel %vm4029_vm14, %v6736_v27, %v4026_v5 }
0x3def   :  { %v4031_v53 = vmul.f32 %v4030_v19, %v4014_v0 }
0x3df1   :  { %v4032_v59 = vmul.f32 %v8377_v34, %v4031_v53 }
0x3df3   :  { %v8383_v22 = vadd.f32 %v8380_v46, %v4032_v59 }
0x3df5   :  { %v4034_v52 = vpack.c.bf16 %v8383_v22, %v8383_v22 }
0x3df7   :  { %6426 = vmatmul.msk.bf16.vlgmr.msrb.gmra.mxu3 %vm195_vm0, %v4034_v52 }
0x3e7a   :  { %v4047_v61 = vpop.f32.mrf.mxu3 }
0x3e7b   :  { %v4048_v15 = vadd.f32 %v8391_v49, %v4047_v61 }
0x3e7d   :  { %v4051_v35 = vpack.c.bf16 %v4048_v15, %v4048_v15 }
0x3e7f   :  { %v4053_v3 = vunpack.c.l.b16 %v4051_v35 }
0x3e81   :  { %v8394_v2 = vpack.c.b16 %v4053_v3, %v4053_v3 }
0x3e82   :  { %v4049_v50 = vpop.f32.mrf.mxu3 }
0x3e83   :  { %4099 = vrot.lane.b32.xlu2 %v8394_v2, %s7121_s30  ;;  %4124 = vrot.lane.b32.xlu0 %v8394_v2, %s7125_s18 }
0x3e84   :  { %4101 = vrot.lane.b32.xlu1 %v8394_v2, %s7122_s15 }
0x3e8b   :  { %4122 = vrot.lane.b32.xlu0 %v8394_v2, %s7124_s17 }
0x3e8c   :  { %4078 = vrot.lane.b32.xlu1 %v8394_v2, %s7123_s16 }
0x3e93   :  { %4076 = vrot.lane.b32.xlu0 %v8394_v2, %s7126_s0 }
0x3e94   :  { %4055 = vrot.lane.b32.xlu1 %v8394_v2, %s7127_s19 }
0x3edd   :  { %v4100_v42 = vpop.permute.xlu2 %4099 }
0x3ef5   :  { %v4125_v13 = vpop.permute.xlu0 %4124 }
0x3ef6   :  { %v4130_v1 = vsel %vm258_vm1, %v4125_v13, 0  ;;  %v4102_v60 = vpop.permute.xlu1 %4101 }
0x3ef7   :  { %v4107_v57 = vsel %vm258_vm1, %v4102_v60, 0  ;;  %4139 = vmatpush.bf16.xpose.msra.mxu3 %v4130_v1 }
0x3ef8   :  { %4116 = vmatpush.bf16.xpose.msra.mxu2 %v4107_v57 }
0x3efd   :  { %v4123_v32 = vpop.permute.xlu0 %4122 }
0x3efe   :  { %v4079_v28 = vpop.permute.xlu1 %4078  ;;  %6430 = vmatmul.msk.bf16.vlgmr.msra.gmra.mxu3 %vm258_vm1, %v4123_v32 }
0x3eff   :  { %v4084_v6 = vsel %vm258_vm1, %v4079_v28, 0  ;;  %6429 = vmatmul.msk.bf16.vlgmr.msra.gmra.mxu2 %vm258_vm1, %v4100_v42 }
0x3f00   :  { %4093 = vmatpush.bf16.xpose.msra.mxu1 %v4084_v6 }
0x3f05   :  { %v4077_v48 = vpop.permute.xlu0 %4076 }
0x3f06   :  { %v4056_v21 = vpop.permute.xlu1 %4055 }
0x3f07   :  { %v4061_v33 = vsel %vm258_vm1, %v4056_v21, 0  ;;  %6428 = vmatmul.msk.bf16.vlgmr.msra.gmra.mxu1 %vm258_vm1, %v4077_v48 }
0x3f08   :  { %4070 = vmatpush.bf16.xpose.msra.mxu0 %v4061_v33 }
0x3f0f   :  { %6427 = vmatmul.msk.bf16.vlgmr.msra.gmra.mxu0 %vm258_vm1, %v4051_v35 }
0x3f81   :  { %v4141_v0 = vpop.f32.mrf.mxu3 }
0x3f82   :  { %v4118_v17 = vpop.f32.mrf.mxu2  ;;  %v4148_v11 = vmul.f32 0.35355338, %v4141_v0 }
0x3f83   :  { %v4147_v24 = vmul.f32 0.35355338, %v4118_v17 }
0x3f84   :  { %v4095_v16 = vpop.f32.mrf.mxu1  ;;  %v4158_v36 = vsel %vm258_vm1, %v4148_v11, -inf }
0x3f85   :  { %v4146_v27 = vmul.f32 0.35355338, %v4095_v16  ;;  %4159 = vmax.xlane.f32.xlu0 %v4158_v36  ;;  %v4155_v37 = vsel %vm258_vm1, %v4147_v24, -inf }
0x3f86   :  { %4156 = vmax.xlane.f32.xlu2 %v4155_v37 }
0x3f87   :  { %v4152_v7 = vsel %vm258_vm1, %v4146_v27, -inf }
0x3f88   :  { %4153 = vmax.xlane.f32.xlu1 %v4152_v7 }
0x3f89   :  { %v4143_v40 = vpop.f32.mrf.mxu3 }
0x3f8a   :  { %v4120_v56 = vpop.f32.mrf.mxu2 }
0x3f8c   :  { %v4072_v5 = vpop.f32.mrf.mxu0  ;;  %v4097_v19 = vpop.f32.mrf.mxu1 }
0x3f8d   :  { %v4145_v53 = vmul.f32 0.35355338, %v4072_v5 }
0x3f8f   :  { %v4149_v59 = vsel %vm258_vm1, %v4145_v53, -inf }
0x3f90   :  { %4150 = vmax.xlane.f32.xlu2 %v4149_v59 }
0x3f94   :  { %v4074_v52 = vpop.f32.mrf.mxu0 }
0x3ff8   :  { %v4160_v61 = vpop.xlane.xlu0 %4159 }
0x3ff9   :  { %v4164_v15 = vsub.f32 %v4148_v11, %v4160_v61  ;;  %v4157_v35 = vpop.xlane.xlu2 %4156 }
0x3ffa   :  { %v4163_v3 = vsub.f32 %v4147_v24, %v4157_v35 }
0x3ffb   :  { %v4171_v50 = vmul.f32 1.442695, %v4164_v15  ;;  %v4154_v13 = vpop.xlane.xlu1 %4153 }
0x3ffc   :  { %v4169_v1 = vmul.f32 1.442695, %v4163_v3  ;;  %v4162_v60 = vsub.f32 %v4146_v27, %v4154_v13 }
0x3ffd   :  { %6737 = vpow2.f32 %v4171_v50 }
0x3ffe   :  { %6739 = vpow2.f32 %v4169_v1  ;;  %v4167_v57 = vmul.f32 1.442695, %v4162_v60 }
0x4000   :  { %6741 = vpow2.f32 %v4167_v57 }
0x4003   :  { %v8422_v32 = vpop.eup %6737  ;;  %v4151_v33 = vpop.xlane.xlu2 %4150 }
0x4004   :  { %v8424_v42 = vpop.eup %6739  ;;  %v4182_v28 = vsel %vm258_vm1, %v8422_v32, 0.0  ;;  %v4161_v0 = vsub.f32 %v4145_v53, %v4151_v33 }
0x4005   :  { %v4179_v6 = vsel %vm258_vm1, %v8424_v42, 0.0  ;;  %4183 = vadd.xlane.f32.xlu2 %v4182_v28 }
0x4006   :  { %v8430_v48 = vpop.eup %6741  ;;  %4180 = vadd.xlane.f32.xlu0 %v4179_v6  ;;  %v4165_v17 = vmul.f32 1.442695, %v4161_v0 }
0x4007   :  { %v4176_v21 = vsel %vm258_vm1, %v8430_v48, 0.0 }
0x4008   :  { %4177 = vadd.xlane.f32.xlu1 %v4176_v21  ;;  %6743 = vpow2.f32 %v4165_v17 }
0x400e   :  { %v8442_v11 = vpop.eup %6743 }
0x400f   :  { %v4173_v24 = vsel %vm258_vm1, %v8442_v11, 0.0 }
0x401a   :  { %4291 = vrot.lane.b32.xlu0 %v8394_v2, %s7128_s1 }
0x401d   :  { %4312 = vrot.lane.b32.xlu2 %v8394_v2, %s7129_s25 }
0x4021   :  { %4270 = vrot.lane.b32.xlu1 %v8394_v2, %s7130_s10 }
0x4025   :  { %4249 = vrot.lane.b32.xlu2 %v8394_v2, %s7112_s21 }
0x4044   :  { %4174 = vadd.xlane.f32.xlu0 %v4173_v24 }
0x4078   :  { %v4184_v16 = vpop.xlane.xlu2 %4183 }
0x4079   :  { %v4181_v36 = vpop.xlane.xlu0 %4180  ;;  %6745 = vrcp.f32 %v4184_v16  ;;  %v4236_v59 = vand.u32 2147483647, %v4184_v16  ;;  %v4238_v15 = vand.u32 2147483648, %v4184_v16  ;;  %vm4232_vm5 = vweird.f32 %v4184_v16 }
0x407a   :  { %6747 = vrcp.f32 %v4181_v36  ;;  %v4222_v61 = vand.u32 2147483647, %v4181_v36  ;;  %v4224_v3 = vand.u32 2147483648, %v4181_v36  ;;  %vm4218_vm4 = vweird.f32 %v4181_v36 }
0x407b   :  { %v4178_v27 = vpop.xlane.xlu1 %4177  ;;  %vm4237_vm8 = vcmp.eq.f32.partialorder %v4236_v59, 8.507059e+37  ;;  %v4239_v28 = vor.u32 1.1754944e-38, %v4238_v15 }
0x407c   :  { %6749 = vrcp.f32 %v4178_v27  ;;  %vm4223_vm10 = vcmp.eq.f32.partialorder %v4222_v61, 8.507059e+37  ;;  %v4225_v21 = vor.u32 1.1754944e-38, %v4224_v3  ;;  %v4210_v0 = vand.u32 2147483648, %v4178_v27  ;;  %v8466_v3 = vld [vmem:[#allocation5 + $0x8] sm:$0xff] }
0x407d   :  { %vm4204_vm9 = vweird.f32 %v4178_v27 }
0x407e   :  { %v4211_v61 = vor.u32 1.1754944e-38, %v4210_v0 }
0x407f   :  { %v6746_v37 = vpop.eup %6745 }
0x4080   :  { %v6748_v7 = vpop.eup %6747  ;;  %v4228_v40 = vmul.f32 %v6746_v37, %v4184_v16  ;;  %v4313_v2 = vpop.permute.xlu2 %4312  ;;  %vm4233_vm15 = vweird.f32 %v6746_v37 }
0x4081   :  { %v4214_v56 = vmul.f32 %v6748_v7, %v4181_v36  ;;  %v4318_v5 = vsel %vm456_vm2, %v4313_v2, 0  ;;  %vm4219_vm3 = vweird.f32 %v6748_v7  ;;  %vm4234_vm11 = vmor %vm4232_vm5, %vm4233_vm15 }
0x4082   :  { %v6750_v19 = vpop.eup %6749  ;;  %v4229_v53 = vsub.f32 1.0, %v4228_v40  ;;  %4327 = vmatpush.bf16.msrb.mxu3 %v4318_v5  ;;  %vm4220_vm12 = vmor %vm4218_vm4, %vm4219_vm3  ;;  %v4208_v5 = vand.u32 2147483647, %v4178_v27 }
0x4083   :  { %v4215_v52 = vsub.f32 1.0, %v4214_v56  ;;  %v4200_v35 = vmul.f32 %v6750_v19, %v4178_v27  ;;  %vm4205_vm13 = vweird.f32 %v6750_v19 }
0x4084   :  { %v4230_v50 = vmul.f32 %v6746_v37, %v4229_v53  ;;  %vm4206_vm14 = vmor %vm4204_vm9, %vm4205_vm13  ;;  %vm4209_vm15 = vcmp.eq.f32.partialorder %v4208_v5, 8.507059e+37 }
0x4085   :  { %v4216_v13 = vmul.f32 %v6748_v7, %v4215_v52  ;;  %v4201_v1 = vsub.f32 1.0, %v4200_v35 }
0x4086   :  { %4439 = vmatpush.bf16.xpose.msra.mxu3 %v7415_v25  ;;  %v4231_v60 = vadd.f32 %v6746_v37, %v4230_v50 }
0x4087   :  { %v4217_v57 = vadd.f32 %v6748_v7, %v4216_v13  ;;  %v4202_v6 = vmul.f32 %v6750_v19, %v4201_v1 }
0x4088   :  { %v4235_v33 = vsel %vm4234_vm11, %v6746_v37, %v4231_v60  ;;  %v4250_v17 = vpop.permute.xlu2 %4249 }
0x4089   :  { %v4221_v24 = vsel %vm4220_vm12, %v6748_v7, %v4217_v57  ;;  %v4240_v40 = vsel %vm4237_vm8, %v4239_v28, %v4235_v33  ;;  %v4203_v2 = vadd.f32 %v6750_v19, %v4202_v6  ;;  %v4255_v56 = vsel %vm456_vm2, %v4250_v17, 0 }
0x408a   :  { %v4226_v36 = vsel %vm4223_vm10, %v4225_v21, %v4221_v24  ;;  %v4244_v16 = vmul.f32 %v8422_v32, %v4240_v40  ;;  %4264 = vmatpush.bf16.msrb.mxu0 %v4255_v56 }
0x408b   :  { %v4243_v53 = vmul.f32 %v8424_v42, %v4226_v36  ;;  %v4207_v59 = vsel %vm4206_vm14, %v6750_v19, %v4203_v2 }
0x408c   :  { %v4248_v37 = vpack.c.bf16 %v4244_v16, %v4244_v16  ;;  %v4292_v52 = vpop.permute.xlu0 %4291  ;;  %v4212_v32 = vsel %vm4209_vm15, %v4211_v61, %v4207_v59 }
0x408d   :  { %v4297_v7 = vsel %vm456_vm2, %v4292_v52, 0  ;;  %v4247_v15 = vpack.c.bf16 %v4243_v53, %v4243_v53  ;;  %v4242_v42 = vmul.f32 %v8430_v48, %v4212_v32 }
0x408e   :  { %4358 = vmatpush.bf16.msra.mxu0 %v8230_v10  ;;  %4306 = vmatpush.bf16.msrb.mxu2 %v4297_v7  ;;  %v8459_v10 = vld [vmem:[%s8977_s4] sm:$0xff] }
0x408f   :  { %6434 = vmatmul.msk.bf16.vlgmr.msrb.gmra.mxu3 %vm258_vm1, %v4248_v37  ;;  %v4246_v35 = vpack.c.bf16 %v4242_v42, %v4242_v42  ;;  %v8483_v42 = vld [vmem:[#allocation11] ss:$0 sm:$0xff] }
0x4090   :  { %4611 = vmatpush.bf16.msrb.mxu3 %v7459_v58 }
0x4091   :  { %6433 = vmatmul.msk.bf16.vlgmr.msrb.gmra.mxu2 %vm258_vm1, %v4247_v15 }
0x4092   :  { %4418 = vmatpush.bf16.xpose.msra.mxu2 %v7330_v20  ;;  %4359 = vmatpush.bf16.msra.mxu0 %v8459_v10 }
0x4093   :  { %v4271_v27 = vpop.permute.xlu1 %4270 }
0x4094   :  { %v4276_v19 = vsel %vm456_vm2, %v4271_v27, 0 }
0x4095   :  { %4285 = vmatpush.bf16.msrb.mxu1 %v4276_v19 }
0x4098   :  { %6432 = vmatmul.msk.bf16.vlgmr.msrb.gmra.mxu1 %vm258_vm1, %v4246_v35 }
0x4099   :  { %4400 = vmatpush.bf16.msra.mxu1 %v8466_v3 }
0x409a   :  { %4595 = vmatpush.bf16.msrb.mxu2 %v7447_v23 }
0x409d   :  { %4401 = vmatpush.bf16.msra.mxu1 %v8218_v63 }
0x40a1   :  { %4475 = vmatpush.bf16.xpose.msrb.mxu1 %v7385_v54 }
0x40b7   :  { %v4175_v50 = vpop.xlane.xlu0 %4174 }
0x40b8   :  { %6751 = vrcp.f32 %v4175_v50  ;;  %v4196_v60 = vand.u32 2147483648, %v4175_v50  ;;  %v4194_v28 = vand.u32 2147483647, %v4175_v50  ;;  %vm4190_vm4 = vweird.f32 %v4175_v50 }
0x40ba   :  { %v4197_v21 = vor.u32 1.1754944e-38, %v4196_v60  ;;  %vm4195_vm8 = vcmp.eq.f32.partialorder %v4194_v28, 8.507059e+37 }
0x40be   :  { %v6752_v48 = vpop.eup %6751 }
0x40bf   :  { %v4186_v13 = vmul.f32 %v6752_v48, %v4175_v50  ;;  %vm4191_vm3 = vweird.f32 %v6752_v48 }
0x40c0   :  { %vm4192_vm5 = vmor %vm4190_vm4, %vm4191_vm3 }
0x40c1   :  { %v4187_v1 = vsub.f32 1.0, %v4186_v13 }
0x40c3   :  { %v4188_v57 = vmul.f32 %v6752_v48, %v4187_v1 }
0x40c5   :  { %v4189_v6 = vadd.f32 %v6752_v48, %v4188_v57 }
0x40c7   :  { %v4193_v33 = vsel %vm4192_vm5, %v6752_v48, %v4189_v6 }
0x40c8   :  { %v4198_v0 = vsel %vm4195_vm8, %v4197_v21, %v4193_v33 }
0x40c9   :  { %v4241_v63 = vmul.f32 %v8442_v11, %v4198_v0 }
0x40cb   :  { %v4245_v17 = vpack.c.bf16 %v4241_v63, %v4241_v63 }
0x40cd   :  { %6431 = vmatmul.msk.bf16.vlgmr.msrb.gmra.mxu0 %vm258_vm1, %v4245_v17 }
0x40ce   :  { %4457 = vmatpush.bf16.xpose.msrb.mxu0 %v7360_v18 }
0x4112   :  { %v4329_v24 = vpop.f32.mrf.mxu3 }
0x4114   :  { %v4308_v40 = vpop.f32.mrf.mxu2 }
0x4115   :  { %4338 = vrot.lane.b32.xlu2 %v4308_v40, %s7131_s28  ;;  %v4287_v2 = vpop.f32.mrf.mxu1 }
0x4116   :  { %4334 = vrot.lane.b32.xlu1 %v4287_v2, %s7120_s26 }
0x411a   :  { %v4331_v56 = vpop.f32.mrf.mxu3 }
0x411c   :  { %v4310_v36 = vpop.f32.mrf.mxu2 }
0x411d   :  { %v4289_v16 = vpop.f32.mrf.mxu1 }
0x411e   :  { %4342 = vrot.lane.b32.xlu1 %v4329_v24, %s7132_s29 }
0x414a   :  { %v4266_v5 = vpop.f32.mrf.mxu0 }
0x4152   :  { %v4268_v53 = vpop.f32.mrf.mxu0 }
0x416f   :  { %v4339_v59 = vpop.permute.xlu2 %4338 }
0x4188   :  { %v4335_v11 = vpop.permute.xlu1 %4334 }
0x4189   :  { %v4345_v37 = vsel %vm258_vm1, %v4266_v5, %v4335_v11 }
0x418a   :  { %v4346_v52 = vsel %vm549_vm6, %v4345_v37, %v4339_v59 }
0x4190   :  { %v4343_v61 = vpop.permute.xlu1 %4342 }
0x4191   :  { %v4347_v7 = vsel %vm551_vm7, %v4346_v52, %v4343_v61 }
0x4192   :  { %v4348_v15 = vpack.c.bf16 %v4347_v7, %v4347_v7 }
0x4194   :  { %6435 = vmatmul.msk.bf16.vlgmr.msra.gmra.mxu0 %vm195_vm0, %v4348_v15 }
0x4195   :  { %4627 = vmatpush.bf16.msra.mxu0 %v7444_v14 }
0x4211   :  { %v4361_v32 = vpop.f32.mrf.mxu0 }
0x4212   :  { %v4362_v27 = vadd.f32 %v8483_v42, %v4361_v32 }
0x4214   :  { %v4365_v19 = vadd.f32 %v4362_v27, %v8383_v22 }
0x4216   :  { %v4366_v35 = vsel %vm195_vm0, %v4365_v19, 0.0 }
0x4217   :  { %4367 = vadd.xlane.f32.xlu2 %v4366_v35 }
0x4219   :  { %v4363_v50 = vpop.f32.mrf.mxu0 }
0x428a   :  { %v4368_v48 = vpop.xlane.xlu2 %4367 }
0x428b   :  { %v4369_v13 = vmul.f32 %v4368_v48, %v7380_v47 }
0x428d   :  { %v4370_v1 = vsub.f32 %v4365_v19, %v4369_v13 }
0x428f   :  { %v4371_v60 = vmul.f32 %v4370_v1, %v4370_v1 }
0x4291   :  { %v4372_v57 = vsel %vm195_vm0, %v4371_v60, 0.0 }
0x4292   :  { %4373 = vadd.xlane.f32.xlu1 %v4372_v57 }
0x4305   :  { %v4374_v28 = vpop.xlane.xlu1 %4373 }
0x4306   :  { %v4375_v6 = vmul.f32 %v4374_v28, %v7380_v47 }
0x4308   :  { %v4376_v21 = vadd.f32 1e-05, %v4375_v6 }
0x430a   :  { %6753 = vrsqrt.f32 %v4376_v21  ;;  %vm4383_vm11 = vweird.f32 %v4376_v21 }
0x4310   :  { %v6754_v33 = vpop.eup %6753 }
0x4311   :  { %v4378_v0 = vmul.f32 %v6754_v33, %v4376_v21  ;;  %vm4384_vm10 = vweird.f32 %v6754_v33 }
0x4312   :  { %vm4385_vm12 = vmor %vm4383_vm11, %vm4384_vm10 }
0x4313   :  { %v4379_v22 = vmul.f32 %v6754_v33, %v4378_v0 }
0x4315   :  { %v4380_v63 = vmul.f32 0.5, %v4379_v22 }
0x4317   :  { %v4381_v17 = vsub.f32 1.5, %v4380_v63 }
0x4319   :  { %v4382_v24 = vmul.f32 %v6754_v33, %v4381_v17 }
0x431b   :  { %v4386_v40 = vsel %vm4385_vm12, %v6754_v33, %v4382_v24 }
0x431c   :  { %v4387_v2 = vmul.f32 %v4386_v40, %v4370_v1 }
0x431e   :  { %v4388_v56 = vmul.f32 %v8258_v41, %v4387_v2 }
0x4320   :  { %v8493_v36 = vadd.f32 %v8261_v30, %v4388_v56 }
0x4322   :  { %v4390_v16 = vpack.c.bf16 %v8493_v36, %v8493_v36 }
0x4324   :  { %6436 = vmatmul.msk.bf16.vlgmr.msra.gmra.mxu1 %vm195_vm0, %v4390_v16 }
0x4325   :  { %4643 = vmatpush.bf16.msra.mxu1 %v7452_v43 }
0x43a1   :  { %v4403_v5 = vpop.f32.mrf.mxu1 }
0x43a2   :  { %v4404_v53 = vadd.f32 %v8273_v38, %v4403_v5  ;;  %v8510_v38 = vld [vmem:[%s8975_s2 + $0x8] sm:$0xff] }
0x43a4   :  { %v4407_v11 = vpack.c.bf16 %v4404_v53, %v4404_v53 }
0x43a6   :  { %v4425_v37 = vunpack.c.l.b16 %v4407_v11  ;;  %6437 = vmatmul.msk.bf16.vlgmr.msra.gmra.mxu2 %vm258_vm1, %v4407_v11 }
0x43a7   :  { %4674 = vmatpush.bf16.msra.mxu2 %v8277_v26  ;;  %v8516_v26 = vld [vmem:[%s8975_s2] sm:$0xff] }
0x43a8   :  { %v4426_v41 = vpack.c.b16 %v4425_v37, %v4425_v37 }
0x43a9   :  { %v4405_v59 = vpop.f32.mrf.mxu1 }
0x43aa   :  { %4463 = vrot.lane.b32.xlu2 %v4426_v41, %s7124_s17  ;;  %4427 = vrot.lane.b32.xlu0 %v4426_v41, %s7126_s0 }
0x43ab   :  { %4675 = vmatpush.bf16.msra.mxu2 %v8282_v29 }
0x43b2   :  { %4445 = vrot.lane.b32.xlu0 %v4426_v41, %s7121_s30 }
0x4404   :  { %v4464_v30 = vpop.permute.xlu2 %4463 }
0x4405   :  { %6440 = vmatmul.msk.bf16.vlgmr.msrb.gmra.mxu1 %vm258_vm1, %v4464_v30 }
0x4406   :  { %4776 = vmatpush.bf16.msrb.mxu1 %v8510_v38 }
0x440a   :  { %4777 = vmatpush.bf16.msrb.mxu1 %v8516_v26 }
0x441c   :  { %v4428_v29 = vpop.permute.xlu0 %4427 }
0x441d   :  { %6438 = vmatmul.msk.bf16.vlgmr.msra.gmra.mxu3 %vm258_vm1, %v4428_v29 }
0x441e   :  { %4716 = vmatpush.bf16.msra.mxu3 %v8303_v45 }
0x4422   :  { %4717 = vmatpush.bf16.msra.mxu3 %v8312_v4 }
0x4424   :  { %v4446_v52 = vpop.permute.xlu0 %4445 }
0x4425   :  { %6439 = vmatmul.msk.bf16.vlgmr.msrb.gmra.mxu0 %vm258_vm1, %v4446_v52 }
0x4426   :  { %4732 = vmatpush.bf16.msrb.mxu0 %v8293_v55 }
0x4429   :  { %v4420_v61 = vpop.f32.mrf.mxu2 }
0x442a   :  { %4733 = vmatpush.bf16.msrb.mxu0 %v8299_v44  ;;  %v4481_v13 = vmul.f32 0.35355338, %v4420_v61 }
0x442e   :  { %4734 = vmatpush.bf16.msrb.mxu0 %v8309_v8 }
0x4431   :  { %v4422_v7 = vpop.f32.mrf.mxu2 }
0x4432   :  { %4735 = vmatpush.bf16.msrb.mxu0 %v8318_v51  ;;  %v4485_v51 = vsel %vm549_vm6, %v4481_v13, -inf }
0x4482   :  { %v4477_v15 = vpop.f32.mrf.mxu1 }
0x4483   :  { %v4484_v55 = vmul.f32 0.35355338, %v4477_v15 }
0x4485   :  { %v4494_v8 = vsel %vm549_vm6, %v4484_v55, -inf }
0x448a   :  { %v4479_v32 = vpop.f32.mrf.mxu1 }
0x44a0   :  { %v4441_v27 = vpop.f32.mrf.mxu3 }
0x44a1   :  { %v4482_v19 = vmul.f32 0.35355338, %v4441_v27 }
0x44a2   :  { %v4459_v45 = vpop.f32.mrf.mxu0 }
0x44a3   :  { %v4483_v35 = vmul.f32 0.35355338, %v4459_v45  ;;  %v4488_v4 = vsel %vm549_vm6, %v4482_v19, -inf }
0x44a4   :  { %4489 = vmax.xlane.f32.xlu1 %v4488_v4 }
0x44a5   :  { %v4491_v50 = vsel %vm549_vm6, %v4483_v35, -inf }
0x44a6   :  { %4492 = vmax.xlane.f32.xlu0 %v4491_v50 }
0x44a8   :  { %v4443_v48 = vpop.f32.mrf.mxu3 }
0x44aa   :  { %v4461_v44 = vpop.f32.mrf.mxu0 }
0x44ac   :  { %4495 = vmax.xlane.f32.xlu1 %v4494_v8 }
0x44b4   :  { %4486 = vmax.xlane.f32.xlu1 %v4485_v51 }
0x4517   :  { %v4490_v1 = vpop.xlane.xlu1 %4489 }
0x4518   :  { %v4498_v60 = vsub.f32 %v4482_v19, %v4490_v1 }
0x4519   :  { %v4493_v57 = vpop.xlane.xlu0 %4492 }
0x451a   :  { %v4503_v28 = vmul.f32 1.442695, %v4498_v60  ;;  %v4499_v6 = vsub.f32 %v4483_v35, %v4493_v57 }
0x451c   :  { %6755 = vpow2.f32 %v4503_v28  ;;  %v4505_v21 = vmul.f32 1.442695, %v4499_v6 }
0x451e   :  { %6757 = vpow2.f32 %v4505_v21 }
0x451f   :  { %v4496_v33 = vpop.xlane.xlu1 %4495 }
0x4520   :  { %v4500_v0 = vsub.f32 %v4484_v55, %v4496_v33 }
0x4522   :  { %v6756_v22 = vpop.eup %6755  ;;  %v4507_v63 = vmul.f32 1.442695, %v4500_v0 }
0x4523   :  { %v4512_v17 = vsel %vm549_vm6, %v6756_v22, 0.0 }
0x4524   :  { %v6758_v24 = vpop.eup %6757  ;;  %6759 = vpow2.f32 %v4507_v63  ;;  %4513 = vadd.xlane.f32.xlu2 %v4512_v17 }
0x4525   :  { %v4515_v40 = vsel %vm549_vm6, %v6758_v24, 0.0 }
0x4526   :  { %4516 = vadd.xlane.f32.xlu1 %v4515_v40 }
0x4527   :  { %v4487_v2 = vpop.xlane.xlu1 %4486 }
0x4528   :  { %v4497_v56 = vsub.f32 %v4481_v13, %v4487_v2 }
0x452a   :  { %v8533_v16 = vpop.eup %6759  ;;  %v4501_v5 = vmul.f32 1.442695, %v4497_v56 }
0x452b   :  { %v4518_v53 = vsel %vm549_vm6, %v8533_v16, 0.0 }
0x452c   :  { %6761 = vpow2.f32 %v4501_v5 }
0x452e   :  { %4519 = vadd.xlane.f32.xlu1 %v4518_v53 }
0x4532   :  { %v8537_v11 = vpop.eup %6761 }
0x4533   :  { %v4509_v37 = vsel %vm549_vm6, %v8537_v11, 0.0 }
0x4536   :  { %4510 = vadd.xlane.f32.xlu1 %v4509_v37 }
0x4597   :  { %v4514_v41 = vpop.xlane.xlu2 %4513 }
0x4598   :  { %6763 = vrcp.f32 %v4514_v41  ;;  %v4546_v32 = vand.u32 2147483648, %v4514_v41  ;;  %v4544_v19 = vand.u32 2147483647, %v4514_v41  ;;  %vm4540_vm9 = vweird.f32 %v4514_v41 }
0x4599   :  { %v4517_v59 = vpop.xlane.xlu1 %4516 }
0x459a   :  { %6765 = vrcp.f32 %v4517_v59  ;;  %v4560_v35 = vand.u32 2147483648, %v4517_v59  ;;  %v4558_v55 = vand.u32 2147483647, %v4517_v59  ;;  %v4547_v48 = vor.u32 1.1754944e-38, %v4546_v32 }
0x459b   :  { %vm4545_vm3 = vcmp.eq.f32.partialorder %v4544_v19, 8.507059e+37  ;;  %vm4554_vm4 = vweird.f32 %v4517_v59 }
0x459c   :  { %v4561_v1 = vor.u32 1.1754944e-38, %v4560_v35  ;;  %vm4559_vm8 = vcmp.eq.f32.partialorder %v4558_v55, 8.507059e+37 }
0x459e   :  { %v6764_v30 = vpop.eup %6763 }
0x459f   :  { %v4536_v29 = vmul.f32 %v6764_v30, %v4514_v41  ;;  %vm4541_vm13 = vweird.f32 %v6764_v30 }
0x45a0   :  { %v6766_v52 = vpop.eup %6765  ;;  %vm4542_vm15 = vmor %vm4540_vm9, %vm4541_vm13 }
0x45a1   :  { %v4537_v61 = vsub.f32 1.0, %v4536_v29  ;;  %v4550_v7 = vmul.f32 %v6766_v52, %v4517_v59  ;;  %v4520_v15 = vpop.xlane.xlu1 %4519  ;;  %vm4555_vm14 = vweird.f32 %v6766_v52 }
0x45a2   :  { %6767 = vrcp.f32 %v4520_v15  ;;  %vm4556_vm5 = vmor %vm4554_vm4, %vm4555_vm14  ;;  %v4574_v17 = vand.u32 2147483648, %v4520_v15  ;;  %v4572_v56 = vand.u32 2147483647, %v4520_v15  ;;  %vm4568_vm11 = vweird.f32 %v4520_v15 }
0x45a3   :  { %v4538_v27 = vmul.f32 %v6764_v30, %v4537_v61  ;;  %v4551_v45 = vsub.f32 1.0, %v4550_v7 }
0x45a4   :  { %v4575_v53 = vor.u32 1.1754944e-38, %v4574_v17  ;;  %vm4573_vm13 = vcmp.eq.f32.partialorder %v4572_v56, 8.507059e+37 }
0x45a5   :  { %v4539_v4 = vadd.f32 %v6764_v30, %v4538_v27  ;;  %v4552_v50 = vmul.f32 %v6766_v52, %v4551_v45 }
0x45a7   :  { %v4543_v44 = vsel %vm4542_vm15, %v6764_v30, %v4539_v4  ;;  %v4553_v8 = vadd.f32 %v6766_v52, %v4552_v50 }
0x45a8   :  { %v6768_v13 = vpop.eup %6767  ;;  %v4548_v51 = vsel %vm4545_vm3, %v4547_v48, %v4543_v44 }
0x45a9   :  { %v4578_v60 = vmul.f32 %v6756_v22, %v4548_v51  ;;  %v4557_v57 = vsel %vm4556_vm5, %v6766_v52, %v4553_v8  ;;  %v4564_v28 = vmul.f32 %v6768_v13, %v4520_v15  ;;  %v4511_v6 = vpop.xlane.xlu1 %4510  ;;  %vm4569_vm10 = vweird.f32 %v6768_v13 }
0x45aa   :  { %v4562_v21 = vsel %vm4559_vm8, %v4561_v1, %v4557_v57  ;;  %6769 = vrcp.f32 %v4511_v6  ;;  %vm4570_vm12 = vmor %vm4568_vm11, %vm4569_vm10  ;;  %v4532_v29 = vand.u32 2147483648, %v4511_v6  ;;  %v4530_v7 = vand.u32 2147483647, %v4511_v6 }
0x45ab   :  { %v4582_v33 = vpack.c.bf16 %v4578_v60, %v4578_v60  ;;  %v4579_v0 = vmul.f32 %v6758_v24, %v4562_v21  ;;  %v4565_v63 = vsub.f32 1.0, %v4564_v28  ;;  %vm4526_vm14 = vweird.f32 %v4511_v6 }
0x45ac   :  { %v4533_v15 = vor.u32 1.1754944e-38, %v4532_v29  ;;  %vm4531_vm3 = vcmp.eq.f32.partialorder %v4530_v7, 8.507059e+37  ;;  %vm8999_vm10 = vcmask 523264  }
0x45ad   :  { %v4583_v40 = vpack.c.bf16 %v4579_v0, %v4579_v0  ;;  %v4566_v2 = vmul.f32 %v6768_v13, %v4565_v63  ;;  %6442 = vmatmul.msk.bf16.vlgmr.msrb.gmra.mxu3 %vm549_vm6, %v4582_v33 }
0x45af   :  { %v4567_v5 = vadd.f32 %v6768_v13, %v4566_v2  ;;  %6443 = vmatmul.msk.bf16.vlgmr.msra.gmra.mxu0 %vm549_vm6, %v4583_v40 }
0x45b0   :  { %v6770_v22 = vpop.eup %6769 }
0x45b1   :  { %v4571_v37 = vsel %vm4570_vm12, %v6768_v13, %v4567_v5  ;;  %v4522_v41 = vmul.f32 %v6770_v22, %v4511_v6  ;;  %vm4527_vm9 = vweird.f32 %v6770_v22 }
0x45b2   :  { %v4576_v59 = vsel %vm4573_vm13, %v4575_v53, %v4571_v37  ;;  %vm4528_vm15 = vmor %vm4526_vm14, %vm4527_vm9 }
0x45b3   :  { %v4580_v24 = vmul.f32 %v8533_v16, %v4576_v59  ;;  %v4523_v30 = vsub.f32 1.0, %v4522_v41 }
0x45b5   :  { %v4584_v52 = vpack.c.bf16 %v4580_v24, %v4580_v24  ;;  %v4524_v61 = vmul.f32 %v6770_v22, %v4523_v30 }
0x45b7   :  { %v4525_v32 = vadd.f32 %v6770_v22, %v4524_v61  ;;  %6444 = vmatmul.msk.bf16.vlgmr.msra.gmra.mxu1 %vm549_vm6, %v4584_v52 }
0x45b9   :  { %v4529_v27 = vsel %vm4528_vm15, %v6770_v22, %v4525_v32 }
0x45ba   :  { %v4534_v19 = vsel %vm4531_vm3, %v4533_v15, %v4529_v27 }
0x45bb   :  { %v4577_v45 = vmul.f32 %v8537_v11, %v4534_v19 }
0x45bd   :  { %v4581_v35 = vpack.c.bf16 %v4577_v45, %v4577_v45 }
0x45bf   :  { %6441 = vmatmul.msk.bf16.vlgmr.msrb.gmra.mxu2 %vm549_vm6, %v4581_v35 }
0x462c   :  { %v4629_v16 = vpop.f32.mrf.mxu0 }
0x462d   :  { %4654 = vrot.lane.b32.xlu1 %v4629_v16, %s7131_s28 }
0x4630   :  { %v4613_v4 = vpop.f32.mrf.mxu3 }
0x4631   :  { %4650 = vrot.lane.b32.xlu0 %v4613_v4, %s7120_s26 }
0x4634   :  { %v4631_v50 = vpop.f32.mrf.mxu0  ;;  %v4645_v55 = vpop.f32.mrf.mxu1 }
0x4635   :  { %4658 = vrot.lane.b32.xlu2 %v4645_v55, %s7132_s29 }
0x4638   :  { %v4615_v48 = vpop.f32.mrf.mxu3 }
0x463c   :  { %v4647_v44 = vpop.f32.mrf.mxu1 }
0x4642   :  { %v4597_v8 = vpop.f32.mrf.mxu2 }
0x464a   :  { %v4599_v13 = vpop.f32.mrf.mxu2 }
0x468f   :  { %v4659_v60 = vpop.permute.xlu2 %4658 }
0x469f   :  { %v4655_v1 = vpop.permute.xlu1 %4654 }
0x46a3   :  { %v4651_v51 = vpop.permute.xlu0 %4650 }
0x46a4   :  { %v4661_v11 = vsel %vm258_vm1, %v4597_v8, %v4651_v51 }
0x46a5   :  { %v4662_v57 = vsel %vm549_vm6, %v4661_v11, %v4655_v1 }
0x46a6   :  { %v4663_v28 = vsel %vm551_vm7, %v4662_v57, %v4659_v60 }
0x46a7   :  { %v4664_v6 = vpack.c.bf16 %v4663_v28, %v4663_v28 }
0x46a9   :  { %6445 = vmatmul.msk.bf16.vlgmr.msra.gmra.mxu2 %vm195_vm0, %v4664_v6 }
0x472c   :  { %v4677_v21 = vpop.f32.mrf.mxu2 }
0x472d   :  { %v4678_v33 = vadd.f32 %v8348_v12, %v4677_v21 }
0x472f   :  { %v4681_v0 = vadd.f32 %v4678_v33, %v8493_v36 }
0x4731   :  { %v4682_v63 = vsel %vm195_vm0, %v4681_v0, 0.0 }
0x4732   :  { %4683 = vadd.xlane.f32.xlu0 %v4682_v63 }
0x4734   :  { %v4679_v17 = vpop.f32.mrf.mxu2 }
0x47a5   :  { %v4684_v40 = vpop.xlane.xlu0 %4683 }
0x47a6   :  { %v4685_v2 = vmul.f32 %v4684_v40, %v7380_v47 }
0x47a8   :  { %v4686_v56 = vsub.f32 %v4681_v0, %v4685_v2 }
0x47aa   :  { %v4687_v5 = vmul.f32 %v4686_v56, %v4686_v56 }
0x47ac   :  { %v4688_v22 = vsel %vm195_vm0, %v4687_v5, 0.0 }
0x47ad   :  { %4689 = vadd.xlane.f32.xlu1 %v4688_v22 }
0x4820   :  { %v4690_v53 = vpop.xlane.xlu1 %4689 }
0x4821   :  { %v4691_v37 = vmul.f32 %v4690_v53, %v7380_v47 }
0x4823   :  { %v4692_v41 = vadd.f32 1e-05, %v4691_v37 }
0x4825   :  { %6771 = vrsqrt.f32 %v4692_v41  ;;  %vm4699_vm5 = vweird.f32 %v4692_v41 }
0x482b   :  { %v6772_v12 = vpop.eup %6771 }
0x482c   :  { %v4694_v59 = vmul.f32 %v6772_v12, %v4692_v41  ;;  %vm4700_vm4 = vweird.f32 %v6772_v12 }
0x482d   :  { %vm4701_vm8 = vmor %vm4699_vm5, %vm4700_vm4 }
0x482e   :  { %v4695_v36 = vmul.f32 %v6772_v12, %v4694_v59 }
0x4830   :  { %v4696_v24 = vmul.f32 0.5, %v4695_v36 }
0x4832   :  { %v4697_v30 = vsub.f32 1.5, %v4696_v24 }
0x4834   :  { %v4698_v29 = vmul.f32 %v6772_v12, %v4697_v30 }
0x4836   :  { %v4702_v52 = vsel %vm4701_vm8, %v6772_v12, %v4698_v29 }
0x4837   :  { %v4703_v61 = vmul.f32 %v4702_v52, %v4686_v56 }
0x4839   :  { %v4704_v7 = vmul.f32 %v8356_v39, %v4703_v61 }
0x483b   :  { %v4705_v32 = vadd.f32 %v8359_v31, %v4704_v7 }
0x483d   :  { %v4706_v15 = vpack.c.bf16 %v4705_v32, %v4705_v32 }
0x483f   :  { %6446 = vmatmul.msk.bf16.vlgmr.msra.gmra.mxu3 %vm195_vm0, %v4706_v15 }
0x48c2   :  { %v4719_v27 = vpop.f32.mrf.mxu3 }
0x48c3   :  { %v4720_v19 = vadd.f32 %v8366_v62, %v4719_v27 }
0x48c5   :  { %v4723_v45 = vmax.f32 %v4720_v19, 0.0 }
0x48c7   :  { %v4724_v35 = vpack.c.bf16 %v4723_v45, %v4723_v45 }
0x48c9   :  { %6447 = vmatmul.msk.bf16.vlgmr.msrb.gmra.mxu0 %vm8999_vm10, %v4724_v35 }
0x48ca   :  { %v4721_v16 = vpop.f32.mrf.mxu3 }
0x4946   :  { %v4737_v4 = vpop.f32.mrf.mxu0 }
0x4947   :  { %v4738_v50 = vadd.f32 %v8370_v9, %v4737_v4 }
0x4949   :  { %v4741_v55 = vadd.f32 %v4738_v50, %v4705_v32 }
0x494b   :  { %v4742_v48 = vsel %vm195_vm0, %v4741_v55, 0.0 }
0x494c   :  { %4743 = vadd.xlane.f32.xlu2 %v4742_v48 }
0x494e   :  { %v4739_v39 = vpop.f32.mrf.mxu0 }
0x49bf   :  { %v4744_v31 = vpop.xlane.xlu2 %4743 }
0x49c0   :  { %v4745_v44 = vmul.f32 %v4744_v31, %v7380_v47 }
0x49c2   :  { %v4746_v8 = vsub.f32 %v4741_v55, %v4745_v44 }
0x49c4   :  { %v4747_v13 = vmul.f32 %v4746_v8, %v4746_v8 }
0x49c6   :  { %v4748_v62 = vsel %vm195_vm0, %v4747_v13, 0.0 }
0x49c7   :  { %4749 = vadd.xlane.f32.xlu0 %v4748_v62 }
0x4a3a   :  { %v4750_v51 = vpop.xlane.xlu0 %4749 }
0x4a3b   :  { %v4751_v1 = vmul.f32 %v4750_v51, %v7380_v47 }
0x4a3d   :  { %v4752_v11 = vadd.f32 1e-05, %v4751_v1 }
0x4a3f   :  { %6773 = vrsqrt.f32 %v4752_v11  ;;  %vm4759_vm12 = vweird.f32 %v4752_v11 }
0x4a45   :  { %v6774_v60 = vpop.eup %6773 }
0x4a46   :  { %v4754_v9 = vmul.f32 %v6774_v60, %v4752_v11  ;;  %vm4760_vm11 = vweird.f32 %v6774_v60 }
0x4a47   :  { %vm4761_vm13 = vmor %vm4759_vm12, %vm4760_vm11 }
0x4a48   :  { %v4755_v57 = vmul.f32 %v6774_v60, %v4754_v9 }
0x4a4a   :  { %v4756_v28 = vmul.f32 0.5, %v4755_v57 }
0x4a4c   :  { %v4757_v6 = vsub.f32 1.5, %v4756_v28 }
0x4a4e   :  { %v4758_v21 = vmul.f32 %v6774_v60, %v4757_v6 }
0x4a50   :  { %v4762_v33 = vsel %vm4761_vm13, %v6774_v60, %v4758_v21 }
0x4a51   :  { %v4763_v0 = vmul.f32 %v4762_v33, %v4746_v8 }
0x4a53   :  { %v4764_v63 = vmul.f32 %v8377_v34, %v4763_v0 }
0x4a55   :  { %v8572_v17 = vadd.f32 %v8380_v46, %v4764_v63 }
0x4a57   :  { %v4766_v40 = vpack.c.bf16 %v8572_v17, %v8572_v17 }
0x4a59   :  { %6448 = vmatmul.msk.bf16.vlgmr.msrb.gmra.mxu1 %vm195_vm0, %v4766_v40 }
0x4ad6   :  { %v4779_v2 = vpop.f32.mrf.mxu1 }
0x4ad7   :  { %v4780_v56 = vadd.f32 %v8391_v49, %v4779_v2 }
0x4ad9   :  { %v4783_v5 = vpack.c.bf16 %v4780_v56, %v4780_v56 }
0x4adb   :  { %v4785_v22 = vunpack.c.l.b16 %v4783_v5 }
0x4add   :  { %v8578_v53 = vpack.c.b16 %v4785_v22, %v4785_v22 }
0x4ade   :  { %v4781_v37 = vpop.f32.mrf.mxu1 }
0x4adf   :  { %4833 = vrot.lane.b32.xlu2 %v8578_v53, %s7122_s15  ;;  %4808 = vrot.lane.b32.xlu0 %v8578_v53, %s7126_s0 }
0x4ae0   :  { %4810 = vrot.lane.b32.xlu1 %v8578_v53, %s7123_s16 }
0x4ae7   :  { %4856 = vrot.lane.b32.xlu0 %v8578_v53, %s7125_s18 }
0x4ae8   :  { %4831 = vrot.lane.b32.xlu1 %v8578_v53, %s7121_s30 }
0x4aef   :  { %4854 = vrot.lane.b32.xlu0 %v8578_v53, %s7124_s17 }
0x4af0   :  { %4787 = vrot.lane.b32.xlu1 %v8578_v53, %s7127_s19 }
0x4b39   :  { %v4834_v34 = vpop.permute.xlu2 %4833 }
0x4b3a   :  { %v4839_v46 = vsel %vm258_vm1, %v4834_v34, 0 }
0x4b3b   :  { %4848 = vmatpush.bf16.xpose.msra.mxu0 %v4839_v46 }
0x4b51   :  { %v4809_v49 = vpop.permute.xlu0 %4808 }
0x4b52   :  { %v4811_v41 = vpop.permute.xlu1 %4810 }
0x4b53   :  { %v4816_v12 = vsel %vm258_vm1, %v4811_v41, 0 }
0x4b54   :  { %4825 = vmatpush.bf16.xpose.msrb.mxu3 %v4816_v12 }
0x4b59   :  { %v4857_v59 = vpop.permute.xlu0 %4856 }
0x4b5a   :  { %v4862_v36 = vsel %vm258_vm1, %v4857_v59, 0  ;;  %v4832_v24 = vpop.permute.xlu1 %4831 }
0x4b5b   :  { %6450 = vmatmul.msk.bf16.vlgmr.msrb.gmra.mxu3 %vm258_vm1, %v4809_v49  ;;  %6451 = vmatmul.msk.bf16.vlgmr.msra.gmra.mxu0 %vm258_vm1, %v4832_v24 }
0x4b5c   :  { %4871 = vmatpush.bf16.xpose.msra.mxu1 %v4862_v36 }
0x4b61   :  { %v4855_v30 = vpop.permute.xlu0 %4854 }
0x4b62   :  { %v4788_v29 = vpop.permute.xlu1 %4787 }
0x4b63   :  { %v4793_v52 = vsel %vm258_vm1, %v4788_v29, 0  ;;  %6452 = vmatmul.msk.bf16.vlgmr.msra.gmra.mxu1 %vm258_vm1, %v4855_v30 }
0x4b64   :  { %4802 = vmatpush.bf16.xpose.msrb.mxu2 %v4793_v52 }
0x4b6b   :  { %6449 = vmatmul.msk.bf16.vlgmr.msrb.gmra.mxu2 %vm258_vm1, %v4783_v5 }
0x4bd8   :  { %v4850_v61 = vpop.f32.mrf.mxu0 }
0x4bd9   :  { %v4879_v7 = vmul.f32 0.35355338, %v4850_v61 }
0x4bdb   :  { %v4887_v32 = vsel %vm258_vm1, %v4879_v7, -inf }
0x4bdc   :  { %4888 = vmax.xlane.f32.xlu0 %v4887_v32 }
0x4bde   :  { %v4827_v15 = vpop.f32.mrf.mxu3 }
0x4bdf   :  { %v4878_v27 = vmul.f32 0.35355338, %v4827_v15 }
0x4be0   :  { %v4852_v19 = vpop.f32.mrf.mxu0  ;;  %v4873_v45 = vpop.f32.mrf.mxu1 }
0x4be1   :  { %v4880_v35 = vmul.f32 0.35355338, %v4873_v45  ;;  %v4884_v16 = vsel %vm258_vm1, %v4878_v27, -inf }
0x4be2   :  { %4885 = vmax.xlane.f32.xlu2 %v4884_v16 }
0x4be3   :  { %v4890_v4 = vsel %vm258_vm1, %v4880_v35, -inf }
0x4be4   :  { %4891 = vmax.xlane.f32.xlu1 %v4890_v4 }
0x4be6   :  { %v4829_v50 = vpop.f32.mrf.mxu3 }
0x4be8   :  { %v4875_v55 = vpop.f32.mrf.mxu1 }
0x4bee   :  { %v4804_v48 = vpop.f32.mrf.mxu2 }
0x4bef   :  { %v4877_v39 = vmul.f32 0.35355338, %v4804_v48 }
0x4bf1   :  { %v4881_v31 = vsel %vm258_vm1, %v4877_v39, -inf }
0x4bf2   :  { %4882 = vmax.xlane.f32.xlu2 %v4881_v31 }
0x4bf6   :  { %v4806_v44 = vpop.f32.mrf.mxu2 }
0x4c4f   :  { %v4889_v8 = vpop.xlane.xlu0 %4888 }
0x4c50   :  { %v4895_v13 = vsub.f32 %v4879_v7, %v4889_v8 }
0x4c52   :  { %v4901_v62 = vmul.f32 1.442695, %v4895_v13 }
0x4c54   :  { %6775 = vpow2.f32 %v4901_v62 }
0x4c55   :  { %v4886_v51 = vpop.xlane.xlu2 %4885 }
0x4c56   :  { %v4894_v1 = vsub.f32 %v4878_v27, %v4886_v51 }
0x4c57   :  { %v4892_v11 = vpop.xlane.xlu1 %4891 }
0x4c58   :  { %v4899_v60 = vmul.f32 1.442695, %v4894_v1  ;;  %v4896_v9 = vsub.f32 %v4880_v35, %v4892_v11 }
0x4c5a   :  { %v8606_v57 = vpop.eup %6775  ;;  %6777 = vpow2.f32 %v4899_v60  ;;  %v4903_v28 = vmul.f32 1.442695, %v4896_v9 }
0x4c5b   :  { %v4911_v6 = vsel %vm258_vm1, %v8606_v57, 0.0 }
0x4c5c   :  { %6779 = vpow2.f32 %v4903_v28  ;;  %4912 = vadd.xlane.f32.xlu1 %v4911_v6 }
0x4c60   :  { %v8610_v21 = vpop.eup %6777 }
0x4c61   :  { %v4908_v33 = vsel %vm258_vm1, %v8610_v21, 0.0 }
0x4c62   :  { %v8614_v0 = vpop.eup %6779  ;;  %4909 = vadd.xlane.f32.xlu0 %v4908_v33 }
0x4c63   :  { %v4914_v63 = vsel %vm258_vm1, %v8614_v0, 0.0 }
0x4c64   :  { %4915 = vadd.xlane.f32.xlu2 %v4914_v63 }
0x4c65   :  { %v4883_v40 = vpop.xlane.xlu2 %4882 }
0x4c66   :  { %v4893_v2 = vsub.f32 %v4877_v39, %v4883_v40 }
0x4c68   :  { %v4897_v56 = vmul.f32 1.442695, %v4893_v2 }
0x4c6a   :  { %6781 = vpow2.f32 %v4897_v56 }
0x4c70   :  { %v8626_v5 = vpop.eup %6781 }
0x4c71   :  { %v4905_v22 = vsel %vm258_vm1, %v8626_v5, 0.0 }
0x4c75   :  { %5023 = vrot.lane.b32.xlu1 %v8578_v53, %s7128_s1 }
0x4c76   :  { %5002 = vrot.lane.b32.xlu0 %v8578_v53, %s7130_s10 }
0x4c7c   :  { %5044 = vrot.lane.b32.xlu2 %v8578_v53, %s7129_s25 }
0x4c7d   :  { %4981 = vrot.lane.b32.xlu1 %v8578_v53, %s7112_s21 }
0x4ca0   :  { %4906 = vadd.xlane.f32.xlu0 %v4905_v22 }
0x4ccf   :  { %v4913_v37 = vpop.xlane.xlu1 %4912 }
0x4cd0   :  { %6783 = vrcp.f32 %v4913_v37  ;;  %v4956_v36 = vand.u32 2147483648, %v4913_v37  ;;  %vm4950_vm14 = vweird.f32 %v4913_v37  ;;  %v4954_v52 = vand.u32 2147483647, %v4913_v37 }
0x4cd2   :  { %v4957_v19 = vor.u32 1.1754944e-38, %v4956_v36  ;;  %vm4955_vm4 = vcmp.eq.f32.partialorder %v4954_v52, 8.507059e+37 }
0x4cd5   :  { %v4910_v34 = vpop.xlane.xlu0 %4909 }
0x4cd6   :  { %v6784_v46 = vpop.eup %6783  ;;  %6785 = vrcp.f32 %v4910_v34  ;;  %v4942_v45 = vand.u32 2147483648, %v4910_v34  ;;  %v4940_v4 = vand.u32 2147483647, %v4910_v34  ;;  %vm4936_vm5 = vweird.f32 %v4910_v34 }
0x4cd7   :  { %v4946_v49 = vmul.f32 %v6784_v46, %v4913_v37  ;;  %v4916_v41 = vpop.xlane.xlu2 %4915  ;;  %vm4951_vm9 = vweird.f32 %v6784_v46 }
0x4cd8   :  { %6787 = vrcp.f32 %v4916_v41  ;;  %vm8630_vm15 = vmor %vm4950_vm14, %vm4951_vm9  ;;  %v4968_v55 = vand.u32 2147483647, %v4916_v41  ;;  %v4970_v48 = vand.u32 2147483648, %v4916_v41  ;;  %v4943_v8 = vor.u32 1.1754944e-38, %v4942_v45 }
0x4cd9   :  { %v4947_v12 = vsub.f32 1.0, %v4946_v49  ;;  %vm4941_vm11 = vcmp.eq.f32.partialorder %v4940_v4, 8.507059e+37  ;;  %vm4964_vm12 = vweird.f32 %v4916_v41 }
0x4cda   :  { %v4971_v11 = vor.u32 1.1754944e-38, %v4970_v48  ;;  %vm4969_vm9 = vcmp.eq.f32.partialorder %v4968_v55, 8.507059e+37 }
0x4cdb   :  { %v4948_v53 = vmul.f32 %v6784_v46, %v4947_v12 }
0x4cdc   :  { %v6786_v59 = vpop.eup %6785 }
0x4cdd   :  { %v4949_v24 = vadd.f32 %v6784_v46, %v4948_v53  ;;  %v4932_v30 = vmul.f32 %v6786_v59, %v4910_v34  ;;  %vm4937_vm3 = vweird.f32 %v6786_v59 }
0x4cde   :  { %v6788_v29 = vpop.eup %6787  ;;  %vm4938_vm10 = vmor %vm4936_vm5, %vm4937_vm3 }
0x4cdf   :  { %v4933_v7 = vsub.f32 1.0, %v4932_v30  ;;  %v4960_v32 = vmul.f32 %v6788_v29, %v4916_v41  ;;  %v5045_v15 = vpop.permute.xlu2 %5044  ;;  %v4953_v27 = vsel %vm8630_vm15, %v6784_v46, %v4949_v24  ;;  %vm4965_vm8 = vweird.f32 %v6788_v29 }
0x4ce0   :  { %v5050_v35 = vsel %vm456_vm2, %v5045_v15, 0  ;;  %v4958_v39 = vsel %vm4955_vm4, %v4957_v19, %v4953_v27  ;;  %vm4966_vm13 = vmor %vm4964_vm12, %vm4965_vm8 }
0x4ce1   :  { %v4934_v16 = vmul.f32 %v6786_v59, %v4933_v7  ;;  %v4961_v50 = vsub.f32 1.0, %v4960_v32  ;;  %5059 = vmatpush.bf16.msrb.mxu1 %v5050_v35  ;;  %v4975_v51 = vmul.f32 %v8606_v57, %v4958_v39 }
0x4ce3   :  { %v4935_v31 = vadd.f32 %v6786_v59, %v4934_v16  ;;  %v4962_v44 = vmul.f32 %v6788_v29, %v4961_v50  ;;  %v4979_v56 = vpack.c.bf16 %v4975_v51, %v4975_v51 }
0x4ce5   :  { %5171 = vmatpush.bf16.xpose.msra.mxu1 %v7415_v25  ;;  %v4939_v13 = vsel %vm4938_vm10, %v6786_v59, %v4935_v31  ;;  %v4963_v62 = vadd.f32 %v6788_v29, %v4962_v44 }
0x4ce6   :  { %v4944_v1 = vsel %vm4941_vm11, %v4943_v8, %v4939_v13 }
0x4ce7   :  { %v4974_v60 = vmul.f32 %v8610_v21, %v4944_v1  ;;  %v4967_v9 = vsel %vm4966_vm13, %v6788_v29, %v4963_v62  ;;  %v5024_v28 = vpop.permute.xlu1 %5023  ;;  %v8650_v21 = vld [vmem:[#allocation5] sm:$0xff] }
0x4ce8   :  { %v4972_v6 = vsel %vm4969_vm9, %v4971_v11, %v4967_v9  ;;  %v5029_v33 = vsel %vm456_vm2, %v5024_v28, 0  ;;  %v5003_v63 = vpop.permute.xlu0 %5002 }
0x4ce9   :  { %v4976_v40 = vmul.f32 %v8614_v0, %v4972_v6  ;;  %v5008_v2 = vsel %vm456_vm2, %v5003_v63, 0  ;;  %5038 = vmatpush.bf16.msrb.mxu0 %v5029_v33  ;;  %v4978_v57 = vpack.c.bf16 %v4974_v60, %v4974_v60 }
0x4cea   :  { %5017 = vmatpush.bf16.msra.mxu3 %v5008_v2 }
0x4ceb   :  { %v4980_v22 = vpack.c.bf16 %v4976_v40, %v4976_v40 }
0x4cec   :  { %6455 = vmatmul.msk.bf16.vlgmr.msrb.gmra.mxu0 %vm258_vm1, %v4979_v56 }
0x4ced   :  { %5150 = vmatpush.bf16.xpose.msra.mxu0 %v7330_v20  ;;  %6454 = vmatmul.msk.bf16.vlgmr.msra.gmra.mxu3 %vm258_vm1, %v4978_v57 }
0x4cee   :  { %5132 = vmatpush.bf16.msrb.mxu3 %v8466_v3  ;;  %6456 = vmatmul.msk.bf16.vlgmr.msrb.gmra.mxu1 %vm258_vm1, %v4980_v22  ;;  %v8658_v3 = vld [vmem:[%s8977_s4 + $0x8] sm:$0xff] }
0x4cef   :  { %5343 = vmatpush.bf16.msrb.mxu1 %v7459_v58  ;;  %v4982_v0 = vpop.permute.xlu1 %4981 }
0x4cf0   :  { %v4987_v37 = vsel %vm456_vm2, %v4982_v0, 0  ;;  %v8679_v0 = vld [vmem:[#allocation11 + $0x3] ss:$0 sm:$0xff] }
0x4cf1   :  { %4996 = vmatpush.bf16.msra.mxu2 %v4987_v37 }
0x4cf2   :  { %5133 = vmatpush.bf16.msrb.mxu3 %v8650_v21 }
0x4cf5   :  { %5327 = vmatpush.bf16.msrb.mxu0 %v7447_v23  ;;  %5090 = vmatpush.bf16.msrb.mxu2 %v8658_v3 }
0x4cf6   :  { %5207 = vmatpush.bf16.xpose.msra.mxu3 %v7385_v54 }
0x4cf9   :  { %5091 = vmatpush.bf16.msrb.mxu2 %v8459_v10 }
0x4d13   :  { %v4907_v34 = vpop.xlane.xlu0 %4906 }
0x4d14   :  { %6789 = vrcp.f32 %v4907_v34  ;;  %v4928_v12 = vand.u32 2147483648, %v4907_v34  ;;  %v4926_v59 = vand.u32 2147483647, %v4907_v34  ;;  %vm4922_vm15 = vweird.f32 %v4907_v34 }
0x4d16   :  { %v4929_v24 = vor.u32 1.1754944e-38, %v4928_v12  ;;  %vm4927_vm4 = vcmp.eq.f32.partialorder %v4926_v59, 8.507059e+37  ;;  %v8694_v12 = vld [vmem:[%s8979_s6] ss:$0 sm:$0xff] }
0x4d1a   :  { %v6790_v46 = vpop.eup %6789 }
0x4d1b   :  { %v4918_v49 = vmul.f32 %v6790_v46, %v4907_v34  ;;  %vm4923_vm14 = vweird.f32 %v6790_v46  ;;  %v8682_v34 = vld [vmem:[#allocation11 + $0x4] ss:$0 sm:$0xff] }
0x4d1c   :  { %vm4924_vm3 = vmor %vm4922_vm15, %vm4923_vm14 }
0x4d1d   :  { %v4919_v41 = vsub.f32 1.0, %v4918_v49 }
0x4d1f   :  { %v4920_v53 = vmul.f32 %v6790_v46, %v4919_v41 }
0x4d21   :  { %v4921_v36 = vadd.f32 %v6790_v46, %v4920_v53 }
0x4d23   :  { %v4925_v30 = vsel %vm4924_vm3, %v6790_v46, %v4921_v36 }
0x4d24   :  { %v4930_v29 = vsel %vm4927_vm4, %v4929_v24, %v4925_v30  ;;  %v8698_v24 = vld [vmem:[#allocation8 + $0x8] sm:$0xff] }
0x4d25   :  { %v4973_v52 = vmul.f32 %v8626_v5, %v4930_v29 }
0x4d27   :  { %v4977_v61 = vpack.c.bf16 %v4973_v52, %v4973_v52  ;;  %v8703_v52 = vld [vmem:[#allocation8] sm:$0xff] }
0x4d29   :  { %6453 = vmatmul.msk.bf16.vlgmr.msra.gmra.mxu2 %vm258_vm1, %v4977_v61 }
0x4d2a   :  { %5189 = vmatpush.bf16.xpose.msra.mxu2 %v7360_v18 }
0x4d69   :  { %v5040_v10 = vpop.f32.mrf.mxu0 }
0x4d6a   :  { %5070 = vrot.lane.b32.xlu1 %v5040_v10, %s7131_s28 }
0x4d6b   :  { %v5061_v7 = vpop.f32.mrf.mxu1 }
0x4d70   :  { %v5019_v32 = vpop.f32.mrf.mxu3 }
0x4d71   :  { %5066 = vrot.lane.b32.xlu2 %v5019_v32, %s7120_s26  ;;  %v5042_v15 = vpop.f32.mrf.mxu0  ;;  %v8715_v32 = vld [vmem:[%s8985_s12 + $0x18] sm:$0xff] }
0x4d72   :  { %v8718_v15 = vld [vmem:[#allocation10] sm:$0xff] }
0x4d73   :  { %v5063_v27 = vpop.f32.mrf.mxu1 }
0x4d74   :  { %v8724_v27 = vld [vmem:[%s8985_s12 + $0x10] sm:$0xff] }
0x4d78   :  { %v5021_v19 = vpop.f32.mrf.mxu3 }
0x4d79   :  { %5074 = vrot.lane.b32.xlu2 %v5061_v7, %s7132_s29  ;;  %v8709_v7 = vld [vmem:[#allocation10 + $0x8] sm:$0xff] }
0x4dac   :  { %v4998_v45 = vpop.f32.mrf.mxu2 }
0x4db4   :  { %v5000_v35 = vpop.f32.mrf.mxu2 }
0x4db5   :  { %v8731_v35 = vld [vmem:[%s8985_s12 + $0x8] sm:$0xff] }
0x4dcb   :  { %v5067_v5 = vpop.permute.xlu2 %5066 }
0x4dcc   :  { %v5077_v16 = vsel %vm258_vm1, %v4998_v45, %v5067_v5  ;;  %v8738_v5 = vld [vmem:[%s8985_s12] sm:$0xff] }
0x4dd3   :  { %v5075_v50 = vpop.permute.xlu2 %5074 }
0x4ddc   :  { %v5071_v4 = vpop.permute.xlu1 %5070 }
0x4ddd   :  { %v5078_v55 = vsel %vm549_vm6, %v5077_v16, %v5071_v4 }
0x4dde   :  { %v5079_v48 = vsel %vm551_vm7, %v5078_v55, %v5075_v50 }
0x4ddf   :  { %v5080_v39 = vpack.c.bf16 %v5079_v48, %v5079_v48 }
0x4de1   :  { %6457 = vmatmul.msk.bf16.vlgmr.msrb.gmra.mxu2 %vm195_vm0, %v5080_v39 }
0x4de2   :  { %5359 = vmatpush.bf16.msrb.mxu2 %v7444_v14 }
0x4e64   :  { %v5093_v31 = vpop.f32.mrf.mxu2 }
0x4e65   :  { %v5094_v44 = vadd.f32 %v8483_v42, %v5093_v31 }
0x4e67   :  { %v5097_v8 = vadd.f32 %v5094_v44, %v8572_v17 }
0x4e69   :  { %v5098_v13 = vsel %vm195_vm0, %v5097_v8, 0.0 }
0x4e6a   :  { %5099 = vadd.xlane.f32.xlu1 %v5098_v13 }
0x4e6c   :  { %v5095_v62 = vpop.f32.mrf.mxu2 }
0x4edd   :  { %v5100_v51 = vpop.xlane.xlu1 %5099 }
0x4ede   :  { %v5101_v1 = vmul.f32 %v5100_v51, %v7380_v47 }
0x4ee0   :  { %v5102_v11 = vsub.f32 %v5097_v8, %v5101_v1 }
0x4ee2   :  { %v5103_v60 = vmul.f32 %v5102_v11, %v5102_v11 }
0x4ee4   :  { %v5104_v9 = vsel %vm195_vm0, %v5103_v60, 0.0 }
0x4ee5   :  { %5105 = vadd.xlane.f32.xlu2 %v5104_v9 }
0x4f58   :  { %v5106_v28 = vpop.xlane.xlu2 %5105 }
0x4f59   :  { %v5107_v6 = vmul.f32 %v5106_v28, %v7380_v47 }
0x4f5b   :  { %v5108_v33 = vadd.f32 1e-05, %v5107_v6 }
0x4f5d   :  { %6791 = vrsqrt.f32 %v5108_v33  ;;  %vm5115_vm8 = vweird.f32 %v5108_v33 }
0x4f63   :  { %v6792_v42 = vpop.eup %6791 }
0x4f64   :  { %v5110_v63 = vmul.f32 %v6792_v42, %v5108_v33  ;;  %vm5116_vm5 = vweird.f32 %v6792_v42 }
0x4f65   :  { %vm5117_vm10 = vmor %vm5115_vm8, %vm5116_vm5 }
0x4f66   :  { %v5111_v17 = vmul.f32 %v6792_v42, %v5110_v63 }
0x4f68   :  { %v5112_v40 = vmul.f32 0.5, %v5111_v17 }
0x4f6a   :  { %v5113_v2 = vsub.f32 1.5, %v5112_v40 }
0x4f6c   :  { %v5114_v56 = vmul.f32 %v6792_v42, %v5113_v2 }
0x4f6e   :  { %v5118_v57 = vsel %vm5117_vm10, %v6792_v42, %v5114_v56 }
0x4f6f   :  { %v5119_v22 = vmul.f32 %v5118_v57, %v5102_v11 }
0x4f71   :  { %v5120_v37 = vmul.f32 %v8679_v0, %v5119_v22 }
0x4f73   :  { %v8685_v46 = vadd.f32 %v8682_v34, %v5120_v37 }
0x4f75   :  { %v5122_v49 = vpack.c.bf16 %v8685_v46, %v8685_v46 }
0x4f77   :  { %6458 = vmatmul.msk.bf16.vlgmr.msrb.gmra.mxu3 %vm195_vm0, %v5122_v49 }
0x4f78   :  { %5375 = vmatpush.bf16.msrb.mxu3 %v7452_v43 }
0x4ffa   :  { %v5135_v41 = vpop.f32.mrf.mxu3 }
0x4ffb   :  { %v5136_v53 = vadd.f32 %v8694_v12, %v5135_v41 }
0x4ffd   :  { %v5139_v59 = vpack.c.bf16 %v5136_v53, %v5136_v53 }
0x4fff   :  { %v5157_v36 = vunpack.c.l.b16 %v5139_v59  ;;  %6459 = vmatmul.msk.bf16.vlgmr.msra.gmra.mxu0 %vm258_vm1, %v5139_v59 }
0x5000   :  { %5406 = vmatpush.bf16.msra.mxu0 %v8698_v24 }
0x5001   :  { %v5158_v30 = vpack.c.b16 %v5157_v36, %v5157_v36 }
0x5002   :  { %v5137_v29 = vpop.f32.mrf.mxu3 }
0x5003   :  { %5159 = vrot.lane.b32.xlu1 %v5158_v30, %s7126_s0  ;;  %5177 = vrot.lane.b32.xlu0 %v5158_v30, %s7121_s30 }
0x5004   :  { %5407 = vmatpush.bf16.msra.mxu0 %v8703_v52 }
0x500b   :  { %5195 = vrot.lane.b32.xlu0 %v5158_v30, %s7124_s17 }
0x5075   :  { %v5160_v61 = vpop.permute.xlu1 %5159  ;;  %v5178_v10 = vpop.permute.xlu0 %5177 }
0x5076   :  { %6460 = vmatmul.msk.bf16.vlgmr.msra.gmra.mxu1 %vm258_vm1, %v5160_v61  ;;  %6461 = vmatmul.msk.bf16.vlgmr.msra.gmra.mxu2 %vm258_vm1, %v5178_v10 }
0x5077   :  { %5448 = vmatpush.bf16.msra.mxu1 %v8709_v7  ;;  %5464 = vmatpush.bf16.msra.mxu2 %v8715_v32 }
0x507b   :  { %5449 = vmatpush.bf16.msra.mxu1 %v8718_v15  ;;  %5465 = vmatpush.bf16.msra.mxu2 %v8724_v27 }
0x507c   :  { %v5152_v19 = vpop.f32.mrf.mxu0 }
0x507d   :  { %v5196_v45 = vpop.permute.xlu0 %5195  ;;  %v5213_v51 = vmul.f32 0.35355338, %v5152_v19 }
0x507e   :  { %6462 = vmatmul.msk.bf16.vlgmr.msra.gmra.mxu3 %vm258_vm1, %v5196_v45 }
0x507f   :  { %5466 = vmatpush.bf16.msra.mxu2 %v8731_v35  ;;  %5508 = vmatpush.bf16.msra.mxu3 %v8510_v38  ;;  %v5217_v1 = vsel %vm549_vm6, %v5213_v51, -inf }
0x5083   :  { %5467 = vmatpush.bf16.msra.mxu2 %v8738_v5  ;;  %5509 = vmatpush.bf16.msra.mxu3 %v8516_v26 }
0x5084   :  { %v5154_v16 = vpop.f32.mrf.mxu0 }
0x50f3   :  { %v5173_v4 = vpop.f32.mrf.mxu1 }
0x50f4   :  { %v5214_v31 = vmul.f32 0.35355338, %v5173_v4 }
0x50f6   :  { %v5220_v13 = vsel %vm549_vm6, %v5214_v31, -inf }
0x50f9   :  { %v5191_v50 = vpop.f32.mrf.mxu2 }
0x50fa   :  { %v5215_v55 = vmul.f32 0.35355338, %v5191_v50 }
0x50fb   :  { %v5175_v48 = vpop.f32.mrf.mxu1 }
0x50fc   :  { %v5223_v39 = vsel %vm549_vm6, %v5215_v55, -inf }
0x50fd   :  { %5224 = vmax.xlane.f32.xlu2 %v5223_v39 }
0x5101   :  { %v5193_v44 = vpop.f32.mrf.mxu2  ;;  %v5209_v38 = vpop.f32.mrf.mxu3 }
0x5102   :  { %v5216_v8 = vmul.f32 0.35355338, %v5209_v38 }
0x5104   :  { %v5226_v62 = vsel %vm549_vm6, %v5216_v8, -inf }
0x5105   :  { %5221 = vmax.xlane.f32.xlu2 %v5220_v13  ;;  %5227 = vmax.xlane.f32.xlu0 %v5226_v62 }
0x5109   :  { %v5211_v26 = vpop.f32.mrf.mxu3 }
0x510d   :  { %5218 = vmax.xlane.f32.xlu2 %v5217_v1 }
0x5170   :  { %v5225_v11 = vpop.xlane.xlu2 %5224 }
0x5171   :  { %v5231_v60 = vsub.f32 %v5215_v55, %v5225_v11 }
0x5173   :  { %v5237_v9 = vmul.f32 1.442695, %v5231_v60 }
0x5175   :  { %6793 = vpow2.f32 %v5237_v9 }
0x5178   :  { %v5222_v28 = vpop.xlane.xlu2 %5221  ;;  %v5228_v6 = vpop.xlane.xlu0 %5227 }
0x5179   :  { %v5230_v33 = vsub.f32 %v5214_v31, %v5222_v28  ;;  %v5232_v42 = vsub.f32 %v5216_v8, %v5228_v6 }
0x517b   :  { %v6794_v63 = vpop.eup %6793  ;;  %v5235_v17 = vmul.f32 1.442695, %v5230_v33  ;;  %v5239_v40 = vmul.f32 1.442695, %v5232_v42 }
0x517c   :  { %v5247_v2 = vsel %vm549_vm6, %v6794_v63, 0.0 }
0x517d   :  { %6795 = vpow2.f32 %v5235_v17  ;;  %5248 = vadd.xlane.f32.xlu2 %v5247_v2 }
0x517e   :  { %6797 = vpow2.f32 %v5239_v40 }
0x5180   :  { %v5219_v56 = vpop.xlane.xlu2 %5218 }
0x5181   :  { %v5229_v57 = vsub.f32 %v5213_v51, %v5219_v56 }
0x5183   :  { %v8747_v22 = vpop.eup %6795  ;;  %v5233_v37 = vmul.f32 1.442695, %v5229_v57 }
0x5184   :  { %v8749_v49 = vpop.eup %6797  ;;  %v5244_v41 = vsel %vm549_vm6, %v8747_v22, 0.0 }
0x5185   :  { %6799 = vpow2.f32 %v5233_v37  ;;  %v5250_v53 = vsel %vm549_vm6, %v8749_v49, 0.0  ;;  %5245 = vadd.xlane.f32.xlu2 %v5244_v41 }
0x5186   :  { %5251 = vadd.xlane.f32.xlu1 %v5250_v53 }
0x518b   :  { %v8755_v59 = vpop.eup %6799 }
0x518c   :  { %v5241_v36 = vsel %vm549_vm6, %v8755_v59, 0.0 }
0x518d   :  { %5242 = vadd.xlane.f32.xlu2 %v5241_v36 }
0x51f0   :  { %v5249_v30 = vpop.xlane.xlu2 %5248 }
0x51f1   :  { %6801 = vrcp.f32 %v5249_v30  ;;  %v5292_v16 = vand.u32 2147483648, %v5249_v30  ;;  %v5290_v50 = vand.u32 2147483647, %v5249_v30  ;;  %vm5286_vm12 = vweird.f32 %v5249_v30 }
0x51f3   :  { %v5293_v39 = vor.u32 1.1754944e-38, %v5292_v16  ;;  %vm5291_vm9 = vcmp.eq.f32.partialorder %v5290_v50, 8.507059e+37 }
0x51f7   :  { %v6802_v29 = vpop.eup %6801 }
0x51f8   :  { %v5282_v61 = vmul.f32 %v6802_v29, %v5249_v30  ;;  %v5246_v10 = vpop.xlane.xlu2 %5245  ;;  %vm5287_vm11 = vweird.f32 %v6802_v29 }
0x51f9   :  { %v5252_v19 = vpop.xlane.xlu1 %5251  ;;  %6803 = vrcp.f32 %v5246_v10  ;;  %vm5288_vm13 = vmor %vm5286_vm12, %vm5287_vm11  ;;  %v5276_v11 = vand.u32 2147483647, %v5246_v10  ;;  %v5278_v60 = vand.u32 2147483648, %v5246_v10  ;;  %vm5272_vm3 = vweird.f32 %v5246_v10 }
0x51fa   :  { %v5283_v45 = vsub.f32 1.0, %v5282_v61  ;;  %6805 = vrcp.f32 %v5252_v19  ;;  %v5306_v28 = vand.u32 2147483648, %v5252_v19  ;;  %v5304_v42 = vand.u32 2147483647, %v5252_v19 }
0x51fb   :  { %vm5300_vm4 = vweird.f32 %v5252_v19  ;;  %vm5277_vm10 = vcmp.eq.f32.partialorder %v5276_v11, 8.507059e+37 }
0x51fc   :  { %v5284_v4 = vmul.f32 %v6802_v29, %v5283_v45  ;;  %v5307_v56 = vor.u32 1.1754944e-38, %v5306_v28  ;;  %vm5305_vm11 = vcmp.eq.f32.partialorder %v5304_v42, 8.507059e+37  ;;  %v8773_v42 = vld [vmem:[#allocation11 + $0x1] ss:$0 sm:$0xff] }
0x51fe   :  { %v5285_v55 = vadd.f32 %v6802_v29, %v5284_v4 }
0x51ff   :  { %v6804_v48 = vpop.eup %6803 }
0x5200   :  { %v6806_v31 = vpop.eup %6805  ;;  %v5289_v44 = vsel %vm5288_vm13, %v6802_v29, %v5285_v55  ;;  %v5268_v38 = vmul.f32 %v6804_v48, %v5246_v10  ;;  %v5243_v8 = vpop.xlane.xlu2 %5242  ;;  %vm5273_vm14 = vweird.f32 %v6804_v48 }
0x5201   :  { %v5294_v13 = vsel %vm5291_vm9, %v5293_v39, %v5289_v44  ;;  %v5296_v62 = vmul.f32 %v6806_v31, %v5252_v19  ;;  %6807 = vrcp.f32 %v5243_v8  ;;  %vm5301_vm15 = vweird.f32 %v6806_v31  ;;  %vm5274_vm5 = vmor %vm5272_vm3, %vm5273_vm14 }
0x5202   :  { %v5311_v51 = vmul.f32 %v6794_v63, %v5294_v13  ;;  %v5269_v26 = vsub.f32 1.0, %v5268_v38  ;;  %v5279_v63 = vor.u32 1.1754944e-38, %v5278_v60  ;;  %vm5302_vm8 = vmor %vm5300_vm4, %vm5301_vm15  ;;  %v5264_v10 = vand.u32 2147483648, %v5243_v8 }
0x5203   :  { %v5297_v1 = vsub.f32 1.0, %v5296_v62  ;;  %v5262_v19 = vand.u32 2147483647, %v5243_v8  ;;  %vm5258_vm13 = vweird.f32 %v5243_v8 }
0x5204   :  { %v5315_v9 = vpack.c.bf16 %v5311_v51, %v5311_v51  ;;  %v5270_v6 = vmul.f32 %v6804_v48, %v5269_v26  ;;  %v5265_v55 = vor.u32 1.1754944e-38, %v5264_v10 }
0x5205   :  { %v5298_v33 = vmul.f32 %v6806_v31, %v5297_v1  ;;  %vm5263_vm14 = vcmp.eq.f32.partialorder %v5262_v19, 8.507059e+37 }
0x5206   :  { %v5271_v17 = vadd.f32 %v6804_v48, %v5270_v6  ;;  %6465 = vmatmul.msk.bf16.vlgmr.msrb.gmra.mxu2 %vm549_vm6, %v5315_v9 }
0x5207   :  { %v6808_v40 = vpop.eup %6807  ;;  %v5299_v2 = vadd.f32 %v6806_v31, %v5298_v33 }
0x5208   :  { %v5275_v57 = vsel %vm5274_vm5, %v6804_v48, %v5271_v17  ;;  %v5254_v37 = vmul.f32 %v6808_v40, %v5243_v8  ;;  %vm5259_vm12 = vweird.f32 %v6808_v40  ;;  %vm9002_vm5 = vcmask 523264  }
0x5209   :  { %v5303_v41 = vsel %vm5302_vm8, %v6806_v31, %v5299_v2  ;;  %v5280_v53 = vsel %vm5277_vm10, %v5279_v63, %v5275_v57  ;;  %vm5260_vm9 = vmor %vm5258_vm13, %vm5259_vm12 }
0x520a   :  { %v5308_v36 = vsel %vm5305_vm11, %v5307_v56, %v5303_v41  ;;  %v5310_v30 = vmul.f32 %v8747_v22, %v5280_v53  ;;  %v5255_v29 = vsub.f32 1.0, %v5254_v37 }
0x520b   :  { %v5312_v61 = vmul.f32 %v8749_v49, %v5308_v36 }
0x520c   :  { %v5314_v45 = vpack.c.bf16 %v5310_v30, %v5310_v30  ;;  %v5256_v16 = vmul.f32 %v6808_v40, %v5255_v29 }
0x520d   :  { %v5316_v4 = vpack.c.bf16 %v5312_v61, %v5312_v61 }
0x520e   :  { %v5257_v50 = vadd.f32 %v6808_v40, %v5256_v16  ;;  %6464 = vmatmul.msk.bf16.vlgmr.msrb.gmra.mxu1 %vm549_vm6, %v5314_v45 }
0x520f   :  { %6466 = vmatmul.msk.bf16.vlgmr.msrb.gmra.mxu3 %vm549_vm6, %v5316_v4 }
0x5210   :  { %v5261_v48 = vsel %vm5260_vm9, %v6808_v40, %v5257_v50 }
0x5211   :  { %v5266_v22 = vsel %vm5263_vm14, %v5265_v55, %v5261_v48  ;;  %v8781_v55 = vld [vmem:[#allocation11 + $0x5] ss:$0 sm:$0xff] }
0x5212   :  { %v5309_v39 = vmul.f32 %v8755_v59, %v5266_v22  ;;  %v8784_v22 = vld [vmem:[#allocation11 + $0x6] ss:$0 sm:$0xff] }
0x5214   :  { %v5313_v49 = vpack.c.bf16 %v5309_v39, %v5309_v39 }
0x5216   :  { %6463 = vmatmul.msk.bf16.vlgmr.msrb.gmra.mxu0 %vm549_vm6, %v5313_v49 }
0x5289   :  { %v5361_v31 = vpop.f32.mrf.mxu2 }
0x528a   :  { %5386 = vrot.lane.b32.xlu2 %v5361_v31, %s7131_s28 }
0x528b   :  { %v5345_v44 = vpop.f32.mrf.mxu1 }
0x528c   :  { %5382 = vrot.lane.b32.xlu0 %v5345_v44, %s7120_s26  ;;  %v8791_v44 = vld [vmem:[%s8984_s11] ss:$0 sm:$0xff] }
0x5291   :  { %v5363_v38 = vpop.f32.mrf.mxu2 }
0x5292   :  { %v5377_v8 = vpop.f32.mrf.mxu3 }
0x5293   :  { %v5329_v13 = vpop.f32.mrf.mxu0  ;;  %v5347_v62 = vpop.f32.mrf.mxu1 }
0x5294   :  { %5390 = vrot.lane.b32.xlu0 %v5377_v8, %s7132_s29 }
0x529a   :  { %v5379_v51 = vpop.f32.mrf.mxu3 }
0x529b   :  { %v5331_v26 = vpop.f32.mrf.mxu0 }
0x529c   :  { %v8795_v26 = vld [vmem:[#allocation11 + $0x2] ss:$0 sm:$0xff] }
0x52e4   :  { %v5387_v11 = vpop.permute.xlu2 %5386 }
0x52fe   :  { %v5383_v1 = vpop.permute.xlu0 %5382 }
0x52ff   :  { %v5393_v59 = vsel %vm258_vm1, %v5329_v13, %v5383_v1 }
0x5300   :  { %v5394_v9 = vsel %vm549_vm6, %v5393_v59, %v5387_v11 }
0x5306   :  { %v5391_v60 = vpop.permute.xlu0 %5390 }
0x5307   :  { %v5395_v28 = vsel %vm551_vm7, %v5394_v9, %v5391_v60 }
0x5308   :  { %v5396_v6 = vpack.c.bf16 %v5395_v28, %v5395_v28 }
0x530a   :  { %6467 = vmatmul.msk.bf16.vlgmr.msra.gmra.mxu0 %vm195_vm0, %v5396_v6 }
0x5387   :  { %v5409_v33 = vpop.f32.mrf.mxu0 }
0x5388   :  { %v5410_v17 = vadd.f32 %v8773_v42, %v5409_v33 }
0x538a   :  { %v5413_v40 = vadd.f32 %v5410_v17, %v8685_v46 }
0x538c   :  { %v5414_v2 = vsel %vm195_vm0, %v5413_v40, 0.0 }
0x538d   :  { %5415 = vadd.xlane.f32.xlu1 %v5414_v2 }
0x538f   :  { %v5411_v63 = vpop.f32.mrf.mxu0 }
0x5400   :  { %v5416_v56 = vpop.xlane.xlu1 %5415 }
0x5401   :  { %v5417_v57 = vmul.f32 %v5416_v56, %v7380_v47 }
0x5403   :  { %v5418_v37 = vsub.f32 %v5413_v40, %v5417_v57 }
0x5405   :  { %v5419_v41 = vmul.f32 %v5418_v37, %v5418_v37 }
0x5407   :  { %v5420_v53 = vsel %vm195_vm0, %v5419_v41, 0.0 }
0x5408   :  { %5421 = vadd.xlane.f32.xlu2 %v5420_v53 }
0x547b   :  { %v5422_v36 = vpop.xlane.xlu2 %5421 }
0x547c   :  { %v5423_v30 = vmul.f32 %v5422_v36, %v7380_v47 }
0x547e   :  { %v5424_v29 = vadd.f32 1e-05, %v5423_v30 }
0x5480   :  { %6809 = vrsqrt.f32 %v5424_v29  ;;  %vm5431_vm3 = vweird.f32 %v5424_v29 }
0x5486   :  { %v6810_v61 = vpop.eup %6809 }
0x5487   :  { %v5426_v10 = vmul.f32 %v6810_v61, %v5424_v29  ;;  %vm5432_vm15 = vweird.f32 %v6810_v61 }
0x5488   :  { %vm5433_vm4 = vmor %vm5431_vm3, %vm5432_vm15 }
0x5489   :  { %v5427_v46 = vmul.f32 %v6810_v61, %v5426_v10 }
0x548b   :  { %v5428_v45 = vmul.f32 0.5, %v5427_v46  ;;  %v8805_v46 = vld [vmem:[#allocation11 + $0x8] ss:$0 sm:$0xff] }
0x548d   :  { %v5429_v16 = vsub.f32 1.5, %v5428_v45 }
0x548f   :  { %v5430_v19 = vmul.f32 %v6810_v61, %v5429_v16 }
0x5491   :  { %v5434_v4 = vsel %vm5433_vm4, %v6810_v61, %v5430_v19  ;;  %v8802_v61 = vld [vmem:[#allocation11 + $0x7] ss:$0 sm:$0xff] }
0x5492   :  { %v5435_v50 = vmul.f32 %v5434_v4, %v5418_v37  ;;  %v6929_v4 = vld [vmem:[%s8976_s3] ss:$0 sm:$0xff] }
0x5494   :  { %v5436_v48 = vmul.f32 %v8781_v55, %v5435_v50 }
0x5496   :  { %v5437_v39 = vadd.f32 %v8784_v22, %v5436_v48 }
0x5498   :  { %v5438_v49 = vpack.c.bf16 %v5437_v39, %v5437_v39 }
0x549a   :  { %6468 = vmatmul.msk.bf16.vlgmr.msra.gmra.mxu1 %vm195_vm0, %v5438_v49 }
0x5517   :  { %v5451_v31 = vpop.f32.mrf.mxu1 }
0x5518   :  { %v5452_v38 = vadd.f32 %v8791_v44, %v5451_v31 }
0x551a   :  { %v5455_v8 = vmax.f32 %v5452_v38, 0.0 }
0x551c   :  { %v5456_v13 = vpack.c.bf16 %v5455_v8, %v5455_v8 }
0x551e   :  { %6469 = vmatmul.msk.bf16.vlgmr.msra.gmra.mxu2 %vm9002_vm5, %v5456_v13 }
0x551f   :  { %v5453_v62 = vpop.f32.mrf.mxu1 }
0x55a1   :  { %v5469_v51 = vpop.f32.mrf.mxu2 }
0x55a2   :  { %v5470_v1 = vadd.f32 %v8795_v26, %v5469_v51 }
0x55a4   :  { %v5473_v59 = vadd.f32 %v5470_v1, %v5437_v39 }
0x55a6   :  { %v5474_v11 = vsel %vm195_vm0, %v5473_v59, 0.0 }
0x55a7   :  { %5475 = vadd.xlane.f32.xlu0 %v5474_v11 }
0x55a9   :  { %v5471_v60 = vpop.f32.mrf.mxu2 }
0x561a   :  { %v5476_v9 = vpop.xlane.xlu0 %5475 }
0x561b   :  { %v5477_v28 = vmul.f32 %v5476_v9, %v7380_v47 }
0x561d   :  { %v5478_v6 = vsub.f32 %v5473_v59, %v5477_v28 }
0x561f   :  { %v5479_v33 = vmul.f32 %v5478_v6, %v5478_v6 }
0x5621   :  { %v5480_v17 = vsel %vm195_vm0, %v5479_v33, 0.0 }
0x5622   :  { %5481 = vadd.xlane.f32.xlu1 %v5480_v17 }
0x5695   :  { %v5482_v40 = vpop.xlane.xlu1 %5481 }
0x5696   :  { %v5483_v2 = vmul.f32 %v5482_v40, %v7380_v47 }
0x5698   :  { %v5484_v63 = vadd.f32 1e-05, %v5483_v2 }
0x569a   :  { %6811 = vrsqrt.f32 %v5484_v63  ;;  %vm5491_vm10 = vweird.f32 %v5484_v63 }
0x56a0   :  { %v6812_v56 = vpop.eup %6811 }
0x56a1   :  { %v5486_v57 = vmul.f32 %v6812_v56, %v5484_v63  ;;  %vm5492_vm8 = vweird.f32 %v6812_v56 }
0x56a2   :  { %vm5493_vm11 = vmor %vm5491_vm10, %vm5492_vm8 }
0x56a3   :  { %v5487_v37 = vmul.f32 %v6812_v56, %v5486_v57 }
0x56a5   :  { %v5488_v41 = vmul.f32 0.5, %v5487_v37 }
0x56a7   :  { %v5489_v53 = vsub.f32 1.5, %v5488_v41 }
0x56a9   :  { %v5490_v36 = vmul.f32 %v6812_v56, %v5489_v53 }
0x56ab   :  { %v5494_v30 = vsel %vm5493_vm11, %v6812_v56, %v5490_v36 }
0x56ac   :  { %v5495_v29 = vmul.f32 %v5494_v30, %v5478_v6 }
0x56ae   :  { %v5496_v10 = vmul.f32 %v8802_v61, %v5495_v29 }
0x56b0   :  { %v8808_v45 = vadd.f32 %v8805_v46, %v5496_v10 }
0x56b2   :  { %v5498_v16 = vpack.c.bf16 %v8808_v45, %v8808_v45 }
0x56b4   :  { %6470 = vmatmul.msk.bf16.vlgmr.msra.gmra.mxu3 %vm195_vm0, %v5498_v16 }
0x5737   :  { %v5511_v19 = vpop.f32.mrf.mxu3 }
0x5738   :  { %v5512_v50 = vadd.f32 %v6929_v4, %v5511_v19 }
0x573a   :  { %v5515_v48 = vpack.c.bf16 %v5512_v50, %v5512_v50 }
0x573c   :  { %v5517_v39 = vunpack.c.l.b16 %v5515_v48 }
0x573e   :  { %v8816_v49 = vpack.c.b16 %v5517_v39, %v5517_v39 }
0x573f   :  { %v5513_v31 = vpop.f32.mrf.mxu3 }
0x5740   :  { %5586 = vrot.lane.b32.xlu0 %v8816_v49, %s7124_s17  ;;  %5563 = vrot.lane.b32.xlu2 %v8816_v49, %s7121_s30 }
0x5741   :  { %5565 = vrot.lane.b32.xlu1 %v8816_v49, %s7122_s15 }
0x5749   :  { %5588 = vrot.lane.b32.xlu1 %v8816_v49, %s7125_s18 }
0x5751   :  { %5542 = vrot.lane.b32.xlu1 %v8816_v49, %s7123_s16  ;;  %s6238_s16 = sshll.u32 %s8987_s14, 4  ;;  %s6239_s16 = int_to_ptr.hbm [resolvable:$true] %s6238_s16 }
0x5759   :  { %5540 = vrot.lane.b32.xlu1 %v8816_v49, %s7126_s0 }
0x5761   :  { %5519 = vrot.lane.b32.xlu1 %v8816_v49, %s7127_s19 }
0x579a   :  { %v5564_v13 = vpop.permute.xlu2 %5563 }
0x57b2   :  { %v5587_v1 = vpop.permute.xlu0 %5586 }
0x57b3   :  { %v5566_v38 = vpop.permute.xlu1 %5565 }
0x57b4   :  { %v5571_v8 = vsel %vm258_vm1, %v5566_v38, 0 }
0x57b5   :  { %5580 = vmatpush.bf16.xpose.msrb.mxu2 %v5571_v8 }
0x57bb   :  { %v5589_v62 = vpop.permute.xlu1 %5588 }
0x57bc   :  { %v5594_v51 = vsel %vm258_vm1, %v5589_v62, 0  ;;  %6473 = vmatmul.msk.bf16.vlgmr.msrb.gmra.mxu2 %vm258_vm1, %v5564_v13 }
0x57bd   :  { %5603 = vmatpush.bf16.xpose.msrb.mxu3 %v5594_v51 }
0x57c3   :  { %v5543_v59 = vpop.permute.xlu1 %5542 }
0x57c4   :  { %v5548_v11 = vsel %vm258_vm1, %v5543_v59, 0  ;;  %6474 = vmatmul.msk.bf16.vlgmr.msrb.gmra.mxu3 %vm258_vm1, %v5587_v1 }
0x57c5   :  { %5557 = vmatpush.bf16.xpose.msrb.mxu1 %v5548_v11 }
0x57cb   :  { %v5541_v60 = vpop.permute.xlu1 %5540 }
0x57cc   :  { %6472 = vmatmul.msk.bf16.vlgmr.msrb.gmra.mxu1 %vm258_vm1, %v5541_v60 }
0x57d3   :  { %v5520_v9 = vpop.permute.xlu1 %5519 }
0x57d4   :  { %v5525_v28 = vsel %vm258_vm1, %v5520_v9, 0 }
0x57d5   :  { %5534 = vmatpush.bf16.xpose.msrb.mxu0 %v5525_v28 }
0x57dc   :  { %6471 = vmatmul.msk.bf16.vlgmr.msrb.gmra.mxu0 %vm258_vm1, %v5515_v48 }
0x583f   :  { %v5582_v6 = vpop.f32.mrf.mxu2 }
0x5840   :  { %v5611_v33 = vmul.f32 0.35355338, %v5582_v6 }
0x5842   :  { %v5619_v17 = vsel %vm258_vm1, %v5611_v33, -inf }
0x5843   :  { %5620 = vmax.xlane.f32.xlu0 %v5619_v17 }
0x5847   :  { %v5584_v40 = vpop.f32.mrf.mxu2  ;;  %v5605_v2 = vpop.f32.mrf.mxu3 }
0x5848   :  { %v5612_v63 = vmul.f32 0.35355338, %v5605_v2 }
0x5849   :  { %v5559_v56 = vpop.f32.mrf.mxu1 }
0x584a   :  { %v5610_v57 = vmul.f32 0.35355338, %v5559_v56  ;;  %v5622_v37 = vsel %vm258_vm1, %v5612_v63, -inf }
0x584b   :  { %5623 = vmax.xlane.f32.xlu2 %v5622_v37 }
0x584c   :  { %v5616_v41 = vsel %vm258_vm1, %v5610_v57, -inf }
0x584d   :  { %5617 = vmax.xlane.f32.xlu1 %v5616_v41 }
0x584f   :  { %v5607_v53 = vpop.f32.mrf.mxu3 }
0x5851   :  { %v5561_v36 = vpop.f32.mrf.mxu1 }
0x5859   :  { %v5536_v30 = vpop.f32.mrf.mxu0 }
0x585a   :  { %v5609_v29 = vmul.f32 0.35355338, %v5536_v30 }
0x585c   :  { %v5613_v10 = vsel %vm258_vm1, %v5609_v29, -inf }
0x585d   :  { %5614 = vmax.xlane.f32.xlu0 %v5613_v10 }
0x5861   :  { %v5538_v16 = vpop.f32.mrf.mxu0 }
0x58b6   :  { %v5621_v19 = vpop.xlane.xlu0 %5620 }
0x58b7   :  { %v5627_v4 = vsub.f32 %v5611_v33, %v5621_v19 }
0x58b9   :  { %v5633_v50 = vmul.f32 1.442695, %v5627_v4 }
0x58bb   :  { %6813 = vpow2.f32 %v5633_v50 }
0x58be   :  { %v5624_v48 = vpop.xlane.xlu2 %5623 }
0x58bf   :  { %v5628_v39 = vsub.f32 %v5612_v63, %v5624_v48 }
0x58c0   :  { %v5618_v31 = vpop.xlane.xlu1 %5617 }
0x58c1   :  { %v6814_v38 = vpop.eup %6813  ;;  %v5635_v8 = vmul.f32 1.442695, %v5628_v39  ;;  %v5626_v13 = vsub.f32 %v5610_v57, %v5618_v31 }
0x58c2   :  { %v5643_v62 = vsel %vm258_vm1, %v6814_v38, 0.0 }
0x58c3   :  { %6815 = vpow2.f32 %v5635_v8  ;;  %v5631_v51 = vmul.f32 1.442695, %v5626_v13  ;;  %5644 = vadd.xlane.f32.xlu2 %v5643_v62 }
0x58c5   :  { %6817 = vpow2.f32 %v5631_v51 }
0x58c9   :  { %v8845_v1 = vpop.eup %6815 }
0x58ca   :  { %v5646_v59 = vsel %vm258_vm1, %v8845_v1, 0.0 }
0x58cb   :  { %v8849_v11 = vpop.eup %6817  ;;  %5647 = vadd.xlane.f32.xlu1 %v5646_v59 }
0x58cc   :  { %v5640_v60 = vsel %vm258_vm1, %v8849_v11, 0.0 }
0x58cd   :  { %5641 = vadd.xlane.f32.xlu0 %v5640_v60 }
0x58d0   :  { %v5615_v9 = vpop.xlane.xlu0 %5614 }
0x58d1   :  { %v5625_v28 = vsub.f32 %v5609_v29, %v5615_v9 }
0x58d3   :  { %v5629_v6 = vmul.f32 1.442695, %v5625_v28 }
0x58d5   :  { %6819 = vpow2.f32 %v5629_v6 }
0x58db   :  { %5755 = vrot.lane.b32.xlu2 %v8816_v49, %s7128_s1  ;;  %v8861_v33 = vpop.eup %6819 }
0x58dc   :  { %v5637_v17 = vsel %vm258_vm1, %v8861_v33, 0.0 }
0x58e1   :  { %5734 = vrot.lane.b32.xlu0 %v8816_v49, %s7130_s10 }
0x58e4   :  { %5776 = vrot.lane.b32.xlu1 %v8816_v49, %s7129_s25 }
0x58e9   :  { %5713 = vrot.lane.b32.xlu0 %v8816_v49, %s7112_s21 }
0x5904   :  { %5638 = vadd.xlane.f32.xlu2 %v5637_v17 }
0x5936   :  { %v5645_v40 = vpop.xlane.xlu2 %5644 }
0x5937   :  { %6821 = vrcp.f32 %v5645_v40  ;;  %v5688_v53 = vand.u32 2147483648, %v5645_v40  ;;  %v5686_v30 = vand.u32 2147483647, %v5645_v40  ;;  %vm5682_vm13 = vweird.f32 %v5645_v40 }
0x5939   :  { %v5689_v16 = vor.u32 1.1754944e-38, %v5688_v53  ;;  %vm5687_vm14 = vcmp.eq.f32.partialorder %v5686_v30, 8.507059e+37  ;;  %v6930_v30 = vld [vmem:[#allocation5 + $0x8] sm:$0xff] }
0x593d   :  { %v6822_v2 = vpop.eup %6821 }
0x593e   :  { %v5678_v63 = vmul.f32 %v6822_v2, %v5645_v40  ;;  %v5756_v56 = vpop.permute.xlu2 %5755  ;;  %v5648_v57 = vpop.xlane.xlu1 %5647  ;;  %vm5683_vm12 = vweird.f32 %v6822_v2 }
0x593f   :  { %v5761_v37 = vsel %vm456_vm2, %v5756_v56, 0  ;;  %6823 = vrcp.f32 %v5648_v57  ;;  %vm5684_vm9 = vmor %vm5682_vm13, %vm5683_vm12  ;;  %vm5696_vm4 = vweird.f32 %v5648_v57  ;;  %v5700_v6 = vand.u32 2147483647, %v5648_v57 }
0x5940   :  { %v5679_v49 = vsub.f32 1.0, %v5678_v63  ;;  %5770 = vmatpush.bf16.msra.mxu2 %v5761_v37  ;;  %v5642_v41 = vpop.xlane.xlu0 %5641 }
0x5941   :  { %6825 = vrcp.f32 %v5642_v41  ;;  %v5674_v59 = vand.u32 2147483648, %v5642_v41  ;;  %v5672_v28 = vand.u32 2147483647, %v5642_v41  ;;  %vm5668_vm8 = vweird.f32 %v5642_v41 }
0x5942   :  { %v5680_v36 = vmul.f32 %v6822_v2, %v5679_v49  ;;  %vm5701_vm12 = vcmp.eq.f32.partialorder %v5700_v6, 8.507059e+37 }
0x5943   :  { %v5675_v40 = vor.u32 1.1754944e-38, %v5674_v59  ;;  %vm5673_vm11 = vcmp.eq.f32.partialorder %v5672_v28, 8.507059e+37 }
0x5944   :  { %5882 = vmatpush.bf16.xpose.msrb.mxu2 %v7330_v20  ;;  %v5681_v29 = vadd.f32 %v6822_v2, %v5680_v36  ;;  %v5702_v20 = vand.u32 2147483648, %v5648_v57 }
0x5945   :  { %v6824_v10 = vpop.eup %6823 }
0x5946   :  { %v5685_v19 = vsel %vm5684_vm9, %v6822_v2, %v5681_v29  ;;  %v5692_v4 = vmul.f32 %v6824_v10, %v5648_v57  ;;  %vm5697_vm15 = vweird.f32 %v6824_v10  ;;  %v5703_v2 = vor.u32 1.1754944e-38, %v5702_v20 }
0x5947   :  { %v6826_v50 = vpop.eup %6825  ;;  %v5690_v48 = vsel %vm5687_vm14, %v5689_v16, %v5685_v19  ;;  %vm5698_vm5 = vmor %vm5696_vm4, %vm5697_vm15  ;;  %v6931_v16 = vld [vmem:[%s8977_s4] sm:$0xff]  ;;  %s7134_s4 = smov [#allocation13]  }
0x5948   :  { %v5707_v39 = vmul.f32 %v6814_v38, %v5690_v48  ;;  %v5693_v31 = vsub.f32 1.0, %v5692_v4  ;;  %v5664_v8 = vmul.f32 %v6826_v50, %v5642_v41  ;;  %vm5669_vm3 = vweird.f32 %v6826_v50 }
0x5949   :  { %vm5670_vm10 = vmor %vm5668_vm8, %vm5669_vm3 }
0x594a   :  { %v5711_v13 = vpack.c.bf16 %v5707_v39, %v5707_v39  ;;  %v5694_v62 = vmul.f32 %v6824_v10, %v5693_v31  ;;  %v5665_v51 = vsub.f32 1.0, %v5664_v8 }
0x594c   :  { %v5695_v60 = vadd.f32 %v6824_v10, %v5694_v62  ;;  %v5666_v9 = vmul.f32 %v6826_v50, %v5665_v51  ;;  %6477 = vmatmul.msk.bf16.vlgmr.msra.gmra.mxu2 %vm258_vm1, %v5711_v13 }
0x594d   :  { %6059 = vmatpush.bf16.msra.mxu2 %v7447_v23 }
0x594e   :  { %v5667_v38 = vadd.f32 %v6826_v50, %v5666_v9  ;;  %v5699_v17 = vsel %vm5698_vm5, %v6824_v10, %v5695_v60 }
0x594f   :  { %v5704_v37 = vsel %vm5701_vm12, %v5703_v2, %v5699_v17 }
0x5950   :  { %v5671_v63 = vsel %vm5670_vm10, %v6826_v50, %v5667_v38  ;;  %v5708_v57 = vmul.f32 %v8845_v1, %v5704_v37  ;;  %v6932_v37 = vld [vmem:[#allocation11] ss:$0 sm:$0xff] }
0x5951   :  { %v5676_v56 = vsel %vm5673_vm11, %v5675_v40, %v5671_v63 }
0x5952   :  { %v5706_v49 = vmul.f32 %v8849_v11, %v5676_v56  ;;  %v5712_v10 = vpack.c.bf16 %v5708_v57, %v5708_v57 }
0x5953   :  { %v5735_v53 = vpop.permute.xlu0 %5734 }
0x5954   :  { %v5740_v36 = vsel %vm456_vm2, %v5735_v53, 0  ;;  %v5710_v23 = vpack.c.bf16 %v5706_v49, %v5706_v49 }
0x5955   :  { %5749 = vmatpush.bf16.msra.mxu1 %v5740_v36 }
0x5956   :  { %v5777_v41 = vpop.permute.xlu1 %5776 }
0x5957   :  { %v5782_v29 = vsel %vm456_vm2, %v5777_v41, 0 }
0x5958   :  { %6476 = vmatmul.msk.bf16.vlgmr.msra.gmra.mxu1 %vm258_vm1, %v5710_v23  ;;  %5791 = vmatpush.bf16.msra.mxu3 %v5782_v29 }
0x5959   :  { %5864 = vmatpush.bf16.msrb.mxu1 %v6930_v30 }
0x595b   :  { %v5714_v11 = vpop.permute.xlu0 %5713  ;;  %6478 = vmatmul.msk.bf16.vlgmr.msra.gmra.mxu3 %vm258_vm1, %v5712_v10 }
0x595c   :  { %5903 = vmatpush.bf16.xpose.msrb.mxu3 %v7415_v25  ;;  %v5719_v1 = vsel %vm456_vm2, %v5714_v11, 0 }
0x595d   :  { %5865 = vmatpush.bf16.msrb.mxu1 %v8650_v21  ;;  %5728 = vmatpush.bf16.msra.mxu0 %v5719_v1 }
0x5961   :  { %5939 = vmatpush.bf16.xpose.msra.mxu1 %v7385_v54  ;;  %5822 = vmatpush.bf16.msrb.mxu0 %v8658_v3 }
0x5964   :  { %6075 = vmatpush.bf16.msra.mxu3 %v7459_v58 }
0x5965   :  { %5823 = vmatpush.bf16.msrb.mxu0 %v6931_v16 }
0x5977   :  { %v5639_v25 = vpop.xlane.xlu2 %5638 }
0x5978   :  { %6827 = vrcp.f32 %v5639_v25  ;;  %v5660_v4 = vand.u32 2147483648, %v5639_v25  ;;  %v5658_v48 = vand.u32 2147483647, %v5639_v25  ;;  %vm5654_vm2 = vweird.f32 %v5639_v25 }
0x597a   :  { %v5661_v58 = vor.u32 1.1754944e-38, %v5660_v4  ;;  %vm5659_vm14 = vcmp.eq.f32.partialorder %v5658_v48, 8.507059e+37 }
0x597e   :  { %v6828_v21 = vpop.eup %6827 }
0x597f   :  { %v5650_v19 = vmul.f32 %v6828_v21, %v5639_v25  ;;  %vm5655_vm13 = vweird.f32 %v6828_v21 }
0x5980   :  { %vm5656_vm9 = vmor %vm5654_vm2, %vm5655_vm13 }
0x5981   :  { %v5651_v54 = vsub.f32 1.0, %v5650_v19 }
0x5983   :  { %v5652_v50 = vmul.f32 %v6828_v21, %v5651_v54 }
0x5985   :  { %v5653_v39 = vadd.f32 %v6828_v21, %v5652_v50 }
0x5987   :  { %v5657_v31 = vsel %vm5656_vm9, %v6828_v21, %v5653_v39 }
0x5988   :  { %v5662_v3 = vsel %vm5659_vm14, %v5661_v58, %v5657_v31 }
0x5989   :  { %v5705_v8 = vmul.f32 %v8861_v33, %v5662_v3 }
0x598b   :  { %v5709_v13 = vpack.c.bf16 %v5705_v8, %v5705_v8 }
0x598d   :  { %6475 = vmatmul.msk.bf16.vlgmr.msra.gmra.mxu0 %vm258_vm1, %v5709_v13 }
0x598e   :  { %5921 = vmatpush.bf16.xpose.msra.mxu0 %v7360_v18 }
0x59cf   :  { %v5772_v62 = vpop.f32.mrf.mxu2 }
0x59d0   :  { %5802 = vrot.lane.b32.xlu0 %v5772_v62, %s7131_s28 }
0x59d5   :  { %v5751_v51 = vpop.f32.mrf.mxu1 }
0x59d6   :  { %5798 = vrot.lane.b32.xlu1 %v5751_v51, %s7120_s26 }
0x59d7   :  { %v5774_v20 = vpop.f32.mrf.mxu2 }
0x59dd   :  { %v5753_v59 = vpop.f32.mrf.mxu1 }
0x59de   :  { %v5793_v60 = vpop.f32.mrf.mxu3 }
0x59df   :  { %5806 = vrot.lane.b32.xlu1 %v5793_v60, %s7132_s29 }
0x59e6   :  { %v5795_v9 = vpop.f32.mrf.mxu3 }
0x5a0a   :  { %v5730_v28 = vpop.f32.mrf.mxu0 }
0x5a12   :  { %v5732_v6 = vpop.f32.mrf.mxu0 }
0x5a42   :  { %v5803_v17 = vpop.permute.xlu0 %5802 }
0x5a48   :  { %v5799_v33 = vpop.permute.xlu1 %5798 }
0x5a49   :  { %v5809_v38 = vsel %vm258_vm1, %v5730_v28, %v5799_v33 }
0x5a4a   :  { %v5810_v18 = vsel %vm549_vm6, %v5809_v38, %v5803_v17 }
0x5a51   :  { %v5807_v40 = vpop.permute.xlu1 %5806 }
0x5a52   :  { %v5811_v2 = vsel %vm551_vm7, %v5810_v18, %v5807_v40 }
0x5a53   :  { %v5812_v63 = vpack.c.bf16 %v5811_v2, %v5811_v2 }
0x5a55   :  { %6479 = vmatmul.msk.bf16.vlgmr.msrb.gmra.mxu0 %vm195_vm0, %v5812_v63 }
0x5a56   :  { %6091 = vmatpush.bf16.msrb.mxu0 %v7444_v14 }
0x5ad2   :  { %v5825_v56 = vpop.f32.mrf.mxu0 }
0x5ad3   :  { %v5826_v49 = vadd.f32 %v6932_v37, %v5825_v56 }
0x5ad5   :  { %v5829_v53 = vadd.f32 %v5826_v49, %v8808_v45 }
0x5ad7   :  { %v5830_v36 = vsel %vm195_vm0, %v5829_v53, 0.0 }
0x5ad8   :  { %5831 = vadd.xlane.f32.xlu0 %v5830_v36 }
0x5ada   :  { %v5827_v57 = vpop.f32.mrf.mxu0 }
0x5b4b   :  { %v5832_v23 = vpop.xlane.xlu0 %5831 }
0x5b4c   :  { %v5833_v30 = vmul.f32 %v5832_v23, %v7380_v47 }
0x5b4e   :  { %v5834_v41 = vsub.f32 %v5829_v53, %v5833_v30 }
0x5b50   :  { %v5835_v29 = vmul.f32 %v5834_v41, %v5834_v41 }
0x5b52   :  { %v5836_v10 = vsel %vm195_vm0, %v5835_v29, 0.0 }
0x5b53   :  { %5837 = vadd.xlane.f32.xlu1 %v5836_v10 }
0x5bc6   :  { %v5838_v11 = vpop.xlane.xlu1 %5837 }
0x5bc7   :  { %v5839_v14 = vmul.f32 %v5838_v11, %v7380_v47 }
0x5bc9   :  { %v5840_v1 = vadd.f32 1e-05, %v5839_v14 }
0x5bcb   :  { %6829 = vrsqrt.f32 %v5840_v1  ;;  %vm5847_vm3 = vweird.f32 %v5840_v1 }
0x5bd1   :  { %v6830_v16 = vpop.eup %6829 }
0x5bd2   :  { %v5842_v25 = vmul.f32 %v6830_v16, %v5840_v1  ;;  %vm5848_vm15 = vweird.f32 %v6830_v16 }
0x5bd3   :  { %vm5849_vm4 = vmor %vm5847_vm3, %vm5848_vm15 }
0x5bd4   :  { %v5843_v45 = vmul.f32 %v6830_v16, %v5842_v25 }
0x5bd6   :  { %v5844_v21 = vmul.f32 0.5, %v5843_v45 }
0x5bd8   :  { %v5845_v19 = vsub.f32 1.5, %v5844_v21 }
0x5bda   :  { %v5846_v54 = vmul.f32 %v6830_v16, %v5845_v19 }
0x5bdc   :  { %v5850_v4 = vsel %vm5849_vm4, %v6830_v16, %v5846_v54 }
0x5bdd   :  { %v5851_v50 = vmul.f32 %v5850_v4, %v5834_v41 }
0x5bdf   :  { %v5852_v48 = vmul.f32 %v8679_v0, %v5851_v50 }
0x5be1   :  { %v8902_v39 = vadd.f32 %v8682_v34, %v5852_v48 }
0x5be3   :  { %v5854_v58 = vpack.c.bf16 %v8902_v39, %v8902_v39 }
0x5be5   :  { %6480 = vmatmul.msk.bf16.vlgmr.msrb.gmra.mxu1 %vm195_vm0, %v5854_v58 }
0x5be6   :  { %6107 = vmatpush.bf16.msrb.mxu1 %v7452_v43 }
0x5c62   :  { %v5867_v31 = vpop.f32.mrf.mxu1 }
0x5c63   :  { %v5868_v3 = vadd.f32 %v8694_v12, %v5867_v31 }
0x5c65   :  { %v5871_v8 = vpack.c.bf16 %v5868_v3, %v5868_v3 }
0x5c67   :  { %v5889_v13 = vunpack.c.l.b16 %v5871_v8  ;;  %6481 = vmatmul.msk.bf16.vlgmr.msrb.gmra.mxu2 %vm258_vm1, %v5871_v8 }
0x5c68   :  { %6138 = vmatpush.bf16.msrb.mxu2 %v8698_v24 }
0x5c69   :  { %v5890_v0 = vpack.c.b16 %v5889_v13, %v5889_v13 }
0x5c6a   :  { %v5869_v62 = vpop.f32.mrf.mxu1 }
0x5c6b   :  { %5927 = vrot.lane.b32.xlu1 %v5890_v0, %s7124_s17  ;;  %5909 = vrot.lane.b32.xlu0 %v5890_v0, %s7121_s30 }
0x5c6c   :  { %5891 = vrot.lane.b32.xlu2 %v5890_v0, %s7126_s0  ;;  %6139 = vmatpush.bf16.msrb.mxu2 %v8703_v52 }
0x5cc6   :  { %v5892_v43 = vpop.permute.xlu2 %5891 }
0x5cc7   :  { %6482 = vmatmul.msk.bf16.vlgmr.msrb.gmra.mxu3 %vm258_vm1, %v5892_v43 }
0x5cc8   :  { %6180 = vmatpush.bf16.msrb.mxu3 %v8709_v7 }
0x5ccc   :  { %6181 = vmatpush.bf16.msrb.mxu3 %v8718_v15 }
0x5cdd   :  { %v5928_v34 = vpop.permute.xlu1 %5927  ;;  %v5910_v12 = vpop.permute.xlu0 %5909 }
0x5cde   :  { %6483 = vmatmul.msk.bf16.vlgmr.msra.gmra.mxu0 %vm258_vm1, %v5910_v12  ;;  %6484 = vmatmul.msk.bf16.vlgmr.msra.gmra.mxu1 %vm258_vm1, %v5928_v34 }
0x5cdf   :  { %6196 = vmatpush.bf16.msra.mxu0 %v8715_v32 }
0x5ce3   :  { %6197 = vmatpush.bf16.msra.mxu0 %v8724_v27 }
0x5ce7   :  { %6198 = vmatpush.bf16.msra.mxu0 %v8731_v35 }
0x5cea   :  { %v5884_v24 = vpop.f32.mrf.mxu2 }
0x5ceb   :  { %6199 = vmatpush.bf16.msra.mxu0 %v8738_v5  ;;  %v5945_v20 = vmul.f32 0.35355338, %v5884_v24 }
0x5ced   :  { %v5949_v60 = vsel %vm549_vm6, %v5945_v20, -inf }
0x5cf2   :  { %v5886_v52 = vpop.f32.mrf.mxu2 }
0x5d4a   :  { %v5905_v51 = vpop.f32.mrf.mxu3 }
0x5d4b   :  { %v5946_v7 = vmul.f32 0.35355338, %v5905_v51 }
0x5d4d   :  { %v5952_v15 = vsel %vm549_vm6, %v5946_v7, -inf }
0x5d4e   :  { %5953 = vmax.xlane.f32.xlu2 %v5952_v15 }
0x5d52   :  { %v5907_v59 = vpop.f32.mrf.mxu3 }
0x5d56   :  { %5950 = vmax.xlane.f32.xlu2 %v5949_v60 }
0x5d5b   :  { %v5923_v9 = vpop.f32.mrf.mxu0  ;;  %v5941_v32 = vpop.f32.mrf.mxu1 }
0x5d5c   :  { %v5947_v28 = vmul.f32 0.35355338, %v5923_v9  ;;  %v5948_v27 = vmul.f32 0.35355338, %v5941_v32 }
0x5d5e   :  { %v5958_v35 = vsel %vm549_vm6, %v5948_v27, -inf  ;;  %v5955_v6 = vsel %vm549_vm6, %v5947_v28, -inf }
0x5d5f   :  { %5959 = vmax.xlane.f32.xlu1 %v5958_v35  ;;  %5956 = vmax.xlane.f32.xlu0 %v5955_v6 }
0x5d63   :  { %v5925_v5 = vpop.f32.mrf.mxu0  ;;  %v5943_v33 = vpop.f32.mrf.mxu1 }
0x5dc1   :  { %v5954_v38 = vpop.xlane.xlu2 %5953 }
0x5dc2   :  { %v5962_v17 = vsub.f32 %v5946_v7, %v5954_v38 }
0x5dc4   :  { %v5967_v18 = vmul.f32 1.442695, %v5962_v17 }
0x5dc6   :  { %6831 = vpow2.f32 %v5967_v18 }
0x5dc9   :  { %v5951_v40 = vpop.xlane.xlu2 %5950 }
0x5dca   :  { %v5961_v2 = vsub.f32 %v5945_v20, %v5951_v40 }
0x5dcc   :  { %v6832_v63 = vpop.eup %6831  ;;  %v5965_v56 = vmul.f32 1.442695, %v5961_v2 }
0x5dcd   :  { %v5976_v37 = vsel %vm549_vm6, %v6832_v63, 0.0 }
0x5dce   :  { %6833 = vpow2.f32 %v5965_v56  ;;  %5977 = vadd.xlane.f32.xlu2 %v5976_v37 }
0x5dd2   :  { %v5960_v49 = vpop.xlane.xlu1 %5959  ;;  %v5957_v53 = vpop.xlane.xlu0 %5956 }
0x5dd3   :  { %v5964_v36 = vsub.f32 %v5948_v27, %v5960_v49  ;;  %v5963_v57 = vsub.f32 %v5947_v28, %v5957_v53 }
0x5dd4   :  { %v6834_v23 = vpop.eup %6833 }
0x5dd5   :  { %v5971_v30 = vmul.f32 1.442695, %v5964_v36  ;;  %v5969_v41 = vmul.f32 1.442695, %v5963_v57  ;;  %v5973_v29 = vsel %vm549_vm6, %v6834_v23, 0.0 }
0x5dd6   :  { %5974 = vadd.xlane.f32.xlu1 %v5973_v29 }
0x5dd7   :  { %6835 = vpow2.f32 %v5971_v30 }
0x5dd8   :  { %6837 = vpow2.f32 %v5969_v41 }
0x5ddd   :  { %v8930_v10 = vpop.eup %6835 }
0x5dde   :  { %v8932_v11 = vpop.eup %6837  ;;  %v5982_v14 = vsel %vm549_vm6, %v8930_v10, 0.0 }
0x5ddf   :  { %5983 = vadd.xlane.f32.xlu0 %v5982_v14  ;;  %v5979_v1 = vsel %vm549_vm6, %v8932_v11, 0.0 }
0x5de0   :  { %5980 = vadd.xlane.f32.xlu2 %v5979_v1 }
0x5e41   :  { %v5978_v16 = vpop.xlane.xlu2 %5977 }
0x5e42   :  { %6839 = vrcp.f32 %v5978_v16  ;;  %v6010_v54 = vand.u32 2147483648, %v5978_v16  ;;  %v6008_v50 = vand.u32 2147483647, %v5978_v16  ;;  %vm6004_vm8 = vweird.f32 %v5978_v16 }
0x5e44   :  { %v6011_v31 = vor.u32 1.1754944e-38, %v6010_v54  ;;  %vm6009_vm11 = vcmp.eq.f32.partialorder %v6008_v50, 8.507059e+37 }
0x5e48   :  { %v6840_v25 = vpop.eup %6839 }
0x5e49   :  { %v6000_v45 = vmul.f32 %v6840_v25, %v5978_v16  ;;  %v5975_v21 = vpop.xlane.xlu1 %5974  ;;  %vm6005_vm5 = vweird.f32 %v6840_v25 }
0x5e4a   :  { %6841 = vrcp.f32 %v5975_v21  ;;  %vm6006_vm10 = vmor %vm6004_vm8, %vm6005_vm5  ;;  %v5996_v12 = vand.u32 2147483648, %v5975_v21  ;;  %v5994_v51 = vand.u32 2147483647, %v5975_v21  ;;  %vm5990_vm13 = vweird.f32 %v5975_v21 }
0x5e4b   :  { %v6001_v19 = vsub.f32 1.0, %v6000_v45 }
0x5e4c   :  { %v5997_v15 = vor.u32 1.1754944e-38, %v5996_v12  ;;  %vm5995_vm9 = vcmp.eq.f32.partialorder %v5994_v51, 8.507059e+37 }
0x5e4d   :  { %v6002_v4 = vmul.f32 %v6840_v25, %v6001_v19 }
0x5e4f   :  { %v6003_v48 = vadd.f32 %v6840_v25, %v6002_v4 }
0x5e50   :  { %v6842_v58 = vpop.eup %6841 }
0x5e51   :  { %v6007_v3 = vsel %vm6006_vm10, %v6840_v25, %v6003_v48  ;;  %v5986_v8 = vmul.f32 %v6842_v58, %v5975_v21  ;;  %vm5991_vm12 = vweird.f32 %v6842_v58 }
0x5e52   :  { %v6012_v13 = vsel %vm6009_vm11, %v6011_v31, %v6007_v3  ;;  %v5984_v0 = vpop.xlane.xlu0 %5983  ;;  %vm5992_vm2 = vmor %vm5990_vm13, %vm5991_vm12  ;;  %vm9003_vm12 = vcmask 523264  }
0x5e53   :  { %v6042_v62 = vmul.f32 %v6832_v63, %v6012_v13  ;;  %v5987_v43 = vsub.f32 1.0, %v5986_v8  ;;  %6843 = vrcp.f32 %v5984_v0  ;;  %v5981_v34 = vpop.xlane.xlu2 %5980  ;;  %v6038_v5 = vand.u32 2147483648, %v5984_v0 }
0x5e54   :  { %6845 = vrcp.f32 %v5981_v34  ;;  %v6036_v17 = vand.u32 2147483647, %v5984_v0  ;;  %v6024_v18 = vand.u32 2147483648, %v5981_v34  ;;  %v6022_v2 = vand.u32 2147483647, %v5981_v34 }
0x5e55   :  { %v6046_v24 = vpack.c.bf16 %v6042_v62, %v6042_v62  ;;  %v5988_v52 = vmul.f32 %v6842_v58, %v5987_v43  ;;  %vm6032_vm3 = vweird.f32 %v5984_v0  ;;  %v6039_v56 = vor.u32 1.1754944e-38, %v6038_v5 }
0x5e56   :  { %vm6018_vm5 = vweird.f32 %v5981_v34  ;;  %vm6037_vm8 = vcmp.eq.f32.partialorder %v6036_v17, 8.507059e+37  ;;  %v6025_v53 = vor.u32 1.1754944e-38, %v6024_v18  ;;  %vm6023_vm11 = vcmp.eq.f32.partialorder %v6022_v2, 8.507059e+37 }
0x5e57   :  { %v5989_v7 = vadd.f32 %v6842_v58, %v5988_v52  ;;  %6486 = vmatmul.msk.bf16.vlgmr.msra.gmra.mxu3 %vm549_vm6, %v6046_v24 }
0x5e59   :  { %v6844_v20 = vpop.eup %6843  ;;  %v5993_v59 = vsel %vm5992_vm2, %v6842_v58, %v5989_v7 }
0x5e5a   :  { %v6846_v60 = vpop.eup %6845  ;;  %v5998_v9 = vsel %vm5995_vm9, %v5997_v15, %v5993_v59  ;;  %v6028_v32 = vmul.f32 %v6844_v20, %v5984_v0  ;;  %vm6033_vm14 = vweird.f32 %v6844_v20 }
0x5e5b   :  { %v6041_v28 = vmul.f32 %v6834_v23, %v5998_v9  ;;  %v6014_v27 = vmul.f32 %v6846_v60, %v5981_v34  ;;  %vm6019_vm15 = vweird.f32 %v6846_v60  ;;  %vm6034_vm4 = vmor %vm6032_vm3, %vm6033_vm14 }
0x5e5c   :  { %v6029_v35 = vsub.f32 1.0, %v6028_v32  ;;  %vm6020_vm10 = vmor %vm6018_vm5, %vm6019_vm15 }
0x5e5d   :  { %v6045_v6 = vpack.c.bf16 %v6041_v28, %v6041_v28  ;;  %v6015_v33 = vsub.f32 1.0, %v6014_v27 }
0x5e5e   :  { %v6030_v38 = vmul.f32 %v6844_v20, %v6029_v35 }
0x5e5f   :  { %v6016_v40 = vmul.f32 %v6846_v60, %v6015_v33  ;;  %6485 = vmatmul.msk.bf16.vlgmr.msra.gmra.mxu2 %vm549_vm6, %v6045_v6 }
0x5e60   :  { %v6031_v63 = vadd.f32 %v6844_v20, %v6030_v38 }
0x5e61   :  { %v6017_v37 = vadd.f32 %v6846_v60, %v6016_v40 }
0x5e62   :  { %v6035_v49 = vsel %vm6034_vm4, %v6844_v20, %v6031_v63 }
0x5e63   :  { %v6040_v36 = vsel %vm6037_vm8, %v6039_v56, %v6035_v49  ;;  %v6021_v57 = vsel %vm6020_vm10, %v6846_v60, %v6017_v37 }
0x5e64   :  { %v6044_v23 = vmul.f32 %v8930_v10, %v6040_v36  ;;  %v6026_v30 = vsel %vm6023_vm11, %v6025_v53, %v6021_v57 }
0x5e65   :  { %v6043_v41 = vmul.f32 %v8932_v11, %v6026_v30 }
0x5e66   :  { %v6048_v29 = vpack.c.bf16 %v6044_v23, %v6044_v23 }
0x5e67   :  { %v6047_v14 = vpack.c.bf16 %v6043_v41, %v6043_v41 }
0x5e68   :  { %6488 = vmatmul.msk.bf16.vlgmr.msrb.gmra.mxu1 %vm549_vm6, %v6048_v29 }
0x5e69   :  { %6487 = vmatmul.msk.bf16.vlgmr.msrb.gmra.mxu0 %vm549_vm6, %v6047_v14 }
0x5eda   :  { %v6077_v1 = vpop.f32.mrf.mxu3 }
0x5edb   :  { %6114 = vrot.lane.b32.xlu2 %v6077_v1, %s7120_s26  ;;  %s6236_s26 = sshll.u32 %s7134_s4, 4  ;;  %s6237_s26 = int_to_ptr.vmem [resolvable:$true] %s6236_s26 }
0x5ee2   :  { %v6061_v16 = vpop.f32.mrf.mxu2  ;;  %v6079_v25 = vpop.f32.mrf.mxu3 }
0x5ee5   :  { %v6109_v45 = vpop.f32.mrf.mxu1 }
0x5ee6   :  { %v6093_v21 = vpop.f32.mrf.mxu0  ;;  %6122 = vrot.lane.b32.xlu1 %v6109_v45, %s7132_s29 }
0x5ee7   :  { %6118 = vrot.lane.b32.xlu0 %v6093_v21, %s7131_s28 }
0x5eea   :  { %v6063_v10 = vpop.f32.mrf.mxu2 }
0x5eed   :  { %v6111_v19 = vpop.f32.mrf.mxu1 }
0x5eee   :  { %v6095_v11 = vpop.f32.mrf.mxu0 }
0x5f35   :  { %v6115_v54 = vpop.permute.xlu2 %6114 }
0x5f36   :  { %v6125_v50 = vsel %vm258_vm1, %v6061_v16, %v6115_v54 }
0x5f58   :  { %v6123_v4 = vpop.permute.xlu1 %6122 }
0x5f59   :  { %v6119_v48 = vpop.permute.xlu0 %6118 }
0x5f5a   :  { %v6126_v58 = vsel %vm549_vm6, %v6125_v50, %v6119_v48 }
0x5f5b   :  { %v6127_v31 = vsel %vm551_vm7, %v6126_v58, %v6123_v4 }
0x5f5c   :  { %v6128_v3 = vpack.c.bf16 %v6127_v31, %v6127_v31 }
0x5f5e   :  { %6489 = vmatmul.msk.bf16.vlgmr.msrb.gmra.mxu2 %vm195_vm0, %v6128_v3 }
0x5fe1   :  { %v6141_v8 = vpop.f32.mrf.mxu2 }
0x5fe2   :  { %v6142_v13 = vadd.f32 %v8773_v42, %v6141_v8 }
0x5fe4   :  { %v6145_v0 = vadd.f32 %v6142_v13, %v8902_v39 }
0x5fe6   :  { %v6146_v62 = vsel %vm195_vm0, %v6145_v0, 0.0 }
0x5fe7   :  { %6147 = vadd.xlane.f32.xlu0 %v6146_v62 }
0x5fe9   :  { %v6143_v43 = vpop.f32.mrf.mxu2 }
0x605a   :  { %v6148_v34 = vpop.xlane.xlu0 %6147 }
0x605b   :  { %v6149_v12 = vmul.f32 %v6148_v34, %v7380_v47 }
0x605d   :  { %v6150_v24 = vsub.f32 %v6145_v0, %v6149_v12 }
0x605f   :  { %v6151_v52 = vmul.f32 %v6150_v24, %v6150_v24 }
0x6061   :  { %v6152_v51 = vsel %vm195_vm0, %v6151_v52, 0.0 }
0x6062   :  { %6153 = vadd.xlane.f32.xlu2 %v6152_v51 }
0x60d5   :  { %v6154_v7 = vpop.xlane.xlu2 %6153 }
0x60d6   :  { %v6155_v15 = vmul.f32 %v6154_v7, %v7380_v47 }
0x60d8   :  { %v6156_v20 = vadd.f32 1e-05, %v6155_v15 }
0x60da   :  { %6847 = vrsqrt.f32 %v6156_v20  ;;  %vm6163_vm6 = vweird.f32 %v6156_v20 }
0x60e0   :  { %v6848_v42 = vpop.eup %6847 }
0x60e1   :  { %v6158_v59 = vmul.f32 %v6848_v42, %v6156_v20  ;;  %vm6164_vm1 = vweird.f32 %v6848_v42 }
0x60e2   :  { %vm6165_vm7 = vmor %vm6163_vm6, %vm6164_vm1 }
0x60e3   :  { %v6159_v39 = vmul.f32 %v6848_v42, %v6158_v59 }
0x60e5   :  { %v6160_v60 = vmul.f32 0.5, %v6159_v39 }
0x60e7   :  { %v6161_v9 = vsub.f32 1.5, %v6160_v60 }
0x60e9   :  { %v6162_v32 = vmul.f32 %v6848_v42, %v6161_v9 }
0x60eb   :  { %v6166_v28 = vsel %vm6165_vm7, %v6848_v42, %v6162_v32 }
0x60ec   :  { %v6167_v27 = vmul.f32 %v6166_v28, %v6150_v24 }
0x60ee   :  { %v6168_v35 = vmul.f32 %v8781_v55, %v6167_v27 }
0x60f0   :  { %v6169_v6 = vadd.f32 %v8784_v22, %v6168_v35 }
0x60f2   :  { %v6170_v5 = vpack.c.bf16 %v6169_v6, %v6169_v6 }
0x60f4   :  { %6490 = vmatmul.msk.bf16.vlgmr.msrb.gmra.mxu3 %vm195_vm0, %v6170_v5 }
0x6177   :  { %v6183_v33 = vpop.f32.mrf.mxu3 }
0x6178   :  { %v6184_v38 = vadd.f32 %v8791_v44, %v6183_v33 }
0x617a   :  { %v6187_v17 = vmax.f32 %v6184_v38, 0.0 }
0x617c   :  { %v6188_v18 = vpack.c.bf16 %v6187_v17, %v6187_v17 }
0x617e   :  { %6491 = vmatmul.msk.bf16.vlgmr.msra.gmra.mxu0 %vm9003_vm12, %v6188_v18 }
0x617f   :  { %v6185_v40 = vpop.f32.mrf.mxu3 }
0x61fb   :  { %v6201_v2 = vpop.f32.mrf.mxu0 }
0x61fc   :  { %v6202_v63 = vadd.f32 %v8795_v26, %v6201_v2 }
0x61fe   :  { %v6205_v56 = vadd.f32 %v6202_v63, %v6169_v6 }
0x6200   :  { %v6206_v37 = vsel %vm195_vm0, %v6205_v56, 0.0 }
0x6201   :  { %6207 = vadd.xlane.f32.xlu1 %v6206_v37 }
0x6203   :  { %v6203_v55 = vpop.f32.mrf.mxu0 }
0x6274   :  { %v6208_v22 = vpop.xlane.xlu1 %6207 }
0x6275   :  { %v6209_v49 = vmul.f32 %v6208_v22, %v7380_v47 }
0x6277   :  { %v6210_v53 = vsub.f32 %v6205_v56, %v6209_v49 }
0x6279   :  { %v6211_v36 = vmul.f32 %v6210_v53, %v6210_v53 }
0x627b   :  { %v6212_v44 = vsel %vm195_vm0, %v6211_v36, 0.0 }
0x627c   :  { %6213 = vadd.xlane.f32.xlu0 %v6212_v44 }
0x62ef   :  { %v6214_v57 = vpop.xlane.xlu0 %6213 }
0x62f0   :  { %v6215_v23 = vmul.f32 %v6214_v57, %v7380_v47 }
0x62f2   :  { %v6216_v30 = vadd.f32 1e-05, %v6215_v23 }
0x62f4   :  { %6849 = vrsqrt.f32 %v6216_v30  ;;  %vm6223_vm2 = vweird.f32 %v6216_v30 }
0x62fa   :  { %v6850_v41 = vpop.eup %6849 }
0x62fb   :  { %v6218_v26 = vmul.f32 %v6850_v41, %v6216_v30  ;;  %vm6224_vm13 = vweird.f32 %v6850_v41 }
0x62fc   :  { %vm6225_vm9 = vmor %vm6223_vm2, %vm6224_vm13 }
0x62fd   :  { %v6219_v29 = vmul.f32 %v6850_v41, %v6218_v26 }
0x62ff   :  { %v6220_v14 = vmul.f32 0.5, %v6219_v29 }
0x6301   :  { %v6221_v1 = vsub.f32 1.5, %v6220_v14 }
0x6303   :  { %v6222_v16 = vmul.f32 %v6850_v41, %v6221_v1 }
0x6305   :  { %v6226_v25 = vsel %vm6225_vm9, %v6850_v41, %v6222_v16 }
0x6306   :  { %v6227_v45 = vmul.f32 %v6226_v25, %v6210_v53 }
0x6308   :  { %v6228_v47 = vmul.f32 %v8802_v61, %v6227_v45 }
0x630a   :  { %v6229_v21 = vadd.f32 %v8805_v46, %v6228_v47 }
0x630c   :  { %6230 = vst.msk [vmem:[#allocation13] sm:$0xff] %vm195_vm0, %v6229_v21 }
0x630d   :  { %6241 = dma.vmem_to_hbm [thread:$0]  %s6237_s26, 128, %s6239_s16, [#allocation4]  }
0x630e   :  { %7109 = dma.done.wait [#allocation4], 128  }
0x630f   :  { %7110 = vsyncadd [#allocation4], 4294967168 }
0x6310   :  { %6246 = vsyncpa [#allocation3], 1 }
0x6311   :  { %6247 = vsyncpa [#allocation6], 1 }
0x6312   :  { %6248 = vsyncpa [#allocation9], 1 }
0x6313   :  { %6249 = vsyncpa [#allocation12], 1 }
0x6314   :  { %6250 = vsyncpa [#allocation4], 1 }

</bundles_post_ra>
